<compile_context>
chip_gen: v7x
topology: tpu7x:2x2x1
jax: 0.10.0
libtpu: 0.0.40
codegen_flags: <defaults>
</compile_context>

<pallas_src>
import functools

import jax
import jax.numpy as jnp
from jax import lax
from jax.experimental import pallas as pl
from jax.experimental.pallas import tpu as pltpu

LEAKY_SLOPE = 0.01      # nn.LeakyReLU default negative_slope
BN_EPS = 1e-5           # nn.BatchNorm2d default eps
_LANE = 128             # TPU lane width
_PAD_L = 8              # left spatial pad inside scratch -> interior column is sublane-aligned


def _round_up(v, m):
    return (v + m - 1) // m * m


def _tap_order():
    return [(dy, dx) for dy in range(3) for dx in range(3)]


def _make_fused_cnn_kernel(H, W, ks, num_mid, k_pad, pad_w):
    """Whole-network kernel; all activations stay resident in VMEM scratch."""
    col0 = _PAD_L  # first interior column of the padded activation scratch

    def kernel(*refs):
        if num_mid > 0:
            x_ref, w0_ref, wmid_ref, wlast_ref, o_ref, a_ref, b_ref, cols_ref = refs
        else:
            x_ref, w0_ref, wlast_ref, o_ref, a_ref, b_ref, cols_ref = refs
            wmid_ref = None

        def leaky(v):
            return jnp.where(v >= 0, v, LEAKY_SLOPE * v)

        def zero_border(ref):
            # Only the 'same'-padding halo needs zeros; the interior is fully
            # rewritten by every layer (no full-buffer zero-fill).
            ref[:, :col0, :] = jnp.zeros((H + 2, col0, ks), jnp.float32)
            ref[:, col0 + W:, :] = jnp.zeros((H + 2, pad_w - col0 - W, ks), jnp.float32)
            ref[0:1, col0:col0 + W, :] = jnp.zeros((1, W, ks), jnp.float32)
            ref[H + 1:H + 2, col0:col0 + W, :] = jnp.zeros((1, W, ks), jnp.float32)

        def shifted(src_ref):
            # Three column-shifted loads (dx = 0, 1, 2); the dy offsets used
            # below are free major-dim slices of these values.
            return [src_ref[:, col0 - 1 + dx:col0 - 1 + dx + W, :] for dx in range(3)]

        def store_act(dst_ref, val):
            # Write only the (H, W) interior; the zero halo provides the 'same'
            # padding for the next layer (no HBM round trip, no jnp.pad).
            dst_ref[1:H + 1, col0:col0 + W, :] = val

        # ---- one-time init: halo of ping/pong buffers + padding tail lanes of slab ----
        zero_border(a_ref)
        zero_border(b_ref)
        if num_mid > 0 and k_pad > 9 * ks:
            cols_ref[:, :, 9 * ks:] = jnp.zeros((H, W, k_pad - 9 * ks), jnp.bfloat16)

        # ---- layer 0: Conv2d(1 -> ks) + LeakyReLU on the VPU (Cin=1 would waste
        #      the MXU). Channel-replicated padded input -> plain lane-wise MACs. ----
        store_act(a_ref, jnp.broadcast_to(x_ref[...], (H, W, ks)))
        w0 = w0_ref[...]                                   # (3, 3, ks) f32
        sh = shifted(a_ref)
        acc = jnp.zeros((H, W, ks), jnp.float32)
        for dy, dx in _tap_order():
            acc = acc + sh[dx][dy:dy + H] * w0[dy, dx]     # (H,W,ks) * (ks,)
        store_act(b_ref, leaky(acc))

        # ---- middle layers: packed-K im2col -> ONE bf16 MXU matmul (f32 accum)
        #      -> BatchNorm (two-pass batch stats, f32) -> LeakyReLU ----
        src, dst = b_ref, a_ref
        for li in range(num_mid):
            sh = shifted(src)
            for t, (dy, dx) in enumerate(_tap_order()):
                # tap t occupies lanes [t*ks, (t+1)*ks); tail lanes [9*ks, k_pad)
                # stay zero and are matched by zero weight rows.
                cols_ref[:, :, t * ks:(t + 1) * ks] = (
                    sh[dx][dy:dy + H].astype(jnp.bfloat16))
            acc = jnp.einsum("hwk,kf->hwf", cols_ref[...], wmid_ref[li],
                             preferred_element_type=jnp.float32)   # (H, W, ks) f32
            mean = jnp.mean(acc, axis=(0, 1), keepdims=True)
            var = jnp.mean(jnp.square(acc - mean), axis=(0, 1), keepdims=True)
            acc = (acc - mean) * lax.rsqrt(var + BN_EPS)
            store_act(dst, leaky(acc))
            src, dst = dst, src

        # ---- last layer: Conv2d(ks -> 1) on the VPU: per-tap MAC, then reduce
        #      over only the ks lanes (no slab gather, no padded-lane work). ----
        wl = wlast_ref[...]                                # (3, 3, ks) f32
        sh = shifted(src)
        acc = jnp.zeros((H, W, ks), jnp.float32)
        for dy, dx in _tap_order():
            acc = acc + sh[dx][dy:dy + H] * wl[dy, dx]
        o_ref[...] = jnp.sum(acc, axis=-1)                 # (H, W)

    return kernel


def _prep_weights(params, ks, k_pad):
    """Reshape HWIO conv weights to the kernel's packed-K layout (bf16 mid weights)."""

    def flat_mid(w):  # (3, 3, ks, ks) -> (k_pad, ks) bf16, zero-padded K rows
        wf = w.astype(jnp.float32).reshape(9 * ks, ks)
        wf = jnp.pad(wf, ((0, k_pad - 9 * ks), (0, 0)))
        return wf.astype(jnp.bfloat16)

    w0 = params[0].astype(jnp.float32)[:, :, 0, :]          # (3, 3, ks)
    wmid = None
    if len(params) > 2:
        wmid = jnp.stack([flat_mid(p) for p in params[1:-1]])   # (num_mid, k_pad, ks)
    wlast = params[-1].astype(jnp.float32)[:, :, :, 0]      # (3, 3, ks)
    return w0, wmid, wlast


def _vmem_budget(H, W, ks, num_mid, k_pad, pad_w):
    """Scoped-VMEM request sized from lane/sublane-padded buffer footprints."""

    def padded_bytes(shape, itemsize):
        s = list(shape)
        s[-1] = _round_up(s[-1], _LANE)
        if len(s) >= 2:
            s[-2] = _round_up(s[-2], 8 * (4 // itemsize))
        n = 1
        for d in s:
            n *= d
        return n * itemsize

    total = padded_bytes((H, W, 1), 4)                      # x
    total += 2 * padded_bytes((3, 3, ks), 4)                # w0, wlast
    if num_mid > 0:
        total += padded_bytes((num_mid, k_pad, ks), 2)      # wmid (bf16)
    total += padded_bytes((H, W), 4)                        # output
    total += 2 * padded_bytes((H + 2, pad_w, ks), 4)        # activation ping/pong
    total += padded_bytes((H, W, k_pad), 2)                 # im2col slab (bf16)
    return min(2 * int(total) + (2 << 20), 64 << 20)


@functools.partial(jax.jit, static_argnames=("layer_num",))
def cnn_forward(x2d, params, layer_num):
    """x2d: (H, W) f32  ->  y: (1, 1, H, W) f32 (matches PyTorch NCHW output)."""
    H, W = x2d.shape
    ks = params[0].shape[-1]
    num_mid = layer_num - 2
    k_pad = _round_up(9 * ks, _LANE)                # packed contraction dim
    pad_w = _PAD_L + _round_up(W + 1, 8)            # interior + aligned right halo

    w0, wmid, wlast = _prep_weights(params, ks, k_pad)

    args = [x2d[:, :, None].astype(jnp.float32), w0]
    if num_mid > 0:
        args.append(wmid)
    args.append(wlast)

    kernel = _make_fused_cnn_kernel(H, W, ks, num_mid, k_pad, pad_w)
    y = pl.pallas_call(
        kernel,
        out_shape=jax.ShapeDtypeStruct((H, W), jnp.float32),
        in_specs=[pl.BlockSpec(memory_space=pltpu.MemorySpace.VMEM)] * len(args),
        out_specs=pl.BlockSpec(memory_space=pltpu.MemorySpace.VMEM),
        scratch_shapes=[
            pltpu.VMEM((H + 2, pad_w, ks), jnp.float32),    # activation ping
            pltpu.VMEM((H + 2, pad_w, ks), jnp.float32),    # activation pong
            pltpu.VMEM((H, W, k_pad), jnp.bfloat16),        # packed im2col slab
        ],
        compiler_params=pltpu.CompilerParams(
            vmem_limit_bytes=_vmem_budget(H, W, ks, num_mid, k_pad, pad_w)),
    )(*args)
    return y[None, None, :, :]


def init_cnn_params(key, layer_num: int, ks: int):
    """Deterministic synthetic parameters (Conv2d weights only; bias=False everywhere)."""
    channels = 1
    shapes = [(3, 3, channels, ks)]
    for _ in range(layer_num - 2):
        shapes.append((3, 3, ks, ks))
    shapes.append((3, 3, ks, channels))

    params = []
    for shp in shapes:
        key, sub = jax.random.split(key)
        fan_in = shp[0] * shp[1] * shp[2]
        params.append(jax.random.normal(sub, shp, jnp.float32) / jnp.sqrt(fan_in))
    return params


def _reference_forward(x2d, params, layer_num: int, mid_matmul_dtype=jnp.float32):
    """Pure-JAX reference (lax.conv). mid_matmul_dtype=bf16 mirrors the kernel's MXU
    operand precision exactly (f32 accumulation), isolating layout/indexing errors."""
    h = x2d[None, :, :, None].astype(jnp.float32)  # NHWC
    dn = lax.conv_dimension_numbers(h.shape, (3, 3, 1, 1), ("NHWC", "HWIO", "NHWC"))

    def conv(h, w, dtype):
        return lax.conv_general_dilated(
            h.astype(dtype), w.astype(dtype), (1, 1), "SAME",
            dimension_numbers=dn, preferred_element_type=jnp.float32)

    h = conv(h, params[0], jnp.float32)
    h = jnp.where(h >= 0, h, LEAKY_SLOPE * h)
    for li in range(1, layer_num - 1):
        h = conv(h, params[li], mid_matmul_dtype)
        mean = jnp.mean(h, axis=(0, 1, 2), keepdims=True)
        var = jnp.mean((h - mean) ** 2, axis=(0, 1, 2), keepdims=True)
        h = (h - mean) * lax.rsqrt(var + BN_EPS)
        h = jnp.where(h >= 0, h, LEAKY_SLOPE * h)
    h = conv(h, params[-1], jnp.float32)
    return jnp.transpose(h, (0, 3, 1, 2))  # (1, 1, H, W)


if __name__ == "__main__":
    LAYER_NUM = 4   # total conv layers
    KS = 32         # features
    H, W = 16, 16

    key = jax.random.PRNGKey(0)
    k_x, k_p = jax.random.split(key)
    x = jax.random.normal(k_x, (H, W), jnp.float32)
    params = init_cnn_params(k_p, LAYER_NUM, KS)

    y = cnn_forward(x, params, LAYER_NUM)
    y = jax.block_until_ready(y)
    assert y.shape == (1, 1, H, W), y.shape

    # Exact-math check: reference mid-layer convs also use bf16 operands with f32
    # accumulation, so any mismatch beyond f32 summation-order noise is a kernel bug.
    y_bf16 = _reference_forward(x, params, LAYER_NUM, mid_matmul_dtype=jnp.bfloat16)
    err_strict = float(jnp.max(jnp.abs(y - y_bf16)))
    assert jnp.allclose(y, y_bf16, atol=1e-2, rtol=1e-2), err_strict

    # Coarse check vs. the full-f32 reference: bounds the expected bf16-MXU drift.
    y_f32 = _reference_forward(x, params, LAYER_NUM, mid_matmul_dtype=jnp.float32)
    err_loose = float(jnp.max(jnp.abs(y - y_f32)))
    assert err_loose < 0.25, err_loose

    print("KERNEL_OK")
</pallas_src>

<mosaic_0001>
module attributes {stable_mosaic.version = 11 : i64} {
  func.func @kernel(%arg0: memref<16x16x1xf32, #tpu.memory_space<vmem>>, %arg1: memref<3x3x32xf32, #tpu.memory_space<vmem>>, %arg2: memref<2x384x32xbf16, #tpu.memory_space<vmem>>, %arg3: memref<3x3x32xf32, #tpu.memory_space<vmem>>, %arg4: memref<16x16xf32, #tpu.memory_space<vmem>>, %arg5: memref<18x32x32xf32, #tpu.memory_space<vmem>>, %arg6: memref<18x32x32xf32, #tpu.memory_space<vmem>>, %arg7: memref<16x16x384xbf16, #tpu.memory_space<vmem>>) attributes {dimension_semantics = [], scalar_prefetch = 0 : i64, scratch_operands = 3 : i64, tpu.core_type = #tpu.core_type<tc>} {
    %cst = arith.constant 0.000000e+00 : f32
    %0 = vector.broadcast %cst : f32 to vector<18x8x32xf32>
    %c0 = arith.constant 0 : index
    %c0_0 = arith.constant 0 : index
    %c0_1 = arith.constant 0 : index
    %1 = vector.load %arg5[%c0, %c0_0, %c0_1] : memref<18x32x32xf32, #tpu.memory_space<vmem>>, vector<18x8x32xf32>
    tpu.vector_store %arg5[%c0, %c0_0, %c0_1], %0 {strides = array<i32>} : memref<18x32x32xf32, #tpu.memory_space<vmem>>, vector<18x8x32xf32>,
    %cst_2 = arith.constant 0.000000e+00 : f32
    %2 = vector.broadcast %cst_2 : f32 to vector<18x8x32xf32>
    %c0_3 = arith.constant 0 : index
    %c24 = arith.constant 24 : index
    %c0_4 = arith.constant 0 : index
    %3 = vector.load %arg5[%c0_3, %c24, %c0_4] : memref<18x32x32xf32, #tpu.memory_space<vmem>>, vector<18x8x32xf32>
    tpu.vector_store %arg5[%c0_3, %c24, %c0_4], %2 {strides = array<i32>} : memref<18x32x32xf32, #tpu.memory_space<vmem>>, vector<18x8x32xf32>,
    %cst_5 = arith.constant 0.000000e+00 : f32
    %4 = vector.broadcast %cst_5 : f32 to vector<1x16x32xf32>
    %c0_6 = arith.constant 0 : index
    %c8 = arith.constant 8 : index
    %c0_7 = arith.constant 0 : index
    %5 = vector.load %arg5[%c0_6, %c8, %c0_7] : memref<18x32x32xf32, #tpu.memory_space<vmem>>, vector<1x16x32xf32>
    tpu.vector_store %arg5[%c0_6, %c8, %c0_7], %4 {strides = array<i32>} : memref<18x32x32xf32, #tpu.memory_space<vmem>>, vector<1x16x32xf32>,
    %cst_8 = arith.constant 0.000000e+00 : f32
    %6 = vector.broadcast %cst_8 : f32 to vector<1x16x32xf32>
    %c17 = arith.constant 17 : index
    %c8_9 = arith.constant 8 : index
    %c0_10 = arith.constant 0 : index
    %7 = vector.load %arg5[%c17, %c8_9, %c0_10] : memref<18x32x32xf32, #tpu.memory_space<vmem>>, vector<1x16x32xf32>
    tpu.vector_store %arg5[%c17, %c8_9, %c0_10], %6 {strides = array<i32>} : memref<18x32x32xf32, #tpu.memory_space<vmem>>, vector<1x16x32xf32>,
    %cst_11 = arith.constant 0.000000e+00 : f32
    %8 = vector.broadcast %cst_11 : f32 to vector<18x8x32xf32>
    %c0_12 = arith.constant 0 : index
    %c0_13 = arith.constant 0 : index
    %c0_14 = arith.constant 0 : index
    %9 = vector.load %arg6[%c0_12, %c0_13, %c0_14] : memref<18x32x32xf32, #tpu.memory_space<vmem>>, vector<18x8x32xf32>
    tpu.vector_store %arg6[%c0_12, %c0_13, %c0_14], %8 {strides = array<i32>} : memref<18x32x32xf32, #tpu.memory_space<vmem>>, vector<18x8x32xf32>,
    %cst_15 = arith.constant 0.000000e+00 : f32
    %10 = vector.broadcast %cst_15 : f32 to vector<18x8x32xf32>
    %c0_16 = arith.constant 0 : index
    %c24_17 = arith.constant 24 : index
    %c0_18 = arith.constant 0 : index
    %11 = vector.load %arg6[%c0_16, %c24_17, %c0_18] : memref<18x32x32xf32, #tpu.memory_space<vmem>>, vector<18x8x32xf32>
    tpu.vector_store %arg6[%c0_16, %c24_17, %c0_18], %10 {strides = array<i32>} : memref<18x32x32xf32, #tpu.memory_space<vmem>>, vector<18x8x32xf32>,
    %cst_19 = arith.constant 0.000000e+00 : f32
    %12 = vector.broadcast %cst_19 : f32 to vector<1x16x32xf32>
    %c0_20 = arith.constant 0 : index
    %c8_21 = arith.constant 8 : index
    %c0_22 = arith.constant 0 : index
    %13 = vector.load %arg6[%c0_20, %c8_21, %c0_22] : memref<18x32x32xf32, #tpu.memory_space<vmem>>, vector<1x16x32xf32>
    tpu.vector_store %arg6[%c0_20, %c8_21, %c0_22], %12 {strides = array<i32>} : memref<18x32x32xf32, #tpu.memory_space<vmem>>, vector<1x16x32xf32>,
    %cst_23 = arith.constant 0.000000e+00 : f32
    %14 = vector.broadcast %cst_23 : f32 to vector<1x16x32xf32>
    %c17_24 = arith.constant 17 : index
    %c8_25 = arith.constant 8 : index
    %c0_26 = arith.constant 0 : index
    %15 = vector.load %arg6[%c17_24, %c8_25, %c0_26] : memref<18x32x32xf32, #tpu.memory_space<vmem>>, vector<1x16x32xf32>
    tpu.vector_store %arg6[%c17_24, %c8_25, %c0_26], %14 {strides = array<i32>} : memref<18x32x32xf32, #tpu.memory_space<vmem>>, vector<1x16x32xf32>,
    %cst_27 = arith.constant 0.000000e+00 : bf16
    %16 = vector.broadcast %cst_27 : bf16 to vector<16x16x96xbf16>
    %c0_28 = arith.constant 0 : index
    %c0_29 = arith.constant 0 : index
    %c288 = arith.constant 288 : index
    %17 = vector.load %arg7[%c0_28, %c0_29, %c288] : memref<16x16x384xbf16, #tpu.memory_space<vmem>>, vector<16x16x96xbf16>
    tpu.vector_store %arg7[%c0_28, %c0_29, %c288], %16 {strides = array<i32>} : memref<16x16x384xbf16, #tpu.memory_space<vmem>>, vector<16x16x96xbf16>,
    %c0_30 = arith.constant 0 : index
    %c0_31 = arith.constant 0 : index
    %c0_32 = arith.constant 0 : index
    %18 = vector.load %arg0[%c0_30, %c0_31, %c0_32] : memref<16x16x1xf32, #tpu.memory_space<vmem>>, vector<16x16x1xf32>
    %19 = vector.shape_cast %18 : vector<16x16x1xf32> to vector<16x16x1xf32>
    %20 = vector.broadcast %19 : vector<16x16x1xf32> to vector<16x16x32xf32>
    %c1 = arith.constant 1 : index
    %c8_33 = arith.constant 8 : index
    %c0_34 = arith.constant 0 : index
    %21 = vector.load %arg5[%c1, %c8_33, %c0_34] : memref<18x32x32xf32, #tpu.memory_space<vmem>>, vector<16x16x32xf32>
    tpu.vector_store %arg5[%c1, %c8_33, %c0_34], %20 {strides = array<i32>} : memref<18x32x32xf32, #tpu.memory_space<vmem>>, vector<16x16x32xf32>,
    %c0_35 = arith.constant 0 : index
    %c0_36 = arith.constant 0 : index
    %c0_37 = arith.constant 0 : index
    %22 = vector.load %arg1[%c0_35, %c0_36, %c0_37] : memref<3x3x32xf32, #tpu.memory_space<vmem>>, vector<3x3x32xf32>
    %c0_38 = arith.constant 0 : index
    %c7 = arith.constant 7 : index
    %c0_39 = arith.constant 0 : index
    %23 = vector.load %arg5[%c0_38, %c7, %c0_39] : memref<18x32x32xf32, #tpu.memory_space<vmem>>, vector<18x16x32xf32>
    %c0_40 = arith.constant 0 : index
    %c8_41 = arith.constant 8 : index
    %c0_42 = arith.constant 0 : index
    %24 = vector.load %arg5[%c0_40, %c8_41, %c0_42] : memref<18x32x32xf32, #tpu.memory_space<vmem>>, vector<18x16x32xf32>
    %c0_43 = arith.constant 0 : index
    %c9 = arith.constant 9 : index
    %c0_44 = arith.constant 0 : index
    %25 = vector.load %arg5[%c0_43, %c9, %c0_44] : memref<18x32x32xf32, #tpu.memory_space<vmem>>, vector<18x16x32xf32>
    %cst_45 = arith.constant 0.000000e+00 : f32
    %26 = vector.broadcast %cst_45 : f32 to vector<16x16x32xf32>
    %27 = vector.extract_strided_slice %23 {offsets = [0, 0, 0], sizes = [16, 16, 32], strides = [1, 1, 1]} : vector<18x16x32xf32> to vector<16x16x32xf32>
    %28 = vector.extract_strided_slice %22 {offsets = [0, 0, 0], sizes = [1, 1, 32], strides = [1, 1, 1]} : vector<3x3x32xf32> to vector<1x1x32xf32>
    %29 = vector.shape_cast %28 : vector<1x1x32xf32> to vector<32xf32>
    %30 = vector.shape_cast %29 : vector<32xf32> to vector<1x1x32xf32>
    %31 = vector.broadcast %30 : vector<1x1x32xf32> to vector<16x16x32xf32>
    %32 = arith.mulf %27, %31 : vector<16x16x32xf32>
    %33 = arith.addf %26, %32 : vector<16x16x32xf32>
    %34 = vector.extract_strided_slice %24 {offsets = [0, 0, 0], sizes = [16, 16, 32], strides = [1, 1, 1]} : vector<18x16x32xf32> to vector<16x16x32xf32>
    %35 = vector.extract_strided_slice %22 {offsets = [0, 1, 0], sizes = [1, 1, 32], strides = [1, 1, 1]} : vector<3x3x32xf32> to vector<1x1x32xf32>
    %36 = vector.shape_cast %35 : vector<1x1x32xf32> to vector<32xf32>
    %37 = vector.shape_cast %36 : vector<32xf32> to vector<1x1x32xf32>
    %38 = vector.broadcast %37 : vector<1x1x32xf32> to vector<16x16x32xf32>
    %39 = arith.mulf %34, %38 : vector<16x16x32xf32>
    %40 = arith.addf %33, %39 : vector<16x16x32xf32>
    %41 = vector.extract_strided_slice %25 {offsets = [0, 0, 0], sizes = [16, 16, 32], strides = [1, 1, 1]} : vector<18x16x32xf32> to vector<16x16x32xf32>
    %42 = vector.extract_strided_slice %22 {offsets = [0, 2, 0], sizes = [1, 1, 32], strides = [1, 1, 1]} : vector<3x3x32xf32> to vector<1x1x32xf32>
    %43 = vector.shape_cast %42 : vector<1x1x32xf32> to vector<32xf32>
    %44 = vector.shape_cast %43 : vector<32xf32> to vector<1x1x32xf32>
    %45 = vector.broadcast %44 : vector<1x1x32xf32> to vector<16x16x32xf32>
    %46 = arith.mulf %41, %45 : vector<16x16x32xf32>
    %47 = arith.addf %40, %46 : vector<16x16x32xf32>
    %48 = vector.extract_strided_slice %23 {offsets = [1, 0, 0], sizes = [16, 16, 32], strides = [1, 1, 1]} : vector<18x16x32xf32> to vector<16x16x32xf32>
    %49 = vector.extract_strided_slice %22 {offsets = [1, 0, 0], sizes = [1, 1, 32], strides = [1, 1, 1]} : vector<3x3x32xf32> to vector<1x1x32xf32>
    %50 = vector.shape_cast %49 : vector<1x1x32xf32> to vector<32xf32>
    %51 = vector.shape_cast %50 : vector<32xf32> to vector<1x1x32xf32>
    %52 = vector.broadcast %51 : vector<1x1x32xf32> to vector<16x16x32xf32>
    %53 = arith.mulf %48, %52 : vector<16x16x32xf32>
    %54 = arith.addf %47, %53 : vector<16x16x32xf32>
    %55 = vector.extract_strided_slice %24 {offsets = [1, 0, 0], sizes = [16, 16, 32], strides = [1, 1, 1]} : vector<18x16x32xf32> to vector<16x16x32xf32>
    %56 = vector.extract_strided_slice %22 {offsets = [1, 1, 0], sizes = [1, 1, 32], strides = [1, 1, 1]} : vector<3x3x32xf32> to vector<1x1x32xf32>
    %57 = vector.shape_cast %56 : vector<1x1x32xf32> to vector<32xf32>
    %58 = vector.shape_cast %57 : vector<32xf32> to vector<1x1x32xf32>
    %59 = vector.broadcast %58 : vector<1x1x32xf32> to vector<16x16x32xf32>
    %60 = arith.mulf %55, %59 : vector<16x16x32xf32>
    %61 = arith.addf %54, %60 : vector<16x16x32xf32>
    %62 = vector.extract_strided_slice %25 {offsets = [1, 0, 0], sizes = [16, 16, 32], strides = [1, 1, 1]} : vector<18x16x32xf32> to vector<16x16x32xf32>
    %63 = vector.extract_strided_slice %22 {offsets = [1, 2, 0], sizes = [1, 1, 32], strides = [1, 1, 1]} : vector<3x3x32xf32> to vector<1x1x32xf32>
    %64 = vector.shape_cast %63 : vector<1x1x32xf32> to vector<32xf32>
    %65 = vector.shape_cast %64 : vector<32xf32> to vector<1x1x32xf32>
    %66 = vector.broadcast %65 : vector<1x1x32xf32> to vector<16x16x32xf32>
    %67 = arith.mulf %62, %66 : vector<16x16x32xf32>
    %68 = arith.addf %61, %67 : vector<16x16x32xf32>
    %69 = vector.extract_strided_slice %23 {offsets = [2, 0, 0], sizes = [16, 16, 32], strides = [1, 1, 1]} : vector<18x16x32xf32> to vector<16x16x32xf32>
    %70 = vector.extract_strided_slice %22 {offsets = [2, 0, 0], sizes = [1, 1, 32], strides = [1, 1, 1]} : vector<3x3x32xf32> to vector<1x1x32xf32>
    %71 = vector.shape_cast %70 : vector<1x1x32xf32> to vector<32xf32>
    %72 = vector.shape_cast %71 : vector<32xf32> to vector<1x1x32xf32>
    %73 = vector.broadcast %72 : vector<1x1x32xf32> to vector<16x16x32xf32>
    %74 = arith.mulf %69, %73 : vector<16x16x32xf32>
    %75 = arith.addf %68, %74 : vector<16x16x32xf32>
    %76 = vector.extract_strided_slice %24 {offsets = [2, 0, 0], sizes = [16, 16, 32], strides = [1, 1, 1]} : vector<18x16x32xf32> to vector<16x16x32xf32>
    %77 = vector.extract_strided_slice %22 {offsets = [2, 1, 0], sizes = [1, 1, 32], strides = [1, 1, 1]} : vector<3x3x32xf32> to vector<1x1x32xf32>
    %78 = vector.shape_cast %77 : vector<1x1x32xf32> to vector<32xf32>
    %79 = vector.shape_cast %78 : vector<32xf32> to vector<1x1x32xf32>
    %80 = vector.broadcast %79 : vector<1x1x32xf32> to vector<16x16x32xf32>
    %81 = arith.mulf %76, %80 : vector<16x16x32xf32>
    %82 = arith.addf %75, %81 : vector<16x16x32xf32>
    %83 = vector.extract_strided_slice %25 {offsets = [2, 0, 0], sizes = [16, 16, 32], strides = [1, 1, 1]} : vector<18x16x32xf32> to vector<16x16x32xf32>
    %84 = vector.extract_strided_slice %22 {offsets = [2, 2, 0], sizes = [1, 1, 32], strides = [1, 1, 1]} : vector<3x3x32xf32> to vector<1x1x32xf32>
    %85 = vector.shape_cast %84 : vector<1x1x32xf32> to vector<32xf32>
    %86 = vector.shape_cast %85 : vector<32xf32> to vector<1x1x32xf32>
    %87 = vector.broadcast %86 : vector<1x1x32xf32> to vector<16x16x32xf32>
    %88 = arith.mulf %83, %87 : vector<16x16x32xf32>
    %89 = arith.addf %82, %88 : vector<16x16x32xf32>
    %cst_46 = arith.constant 0.000000e+00 : f32
    %90 = vector.broadcast %cst_46 : f32 to vector<16x16x32xf32>
    %91 = arith.cmpf oge, %89, %90 : vector<16x16x32xf32>
    %cst_47 = arith.constant 0.00999999977 : f32
    %92 = vector.broadcast %cst_47 : f32 to vector<16x16x32xf32>
    %93 = arith.mulf %92, %89 : vector<16x16x32xf32>
    %94 = arith.select %91, %89, %93 : vector<16x16x32xi1>, vector<16x16x32xf32>
    %c1_48 = arith.constant 1 : index
    %c8_49 = arith.constant 8 : index
    %c0_50 = arith.constant 0 : index
    %95 = vector.load %arg6[%c1_48, %c8_49, %c0_50] : memref<18x32x32xf32, #tpu.memory_space<vmem>>, vector<16x16x32xf32>
    tpu.vector_store %arg6[%c1_48, %c8_49, %c0_50], %94 {strides = array<i32>} : memref<18x32x32xf32, #tpu.memory_space<vmem>>, vector<16x16x32xf32>,
    %c0_51 = arith.constant 0 : index
    %c7_52 = arith.constant 7 : index
    %c0_53 = arith.constant 0 : index
    %96 = vector.load %arg6[%c0_51, %c7_52, %c0_53] : memref<18x32x32xf32, #tpu.memory_space<vmem>>, vector<18x16x32xf32>
    %c0_54 = arith.constant 0 : index
    %c8_55 = arith.constant 8 : index
    %c0_56 = arith.constant 0 : index
    %97 = vector.load %arg6[%c0_54, %c8_55, %c0_56] : memref<18x32x32xf32, #tpu.memory_space<vmem>>, vector<18x16x32xf32>
    %c0_57 = arith.constant 0 : index
    %c9_58 = arith.constant 9 : index
    %c0_59 = arith.constant 0 : index
    %98 = vector.load %arg6[%c0_57, %c9_58, %c0_59] : memref<18x32x32xf32, #tpu.memory_space<vmem>>, vector<18x16x32xf32>
    %99 = vector.extract_strided_slice %96 {offsets = [0, 0, 0], sizes = [16, 16, 32], strides = [1, 1, 1]} : vector<18x16x32xf32> to vector<16x16x32xf32>
    %100 = arith.truncf %99 : vector<16x16x32xf32> to vector<16x16x32xbf16>
    %c0_60 = arith.constant 0 : index
    %c0_61 = arith.constant 0 : index
    %c0_62 = arith.constant 0 : index
    %101 = vector.load %arg7[%c0_60, %c0_61, %c0_62] : memref<16x16x384xbf16, #tpu.memory_space<vmem>>, vector<16x16x32xbf16>
    tpu.vector_store %arg7[%c0_60, %c0_61, %c0_62], %100 {strides = array<i32>} : memref<16x16x384xbf16, #tpu.memory_space<vmem>>, vector<16x16x32xbf16>,
    %102 = vector.extract_strided_slice %97 {offsets = [0, 0, 0], sizes = [16, 16, 32], strides = [1, 1, 1]} : vector<18x16x32xf32> to vector<16x16x32xf32>
    %103 = arith.truncf %102 : vector<16x16x32xf32> to vector<16x16x32xbf16>
    %c0_63 = arith.constant 0 : index
    %c0_64 = arith.constant 0 : index
    %c32 = arith.constant 32 : index
    %104 = vector.load %arg7[%c0_63, %c0_64, %c32] : memref<16x16x384xbf16, #tpu.memory_space<vmem>>, vector<16x16x32xbf16>
    tpu.vector_store %arg7[%c0_63, %c0_64, %c32], %103 {strides = array<i32>} : memref<16x16x384xbf16, #tpu.memory_space<vmem>>, vector<16x16x32xbf16>,
    %105 = vector.extract_strided_slice %98 {offsets = [0, 0, 0], sizes = [16, 16, 32], strides = [1, 1, 1]} : vector<18x16x32xf32> to vector<16x16x32xf32>
    %106 = arith.truncf %105 : vector<16x16x32xf32> to vector<16x16x32xbf16>
    %c0_65 = arith.constant 0 : index
    %c0_66 = arith.constant 0 : index
    %c64 = arith.constant 64 : index
    %107 = vector.load %arg7[%c0_65, %c0_66, %c64] : memref<16x16x384xbf16, #tpu.memory_space<vmem>>, vector<16x16x32xbf16>
    tpu.vector_store %arg7[%c0_65, %c0_66, %c64], %106 {strides = array<i32>} : memref<16x16x384xbf16, #tpu.memory_space<vmem>>, vector<16x16x32xbf16>,
    %108 = vector.extract_strided_slice %96 {offsets = [1, 0, 0], sizes = [16, 16, 32], strides = [1, 1, 1]} : vector<18x16x32xf32> to vector<16x16x32xf32>
    %109 = arith.truncf %108 : vector<16x16x32xf32> to vector<16x16x32xbf16>
    %c0_67 = arith.constant 0 : index
    %c0_68 = arith.constant 0 : index
    %c96 = arith.constant 96 : index
    %110 = vector.load %arg7[%c0_67, %c0_68, %c96] : memref<16x16x384xbf16, #tpu.memory_space<vmem>>, vector<16x16x32xbf16>
    tpu.vector_store %arg7[%c0_67, %c0_68, %c96], %109 {strides = array<i32>} : memref<16x16x384xbf16, #tpu.memory_space<vmem>>, vector<16x16x32xbf16>,
    %111 = vector.extract_strided_slice %97 {offsets = [1, 0, 0], sizes = [16, 16, 32], strides = [1, 1, 1]} : vector<18x16x32xf32> to vector<16x16x32xf32>
    %112 = arith.truncf %111 : vector<16x16x32xf32> to vector<16x16x32xbf16>
    %c0_69 = arith.constant 0 : index
    %c0_70 = arith.constant 0 : index
    %c128 = arith.constant 128 : index
    %113 = vector.load %arg7[%c0_69, %c0_70, %c128] : memref<16x16x384xbf16, #tpu.memory_space<vmem>>, vector<16x16x32xbf16>
    tpu.vector_store %arg7[%c0_69, %c0_70, %c128], %112 {strides = array<i32>} : memref<16x16x384xbf16, #tpu.memory_space<vmem>>, vector<16x16x32xbf16>,
    %114 = vector.extract_strided_slice %98 {offsets = [1, 0, 0], sizes = [16, 16, 32], strides = [1, 1, 1]} : vector<18x16x32xf32> to vector<16x16x32xf32>
    %115 = arith.truncf %114 : vector<16x16x32xf32> to vector<16x16x32xbf16>
    %c0_71 = arith.constant 0 : index
    %c0_72 = arith.constant 0 : index
    %c160 = arith.constant 160 : index
    %116 = vector.load %arg7[%c0_71, %c0_72, %c160] : memref<16x16x384xbf16, #tpu.memory_space<vmem>>, vector<16x16x32xbf16>
    tpu.vector_store %arg7[%c0_71, %c0_72, %c160], %115 {strides = array<i32>} : memref<16x16x384xbf16, #tpu.memory_space<vmem>>, vector<16x16x32xbf16>,
    %117 = vector.extract_strided_slice %96 {offsets = [2, 0, 0], sizes = [16, 16, 32], strides = [1, 1, 1]} : vector<18x16x32xf32> to vector<16x16x32xf32>
    %118 = arith.truncf %117 : vector<16x16x32xf32> to vector<16x16x32xbf16>
    %c0_73 = arith.constant 0 : index
    %c0_74 = arith.constant 0 : index
    %c192 = arith.constant 192 : index
    %119 = vector.load %arg7[%c0_73, %c0_74, %c192] : memref<16x16x384xbf16, #tpu.memory_space<vmem>>, vector<16x16x32xbf16>
    tpu.vector_store %arg7[%c0_73, %c0_74, %c192], %118 {strides = array<i32>} : memref<16x16x384xbf16, #tpu.memory_space<vmem>>, vector<16x16x32xbf16>,
    %120 = vector.extract_strided_slice %97 {offsets = [2, 0, 0], sizes = [16, 16, 32], strides = [1, 1, 1]} : vector<18x16x32xf32> to vector<16x16x32xf32>
    %121 = arith.truncf %120 : vector<16x16x32xf32> to vector<16x16x32xbf16>
    %c0_75 = arith.constant 0 : index
    %c0_76 = arith.constant 0 : index
    %c224 = arith.constant 224 : index
    %122 = vector.load %arg7[%c0_75, %c0_76, %c224] : memref<16x16x384xbf16, #tpu.memory_space<vmem>>, vector<16x16x32xbf16>
    tpu.vector_store %arg7[%c0_75, %c0_76, %c224], %121 {strides = array<i32>} : memref<16x16x384xbf16, #tpu.memory_space<vmem>>, vector<16x16x32xbf16>,
    %123 = vector.extract_strided_slice %98 {offsets = [2, 0, 0], sizes = [16, 16, 32], strides = [1, 1, 1]} : vector<18x16x32xf32> to vector<16x16x32xf32>
    %124 = arith.truncf %123 : vector<16x16x32xf32> to vector<16x16x32xbf16>
    %c0_77 = arith.constant 0 : index
    %c0_78 = arith.constant 0 : index
    %c256 = arith.constant 256 : index
    %125 = vector.load %arg7[%c0_77, %c0_78, %c256] : memref<16x16x384xbf16, #tpu.memory_space<vmem>>, vector<16x16x32xbf16>
    tpu.vector_store %arg7[%c0_77, %c0_78, %c256], %124 {strides = array<i32>} : memref<16x16x384xbf16, #tpu.memory_space<vmem>>, vector<16x16x32xbf16>,
    %c0_79 = arith.constant 0 : index
    %c0_80 = arith.constant 0 : index
    %c0_81 = arith.constant 0 : index
    %126 = vector.load %arg7[%c0_79, %c0_80, %c0_81] : memref<16x16x384xbf16, #tpu.memory_space<vmem>>, vector<16x16x384xbf16>
    %c0_82 = arith.constant 0 : index
    %c0_83 = arith.constant 0 : index
    %c0_84 = arith.constant 0 : index
    %127 = vector.load %arg2[%c0_82, %c0_83, %c0_84] : memref<2x384x32xbf16, #tpu.memory_space<vmem>>, vector<1x384x32xbf16>
    %128 = vector.shape_cast %127 : vector<1x384x32xbf16> to vector<384x32xbf16>
    "tpu.trace_start"() <{level = 10 : i32, message = "hwk,kf->hwf"}> : () -> ()
    %cst_85 = arith.constant dense<0.000000e+00> : vector<16x16x32xf32>
    %129 = tpu.matmul %126, %128, %cst_85 {dimension_numbers = #tpu.dot_dimension_numbers<[2], [0], [0, 1], [1], [0, 0, 0, 1, 1, 1], [], []>} : vector<16x16x384xbf16>, vector<384x32xbf16>, vector<16x16x32xf32> -> vector<16x16x32xf32>
    "tpu.trace_stop"() : () -> ()
    %cst_86 = arith.constant dense<0.000000e+00> : vector<32xf32>
    %130 = vector.multi_reduction <add>, %129, %cst_86 [0, 1] : vector<16x16x32xf32> to vector<32xf32>
    %131 = vector.shape_cast %130 : vector<32xf32> to vector<1x1x32xf32>
    %cst_87 = arith.constant 2.560000e+02 : f32
    %132 = vector.broadcast %cst_87 : f32 to vector<1x1x32xf32>
    %133 = arith.divf %131, %132 : vector<1x1x32xf32>
    %134 = vector.broadcast %133 : vector<1x1x32xf32> to vector<16x16x32xf32>
    %135 = arith.subf %129, %134 : vector<16x16x32xf32>
    %136 = arith.mulf %135, %135 : vector<16x16x32xf32>
    %cst_88 = arith.constant dense<0.000000e+00> : vector<32xf32>
    %137 = vector.multi_reduction <add>, %136, %cst_88 [0, 1] : vector<16x16x32xf32> to vector<32xf32>
    %138 = vector.shape_cast %137 : vector<32xf32> to vector<1x1x32xf32>
    %cst_89 = arith.constant 2.560000e+02 : f32
    %139 = vector.broadcast %cst_89 : f32 to vector<1x1x32xf32>
    %140 = arith.divf %138, %139 : vector<1x1x32xf32>
    %141 = vector.broadcast %133 : vector<1x1x32xf32> to vector<16x16x32xf32>
    %142 = arith.subf %129, %141 : vector<16x16x32xf32>
    %cst_90 = arith.constant 9.99999974E-6 : f32
    %143 = vector.broadcast %cst_90 : f32 to vector<1x1x32xf32>
    %144 = arith.addf %140, %143 : vector<1x1x32xf32>
    %145 = math.rsqrt %144 : vector<1x1x32xf32>
    %146 = vector.broadcast %145 : vector<1x1x32xf32> to vector<16x16x32xf32>
    %147 = arith.mulf %142, %146 : vector<16x16x32xf32>
    %cst_91 = arith.constant 0.000000e+00 : f32
    %148 = vector.broadcast %cst_91 : f32 to vector<16x16x32xf32>
    %149 = arith.cmpf oge, %147, %148 : vector<16x16x32xf32>
    %cst_92 = arith.constant 0.00999999977 : f32
    %150 = vector.broadcast %cst_92 : f32 to vector<16x16x32xf32>
    %151 = arith.mulf %150, %147 : vector<16x16x32xf32>
    %152 = arith.select %149, %147, %151 : vector<16x16x32xi1>, vector<16x16x32xf32>
    %c1_93 = arith.constant 1 : index
    %c8_94 = arith.constant 8 : index
    %c0_95 = arith.constant 0 : index
    %153 = vector.load %arg5[%c1_93, %c8_94, %c0_95] : memref<18x32x32xf32, #tpu.memory_space<vmem>>, vector<16x16x32xf32>
    tpu.vector_store %arg5[%c1_93, %c8_94, %c0_95], %152 {strides = array<i32>} : memref<18x32x32xf32, #tpu.memory_space<vmem>>, vector<16x16x32xf32>,
    %c0_96 = arith.constant 0 : index
    %c7_97 = arith.constant 7 : index
    %c0_98 = arith.constant 0 : index
    %154 = vector.load %arg5[%c0_96, %c7_97, %c0_98] : memref<18x32x32xf32, #tpu.memory_space<vmem>>, vector<18x16x32xf32>
    %c0_99 = arith.constant 0 : index
    %c8_100 = arith.constant 8 : index
    %c0_101 = arith.constant 0 : index
    %155 = vector.load %arg5[%c0_99, %c8_100, %c0_101] : memref<18x32x32xf32, #tpu.memory_space<vmem>>, vector<18x16x32xf32>
    %c0_102 = arith.constant 0 : index
    %c9_103 = arith.constant 9 : index
    %c0_104 = arith.constant 0 : index
    %156 = vector.load %arg5[%c0_102, %c9_103, %c0_104] : memref<18x32x32xf32, #tpu.memory_space<vmem>>, vector<18x16x32xf32>
    %157 = vector.extract_strided_slice %154 {offsets = [0, 0, 0], sizes = [16, 16, 32], strides = [1, 1, 1]} : vector<18x16x32xf32> to vector<16x16x32xf32>
    %158 = arith.truncf %157 : vector<16x16x32xf32> to vector<16x16x32xbf16>
    %c0_105 = arith.constant 0 : index
    %c0_106 = arith.constant 0 : index
    %c0_107 = arith.constant 0 : index
    %159 = vector.load %arg7[%c0_105, %c0_106, %c0_107] : memref<16x16x384xbf16, #tpu.memory_space<vmem>>, vector<16x16x32xbf16>
    tpu.vector_store %arg7[%c0_105, %c0_106, %c0_107], %158 {strides = array<i32>} : memref<16x16x384xbf16, #tpu.memory_space<vmem>>, vector<16x16x32xbf16>,
    %160 = vector.extract_strided_slice %155 {offsets = [0, 0, 0], sizes = [16, 16, 32], strides = [1, 1, 1]} : vector<18x16x32xf32> to vector<16x16x32xf32>
    %161 = arith.truncf %160 : vector<16x16x32xf32> to vector<16x16x32xbf16>
    %c0_108 = arith.constant 0 : index
    %c0_109 = arith.constant 0 : index
    %c32_110 = arith.constant 32 : index
    %162 = vector.load %arg7[%c0_108, %c0_109, %c32_110] : memref<16x16x384xbf16, #tpu.memory_space<vmem>>, vector<16x16x32xbf16>
    tpu.vector_store %arg7[%c0_108, %c0_109, %c32_110], %161 {strides = array<i32>} : memref<16x16x384xbf16, #tpu.memory_space<vmem>>, vector<16x16x32xbf16>,
    %163 = vector.extract_strided_slice %156 {offsets = [0, 0, 0], sizes = [16, 16, 32], strides = [1, 1, 1]} : vector<18x16x32xf32> to vector<16x16x32xf32>
    %164 = arith.truncf %163 : vector<16x16x32xf32> to vector<16x16x32xbf16>
    %c0_111 = arith.constant 0 : index
    %c0_112 = arith.constant 0 : index
    %c64_113 = arith.constant 64 : index
    %165 = vector.load %arg7[%c0_111, %c0_112, %c64_113] : memref<16x16x384xbf16, #tpu.memory_space<vmem>>, vector<16x16x32xbf16>
    tpu.vector_store %arg7[%c0_111, %c0_112, %c64_113], %164 {strides = array<i32>} : memref<16x16x384xbf16, #tpu.memory_space<vmem>>, vector<16x16x32xbf16>,
    %166 = vector.extract_strided_slice %154 {offsets = [1, 0, 0], sizes = [16, 16, 32], strides = [1, 1, 1]} : vector<18x16x32xf32> to vector<16x16x32xf32>
    %167 = arith.truncf %166 : vector<16x16x32xf32> to vector<16x16x32xbf16>
    %c0_114 = arith.constant 0 : index
    %c0_115 = arith.constant 0 : index
    %c96_116 = arith.constant 96 : index
    %168 = vector.load %arg7[%c0_114, %c0_115, %c96_116] : memref<16x16x384xbf16, #tpu.memory_space<vmem>>, vector<16x16x32xbf16>
    tpu.vector_store %arg7[%c0_114, %c0_115, %c96_116], %167 {strides = array<i32>} : memref<16x16x384xbf16, #tpu.memory_space<vmem>>, vector<16x16x32xbf16>,
    %169 = vector.extract_strided_slice %155 {offsets = [1, 0, 0], sizes = [16, 16, 32], strides = [1, 1, 1]} : vector<18x16x32xf32> to vector<16x16x32xf32>
    %170 = arith.truncf %169 : vector<16x16x32xf32> to vector<16x16x32xbf16>
    %c0_117 = arith.constant 0 : index
    %c0_118 = arith.constant 0 : index
    %c128_119 = arith.constant 128 : index
    %171 = vector.load %arg7[%c0_117, %c0_118, %c128_119] : memref<16x16x384xbf16, #tpu.memory_space<vmem>>, vector<16x16x32xbf16>
    tpu.vector_store %arg7[%c0_117, %c0_118, %c128_119], %170 {strides = array<i32>} : memref<16x16x384xbf16, #tpu.memory_space<vmem>>, vector<16x16x32xbf16>,
    %172 = vector.extract_strided_slice %156 {offsets = [1, 0, 0], sizes = [16, 16, 32], strides = [1, 1, 1]} : vector<18x16x32xf32> to vector<16x16x32xf32>
    %173 = arith.truncf %172 : vector<16x16x32xf32> to vector<16x16x32xbf16>
    %c0_120 = arith.constant 0 : index
    %c0_121 = arith.constant 0 : index
    %c160_122 = arith.constant 160 : index
    %174 = vector.load %arg7[%c0_120, %c0_121, %c160_122] : memref<16x16x384xbf16, #tpu.memory_space<vmem>>, vector<16x16x32xbf16>
    tpu.vector_store %arg7[%c0_120, %c0_121, %c160_122], %173 {strides = array<i32>} : memref<16x16x384xbf16, #tpu.memory_space<vmem>>, vector<16x16x32xbf16>,
    %175 = vector.extract_strided_slice %154 {offsets = [2, 0, 0], sizes = [16, 16, 32], strides = [1, 1, 1]} : vector<18x16x32xf32> to vector<16x16x32xf32>
    %176 = arith.truncf %175 : vector<16x16x32xf32> to vector<16x16x32xbf16>
    %c0_123 = arith.constant 0 : index
    %c0_124 = arith.constant 0 : index
    %c192_125 = arith.constant 192 : index
    %177 = vector.load %arg7[%c0_123, %c0_124, %c192_125] : memref<16x16x384xbf16, #tpu.memory_space<vmem>>, vector<16x16x32xbf16>
    tpu.vector_store %arg7[%c0_123, %c0_124, %c192_125], %176 {strides = array<i32>} : memref<16x16x384xbf16, #tpu.memory_space<vmem>>, vector<16x16x32xbf16>,
    %178 = vector.extract_strided_slice %155 {offsets = [2, 0, 0], sizes = [16, 16, 32], strides = [1, 1, 1]} : vector<18x16x32xf32> to vector<16x16x32xf32>
    %179 = arith.truncf %178 : vector<16x16x32xf32> to vector<16x16x32xbf16>
    %c0_126 = arith.constant 0 : index
    %c0_127 = arith.constant 0 : index
    %c224_128 = arith.constant 224 : index
    %180 = vector.load %arg7[%c0_126, %c0_127, %c224_128] : memref<16x16x384xbf16, #tpu.memory_space<vmem>>, vector<16x16x32xbf16>
    tpu.vector_store %arg7[%c0_126, %c0_127, %c224_128], %179 {strides = array<i32>} : memref<16x16x384xbf16, #tpu.memory_space<vmem>>, vector<16x16x32xbf16>,
    %181 = vector.extract_strided_slice %156 {offsets = [2, 0, 0], sizes = [16, 16, 32], strides = [1, 1, 1]} : vector<18x16x32xf32> to vector<16x16x32xf32>
    %182 = arith.truncf %181 : vector<16x16x32xf32> to vector<16x16x32xbf16>
    %c0_129 = arith.constant 0 : index
    %c0_130 = arith.constant 0 : index
    %c256_131 = arith.constant 256 : index
    %183 = vector.load %arg7[%c0_129, %c0_130, %c256_131] : memref<16x16x384xbf16, #tpu.memory_space<vmem>>, vector<16x16x32xbf16>
    tpu.vector_store %arg7[%c0_129, %c0_130, %c256_131], %182 {strides = array<i32>} : memref<16x16x384xbf16, #tpu.memory_space<vmem>>, vector<16x16x32xbf16>,
    %c0_132 = arith.constant 0 : index
    %c0_133 = arith.constant 0 : index
    %c0_134 = arith.constant 0 : index
    %184 = vector.load %arg7[%c0_132, %c0_133, %c0_134] : memref<16x16x384xbf16, #tpu.memory_space<vmem>>, vector<16x16x384xbf16>
    %c1_135 = arith.constant 1 : index
    %c0_136 = arith.constant 0 : index
    %c0_137 = arith.constant 0 : index
    %185 = vector.load %arg2[%c1_135, %c0_136, %c0_137] : memref<2x384x32xbf16, #tpu.memory_space<vmem>>, vector<1x384x32xbf16>
    %186 = vector.shape_cast %185 : vector<1x384x32xbf16> to vector<384x32xbf16>
    "tpu.trace_start"() <{level = 10 : i32, message = "hwk,kf->hwf"}> : () -> ()
    %cst_138 = arith.constant dense<0.000000e+00> : vector<16x16x32xf32>
    %187 = tpu.matmul %184, %186, %cst_138 {dimension_numbers = #tpu.dot_dimension_numbers<[2], [0], [0, 1], [1], [0, 0, 0, 1, 1, 1], [], []>} : vector<16x16x384xbf16>, vector<384x32xbf16>, vector<16x16x32xf32> -> vector<16x16x32xf32>
    "tpu.trace_stop"() : () -> ()
    %cst_139 = arith.constant dense<0.000000e+00> : vector<32xf32>
    %188 = vector.multi_reduction <add>, %187, %cst_139 [0, 1] : vector<16x16x32xf32> to vector<32xf32>
    %189 = vector.shape_cast %188 : vector<32xf32> to vector<1x1x32xf32>
    %cst_140 = arith.constant 2.560000e+02 : f32
    %190 = vector.broadcast %cst_140 : f32 to vector<1x1x32xf32>
    %191 = arith.divf %189, %190 : vector<1x1x32xf32>
    %192 = vector.broadcast %191 : vector<1x1x32xf32> to vector<16x16x32xf32>
    %193 = arith.subf %187, %192 : vector<16x16x32xf32>
    %194 = arith.mulf %193, %193 : vector<16x16x32xf32>
    %cst_141 = arith.constant dense<0.000000e+00> : vector<32xf32>
    %195 = vector.multi_reduction <add>, %194, %cst_141 [0, 1] : vector<16x16x32xf32> to vector<32xf32>
    %196 = vector.shape_cast %195 : vector<32xf32> to vector<1x1x32xf32>
    %cst_142 = arith.constant 2.560000e+02 : f32
    %197 = vector.broadcast %cst_142 : f32 to vector<1x1x32xf32>
    %198 = arith.divf %196, %197 : vector<1x1x32xf32>
    %199 = vector.broadcast %191 : vector<1x1x32xf32> to vector<16x16x32xf32>
    %200 = arith.subf %187, %199 : vector<16x16x32xf32>
    %cst_143 = arith.constant 9.99999974E-6 : f32
    %201 = vector.broadcast %cst_143 : f32 to vector<1x1x32xf32>
    %202 = arith.addf %198, %201 : vector<1x1x32xf32>
    %203 = math.rsqrt %202 : vector<1x1x32xf32>
    %204 = vector.broadcast %203 : vector<1x1x32xf32> to vector<16x16x32xf32>
    %205 = arith.mulf %200, %204 : vector<16x16x32xf32>
    %cst_144 = arith.constant 0.000000e+00 : f32
    %206 = vector.broadcast %cst_144 : f32 to vector<16x16x32xf32>
    %207 = arith.cmpf oge, %205, %206 : vector<16x16x32xf32>
    %cst_145 = arith.constant 0.00999999977 : f32
    %208 = vector.broadcast %cst_145 : f32 to vector<16x16x32xf32>
    %209 = arith.mulf %208, %205 : vector<16x16x32xf32>
    %210 = arith.select %207, %205, %209 : vector<16x16x32xi1>, vector<16x16x32xf32>
    %c1_146 = arith.constant 1 : index
    %c8_147 = arith.constant 8 : index
    %c0_148 = arith.constant 0 : index
    %211 = vector.load %arg6[%c1_146, %c8_147, %c0_148] : memref<18x32x32xf32, #tpu.memory_space<vmem>>, vector<16x16x32xf32>
    tpu.vector_store %arg6[%c1_146, %c8_147, %c0_148], %210 {strides = array<i32>} : memref<18x32x32xf32, #tpu.memory_space<vmem>>, vector<16x16x32xf32>,
    %c0_149 = arith.constant 0 : index
    %c0_150 = arith.constant 0 : index
    %c0_151 = arith.constant 0 : index
    %212 = vector.load %arg3[%c0_149, %c0_150, %c0_151] : memref<3x3x32xf32, #tpu.memory_space<vmem>>, vector<3x3x32xf32>
    %c0_152 = arith.constant 0 : index
    %c7_153 = arith.constant 7 : index
    %c0_154 = arith.constant 0 : index
    %213 = vector.load %arg6[%c0_152, %c7_153, %c0_154] : memref<18x32x32xf32, #tpu.memory_space<vmem>>, vector<18x16x32xf32>
    %c0_155 = arith.constant 0 : index
    %c8_156 = arith.constant 8 : index
    %c0_157 = arith.constant 0 : index
    %214 = vector.load %arg6[%c0_155, %c8_156, %c0_157] : memref<18x32x32xf32, #tpu.memory_space<vmem>>, vector<18x16x32xf32>
    %c0_158 = arith.constant 0 : index
    %c9_159 = arith.constant 9 : index
    %c0_160 = arith.constant 0 : index
    %215 = vector.load %arg6[%c0_158, %c9_159, %c0_160] : memref<18x32x32xf32, #tpu.memory_space<vmem>>, vector<18x16x32xf32>
    %cst_161 = arith.constant 0.000000e+00 : f32
    %216 = vector.broadcast %cst_161 : f32 to vector<16x16x32xf32>
    %217 = vector.extract_strided_slice %213 {offsets = [0, 0, 0], sizes = [16, 16, 32], strides = [1, 1, 1]} : vector<18x16x32xf32> to vector<16x16x32xf32>
    %218 = vector.extract_strided_slice %212 {offsets = [0, 0, 0], sizes = [1, 1, 32], strides = [1, 1, 1]} : vector<3x3x32xf32> to vector<1x1x32xf32>
    %219 = vector.shape_cast %218 : vector<1x1x32xf32> to vector<32xf32>
    %220 = vector.shape_cast %219 : vector<32xf32> to vector<1x1x32xf32>
    %221 = vector.broadcast %220 : vector<1x1x32xf32> to vector<16x16x32xf32>
    %222 = arith.mulf %217, %221 : vector<16x16x32xf32>
    %223 = arith.addf %216, %222 : vector<16x16x32xf32>
    %224 = vector.extract_strided_slice %214 {offsets = [0, 0, 0], sizes = [16, 16, 32], strides = [1, 1, 1]} : vector<18x16x32xf32> to vector<16x16x32xf32>
    %225 = vector.extract_strided_slice %212 {offsets = [0, 1, 0], sizes = [1, 1, 32], strides = [1, 1, 1]} : vector<3x3x32xf32> to vector<1x1x32xf32>
    %226 = vector.shape_cast %225 : vector<1x1x32xf32> to vector<32xf32>
    %227 = vector.shape_cast %226 : vector<32xf32> to vector<1x1x32xf32>
    %228 = vector.broadcast %227 : vector<1x1x32xf32> to vector<16x16x32xf32>
    %229 = arith.mulf %224, %228 : vector<16x16x32xf32>
    %230 = arith.addf %223, %229 : vector<16x16x32xf32>
    %231 = vector.extract_strided_slice %215 {offsets = [0, 0, 0], sizes = [16, 16, 32], strides = [1, 1, 1]} : vector<18x16x32xf32> to vector<16x16x32xf32>
    %232 = vector.extract_strided_slice %212 {offsets = [0, 2, 0], sizes = [1, 1, 32], strides = [1, 1, 1]} : vector<3x3x32xf32> to vector<1x1x32xf32>
    %233 = vector.shape_cast %232 : vector<1x1x32xf32> to vector<32xf32>
    %234 = vector.shape_cast %233 : vector<32xf32> to vector<1x1x32xf32>
    %235 = vector.broadcast %234 : vector<1x1x32xf32> to vector<16x16x32xf32>
    %236 = arith.mulf %231, %235 : vector<16x16x32xf32>
    %237 = arith.addf %230, %236 : vector<16x16x32xf32>
    %238 = vector.extract_strided_slice %213 {offsets = [1, 0, 0], sizes = [16, 16, 32], strides = [1, 1, 1]} : vector<18x16x32xf32> to vector<16x16x32xf32>
    %239 = vector.extract_strided_slice %212 {offsets = [1, 0, 0], sizes = [1, 1, 32], strides = [1, 1, 1]} : vector<3x3x32xf32> to vector<1x1x32xf32>
    %240 = vector.shape_cast %239 : vector<1x1x32xf32> to vector<32xf32>
    %241 = vector.shape_cast %240 : vector<32xf32> to vector<1x1x32xf32>
    %242 = vector.broadcast %241 : vector<1x1x32xf32> to vector<16x16x32xf32>
    %243 = arith.mulf %238, %242 : vector<16x16x32xf32>
    %244 = arith.addf %237, %243 : vector<16x16x32xf32>
    %245 = vector.extract_strided_slice %214 {offsets = [1, 0, 0], sizes = [16, 16, 32], strides = [1, 1, 1]} : vector<18x16x32xf32> to vector<16x16x32xf32>
    %246 = vector.extract_strided_slice %212 {offsets = [1, 1, 0], sizes = [1, 1, 32], strides = [1, 1, 1]} : vector<3x3x32xf32> to vector<1x1x32xf32>
    %247 = vector.shape_cast %246 : vector<1x1x32xf32> to vector<32xf32>
    %248 = vector.shape_cast %247 : vector<32xf32> to vector<1x1x32xf32>
    %249 = vector.broadcast %248 : vector<1x1x32xf32> to vector<16x16x32xf32>
    %250 = arith.mulf %245, %249 : vector<16x16x32xf32>
    %251 = arith.addf %244, %250 : vector<16x16x32xf32>
    %252 = vector.extract_strided_slice %215 {offsets = [1, 0, 0], sizes = [16, 16, 32], strides = [1, 1, 1]} : vector<18x16x32xf32> to vector<16x16x32xf32>
    %253 = vector.extract_strided_slice %212 {offsets = [1, 2, 0], sizes = [1, 1, 32], strides = [1, 1, 1]} : vector<3x3x32xf32> to vector<1x1x32xf32>
    %254 = vector.shape_cast %253 : vector<1x1x32xf32> to vector<32xf32>
    %255 = vector.shape_cast %254 : vector<32xf32> to vector<1x1x32xf32>
    %256 = vector.broadcast %255 : vector<1x1x32xf32> to vector<16x16x32xf32>
    %257 = arith.mulf %252, %256 : vector<16x16x32xf32>
    %258 = arith.addf %251, %257 : vector<16x16x32xf32>
    %259 = vector.extract_strided_slice %213 {offsets = [2, 0, 0], sizes = [16, 16, 32], strides = [1, 1, 1]} : vector<18x16x32xf32> to vector<16x16x32xf32>
    %260 = vector.extract_strided_slice %212 {offsets = [2, 0, 0], sizes = [1, 1, 32], strides = [1, 1, 1]} : vector<3x3x32xf32> to vector<1x1x32xf32>
    %261 = vector.shape_cast %260 : vector<1x1x32xf32> to vector<32xf32>
    %262 = vector.shape_cast %261 : vector<32xf32> to vector<1x1x32xf32>
    %263 = vector.broadcast %262 : vector<1x1x32xf32> to vector<16x16x32xf32>
    %264 = arith.mulf %259, %263 : vector<16x16x32xf32>
    %265 = arith.addf %258, %264 : vector<16x16x32xf32>
    %266 = vector.extract_strided_slice %214 {offsets = [2, 0, 0], sizes = [16, 16, 32], strides = [1, 1, 1]} : vector<18x16x32xf32> to vector<16x16x32xf32>
    %267 = vector.extract_strided_slice %212 {offsets = [2, 1, 0], sizes = [1, 1, 32], strides = [1, 1, 1]} : vector<3x3x32xf32> to vector<1x1x32xf32>
    %268 = vector.shape_cast %267 : vector<1x1x32xf32> to vector<32xf32>
    %269 = vector.shape_cast %268 : vector<32xf32> to vector<1x1x32xf32>
    %270 = vector.broadcast %269 : vector<1x1x32xf32> to vector<16x16x32xf32>
    %271 = arith.mulf %266, %270 : vector<16x16x32xf32>
    %272 = arith.addf %265, %271 : vector<16x16x32xf32>
    %273 = vector.extract_strided_slice %215 {offsets = [2, 0, 0], sizes = [16, 16, 32], strides = [1, 1, 1]} : vector<18x16x32xf32> to vector<16x16x32xf32>
    %274 = vector.extract_strided_slice %212 {offsets = [2, 2, 0], sizes = [1, 1, 32], strides = [1, 1, 1]} : vector<3x3x32xf32> to vector<1x1x32xf32>
    %275 = vector.shape_cast %274 : vector<1x1x32xf32> to vector<32xf32>
    %276 = vector.shape_cast %275 : vector<32xf32> to vector<1x1x32xf32>
    %277 = vector.broadcast %276 : vector<1x1x32xf32> to vector<16x16x32xf32>
    %278 = arith.mulf %273, %277 : vector<16x16x32xf32>
    %279 = arith.addf %272, %278 : vector<16x16x32xf32>
    %cst_162 = arith.constant dense<0.000000e+00> : vector<16x16xf32>
    %280 = vector.multi_reduction <add>, %279, %cst_162 [2] : vector<16x16x32xf32> to vector<16x16xf32>
    %c0_163 = arith.constant 0 : index
    %c0_164 = arith.constant 0 : index
    %281 = vector.load %arg4[%c0_163, %c0_164] : memref<16x16xf32, #tpu.memory_space<vmem>>, vector<16x16xf32>
    tpu.vector_store %arg4[%c0_163, %c0_164], %280 {strides = array<i32>} : memref<16x16xf32, #tpu.memory_space<vmem>>, vector<16x16xf32>,
    return
  }
}

</mosaic_0001>

<bundles_post_ra>
// kernel: cnn_forward.1
= control target key start
LH: loop header
LB: loop body
LE: loop exit
PB: predicated region body
PF: predicated region fallthrough
CT: control target
= control target key end

     0   :  { %vm19_vm0 = vcmask 261120   ;;  %v5946_v2 = vmov 0   ;;  %v5947_v3 = vmov 0.0   ;;  %s10259_s0 = inlined_call_operand.vmem [shape: f32[16,16,1], index: 0, kind: input, shape index: {}]   ;;  %s10260_s1 = inlined_call_operand.vmem [shape: f32[3,3,32], index: 1, kind: input, shape index: {}]   ;;  %s10261_s2 = inlined_call_operand.vmem [shape: bf16[2,384,32], index: 2, kind: input, shape index: {}]   ;;  %s10262_s3 = inlined_call_operand.vmem [shape: f32[3,3,32], index: 3, kind: input, shape index: {}]   ;;  %s10263_s4 = inlined_call_operand.hbm [shape: f32[16,16], index: 4, kind: output, shape index: {}]  }
   0x1   :  { %v5982_v0 = vld [vmem:[%s10259_s0 + $0x10] sm:$0xff]  ;;  %v5987_v1 = vld [vmem:[%s10259_s0] sm:$0xff]  ;;  %5863 = vset.pattern.permute.xlu1 %v5946_v2  ;;  %5862 = vset.pattern.permute.xlu0 %v5946_v2  ;;  %97 = vst.msk [vmem:[#allocation3 + $0x8] sm:$0xff] %vm19_vm0, %v5947_v3  ;;  %98 = vst.msk [vmem:[#allocation3 + $0x10] sm:$0xff] %vm19_vm0, %v5947_v3 }
   0x2   :  { %20 = vst.msk [vmem:[#allocation2] sm:$0xff] %vm19_vm0, %v5947_v3  ;;  %21 = vst.msk [vmem:[#allocation2 + $0x20] sm:$0xff] %vm19_vm0, %v5947_v3  ;;  %163 = vperm.xlu1 %5863, %v5982_v0   ;;  %153 = vperm.xlu0 %5862, %v5987_v1   ;;  %v122_v4 = vld [vmem:[%s10259_s0 + $0x18] sm:$0xff]  ;;  %v120_v5 = vld [vmem:[%s10259_s0 + $0x8] sm:$0xff] }
   0x3   :  { %22 = vst.msk [vmem:[#allocation2 + $0x40] sm:$0xff] %vm19_vm0, %v5947_v3  ;;  %23 = vst.msk [vmem:[#allocation2 + $0x60] sm:$0xff] %vm19_vm0, %v5947_v3  ;;  %v124_v6 = vld [vmem:[%s10259_s0 + $0x28] sm:$0xff]  ;;  %v123_v7 = vld [vmem:[%s10259_s0 + $0x20] sm:$0xff] }
   0x4   :  { %24 = vst.msk [vmem:[#allocation2 + $0x80] sm:$0xff] %vm19_vm0, %v5947_v3  ;;  %25 = vst.msk [vmem:[#allocation2 + $0xa0] sm:$0xff] %vm19_vm0, %v5947_v3  ;;  %v126_v8 = vld [vmem:[%s10259_s0 + $0x38] sm:$0xff]  ;;  %v125_v9 = vld [vmem:[%s10259_s0 + $0x30] sm:$0xff] }
   0x5   :  { %26 = vst.msk [vmem:[#allocation2 + $0xc0] sm:$0xff] %vm19_vm0, %v5947_v3  ;;  %27 = vst.msk [vmem:[#allocation2 + $0xe0] sm:$0xff] %vm19_vm0, %v5947_v3  ;;  %v128_v10 = vld [vmem:[%s10259_s0 + $0x48] sm:$0xff]  ;;  %v127_v11 = vld [vmem:[%s10259_s0 + $0x40] sm:$0xff] }
   0x6   :  { %28 = vst.msk [vmem:[#allocation2 + $0x100] sm:$0xff] %vm19_vm0, %v5947_v3  ;;  %29 = vst.msk [vmem:[#allocation2 + $0x120] sm:$0xff] %vm19_vm0, %v5947_v3  ;;  %168 = vperm.xlu1 %5863, %v122_v4   ;;  %158 = vperm.xlu0 %5862, %v120_v5   ;;  %v130_v12 = vld [vmem:[%s10259_s0 + $0x58] sm:$0xff]  ;;  %v129_v13 = vld [vmem:[%s10259_s0 + $0x50] sm:$0xff] }
   0x7   :  { %30 = vst.msk [vmem:[#allocation2 + $0x140] sm:$0xff] %vm19_vm0, %v5947_v3  ;;  %31 = vst.msk [vmem:[#allocation2 + $0x160] sm:$0xff] %vm19_vm0, %v5947_v3  ;;  %v132_v14 = vld [vmem:[%s10259_s0 + $0x68] sm:$0xff]  ;;  %v131_v15 = vld [vmem:[%s10259_s0 + $0x60] sm:$0xff] }
   0x8   :  { %32 = vst.msk [vmem:[#allocation2 + $0x180] sm:$0xff] %vm19_vm0, %v5947_v3  ;;  %33 = vst.msk [vmem:[#allocation2 + $0x1a0] sm:$0xff] %vm19_vm0, %v5947_v3  ;;  %v134_v16 = vld [vmem:[%s10259_s0 + $0x78] sm:$0xff]  ;;  %v133_v17 = vld [vmem:[%s10259_s0 + $0x70] sm:$0xff] }
   0x9   :  { %34 = vst.msk [vmem:[#allocation2 + $0x1c0] sm:$0xff] %vm19_vm0, %v5947_v3  ;;  %35 = vst.msk [vmem:[#allocation2 + $0x1e0] sm:$0xff] %vm19_vm0, %v5947_v3  ;;  %v136_v18 = vld [vmem:[%s10259_s0 + $0x88] sm:$0xff]  ;;  %v135_v19 = vld [vmem:[%s10259_s0 + $0x80] sm:$0xff] }
   0xa   :  { %36 = vst.msk [vmem:[#allocation2 + $0x200] sm:$0xff] %vm19_vm0, %v5947_v3  ;;  %37 = vst.msk [vmem:[#allocation2 + $0x220] sm:$0xff] %vm19_vm0, %v5947_v3  ;;  %178 = vperm.xlu1 %5863, %v124_v6   ;;  %173 = vperm.xlu0 %5862, %v123_v7   ;;  %v138_v20 = vld [vmem:[%s10259_s0 + $0x98] sm:$0xff]  ;;  %v137_v21 = vld [vmem:[%s10259_s0 + $0x90] sm:$0xff] }
   0xb   :  { %38 = vst.msk [vmem:[#allocation2 + $0x18] sm:$0xff] %vm19_vm0, %v5947_v3  ;;  %39 = vst.msk [vmem:[#allocation2 + $0x38] sm:$0xff] %vm19_vm0, %v5947_v3  ;;  %v140_v22 = vld [vmem:[%s10259_s0 + $0xa8] sm:$0xff]  ;;  %v139_v23 = vld [vmem:[%s10259_s0 + $0xa0] sm:$0xff] }
   0xc   :  { %40 = vst.msk [vmem:[#allocation2 + $0x58] sm:$0xff] %vm19_vm0, %v5947_v3  ;;  %41 = vst.msk [vmem:[#allocation2 + $0x78] sm:$0xff] %vm19_vm0, %v5947_v3  ;;  %v142_v24 = vld [vmem:[%s10259_s0 + $0xb8] sm:$0xff]  ;;  %v141_v25 = vld [vmem:[%s10259_s0 + $0xb0] sm:$0xff] }
   0xd   :  { %42 = vst.msk [vmem:[#allocation2 + $0x98] sm:$0xff] %vm19_vm0, %v5947_v3  ;;  %43 = vst.msk [vmem:[#allocation2 + $0xb8] sm:$0xff] %vm19_vm0, %v5947_v3  ;;  %v144_v26 = vld [vmem:[%s10259_s0 + $0xc8] sm:$0xff]  ;;  %v143_v27 = vld [vmem:[%s10259_s0 + $0xc0] sm:$0xff] }
   0xe   :  { %44 = vst.msk [vmem:[#allocation2 + $0xd8] sm:$0xff] %vm19_vm0, %v5947_v3  ;;  %45 = vst.msk [vmem:[#allocation2 + $0xf8] sm:$0xff] %vm19_vm0, %v5947_v3  ;;  %188 = vperm.xlu1 %5863, %v126_v8   ;;  %183 = vperm.xlu0 %5862, %v125_v9  }
   0xf   :  { %46 = vst.msk [vmem:[#allocation2 + $0x118] sm:$0xff] %vm19_vm0, %v5947_v3  ;;  %47 = vst.msk [vmem:[#allocation2 + $0x138] sm:$0xff] %vm19_vm0, %v5947_v3 }
  0x10   :  { %48 = vst.msk [vmem:[#allocation2 + $0x158] sm:$0xff] %vm19_vm0, %v5947_v3  ;;  %49 = vst.msk [vmem:[#allocation2 + $0x178] sm:$0xff] %vm19_vm0, %v5947_v3 }
  0x11   :  { %50 = vst.msk [vmem:[#allocation2 + $0x198] sm:$0xff] %vm19_vm0, %v5947_v3  ;;  %51 = vst.msk [vmem:[#allocation2 + $0x1b8] sm:$0xff] %vm19_vm0, %v5947_v3 }
  0x12   :  { %52 = vst.msk [vmem:[#allocation2 + $0x1d8] sm:$0xff] %vm19_vm0, %v5947_v3  ;;  %53 = vst.msk [vmem:[#allocation2 + $0x1f8] sm:$0xff] %vm19_vm0, %v5947_v3  ;;  %198 = vperm.xlu1 %5863, %v128_v10   ;;  %193 = vperm.xlu0 %5862, %v127_v11  }
  0x13   :  { %54 = vst.msk [vmem:[#allocation2 + $0x218] sm:$0xff] %vm19_vm0, %v5947_v3  ;;  %55 = vst.msk [vmem:[#allocation2 + $0x238] sm:$0xff] %vm19_vm0, %v5947_v3 }
  0x14   :  { %56 = vst.msk [vmem:[#allocation2 + $0x8] sm:$0xff] %vm19_vm0, %v5947_v3  ;;  %57 = vst.msk [vmem:[#allocation2 + $0x10] sm:$0xff] %vm19_vm0, %v5947_v3 }
  0x15   :  { %59 = vst.msk [vmem:[#allocation2 + $0x228] sm:$0xff] %vm19_vm0, %v5947_v3  ;;  %60 = vst.msk [vmem:[#allocation2 + $0x230] sm:$0xff] %vm19_vm0, %v5947_v3 }
  0x16   :  { %61 = vst.msk [vmem:[#allocation3] sm:$0xff] %vm19_vm0, %v5947_v3  ;;  %62 = vst.msk [vmem:[#allocation3 + $0x20] sm:$0xff] %vm19_vm0, %v5947_v3  ;;  %208 = vperm.xlu1 %5863, %v130_v12   ;;  %203 = vperm.xlu0 %5862, %v129_v13  }
  0x17   :  { %63 = vst.msk [vmem:[#allocation3 + $0x40] sm:$0xff] %vm19_vm0, %v5947_v3  ;;  %64 = vst.msk [vmem:[#allocation3 + $0x60] sm:$0xff] %vm19_vm0, %v5947_v3 }
  0x18   :  { %65 = vst.msk [vmem:[#allocation3 + $0x80] sm:$0xff] %vm19_vm0, %v5947_v3  ;;  %66 = vst.msk [vmem:[#allocation3 + $0xa0] sm:$0xff] %vm19_vm0, %v5947_v3 }
  0x19   :  { %67 = vst.msk [vmem:[#allocation3 + $0xc0] sm:$0xff] %vm19_vm0, %v5947_v3  ;;  %68 = vst.msk [vmem:[#allocation3 + $0xe0] sm:$0xff] %vm19_vm0, %v5947_v3 }
  0x1a   :  { %69 = vst.msk [vmem:[#allocation3 + $0x100] sm:$0xff] %vm19_vm0, %v5947_v3  ;;  %70 = vst.msk [vmem:[#allocation3 + $0x120] sm:$0xff] %vm19_vm0, %v5947_v3  ;;  %218 = vperm.xlu1 %5863, %v132_v14   ;;  %213 = vperm.xlu0 %5862, %v131_v15  }
  0x1b   :  { %71 = vst.msk [vmem:[#allocation3 + $0x140] sm:$0xff] %vm19_vm0, %v5947_v3  ;;  %72 = vst.msk [vmem:[#allocation3 + $0x160] sm:$0xff] %vm19_vm0, %v5947_v3 }
  0x1c   :  { %73 = vst.msk [vmem:[#allocation3 + $0x180] sm:$0xff] %vm19_vm0, %v5947_v3  ;;  %74 = vst.msk [vmem:[#allocation3 + $0x1a0] sm:$0xff] %vm19_vm0, %v5947_v3 }
  0x1d   :  { %75 = vst.msk [vmem:[#allocation3 + $0x1c0] sm:$0xff] %vm19_vm0, %v5947_v3  ;;  %76 = vst.msk [vmem:[#allocation3 + $0x1e0] sm:$0xff] %vm19_vm0, %v5947_v3 }
  0x1e   :  { %77 = vst.msk [vmem:[#allocation3 + $0x200] sm:$0xff] %vm19_vm0, %v5947_v3  ;;  %78 = vst.msk [vmem:[#allocation3 + $0x220] sm:$0xff] %vm19_vm0, %v5947_v3  ;;  %228 = vperm.xlu1 %5863, %v134_v16   ;;  %223 = vperm.xlu0 %5862, %v133_v17  }
  0x1f   :  { %79 = vst.msk [vmem:[#allocation3 + $0x18] sm:$0xff] %vm19_vm0, %v5947_v3  ;;  %80 = vst.msk [vmem:[#allocation3 + $0x38] sm:$0xff] %vm19_vm0, %v5947_v3 }
  0x20   :  { %81 = vst.msk [vmem:[#allocation3 + $0x58] sm:$0xff] %vm19_vm0, %v5947_v3  ;;  %82 = vst.msk [vmem:[#allocation3 + $0x78] sm:$0xff] %vm19_vm0, %v5947_v3 }
  0x21   :  { %83 = vst.msk [vmem:[#allocation3 + $0x98] sm:$0xff] %vm19_vm0, %v5947_v3  ;;  %84 = vst.msk [vmem:[#allocation3 + $0xb8] sm:$0xff] %vm19_vm0, %v5947_v3 }
  0x22   :  { %85 = vst.msk [vmem:[#allocation3 + $0xd8] sm:$0xff] %vm19_vm0, %v5947_v3  ;;  %86 = vst.msk [vmem:[#allocation3 + $0xf8] sm:$0xff] %vm19_vm0, %v5947_v3  ;;  %238 = vperm.xlu1 %5863, %v136_v18   ;;  %233 = vperm.xlu0 %5862, %v135_v19  }
  0x23   :  { %87 = vst.msk [vmem:[#allocation3 + $0x118] sm:$0xff] %vm19_vm0, %v5947_v3  ;;  %88 = vst.msk [vmem:[#allocation3 + $0x138] sm:$0xff] %vm19_vm0, %v5947_v3 }
  0x24   :  { %89 = vst.msk [vmem:[#allocation3 + $0x158] sm:$0xff] %vm19_vm0, %v5947_v3  ;;  %90 = vst.msk [vmem:[#allocation3 + $0x178] sm:$0xff] %vm19_vm0, %v5947_v3 }
  0x25   :  { %91 = vst.msk [vmem:[#allocation3 + $0x198] sm:$0xff] %vm19_vm0, %v5947_v3  ;;  %92 = vst.msk [vmem:[#allocation3 + $0x1b8] sm:$0xff] %vm19_vm0, %v5947_v3 }
  0x26   :  { %93 = vst.msk [vmem:[#allocation3 + $0x1d8] sm:$0xff] %vm19_vm0, %v5947_v3  ;;  %94 = vst.msk [vmem:[#allocation3 + $0x1f8] sm:$0xff] %vm19_vm0, %v5947_v3  ;;  %248 = vperm.xlu1 %5863, %v138_v20   ;;  %243 = vperm.xlu0 %5862, %v137_v21  }
  0x27   :  { %95 = vst.msk [vmem:[#allocation3 + $0x218] sm:$0xff] %vm19_vm0, %v5947_v3  ;;  %96 = vst.msk [vmem:[#allocation3 + $0x238] sm:$0xff] %vm19_vm0, %v5947_v3 }
  0x28   :  { %100 = vst.msk [vmem:[#allocation3 + $0x228] sm:$0xff] %vm19_vm0, %v5947_v3  ;;  %101 = vst.msk [vmem:[#allocation3 + $0x230] sm:$0xff] %vm19_vm0, %v5947_v3 }
  0x2a   :  { %258 = vperm.xlu1 %5863, %v140_v22   ;;  %253 = vperm.xlu0 %5862, %v139_v23  }
  0x2e   :  { %268 = vperm.xlu1 %5863, %v142_v24   ;;  %263 = vperm.xlu0 %5862, %v141_v25  }
  0x2f   :  { %9 = vsyncpa [#allocation6], 0  ;;  %v5864_v28 = vld [vmem:[%s10261_s2 + $0x80] sm:$0xff]   ;;  %v146_v29 = vld [vmem:[%s10259_s0 + $0xd8] sm:$0xff]  ;;  %s5948_s23 = smov 32   ;;  %s5949_s28 = smov 64   ;;  %v10267_v45 = vlaneseq }
  0x30   :  { %v145_v30 = vld [vmem:[%s10259_s0 + $0xd0] sm:$0xff]  ;;  %v1232_v31 = vld [vmem:[#allocation3 + $0x8] sm:$0xff]  ;;  %5758 = vmatprep.subr.bf16.mxu1 %v5864_v28  ;;  %v150_v39 = vld [vmem:[%s10259_s0 + $0xf8] sm:$0xff]  ;;  %vm102_vm1 = vcmask 1047808  }
  0x31   :  { %v1233_v32 = vld [vmem:[#allocation3 + $0x10] sm:$0xff]  ;;  %5759 = vmatpush3.bf16.msra.mxu1 %v5864_v28  ;;  %v148_v34 = vld [vmem:[%s10259_s0 + $0xe8] sm:$0xff]  ;;  %v147_v40 = vld [vmem:[%s10259_s0 + $0xe0] sm:$0xff]  ;;  %v6261_v46 = vshrl.u32 %v10267_v45, 7  ;;  %103 = vst.msk [vmem:[#allocation4 + $0x10] sm:$0xff] %vm102_vm1, %v5946_v2 }
  0x32   :  { %278 = vperm.xlu1 %5863, %v144_v26   ;;  %273 = vperm.xlu0 %5862, %v143_v27   ;;  %v1336_v33 = vpack.c.bf16 %v1233_v32, %v1232_v31  ;;  %v1268_v35 = vld [vmem:[#allocation3 + $0x9] sm:$0xff]  ;;  %v1269_v36 = vld [vmem:[#allocation3 + $0x11] sm:$0xff]  ;;  %v5868_v44 = vld [vmem:[%s10261_s2 + $0xa0] sm:$0xff]   ;;  %104 = vst.msk [vmem:[#allocation4 + $0x28] sm:$0xff] %vm102_vm1, %v5946_v2 }
  0x33   :  { %v1433_v37 = vpack.c.bf16 %v1269_v36, %v1268_v35  ;;  %v5865_v38 = vld [vmem:[%s10261_s2 + $0x88] sm:$0xff]   ;;  %v149_v41 = vld [vmem:[%s10259_s0 + $0xf0] sm:$0xff]  ;;  %v5867_v43 = vld [vmem:[%s10261_s2 + $0x98] sm:$0xff]   ;;  %10295 = vst [vmem:[#allocation8_spill] sm:$0xff] %v6261_v46  ;;  %v6264_v47 = vsub.s32 0, %v6261_v46  ;;  %v6267_v48 = vsub.s32 1, %v6261_v46 }
  0x34   :  { %5760 = vmatprep.subr.bf16.mxu1 %v5865_v38  ;;  %v5866_v42 = vld [vmem:[%s10261_s2 + $0x90] sm:$0xff]   ;;  %v344_v49 = vld [vmem:[%s10260_s1] sm:$0x7]  ;;  %v5869_v50 = vld [vmem:[%s10261_s2 + $0xa8] sm:$0xff]   ;;  %v6282_v53 = vsub.s32 2, %v6261_v46  ;;  %105 = vst.msk [vmem:[#allocation4 + $0x40] sm:$0xff] %vm102_vm1, %v5946_v2 }
  0x35   :  { %5761 = vmatpush3.bf16.msra.mxu1 %v5865_v38  ;;  %v6276_v51 = vrot.slane %v344_v49, %v6264_v47  ;;  %v6279_v52 = vrot.slane %v344_v49, %v6267_v48  ;;  %v347_v54 = vld [vmem:[#allocation2 + $0x7] sm:$0xff]  ;;  %v348_v56 = vld [vmem:[#allocation2 + $0xf] sm:$0xff]  ;;  %v345_v4 = vld [vmem:[%s10260_s1 + $0x4] sm:$0x7]  ;;  %106 = vst.msk [vmem:[#allocation4 + $0x58] sm:$0xff] %vm102_vm1, %v5946_v2  ;;  %s5950_s0 = smov 96  }
  0x36   :  { %288 = vperm.xlu1 %5863, %v146_v29   ;;  %283 = vperm.xlu0 %5862, %v145_v30   ;;  %v383_v55 = vld [vmem:[#allocation2 + $0x8] sm:$0xff]  ;;  %v384_v57 = vld [vmem:[#allocation2 + $0x10] sm:$0xff]  ;;  %v6286_v60 = vrot.slane %v344_v49, %v6282_v53  ;;  %107 = vst.msk [vmem:[#allocation4 + $0x70] sm:$0xff] %vm102_vm1, %v5946_v2  ;;  %108 = vst.msk [vmem:[#allocation4 + $0x88] sm:$0xff] %vm102_vm1, %v5946_v2  ;;  %v6339_v13 = vrot.slane %v345_v4, %v6264_v47 }
  0x37   :  { %5762 = vmatprep.subr.bf16.mxu1 %v5866_v42  ;;  %v459_v61 = vmul.f32 %v6276_v51, %v347_v54  ;;  %v527_v62 = vmul.f32 %v6279_v52, %v383_v55  ;;  %v419_v63 = vld [vmem:[#allocation2 + $0x9] sm:$0xff]  ;;  %v460_v0 = vmul.f32 %v6276_v51, %v348_v56  ;;  %v528_v1 = vmul.f32 %v6279_v52, %v384_v57  ;;  %v420_v3 = vld [vmem:[#allocation2 + $0x11] sm:$0xff] }
  0x38   :  { %v346_v5 = vld [vmem:[%s10260_s1 + $0x8] sm:$0x7]  ;;  %v595_v9 = vmul.f32 %v6286_v60, %v419_v63  ;;  %v596_v11 = vmul.f32 %v6286_v60, %v420_v3  ;;  %v5870_v12 = vld [vmem:[%s10261_s2 + $0xb0] sm:$0xff]   ;;  %109 = vst.msk [vmem:[#allocation4 + $0xa0] sm:$0xff] %vm102_vm1, %v5946_v2  ;;  %110 = vst.msk [vmem:[#allocation4 + $0xb8] sm:$0xff] %vm102_vm1, %v5946_v2  ;;  %v6345_v15 = vrot.slane %v345_v4, %v6267_v48 }
  0x39   :  { %5763 = vmatpush3.bf16.msra.mxu1 %v5866_v42  ;;  %v559_v8 = vadd.f32 %v527_v62, %v459_v61  ;;  %v560_v10 = vadd.f32 %v528_v1, %v460_v0  ;;  %111 = vst.msk [vmem:[#allocation4 + $0xd0] sm:$0xff] %vm102_vm1, %v5946_v2  ;;  %112 = vst.msk [vmem:[#allocation4 + $0xe8] sm:$0xff] %vm102_vm1, %v5946_v2  ;;  %v6342_v14 = vrot.slane %v346_v5, %v6264_v47  ;;  %v5871_v30 = vld [vmem:[%s10261_s2 + $0xb8] sm:$0xff]  }
  0x3a   :  { %298 = vperm.xlu0 %5862, %v148_v34   ;;  %1368 = vrot.lane.b32.xlu1 %v1336_v33, %s5948_s23  ;;  %113 = vst.msk [vmem:[#allocation4 + $0x100] sm:$0xff] %vm102_vm1, %v5946_v2  ;;  %114 = vst.msk [vmem:[#allocation4 + $0x118] sm:$0xff] %vm102_vm1, %v5946_v2  ;;  %v6348_v16 = vrot.slane %v346_v5, %v6267_v48  ;;  %v6353_v25 = vrot.slane %v345_v4, %v6282_v53 }
  0x3b   :  { %5764 = vmatprep.subr.bf16.mxu1 %v5867_v43  ;;  %115 = vst.msk [vmem:[#allocation4 + $0x130] sm:$0xff] %vm102_vm1, %v5946_v2  ;;  %116 = vst.msk [vmem:[#allocation4 + $0x148] sm:$0xff] %vm102_vm1, %v5946_v2  ;;  %v627_v24 = vadd.f32 %v595_v9, %v559_v8  ;;  %v6360_v28 = vrot.slane %v346_v5, %v6282_v53  ;;  %v628_v29 = vadd.f32 %v596_v11, %v560_v10 }
  0x3c   :  { %117 = vst.msk [vmem:[#allocation4 + $0x160] sm:$0xff] %vm102_vm1, %v5946_v2  ;;  %118 = vst.msk [vmem:[#allocation4 + $0x178] sm:$0xff] %vm102_vm1, %v5946_v2 }
  0x3d   :  { %5765 = vmatpush3.bf16.msra.mxu1 %v5867_v43 }
  0x3e   :  { %308 = vperm.xlu0 %5862, %v150_v39   ;;  %1465 = vrot.lane.b32.xlu1 %v1433_v37, %s5949_s28 }
  0x3f   :  { %5766 = vmatprep.subr.bf16.mxu1 %v5868_v44 }
  0x41   :  { %5767 = vmatpush3.bf16.msra.mxu1 %v5868_v44 }
  0x42   :  { %293 = vperm.xlu1 %5863, %v147_v40   ;;  %5768 = vmatprep.subr.bf16.mxu1 %v5869_v50 }
  0x45   :  { %5769 = vmatpush3.bf16.msra.mxu1 %v5869_v50 }
  0x46   :  { %303 = vperm.xlu1 %5863, %v149_v41   ;;  %5770 = vmatprep.subr.bf16.mxu1 %v5870_v12 }
  0x49   :  { %5771 = vmatpush3.bf16.msra.mxu1 %v5870_v12 }
  0x4a   :  { %5772 = vmatprep.subr.bf16.mxu1 %v5871_v30 }
  0x4d   :  { %5773 = vmatpush3.bf16.msra.mxu1 %v5871_v30 }
  0x81   :  { %v164_v58 = vpop.permute.xlu1 %163  ;;  %v154_v59 = vpop.permute.xlu0 %153 }
  0x82   :  { %314 = vst.msk [vmem:[#allocation2 + $0x48] sm:$0xff] %vm19_vm0, %v164_v58  ;;  %312 = vst.msk [vmem:[#allocation2 + $0x28] sm:$0xff] %vm19_vm0, %v154_v59 }
  0x85   :  { %v169_v6 = vpop.permute.xlu1 %168  ;;  %v159_v7 = vpop.permute.xlu0 %158 }
  0x86   :  { %315 = vst.msk [vmem:[#allocation2 + $0x50] sm:$0xff] %vm19_vm0, %v169_v6  ;;  %313 = vst.msk [vmem:[#allocation2 + $0x30] sm:$0xff] %vm19_vm0, %v159_v7 }
  0x89   :  { %v351_v17 = vld [vmem:[#allocation2 + $0x47] sm:$0xff]  ;;  %v179_v20 = vpop.permute.xlu1 %178  ;;  %v174_v21 = vpop.permute.xlu0 %173 }
  0x8a   :  { %v387_v18 = vld [vmem:[#allocation2 + $0x48] sm:$0xff]  ;;  %v463_v2 = vmul.f32 %v6276_v51, %v351_v17  ;;  %317 = vst.msk [vmem:[#allocation2 + $0x70] sm:$0xff] %vm19_vm0, %v179_v20  ;;  %316 = vst.msk [vmem:[#allocation2 + $0x68] sm:$0xff] %vm19_vm0, %v174_v21  ;;  %v6366_v31 = vmul.f32 %v6339_v13, %v351_v17  ;;  %v6372_v33 = vmul.f32 %v6342_v14, %v351_v17 }
  0x8b   :  { %v349_v19 = vld [vmem:[#allocation2 + $0x27] sm:$0xff]  ;;  %v531_v22 = vmul.f32 %v6279_v52, %v387_v18  ;;  %v6369_v32 = vmul.f32 %v6345_v15, %v387_v18  ;;  %v6378_v36 = vmul.f32 %v6348_v16, %v387_v18 }
  0x8c   :  { %v385_v23 = vld [vmem:[#allocation2 + $0x28] sm:$0xff]  ;;  %v461_v26 = vmul.f32 %v6276_v51, %v349_v19  ;;  %v663_v34 = vmul.f32 %v6339_v13, %v349_v19 }
  0x8d   :  { %v529_v27 = vmul.f32 %v6279_v52, %v385_v23  ;;  %v6375_v35 = vadd.f32 %v531_v22, %v463_v2  ;;  %v731_v38 = vmul.f32 %v6345_v15, %v385_v23  ;;  %v352_v39 = vld [vmem:[#allocation2 + $0x4f] sm:$0xff]  ;;  %v189_v42 = vpop.permute.xlu1 %188  ;;  %v184_v43 = vpop.permute.xlu0 %183 }
  0x8e   :  { %v388_v40 = vld [vmem:[#allocation2 + $0x50] sm:$0xff]  ;;  %v695_v44 = vadd.f32 %v663_v34, %v627_v24  ;;  %v464_v50 = vmul.f32 %v6276_v51, %v352_v39  ;;  %319 = vst.msk [vmem:[#allocation2 + $0x90] sm:$0xff] %vm19_vm0, %v189_v42  ;;  %318 = vst.msk [vmem:[#allocation2 + $0x88] sm:$0xff] %vm19_vm0, %v184_v43  ;;  %v666_v58 = vmul.f32 %v6339_v13, %v352_v39 }
  0x8f   :  { %v561_v37 = vadd.f32 %v529_v27, %v461_v26  ;;  %v423_v41 = vld [vmem:[#allocation2 + $0x49] sm:$0xff]  ;;  %v424_v49 = vld [vmem:[#allocation2 + $0x51] sm:$0xff]  ;;  %v532_v54 = vmul.f32 %v6279_v52, %v388_v40  ;;  %v734_v59 = vmul.f32 %v6345_v15, %v388_v40  ;;  %v868_v5 = vmul.f32 %v6342_v14, %v352_v39 }
  0x90   :  { %v599_v55 = vmul.f32 %v6286_v60, %v423_v41  ;;  %v350_v56 = vld [vmem:[#allocation2 + $0x2f] sm:$0xff]  ;;  %v600_v57 = vmul.f32 %v6286_v60, %v424_v49  ;;  %v6390_v61 = vmul.f32 %v6353_v25, %v423_v41  ;;  %v763_v1 = vadd.f32 %v731_v38, %v695_v44 }
  0x91   :  { %v386_v62 = vld [vmem:[#allocation2 + $0x30] sm:$0xff]  ;;  %v564_v3 = vadd.f32 %v532_v54, %v464_v50  ;;  %v6393_v4 = vmul.f32 %v6353_v25, %v424_v49  ;;  %v6397_v6 = vmul.f32 %v6348_v16, %v388_v40  ;;  %v6400_v7 = vmul.f32 %v6360_v28, %v423_v41  ;;  %v199_v12 = vpop.permute.xlu1 %198  ;;  %v194_v17 = vpop.permute.xlu0 %193  ;;  %v353_v38 = vld [vmem:[#allocation2 + $0x67] sm:$0xff] }
  0x92   :  { %v421_v63 = vld [vmem:[#allocation2 + $0x29] sm:$0xff]  ;;  %v422_v0 = vld [vmem:[#allocation2 + $0x31] sm:$0xff]  ;;  %v6403_v8 = vmul.f32 %v6360_v28, %v424_v49  ;;  %v462_v9 = vmul.f32 %v6276_v51, %v350_v56  ;;  %v530_v19 = vmul.f32 %v6279_v52, %v386_v62  ;;  %321 = vst.msk [vmem:[#allocation2 + $0xb0] sm:$0xff] %vm19_vm0, %v199_v12  ;;  %320 = vst.msk [vmem:[#allocation2 + $0xa8] sm:$0xff] %vm19_vm0, %v194_v17 }
  0x93   :  { %v390_v10 = vld [vmem:[#allocation2 + $0x70] sm:$0xff]  ;;  %v632_v18 = vadd.f32 %v600_v57, %v564_v3  ;;  %v597_v20 = vmul.f32 %v6286_v60, %v421_v63  ;;  %v598_v21 = vmul.f32 %v6286_v60, %v422_v0  ;;  %v664_v2 = vmul.f32 %v6339_v13, %v350_v56  ;;  %v389_v44 = vld [vmem:[#allocation2 + $0x68] sm:$0xff] }
  0x94   :  { %v426_v11 = vld [vmem:[#allocation2 + $0x71] sm:$0xff]  ;;  %v732_v22 = vmul.f32 %v6345_v15, %v386_v62  ;;  %v799_v23 = vmul.f32 %v6353_v25, %v421_v63  ;;  %v800_v24 = vmul.f32 %v6353_v25, %v422_v0  ;;  %v562_v26 = vadd.f32 %v530_v19, %v462_v9  ;;  %v425_v49 = vld [vmem:[#allocation2 + $0x69] sm:$0xff] }
  0x95   :  { %v629_v27 = vadd.f32 %v597_v20, %v561_v37  ;;  %v534_v30 = vmul.f32 %v6279_v52, %v390_v10  ;;  %v6417_v34 = vmul.f32 %v6286_v60, %v426_v11  ;;  %v354_v39 = vld [vmem:[#allocation2 + $0x6f] sm:$0xff]  ;;  %v696_v40 = vadd.f32 %v664_v2, %v628_v29  ;;  %v209_v50 = vpop.permute.xlu1 %208  ;;  %v204_v54 = vpop.permute.xlu0 %203 }
  0x96   :  { %v831_v41 = vadd.f32 %v799_v23, %v763_v1  ;;  %v736_v42 = vmul.f32 %v6345_v15, %v390_v10  ;;  %v6421_v43 = vmul.f32 %v6353_v25, %v426_v11  ;;  %v630_v56 = vadd.f32 %v598_v21, %v562_v26  ;;  %323 = vst.msk [vmem:[#allocation2 + $0xd0] sm:$0xff] %vm19_vm0, %v209_v50 }
  0x97   :  { %v697_v37 = vadd.f32 %v6366_v31, %v629_v27  ;;  %v938_v57 = vmul.f32 %v6348_v16, %v390_v10  ;;  %v6426_v62 = vmul.f32 %v6360_v28, %v426_v11  ;;  %322 = vst.msk [vmem:[#allocation2 + $0xc8] sm:$0xff] %vm19_vm0, %v204_v54  ;;  %v764_v29 = vadd.f32 %v732_v22, %v696_v40  ;;  %v428_v40 = vld [vmem:[#allocation2 + $0x91] sm:$0xff] }
  0x98   :  { %v899_v63 = vadd.f32 %v6372_v33, %v831_v41  ;;  %v465_v0 = vmul.f32 %v6276_v51, %v353_v38  ;;  %v466_v1 = vmul.f32 %v6276_v51, %v354_v39  ;;  %v698_v3 = vadd.f32 %v666_v58, %v630_v56 }
  0x99   :  { %v533_v9 = vmul.f32 %v6279_v52, %v389_v44  ;;  %v601_v31 = vmul.f32 %v6286_v60, %v425_v49  ;;  %v631_v10 = vadd.f32 %v599_v55, %v6375_v35  ;;  %v832_v11 = vadd.f32 %v800_v24, %v764_v29  ;;  %v219_v20 = vpop.permute.xlu1 %218  ;;  %v214_v33 = vpop.permute.xlu0 %213  ;;  %v392_v24 = vld [vmem:[#allocation2 + $0x90] sm:$0xff] }
  0x9a   :  { %v6437_v12 = vadd.f32 %v6378_v36, %v899_v63  ;;  %v566_v17 = vadd.f32 %v534_v30, %v466_v1  ;;  %v667_v19 = vmul.f32 %v6339_v13, %v353_v38  ;;  %v766_v21 = vadd.f32 %v734_v59, %v698_v3  ;;  %325 = vst.msk [vmem:[#allocation2 + $0xf0] sm:$0xff] %vm19_vm0, %v219_v20  ;;  %v356_v63 = vld [vmem:[#allocation2 + $0x8f] sm:$0xff] }
  0x9b   :  { %v565_v2 = vadd.f32 %v533_v9, %v465_v0  ;;  %v668_v22 = vmul.f32 %v6339_v13, %v354_v39  ;;  %v735_v58 = vmul.f32 %v6345_v15, %v389_v44  ;;  %324 = vst.msk [vmem:[#allocation2 + $0xe8] sm:$0xff] %vm19_vm0, %v214_v33  ;;  %v900_v35 = vadd.f32 %v868_v5, %v832_v11  ;;  %v427_v0 = vld [vmem:[#allocation2 + $0x89] sm:$0xff] }
  0x9c   :  { %v699_v55 = vadd.f32 %v667_v19, %v631_v10  ;;  %v765_v36 = vadd.f32 %v6369_v32, %v697_v37  ;;  %v803_v23 = vmul.f32 %v6353_v25, %v425_v49  ;;  %v834_v27 = vadd.f32 %v6393_v4, %v766_v21  ;;  %v355_v32 = vld [vmem:[#allocation2 + $0x87] sm:$0xff] }
  0x9d   :  { %v700_v26 = vadd.f32 %v668_v22, %v632_v18  ;;  %v869_v59 = vmul.f32 %v6342_v14, %v353_v38  ;;  %v870_v30 = vmul.f32 %v6342_v14, %v354_v39  ;;  %v6450_v41 = vadd.f32 %v6397_v6, %v900_v35  ;;  %v229_v56 = vpop.permute.xlu1 %228  ;;  %v224_v37 = vpop.permute.xlu0 %223  ;;  %v391_v39 = vld [vmem:[#allocation2 + $0x88] sm:$0xff] }
  0x9e   :  { %v767_v50 = vadd.f32 %v735_v58, %v699_v55  ;;  %v833_v5 = vadd.f32 %v6390_v61, %v765_v36  ;;  %v937_v54 = vmul.f32 %v6348_v16, %v389_v44  ;;  %v1005_v4 = vmul.f32 %v6360_v28, %v425_v49  ;;  %327 = vst.msk [vmem:[#allocation2 + $0x110] sm:$0xff] %vm19_vm0, %v229_v56  ;;  %v357_v56 = vld [vmem:[#allocation2 + $0xa7] sm:$0xff] }
  0x9f   :  { %v768_v29 = vadd.f32 %v736_v42, %v700_v26  ;;  %v902_v18 = vadd.f32 %v870_v30, %v834_v27  ;;  %v536_v38 = vmul.f32 %v6279_v52, %v392_v24  ;;  %326 = vst.msk [vmem:[#allocation2 + $0x108] sm:$0xff] %vm19_vm0, %v224_v37  ;;  %v604_v61 = vmul.f32 %v6286_v60, %v428_v40  ;;  %v394_v27 = vld [vmem:[#allocation2 + $0xb0] sm:$0xff] }
  0xa0   :  { %v901_v6 = vadd.f32 %v869_v59, %v833_v5  ;;  %v738_v44 = vmul.f32 %v6345_v15, %v392_v24  ;;  %v6461_v1 = vmul.f32 %v6353_v25, %v428_v40  ;;  %v940_v49 = vmul.f32 %v6348_v16, %v392_v24 }
  0xa1   :  { %v6463_v42 = vadd.f32 %v938_v57, %v902_v18  ;;  %v1008_v3 = vmul.f32 %v6360_v28, %v428_v40  ;;  %v467_v9 = vmul.f32 %v6276_v51, %v355_v32  ;;  %v468_v11 = vmul.f32 %v6276_v51, %v356_v63  ;;  %v239_v33 = vpop.permute.xlu1 %238  ;;  %v234_v21 = vpop.permute.xlu0 %233 }
  0xa2   :  { %v969_v10 = vadd.f32 %v937_v54, %v901_v6  ;;  %v535_v19 = vmul.f32 %v6279_v52, %v391_v39  ;;  %v603_v20 = vmul.f32 %v6286_v60, %v427_v0  ;;  %v633_v22 = vadd.f32 %v601_v31, %v565_v2  ;;  %329 = vst.msk [vmem:[#allocation2 + $0x130] sm:$0xff] %vm19_vm0, %v239_v33 }
  0xa3   :  { %v634_v58 = vadd.f32 %v6417_v34, %v566_v17  ;;  %v669_v57 = vmul.f32 %v6339_v13, %v355_v32  ;;  %v670_v35 = vmul.f32 %v6339_v13, %v356_v63  ;;  %328 = vst.msk [vmem:[#allocation2 + $0x128] sm:$0xff] %vm19_vm0, %v234_v21  ;;  %v568_v24 = vadd.f32 %v536_v38, %v468_v11  ;;  %v430_v17 = vld [vmem:[#allocation2 + $0xb1] sm:$0xff] }
  0xa4   :  { %v6476_v55 = vadd.f32 %v1005_v4, %v969_v10  ;;  %v567_v36 = vadd.f32 %v535_v19, %v467_v9  ;;  %v737_v26 = vmul.f32 %v6345_v15, %v391_v39  ;;  %v805_v31 = vmul.f32 %v6353_v25, %v427_v0  ;;  %v358_v10 = vld [vmem:[#allocation2 + $0xaf] sm:$0xff] }
  0xa5   :  { %v701_v59 = vadd.f32 %v669_v57, %v633_v22  ;;  %v702_v30 = vadd.f32 %v670_v35, %v634_v58  ;;  %v835_v34 = vadd.f32 %v803_v23, %v767_v50  ;;  %v836_v2 = vadd.f32 %v6421_v43, %v768_v29  ;;  %v249_v37 = vpop.permute.xlu1 %248  ;;  %v244_v18 = vpop.permute.xlu0 %243  ;;  %v393_v23 = vld [vmem:[#allocation2 + $0xa8] sm:$0xff] }
  0xa6   :  { %v871_v40 = vmul.f32 %v6342_v14, %v355_v32  ;;  %v872_v5 = vmul.f32 %v6342_v14, %v356_v63  ;;  %v939_v54 = vmul.f32 %v6348_v16, %v391_v39  ;;  %v1007_v6 = vmul.f32 %v6360_v28, %v427_v0  ;;  %331 = vst.msk [vmem:[#allocation2 + $0x150] sm:$0xff] %vm19_vm0, %v249_v37  ;;  %v429_v63 = vld [vmem:[#allocation2 + $0xa9] sm:$0xff] }
  0xa7   :  { %v769_v4 = vadd.f32 %v737_v26, %v701_v59  ;;  %v770_v38 = vadd.f32 %v738_v44, %v702_v30  ;;  %v538_v9 = vmul.f32 %v6279_v52, %v394_v27  ;;  %330 = vst.msk [vmem:[#allocation2 + $0x148] sm:$0xff] %vm19_vm0, %v244_v18  ;;  %v6489_v32 = vmul.f32 %v6286_v60, %v430_v17 }
  0xa8   :  { %v903_v43 = vadd.f32 %v871_v40, %v835_v34  ;;  %v904_v50 = vadd.f32 %v872_v5, %v836_v2  ;;  %v740_v29 = vmul.f32 %v6345_v15, %v394_v27  ;;  %v6493_v39 = vmul.f32 %v6353_v25, %v430_v17 }
  0xa9   :  { %v6496_v0 = vmul.f32 %v6348_v16, %v394_v27  ;;  %v6499_v44 = vmul.f32 %v6360_v28, %v430_v17  ;;  %v469_v11 = vmul.f32 %v6276_v51, %v357_v56  ;;  %v470_v21 = vmul.f32 %v6276_v51, %v358_v10  ;;  %v259_v58 = vpop.permute.xlu1 %258  ;;  %v254_v57 = vpop.permute.xlu0 %253 }
  0xaa   :  { %v971_v19 = vadd.f32 %v939_v54, %v903_v43  ;;  %v972_v33 = vadd.f32 %v940_v49, %v904_v50  ;;  %v537_v22 = vmul.f32 %v6279_v52, %v393_v23  ;;  %v605_v35 = vmul.f32 %v6286_v60, %v429_v63  ;;  %333 = vst.msk [vmem:[#allocation2 + $0x170] sm:$0xff] %vm19_vm0, %v259_v58  ;;  %v432_v43 = vld [vmem:[#allocation2 + $0xd1] sm:$0xff]  ;;  %v395_v58 = vld [vmem:[#allocation2 + $0xc8] sm:$0xff] }
  0xab   :  { %v635_v26 = vadd.f32 %v603_v20, %v567_v36  ;;  %v636_v59 = vadd.f32 %v604_v61, %v568_v24  ;;  %v671_v27 = vmul.f32 %v6339_v13, %v357_v56  ;;  %332 = vst.msk [vmem:[#allocation2 + $0x168] sm:$0xff] %vm19_vm0, %v254_v57  ;;  %v570_v49 = vadd.f32 %v538_v9, %v470_v21  ;;  %v396_v20 = vld [vmem:[#allocation2 + $0xd0] sm:$0xff]  ;;  %v359_v21 = vld [vmem:[#allocation2 + $0xc7] sm:$0xff] }
  0xac   :  { %v1039_v30 = vadd.f32 %v1007_v6, %v971_v19  ;;  %v1040_v34 = vadd.f32 %v1008_v3, %v972_v33  ;;  %v569_v17 = vadd.f32 %v537_v22, %v469_v11  ;;  %v672_v2 = vmul.f32 %v6339_v13, %v358_v10 }
  0xad   :  { %v703_v40 = vadd.f32 %v671_v27, %v635_v26  ;;  %v739_v5 = vmul.f32 %v6345_v15, %v393_v23  ;;  %v6511_v54 = vmul.f32 %v6353_v25, %v429_v63  ;;  %v269_v24 = vpop.permute.xlu1 %268  ;;  %v264_v37 = vpop.permute.xlu0 %263  ;;  %v837_v3 = vadd.f32 %v805_v31, %v769_v4 }
  0xae   :  { %vm1071_vm2 = vcmp.ge.f32.partialorder %v1039_v30, 0.0  ;;  %vm1072_vm3 = vcmp.ge.f32.partialorder %v1040_v34, 0.0  ;;  %v1103_v61 = vmul.f32 0.01, %v1039_v30  ;;  %v1104_v36 = vmul.f32 0.01, %v1040_v34 }
  0xaf   :  { %v704_v18 = vadd.f32 %v672_v2, %v636_v59  ;;  %v771_v6 = vadd.f32 %v739_v5, %v703_v40  ;;  %v838_v9 = vadd.f32 %v6461_v1, %v770_v38  ;;  %335 = vst.msk [vmem:[#allocation2 + $0x190] sm:$0xff] %vm19_vm0, %v269_v24  ;;  %334 = vst.msk [vmem:[#allocation2 + $0x188] sm:$0xff] %vm19_vm0, %v264_v37  ;;  %v360_v38 = vld [vmem:[#allocation2 + $0xcf] sm:$0xff] }
  0xb0   :  { %v1135_v50 = vsel %vm1071_vm2, %v1039_v30, %v1103_v61  ;;  %v1136_v11 = vsel %vm1072_vm3, %v1040_v34, %v1104_v36  ;;  %v873_v19 = vmul.f32 %v6342_v14, %v357_v56  ;;  %v874_v33 = vmul.f32 %v6342_v14, %v358_v10  ;;  %v431_v59 = vld [vmem:[#allocation2 + $0xc9] sm:$0xff] }
  0xb1   :  { %1168 = vst.msk [vmem:[#allocation3 + $0x68] sm:$0xff] %vm19_vm0, %v1135_v50  ;;  %1169 = vst.msk [vmem:[#allocation3 + $0x70] sm:$0xff] %vm19_vm0, %v1136_v11  ;;  %v772_v22 = vadd.f32 %v740_v29, %v704_v18  ;;  %v941_v31 = vmul.f32 %v6348_v16, %v393_v23  ;;  %v1009_v1 = vmul.f32 %v6360_v28, %v429_v63  ;;  %v279_v27 = vpop.permute.xlu1 %278  ;;  %v274_v30 = vpop.permute.xlu0 %273 }
  0xb2   :  { %v540_v4 = vmul.f32 %v6279_v52, %v396_v20  ;;  %v905_v57 = vadd.f32 %v873_v19, %v837_v3  ;;  %v906_v26 = vadd.f32 %v874_v33, %v838_v9  ;;  %v6524_v56 = vmul.f32 %v6286_v60, %v432_v43  ;;  %337 = vst.msk [vmem:[#allocation2 + $0x1b0] sm:$0xff] %vm19_vm0, %v279_v27 }
  0xb3   :  { %v742_v10 = vmul.f32 %v6345_v15, %v396_v20  ;;  %v6528_v29 = vmul.f32 %v6353_v25, %v432_v43  ;;  %v944_v23 = vmul.f32 %v6348_v16, %v396_v20  ;;  %v6532_v63 = vmul.f32 %v6360_v28, %v432_v43  ;;  %336 = vst.msk [vmem:[#allocation2 + $0x1a8] sm:$0xff] %vm19_vm0, %v274_v30 }
  0xb4   :  { %v471_v34 = vmul.f32 %v6276_v51, %v359_v21  ;;  %v973_v2 = vadd.f32 %v941_v31, %v905_v57  ;;  %v974_v40 = vadd.f32 %v6496_v0, %v906_v26  ;;  %v472_v5 = vmul.f32 %v6276_v51, %v360_v38  ;;  %v434_v57 = vld [vmem:[#allocation2 + $0xf1] sm:$0xff] }
  0xb5   :  { %v539_v61 = vmul.f32 %v6279_v52, %v395_v58  ;;  %v607_v36 = vmul.f32 %v6286_v60, %v431_v59  ;;  %v637_v24 = vadd.f32 %v605_v35, %v569_v17  ;;  %v638_v20 = vadd.f32 %v6489_v32, %v570_v49  ;;  %v289_v50 = vpop.permute.xlu1 %288  ;;  %v284_v11 = vpop.permute.xlu0 %283  ;;  %v398_v35 = vld [vmem:[#allocation2 + $0xf0] sm:$0xff] }
  0xb6   :  { %v673_v37 = vmul.f32 %v6339_v13, %v359_v21  ;;  %v1041_v18 = vadd.f32 %v1009_v1, %v973_v2  ;;  %v1042_v3 = vadd.f32 %v6499_v44, %v974_v40  ;;  %v572_v43 = vadd.f32 %v540_v4, %v472_v5  ;;  %339 = vst.msk [vmem:[#allocation2 + $0x1d0] sm:$0xff] %vm19_vm0, %v289_v50  ;;  %v361_v2 = vld [vmem:[#allocation2 + $0xe7] sm:$0xff] }
  0xb7   :  { %v571_v9 = vadd.f32 %v539_v61, %v471_v34  ;;  %v674_v0 = vmul.f32 %v6339_v13, %v360_v38  ;;  %v741_v33 = vmul.f32 %v6345_v15, %v395_v58  ;;  %v6547_v31 = vmul.f32 %v6353_v25, %v431_v59  ;;  %338 = vst.msk [vmem:[#allocation2 + $0x1c8] sm:$0xff] %vm19_vm0, %v284_v11 }
  0xb8   :  { %v705_v19 = vadd.f32 %v673_v37, %v637_v24  ;;  %vm1073_vm4 = vcmp.ge.f32.partialorder %v1041_v18, 0.0  ;;  %vm1074_vm5 = vcmp.ge.f32.partialorder %v1042_v3, 0.0  ;;  %v1105_v32 = vmul.f32 0.01, %v1041_v18  ;;  %v397_v24 = vld [vmem:[#allocation2 + $0xe8] sm:$0xff] }
  0xb9   :  { %v1106_v44 = vmul.f32 0.01, %v1042_v3  ;;  %v706_v17 = vadd.f32 %v674_v0, %v638_v20  ;;  %v839_v1 = vadd.f32 %v6511_v54, %v771_v6  ;;  %v840_v4 = vadd.f32 %v6493_v39, %v772_v22  ;;  %v299_v40 = vpop.permute.xlu0 %298  ;;  %v6555_v5 = vpop.permute.xlu1 %1368  ;;  %v362_v22 = vld [vmem:[#allocation2 + $0xef] sm:$0xff] }
  0xba   :  { %v773_v49 = vadd.f32 %v741_v33, %v705_v19  ;;  %v1137_v26 = vsel %vm1073_vm4, %v1041_v18, %v1105_v32  ;;  %v875_v30 = vmul.f32 %v6342_v14, %v359_v21  ;;  %v876_v34 = vmul.f32 %v6342_v14, %v360_v38  ;;  %341 = vst.msk [vmem:[#allocation2 + $0x1f0] sm:$0xff] %vm19_vm0, %v299_v40  ;;  %v433_v18 = vld [vmem:[#allocation2 + $0xe9] sm:$0xff] }
  0xbb   :  { %v1138_v27 = vsel %vm1074_vm5, %v1042_v3, %v1106_v44  ;;  %1170 = vst.msk [vmem:[#allocation3 + $0x88] sm:$0xff] %vm19_vm0, %v1137_v26  ;;  %v774_v61 = vadd.f32 %v742_v10, %v706_v17  ;;  %v943_v54 = vmul.f32 %v6348_v16, %v395_v58  ;;  %v1011_v39 = vmul.f32 %v6360_v28, %v431_v59 }
  0xbc   :  { %1171 = vst.msk [vmem:[#allocation3 + $0x90] sm:$0xff] %vm19_vm0, %v1138_v27  ;;  %v542_v6 = vmul.f32 %v6279_v52, %v398_v35  ;;  %v907_v21 = vadd.f32 %v875_v30, %v839_v1  ;;  %v908_v38 = vadd.f32 %v876_v34, %v840_v4  ;;  %v6564_v20 = vmul.f32 %v6286_v60, %v434_v57 }
  0xbd   :  { %v744_v37 = vmul.f32 %v6345_v15, %v398_v35  ;;  %v6568_v10 = vmul.f32 %v6353_v25, %v434_v57  ;;  %v946_v58 = vmul.f32 %v6348_v16, %v398_v35  ;;  %v6572_v59 = vmul.f32 %v6360_v28, %v434_v57  ;;  %v309_v33 = vpop.permute.xlu0 %308  ;;  %v6577_v32 = vpop.permute.xlu1 %1465 }
  0xbe   :  { %v473_v3 = vmul.f32 %v6276_v51, %v361_v2  ;;  %v975_v50 = vadd.f32 %v943_v54, %v907_v21  ;;  %v976_v11 = vadd.f32 %v944_v23, %v908_v38  ;;  %v474_v0 = vmul.f32 %v6276_v51, %v362_v22  ;;  %343 = vst.msk [vmem:[#allocation2 + $0x210] sm:$0xff] %vm19_vm0, %v309_v33  ;;  %v400_v54 = vld [vmem:[#allocation2 + $0x110] sm:$0xff] }
  0xbf   :  { %v541_v19 = vmul.f32 %v6279_v52, %v397_v24  ;;  %v609_v44 = vmul.f32 %v6286_v60, %v433_v18  ;;  %v639_v17 = vadd.f32 %v607_v36, %v571_v9  ;;  %v640_v1 = vadd.f32 %v6524_v56, %v572_v43 }
  0xc0   :  { %v675_v35 = vmul.f32 %v6339_v13, %v361_v2  ;;  %v1043_v4 = vadd.f32 %v1011_v39, %v975_v50  ;;  %v1044_v57 = vadd.f32 %v6532_v63, %v976_v11  ;;  %v574_v26 = vadd.f32 %v542_v6, %v474_v0  ;;  %v436_v6 = vld [vmem:[#allocation2 + $0x111] sm:$0xff]  ;;  %v363_v0 = vld [vmem:[#allocation2 + $0x107] sm:$0xff] }
  0xc1   :  { %v573_v23 = vadd.f32 %v541_v19, %v473_v3  ;;  %v676_v27 = vmul.f32 %v6339_v13, %v362_v22  ;;  %v743_v34 = vmul.f32 %v6345_v15, %v397_v24  ;;  %v811_v40 = vmul.f32 %v6353_v25, %v433_v18  ;;  %v294_v9 = vpop.permute.xlu1 %293 }
  0xc2   :  { %v707_v30 = vadd.f32 %v675_v35, %v639_v17  ;;  %vm1075_vm6 = vcmp.ge.f32.partialorder %v1043_v4, 0.0  ;;  %vm1076_vm7 = vcmp.ge.f32.partialorder %v1044_v57, 0.0  ;;  %v1107_v56 = vmul.f32 0.01, %v1043_v4  ;;  %340 = vst.msk [vmem:[#allocation2 + $0x1e8] sm:$0xff] %vm19_vm0, %v294_v9  ;;  %v435_v35 = vld [vmem:[#allocation2 + $0x109] sm:$0xff] }
  0xc3   :  { %v1108_v36 = vmul.f32 0.01, %v1044_v57  ;;  %v708_v43 = vadd.f32 %v676_v27, %v640_v1  ;;  %v841_v39 = vadd.f32 %v6547_v31, %v773_v49  ;;  %v842_v63 = vadd.f32 %v6528_v29, %v774_v61  ;;  %v364_v49 = vld [vmem:[#allocation2 + $0x10f] sm:$0xff] }
  0xc4   :  { %v775_v21 = vadd.f32 %v743_v34, %v707_v30  ;;  %v1139_v38 = vsel %vm1075_vm6, %v1043_v4, %v1107_v56  ;;  %v877_v50 = vmul.f32 %v6342_v14, %v361_v2  ;;  %v878_v11 = vmul.f32 %v6342_v14, %v362_v22  ;;  %v399_v61 = vld [vmem:[#allocation2 + $0x108] sm:$0xff] }
  0xc5   :  { %v1140_v3 = vsel %vm1076_vm7, %v1044_v57, %v1108_v36  ;;  %1172 = vst.msk [vmem:[#allocation3 + $0xa8] sm:$0xff] %vm19_vm0, %v1139_v38  ;;  %v776_v19 = vadd.f32 %v744_v37, %v708_v43  ;;  %v945_v33 = vmul.f32 %v6348_v16, %v397_v24  ;;  %v1013_v31 = vmul.f32 %v6360_v28, %v433_v18  ;;  %v304_v4 = vpop.permute.xlu1 %303 }
  0xc6   :  { %1173 = vst.msk [vmem:[#allocation3 + $0xb0] sm:$0xff] %vm19_vm0, %v1140_v3  ;;  %v544_v29 = vmul.f32 %v6279_v52, %v400_v54  ;;  %v909_v17 = vadd.f32 %v877_v50, %v841_v39  ;;  %v910_v1 = vadd.f32 %v878_v11, %v842_v63  ;;  %v6598_v2 = vmul.f32 %v6286_v60, %v436_v6 }
  0xc7   :  { %v746_v22 = vmul.f32 %v6345_v15, %v400_v54  ;;  %v6602_v57 = vmul.f32 %v6353_v25, %v436_v6  ;;  %v948_v24 = vmul.f32 %v6348_v16, %v400_v54  ;;  %v1016_v37 = vmul.f32 %v6360_v28, %v436_v6  ;;  %342 = vst.msk [vmem:[#allocation2 + $0x208] sm:$0xff] %vm19_vm0, %v304_v4 }
  0xc8   :  { %v475_v18 = vmul.f32 %v6276_v51, %v363_v0  ;;  %v977_v27 = vadd.f32 %v945_v33, %v909_v17  ;;  %v978_v30 = vadd.f32 %v946_v58, %v910_v1  ;;  %v476_v34 = vmul.f32 %v6276_v51, %v364_v49  ;;  %v402_v33 = vld [vmem:[#allocation2 + $0x130] sm:$0xff] }
  0xc9   :  { %v543_v56 = vmul.f32 %v6279_v52, %v399_v61  ;;  %v611_v36 = vmul.f32 %v6286_v60, %v435_v35  ;;  %v641_v9 = vadd.f32 %v609_v44, %v573_v23  ;;  %v642_v43 = vadd.f32 %v6564_v20, %v574_v26 }
  0xca   :  { %v677_v39 = vmul.f32 %v6339_v13, %v363_v0  ;;  %v1045_v54 = vadd.f32 %v1013_v31, %v977_v27  ;;  %v1046_v63 = vadd.f32 %v6572_v59, %v978_v30  ;;  %v576_v38 = vadd.f32 %v544_v29, %v476_v34  ;;  %v438_v59 = vld [vmem:[#allocation2 + $0x131] sm:$0xff]  ;;  %v365_v27 = vld [vmem:[#allocation2 + $0x127] sm:$0xff] }
  0xcb   :  { %v575_v6 = vadd.f32 %v543_v56, %v475_v18  ;;  %v678_v3 = vmul.f32 %v6339_v13, %v364_v49  ;;  %v745_v58 = vmul.f32 %v6345_v15, %v399_v61  ;;  %v813_v11 = vmul.f32 %v6353_v25, %v435_v35 }
  0xcc   :  { %v709_v50 = vadd.f32 %v677_v39, %v641_v9  ;;  %vm1077_vm8 = vcmp.ge.f32.partialorder %v1045_v54, 0.0  ;;  %vm1078_vm9 = vcmp.ge.f32.partialorder %v1046_v63, 0.0  ;;  %v1109_v44 = vmul.f32 0.01, %v1045_v54 }
  0xcd   :  { %v1110_v23 = vmul.f32 0.01, %v1046_v63  ;;  %v710_v20 = vadd.f32 %v678_v3, %v642_v43  ;;  %v843_v17 = vadd.f32 %v811_v40, %v775_v21  ;;  %v844_v31 = vadd.f32 %v6568_v10, %v776_v19  ;;  %v366_v10 = vld [vmem:[#allocation2 + $0x12f] sm:$0xff] }
  0xce   :  { %v777_v26 = vadd.f32 %v745_v58, %v709_v50  ;;  %v1141_v1 = vsel %vm1077_vm8, %v1045_v54, %v1109_v44  ;;  %v879_v4 = vmul.f32 %v6342_v14, %v363_v0  ;;  %v880_v18 = vmul.f32 %v6342_v14, %v364_v49  ;;  %v401_v21 = vld [vmem:[#allocation2 + $0x128] sm:$0xff] }
  0xcf   :  { %v1142_v29 = vsel %vm1078_vm9, %v1046_v63, %v1110_v23  ;;  %1174 = vst.msk [vmem:[#allocation3 + $0xc8] sm:$0xff] %vm19_vm0, %v1141_v1  ;;  %v778_v30 = vadd.f32 %v746_v22, %v710_v20  ;;  %v947_v34 = vmul.f32 %v6348_v16, %v399_v61  ;;  %v1015_v56 = vmul.f32 %v6360_v28, %v435_v35  ;;  %v437_v43 = vld [vmem:[#allocation2 + $0x129] sm:$0xff] }
  0xd0   :  { %1175 = vst.msk [vmem:[#allocation3 + $0xd0] sm:$0xff] %vm19_vm0, %v1142_v29  ;;  %v546_v40 = vmul.f32 %v6279_v52, %v402_v33  ;;  %v911_v19 = vadd.f32 %v879_v4, %v843_v17  ;;  %v912_v9 = vadd.f32 %v880_v18, %v844_v31  ;;  %v614_v0 = vmul.f32 %v6286_v60, %v438_v59  ;;  %v404_v18 = vld [vmem:[#allocation2 + $0x150] sm:$0xff] }
  0xd1   :  { %v748_v49 = vmul.f32 %v6345_v15, %v402_v33  ;;  %v6628_v39 = vmul.f32 %v6353_v25, %v438_v59  ;;  %v950_v22 = vmul.f32 %v6348_v16, %v402_v33  ;;  %v1018_v61 = vmul.f32 %v6360_v28, %v438_v59 }
  0xd2   :  { %v477_v35 = vmul.f32 %v6276_v51, %v365_v27  ;;  %v979_v54 = vadd.f32 %v947_v34, %v911_v19  ;;  %v980_v63 = vadd.f32 %v948_v24, %v912_v9  ;;  %v478_v3 = vmul.f32 %v6276_v51, %v366_v10 }
  0xd3   :  { %v545_v50 = vmul.f32 %v6279_v52, %v401_v21  ;;  %v613_v58 = vmul.f32 %v6286_v60, %v437_v43  ;;  %v643_v44 = vadd.f32 %v611_v36, %v575_v6  ;;  %v644_v23 = vadd.f32 %v6598_v2, %v576_v38 }
  0xd4   :  { %v679_v20 = vmul.f32 %v6339_v13, %v365_v27  ;;  %v1047_v17 = vadd.f32 %v1015_v56, %v979_v54  ;;  %v1048_v31 = vadd.f32 %v1016_v37, %v980_v63  ;;  %v578_v1 = vadd.f32 %v546_v40, %v478_v3  ;;  %v440_v37 = vld [vmem:[#allocation2 + $0x151] sm:$0xff]  ;;  %v367_v54 = vld [vmem:[#allocation2 + $0x147] sm:$0xff] }
  0xd5   :  { %v577_v33 = vadd.f32 %v545_v50, %v477_v35  ;;  %v680_v59 = vmul.f32 %v6339_v13, %v366_v10  ;;  %v747_v24 = vmul.f32 %v6345_v15, %v401_v21  ;;  %v815_v4 = vmul.f32 %v6353_v25, %v437_v43 }
  0xd6   :  { %v711_v29 = vadd.f32 %v679_v20, %v643_v44  ;;  %vm1079_vm10 = vcmp.ge.f32.partialorder %v1047_v17, 0.0  ;;  %vm1080_vm11 = vcmp.ge.f32.partialorder %v1048_v31, 0.0  ;;  %v1111_v34 = vmul.f32 0.01, %v1047_v17 }
  0xd7   :  { %v1112_v36 = vmul.f32 0.01, %v1048_v31  ;;  %v712_v6 = vadd.f32 %v680_v59, %v644_v23  ;;  %v845_v38 = vadd.f32 %v813_v11, %v777_v26  ;;  %v846_v56 = vadd.f32 %v6602_v57, %v778_v30  ;;  %v368_v57 = vld [vmem:[#allocation2 + $0x14f] sm:$0xff] }
  0xd8   :  { %v779_v2 = vadd.f32 %v747_v24, %v711_v29  ;;  %v1143_v19 = vsel %vm1079_vm10, %v1047_v17, %v1111_v34  ;;  %v881_v9 = vmul.f32 %v6342_v14, %v365_v27  ;;  %v882_v35 = vmul.f32 %v6342_v14, %v366_v10  ;;  %v403_v26 = vld [vmem:[#allocation2 + $0x148] sm:$0xff] }
  0xd9   :  { %v1144_v40 = vsel %vm1080_vm11, %v1048_v31, %v1112_v36  ;;  %1176 = vst.msk [vmem:[#allocation3 + $0xe8] sm:$0xff] %vm19_vm0, %v1143_v19  ;;  %v780_v63 = vadd.f32 %v748_v49, %v712_v6  ;;  %v949_v3 = vmul.f32 %v6348_v16, %v401_v21  ;;  %v1017_v50 = vmul.f32 %v6360_v28, %v437_v43  ;;  %v439_v23 = vld [vmem:[#allocation2 + $0x149] sm:$0xff] }
  0xda   :  { %1177 = vst.msk [vmem:[#allocation3 + $0xf0] sm:$0xff] %vm19_vm0, %v1144_v40  ;;  %v548_v11 = vmul.f32 %v6279_v52, %v404_v18  ;;  %v913_v30 = vadd.f32 %v881_v9, %v845_v38  ;;  %v914_v44 = vadd.f32 %v882_v35, %v846_v56  ;;  %v616_v27 = vmul.f32 %v6286_v60, %v440_v37  ;;  %v406_v35 = vld [vmem:[#allocation2 + $0x170] sm:$0xff] }
  0xdb   :  { %v750_v10 = vmul.f32 %v6345_v15, %v404_v18  ;;  %v6652_v20 = vmul.f32 %v6353_v25, %v440_v37  ;;  %v952_v49 = vmul.f32 %v6348_v16, %v404_v18  ;;  %v1020_v21 = vmul.f32 %v6360_v28, %v440_v37 }
  0xdc   :  { %v479_v43 = vmul.f32 %v6276_v51, %v367_v54  ;;  %v981_v17 = vadd.f32 %v949_v3, %v913_v30  ;;  %v982_v31 = vadd.f32 %v950_v22, %v914_v44  ;;  %v480_v59 = vmul.f32 %v6276_v51, %v368_v57 }
  0xdd   :  { %v547_v29 = vmul.f32 %v6279_v52, %v403_v26  ;;  %v615_v24 = vmul.f32 %v6286_v60, %v439_v23  ;;  %v645_v34 = vadd.f32 %v613_v58, %v577_v33  ;;  %v646_v36 = vadd.f32 %v614_v0, %v578_v1 }
  0xde   :  { %v681_v6 = vmul.f32 %v6339_v13, %v367_v54  ;;  %v1049_v38 = vadd.f32 %v1017_v50, %v981_v17  ;;  %v1050_v56 = vadd.f32 %v1018_v61, %v982_v31  ;;  %v580_v18 = vadd.f32 %v548_v11, %v480_v59  ;;  %v442_v61 = vld [vmem:[#allocation2 + $0x171] sm:$0xff]  ;;  %v369_v17 = vld [vmem:[#allocation2 + $0x167] sm:$0xff] }
  0xdf   :  { %v579_v19 = vadd.f32 %v547_v29, %v479_v43  ;;  %v682_v37 = vmul.f32 %v6339_v13, %v368_v57  ;;  %v749_v9 = vmul.f32 %v6345_v15, %v403_v26  ;;  %v817_v22 = vmul.f32 %v6353_v25, %v439_v23 }
  0xe0   :  { %v713_v40 = vadd.f32 %v681_v6, %v645_v34  ;;  %vm1081_vm12 = vcmp.ge.f32.partialorder %v1049_v38, 0.0  ;;  %vm1082_vm13 = vcmp.ge.f32.partialorder %v1050_v56, 0.0  ;;  %v1113_v3 = vmul.f32 0.01, %v1049_v38 }
  0xe1   :  { %v1114_v30 = vmul.f32 0.01, %v1050_v56  ;;  %v714_v58 = vadd.f32 %v682_v37, %v646_v36  ;;  %v847_v33 = vadd.f32 %v815_v4, %v779_v2  ;;  %v848_v1 = vadd.f32 %v6628_v39, %v780_v63  ;;  %v370_v39 = vld [vmem:[#allocation2 + $0x16f] sm:$0xff] }
  0xe2   :  { %v781_v0 = vadd.f32 %v749_v9, %v713_v40  ;;  %v1145_v50 = vsel %vm1081_vm12, %v1049_v38, %v1113_v3  ;;  %v883_v44 = vmul.f32 %v6342_v14, %v367_v54  ;;  %v884_v43 = vmul.f32 %v6342_v14, %v368_v57  ;;  %v405_v2 = vld [vmem:[#allocation2 + $0x168] sm:$0xff] }
  0xe3   :  { %v1146_v11 = vsel %vm1082_vm13, %v1050_v56, %v1114_v30  ;;  %1178 = vst.msk [vmem:[#allocation3 + $0x108] sm:$0xff] %vm19_vm0, %v1145_v50  ;;  %v782_v31 = vadd.f32 %v750_v10, %v714_v58  ;;  %v951_v59 = vmul.f32 %v6348_v16, %v403_v26  ;;  %v1019_v29 = vmul.f32 %v6360_v28, %v439_v23  ;;  %v441_v36 = vld [vmem:[#allocation2 + $0x169] sm:$0xff] }
  0xe4   :  { %1179 = vst.msk [vmem:[#allocation3 + $0x110] sm:$0xff] %vm19_vm0, %v1146_v11  ;;  %v550_v4 = vmul.f32 %v6279_v52, %v406_v35  ;;  %v915_v63 = vadd.f32 %v883_v44, %v847_v33  ;;  %v916_v34 = vadd.f32 %v884_v43, %v848_v1  ;;  %v6673_v54 = vmul.f32 %v6286_v60, %v442_v61 }
  0xe5   :  { %v752_v57 = vmul.f32 %v6345_v15, %v406_v35  ;;  %v6677_v6 = vmul.f32 %v6353_v25, %v442_v61  ;;  %v954_v10 = vmul.f32 %v6348_v16, %v406_v35  ;;  %v1022_v26 = vmul.f32 %v6360_v28, %v442_v61 }
  0xe6   :  { %v481_v23 = vmul.f32 %v6276_v51, %v369_v17  ;;  %v983_v38 = vadd.f32 %v951_v59, %v915_v63  ;;  %v984_v56 = vadd.f32 %v952_v49, %v916_v34  ;;  %v482_v37 = vmul.f32 %v6276_v51, %v370_v39  ;;  %v408_v59 = vld [vmem:[#allocation2 + $0x190] sm:$0xff] }
  0xe7   :  { %v549_v40 = vmul.f32 %v6279_v52, %v405_v2  ;;  %v6685_v9 = vmul.f32 %v6286_v60, %v441_v36  ;;  %v647_v3 = vadd.f32 %v615_v24, %v579_v19  ;;  %v648_v30 = vadd.f32 %v616_v27, %v580_v18 }
  0xe8   :  { %v683_v58 = vmul.f32 %v6339_v13, %v369_v17  ;;  %v1051_v33 = vadd.f32 %v1019_v29, %v983_v38  ;;  %v1052_v1 = vadd.f32 %v1020_v21, %v984_v56  ;;  %v6688_v50 = vadd.f32 %v550_v4, %v482_v37 }
  0xe9   :  { %v581_v35 = vadd.f32 %v549_v40, %v481_v23  ;;  %v684_v61 = vmul.f32 %v6339_v13, %v370_v39  ;;  %v751_v49 = vmul.f32 %v6345_v15, %v405_v2  ;;  %v6693_v44 = vmul.f32 %v6353_v25, %v441_v36  ;;  %v444_v23 = vld [vmem:[#allocation2 + $0x191] sm:$0xff] }
  0xea   :  { %v715_v11 = vadd.f32 %v683_v58, %v647_v3  ;;  %vm1083_vm14 = vcmp.ge.f32.partialorder %v1051_v33, 0.0  ;;  %vm1084_vm15 = vcmp.ge.f32.partialorder %v1052_v1, 0.0  ;;  %v1115_v43 = vmul.f32 0.01, %v1051_v33 }
  0xeb   :  { %v1116_v24 = vmul.f32 0.01, %v1052_v1  ;;  %v716_v27 = vadd.f32 %v684_v61, %v648_v30  ;;  %v849_v18 = vadd.f32 %v817_v22, %v781_v0  ;;  %v850_v21 = vadd.f32 %v6652_v20, %v782_v31  ;;  %v443_v30 = vld [vmem:[#allocation2 + $0x189] sm:$0xff] }
  0xec   :  { %v6695_v19 = vadd.f32 %v751_v49, %v715_v11  ;;  %v1147_v29 = vsel %vm1083_vm14, %v1051_v33, %v1115_v43  ;;  %v885_v63 = vmul.f32 %v6342_v14, %v369_v17  ;;  %v886_v34 = vmul.f32 %v6342_v14, %v370_v39 }
  0xed   :  { %v1148_v4 = vsel %vm1084_vm15, %v1052_v1, %v1116_v24  ;;  %1180 = vst.msk [vmem:[#allocation3 + $0x128] sm:$0xff] %vm19_vm0, %v1147_v29  ;;  %v784_v38 = vadd.f32 %v752_v57, %v716_v27  ;;  %v953_v56 = vmul.f32 %v6348_v16, %v405_v2  ;;  %v1021_v37 = vmul.f32 %v6360_v28, %v441_v36  ;;  %v371_v2 = vld [vmem:[#allocation2 + $0x187] sm:$0xff] }
  0xee   :  { %1181 = vst.msk [vmem:[#allocation3 + $0x130] sm:$0xff] %vm19_vm0, %v1148_v4  ;;  %v1035_v20 = vadd.f32 %v6400_v7, %v6437_v12  ;;  %v917_v22 = vadd.f32 %v885_v63, %v849_v18  ;;  %v918_v0 = vadd.f32 %v886_v34, %v850_v21  ;;  %v1036_v17 = vadd.f32 %v6403_v8, %v6450_v41  ;;  %v5872_v7 = vld [vmem:[%s10261_s2 + $0x40] sm:$0xff]   ;;  %v372_v8 = vld [vmem:[#allocation2 + $0x18f] sm:$0xff] }
  0xef   :  { %v552_v31 = vmul.f32 %v6279_v52, %v408_v59  ;;  %v6710_v40 = vmul.f32 %v6286_v60, %v444_v23  ;;  %v6713_v57 = vmul.f32 %v6345_v15, %v408_v59  ;;  %v407_v41 = vld [vmem:[#allocation2 + $0x188] sm:$0xff]  ;;  %v6719_v33 = vmul.f32 %v6353_v25, %v444_v23  ;;  %5486 = vmatprep.subr.bf16.mxu0 %v5872_v7 }
  0xf0   :  { %vm1067_vm1 = vcmp.ge.f32.partialorder %v1035_v20, 0.0  ;;  %v1099_v39 = vmul.f32 0.01, %v1035_v20  ;;  %v985_v12 = vadd.f32 %v953_v56, %v917_v22  ;;  %v986_v36 = vadd.f32 %v954_v10, %v918_v0 }
  0xf1   :  { %vm1068_vm2 = vcmp.ge.f32.partialorder %v1036_v17, 0.0  ;;  %v1100_v3 = vmul.f32 0.01, %v1036_v17  ;;  %v6722_v1 = vmul.f32 %v6348_v16, %v408_v59  ;;  %v6725_v61 = vmul.f32 %v6360_v28, %v444_v23  ;;  %v5874_v59 = vld [vmem:[%s10261_s2 + $0x48] sm:$0xff]  }
  0xf2   :  { %v1131_v58 = vsel %vm1067_vm1, %v1035_v20, %v1099_v39  ;;  %v1053_v11 = vadd.f32 %v1021_v37, %v985_v12  ;;  %v1054_v49 = vadd.f32 %v1022_v26, %v986_v36  ;;  %v483_v10 = vmul.f32 %v6276_v51, %v371_v2  ;;  %v5873_v26 = vld [vmem:[%s10261_s2] sm:$0xff]  }
  0xf3   :  { %v1132_v43 = vsel %vm1068_vm2, %v1036_v17, %v1100_v3  ;;  %1164 = vst.msk [vmem:[#allocation3 + $0x28] sm:$0xff] %vm19_vm0, %v1131_v58  ;;  %v484_v24 = vmul.f32 %v6276_v51, %v372_v8  ;;  %v551_v27 = vmul.f32 %v6279_v52, %v407_v41  ;;  %v6733_v18 = vmul.f32 %v6286_v60, %v443_v30  ;;  %v5875_v17 = vld [vmem:[%s10261_s2 + $0x8] sm:$0xff]   ;;  %v410_v3 = vld [vmem:[#allocation2 + $0x1b0] sm:$0xff] }
  0xf4   :  { %1165 = vst.msk [vmem:[#allocation3 + $0x30] sm:$0xff] %vm19_vm0, %v1132_v43  ;;  %v649_v21 = vadd.f32 %v6685_v9, %v581_v35  ;;  %vm1085_vm3 = vcmp.ge.f32.partialorder %v1053_v11, 0.0  ;;  %vm1086_vm4 = vcmp.ge.f32.partialorder %v1054_v49, 0.0  ;;  %v1117_v29 = vmul.f32 0.01, %v1053_v11  ;;  %5487 = vmatpush3.bf16.msra.mxu0 %v5873_v26 }
  0xf5   :  { %v1118_v4 = vmul.f32 0.01, %v1054_v49  ;;  %v6742_v63 = vadd.f32 %v551_v27, %v483_v10  ;;  %v6744_v34 = vadd.f32 %v552_v31, %v484_v24  ;;  %v650_v23 = vadd.f32 %v6673_v54, %v6688_v50  ;;  %5488 = vmatprep.subr.bf16.mxu0 %v5874_v59  ;;  %v5876_v31 = vld [vmem:[%s10261_s2 + $0x50] sm:$0xff]  }
  0xf6   :  { %v685_v9 = vmul.f32 %v6339_v13, %v371_v2  ;;  %v1149_v35 = vsel %vm1085_vm3, %v1053_v11, %v1117_v29  ;;  %v686_v37 = vmul.f32 %v6339_v13, %v372_v8  ;;  %v753_v20 = vmul.f32 %v6345_v15, %v407_v41  ;;  %v446_v11 = vld [vmem:[#allocation2 + $0x1b1] sm:$0xff] }
  0xf7   :  { %v1150_v56 = vsel %vm1086_vm4, %v1054_v49, %v1118_v4  ;;  %1182 = vst.msk [vmem:[#allocation3 + $0x148] sm:$0xff] %vm19_vm0, %v1149_v35  ;;  %v6754_v0 = vmul.f32 %v6353_v25, %v443_v30  ;;  %v851_v54 = vadd.f32 %v6693_v44, %v6695_v19  ;;  %v852_v50 = vadd.f32 %v6677_v6, %v784_v38 }
  0xf8   :  { %1183 = vst.msk [vmem:[#allocation3 + $0x150] sm:$0xff] %vm19_vm0, %v1150_v56  ;;  %v717_v22 = vadd.f32 %v685_v9, %v649_v21  ;;  %v718_v39 = vadd.f32 %v686_v37, %v650_v23  ;;  %v887_v7 = vmul.f32 %v6342_v14, %v371_v2  ;;  %v888_v12 = vmul.f32 %v6342_v14, %v372_v8  ;;  %v5877_v21 = vld [vmem:[%s10261_s2 + $0x10] sm:$0xff]   ;;  %v373_v23 = vld [vmem:[#allocation2 + $0x1a7] sm:$0xff] }
  0xf9   :  { %v955_v36 = vmul.f32 %v6348_v16, %v407_v41  ;;  %v1023_v6 = vmul.f32 %v6360_v28, %v443_v30  ;;  %v1038_v19 = vadd.f32 %v6426_v62, %v6463_v42  ;;  %vm1069_vm5 = vcmp.ge.f32.partialorder %v6476_v55, 0.0  ;;  %5489 = vmatpush3.bf16.msra.mxu0 %v5875_v17  ;;  %v374_v9 = vld [vmem:[#allocation2 + $0x1af] sm:$0xff] }
  0xfa   :  { %v1198_v58 = vld [vmem:[#allocation3 + $0x27] sm:$0xff]  ;;  %v6768_v44 = vadd.f32 %v753_v20, %v717_v22  ;;  %v6775_v8 = vadd.f32 %v6713_v57, %v718_v39  ;;  %v919_v41 = vadd.f32 %v887_v7, %v851_v54  ;;  %v920_v10 = vadd.f32 %v888_v12, %v852_v50  ;;  %5490 = vmatprep.subr.bf16.mxu0 %v5876_v31  ;;  %v5878_v57 = vld [vmem:[%s10261_s2 + $0x58] sm:$0xff]  }
  0xfb   :  { %v1234_v38 = vld [vmem:[#allocation3 + $0x28] sm:$0xff]  ;;  %v1271_v2 = vld [vmem:[#allocation3 + $0x31] sm:$0xff]  ;;  %v1101_v24 = vmul.f32 0.01, %v6476_v55  ;;  %vm1070_vm6 = vcmp.ge.f32.partialorder %v1038_v19, 0.0  ;;  %v6797_v56 = vmul.f32 %v6286_v60, %v446_v11  ;;  %v756_v20 = vmul.f32 %v6345_v15, %v410_v3 }
  0xfc   :  { %v1270_v49 = vld [vmem:[#allocation3 + $0x29] sm:$0xff]  ;;  %v1102_v62 = vmul.f32 0.01, %v1038_v19  ;;  %v987_v26 = vadd.f32 %v955_v36, %v919_v41  ;;  %v988_v59 = vadd.f32 %v6722_v1, %v920_v10  ;;  %v554_v1 = vmul.f32 %v6279_v52, %v410_v3 }
  0xfd   :  { %v1199_v43 = vld [vmem:[#allocation3 + $0x2f] sm:$0xff]  ;;  %v6778_v30 = vpack.c.bf16 %v1271_v2, %v1270_v49  ;;  %v1133_v29 = vsel %vm1069_vm5, %v6476_v55, %v1101_v24  ;;  %v6804_v22 = vmul.f32 %v6353_v25, %v446_v11  ;;  %5491 = vmatpush3.bf16.msra.mxu0 %v5877_v21  ;;  %v6807_v17 = vmul.f32 %v6348_v16, %v410_v3  ;;  %v5881_v24 = vld [vmem:[%s10261_s2 + $0x20] sm:$0xff]  }
  0xfe   :  { %v1305_v27 = vpack.c.bf16 %v1199_v43, %v1198_v58  ;;  %v1235_v42 = vld [vmem:[#allocation3 + $0x30] sm:$0xff]  ;;  %v1134_v35 = vsel %vm1070_vm6, %v1038_v19, %v1102_v62  ;;  %1166 = vst.msk [vmem:[#allocation3 + $0x48] sm:$0xff] %vm19_vm0, %v1133_v29  ;;  %v1055_v55 = vadd.f32 %v1023_v6, %v987_v26  ;;  %v1056_v37 = vadd.f32 %v6725_v61, %v988_v59  ;;  %v409_v54 = vld [vmem:[#allocation2 + $0x1a8] sm:$0xff]  ;;  %v5879_v19 = vld [vmem:[%s10261_s2 + $0x18] sm:$0xff]  }
  0xff   :  { %v1337_v4 = vpack.c.bf16 %v1235_v42, %v1234_v38  ;;  %1631 = vrot.lane.b32.xlu0 %v6778_v30, %s5948_s23  ;;  %1167 = vst.msk [vmem:[#allocation3 + $0x50] sm:$0xff] %vm19_vm0, %v1134_v35  ;;  %v445_v50 = vld [vmem:[#allocation2 + $0x1a9] sm:$0xff]  ;;  %v6810_v31 = vmul.f32 %v6360_v28, %v446_v11  ;;  %v485_v61 = vmul.f32 %v6276_v51, %v373_v23  ;;  %v5880_v38 = vld [vmem:[%s10261_s2 + $0x60] sm:$0xff]   ;;  %vm10266_vm9 = vcmask 523520  }
 0x100   :  { %1547 = vrot.lane.b32.xlu1 %v1305_v27, %s5950_s0  ;;  %1321 = vst.msk [vmem:[#allocation4 + $0x18] sm:$0xff] %vm19_vm0, %v1305_v27  ;;  %v486_v39 = vmul.f32 %v6276_v51, %v374_v9  ;;  %5492 = vmatprep.subr.bf16.mxu0 %v5878_v57  ;;  %vm1087_vm7 = vcmp.ge.f32.partialorder %v1055_v55, 0.0  ;;  %vm1088_vm8 = vcmp.ge.f32.partialorder %v1056_v37, 0.0  ;;  %v1119_v7 = vmul.f32 0.01, %v1055_v55  ;;  %v412_v21 = vld [vmem:[#allocation2 + $0x1d0] sm:$0xff] }
 0x101   :  { %1613 = vst.msk [vmem:[#allocation4 + $0x8] sm:$0xff] %vm19_vm0, %v1337_v4  ;;  %v1120_v12 = vmul.f32 0.01, %v1056_v37  ;;  %v553_v36 = vmul.f32 %v6279_v52, %v409_v54  ;;  %v6819_v3 = vmul.f32 %v6286_v60, %v445_v50  ;;  %v651_v6 = vadd.f32 %v6733_v18, %v6742_v63  ;;  %5493 = vmatpush3.bf16.msra.mxu0 %v5879_v19  ;;  %v448_v57 = vld [vmem:[#allocation2 + $0x1d1] sm:$0xff] }
 0x102   :  { %v6816_v58 = vadd.f32 %v554_v1, %v486_v39  ;;  %v1151_v11 = vsel %vm1087_vm7, %v1055_v55, %v1119_v7  ;;  %v652_v2 = vadd.f32 %v6710_v40, %v6744_v34  ;;  %v687_v43 = vmul.f32 %v6339_v13, %v373_v23  ;;  %5494 = vmatprep.subr.bf16.mxu0 %v5880_v38  ;;  %v411_v7 = vld [vmem:[#allocation2 + $0x1c8] sm:$0xff]  ;;  %v5884_v38 = vld [vmem:[%s10261_s2 + $0x70] sm:$0xff]  }
 0x103   :  { %v1152_v49 = vsel %vm1088_vm8, %v1056_v37, %v1120_v12  ;;  %1184 = vst.msk [vmem:[#allocation3 + $0x168] sm:$0xff] %vm19_vm0, %v1151_v11  ;;  %v585_v18 = vadd.f32 %v553_v36, %v485_v61  ;;  %v688_v63 = vmul.f32 %v6339_v13, %v374_v9  ;;  %v755_v41 = vmul.f32 %v6345_v15, %v409_v54  ;;  %v6852_v37 = vld [vmem:[#allocation2 + $0x1cf] sm:$0xff] }
 0x104   :  { %1370 = vrot.lane.b32.xlu1 %v1337_v4, %s5948_s23  ;;  %1185 = vst.msk [vmem:[#allocation3 + $0x170] sm:$0xff] %vm19_vm0, %v1152_v49  ;;  %v6837_v10 = vmul.f32 %v6353_v25, %v445_v50  ;;  %v719_v34 = vadd.f32 %v687_v43, %v651_v6  ;;  %v853_v27 = vadd.f32 %v6754_v0, %v6768_v44  ;;  %v5883_v12 = vld [vmem:[%s10261_s2 + $0x28] sm:$0xff]   ;;  %vm10265_vm12 = vcmask 785920  }
 0x105   :  { %v1200_v40 = vld [vmem:[#allocation3 + $0x47] sm:$0xff]  ;;  %v854_v62 = vadd.f32 %v6719_v33, %v6775_v8  ;;  %v889_v42 = vmul.f32 %v6342_v14, %v373_v23  ;;  %v720_v59 = vadd.f32 %v688_v63, %v652_v2  ;;  %v890_v29 = vmul.f32 %v6342_v14, %v374_v9  ;;  %5495 = vmatpush3.bf16.msra.mxu0 %v5881_v24 }
 0x106   :  { %v1201_v26 = vld [vmem:[#allocation3 + $0x4f] sm:$0xff]  ;;  %v957_v4 = vmul.f32 %v6348_v16, %v409_v54  ;;  %v1025_v35 = vmul.f32 %v6360_v28, %v445_v50  ;;  %v787_v33 = vadd.f32 %v755_v41, %v719_v34  ;;  %v375_v23 = vld [vmem:[#allocation2 + $0x1c7] sm:$0xff]  ;;  %v556_v50 = vmul.f32 %v6279_v52, %v412_v21 }
 0x107   :  { %v1236_v1 = vld [vmem:[#allocation3 + $0x48] sm:$0xff]  ;;  %v1237_v55 = vld [vmem:[#allocation3 + $0x50] sm:$0xff]  ;;  %v1306_v0 = vpack.c.bf16 %v1201_v26, %v1200_v40  ;;  %v921_v44 = vadd.f32 %v889_v42, %v853_v27  ;;  %v788_v61 = vadd.f32 %v756_v20, %v720_v59  ;;  %v922_v54 = vadd.f32 %v890_v29, %v854_v62 }
 0x108   :  { %1467 = vrot.lane.b32.xlu1 %v6778_v30, %s5949_s28  ;;  %v1338_v8 = vpack.c.bf16 %v1237_v55, %v1236_v1  ;;  %v5882_v9 = vld [vmem:[%s10261_s2 + $0x68] sm:$0xff]   ;;  %v6859_v39 = vmul.f32 %v6286_v60, %v448_v57  ;;  %v758_v20 = vmul.f32 %v6345_v15, %v412_v21  ;;  %v6869_v6 = vmul.f32 %v6353_v25, %v448_v57  ;;  %v1275_v59 = vld [vmem:[#allocation3 + $0x71] sm:$0xff] }
 0x109   :  { %v447_v30 = vld [vmem:[#allocation2 + $0x1c9] sm:$0xff]  ;;  %1697 = vrot.lane.b32.xlu0 %v1306_v0, %s5949_s28  ;;  %1322 = vst.msk [vmem:[#allocation4 + $0x30] sm:$0xff] %vm19_vm0, %v1306_v0  ;;  %v989_v36 = vadd.f32 %v957_v4, %v921_v44  ;;  %v6872_v19 = vmul.f32 %v6348_v16, %v412_v21  ;;  %v990_v11 = vadd.f32 %v6807_v17, %v922_v54  ;;  %vm10264_vm6 = vcmask 1048320  }
 0x10a   :  { %1614 = vst.msk [vmem:[#allocation4 + $0x20] sm:$0xff] %vm19_vm0, %v1338_v8  ;;  %v6879_v49 = vmul.f32 %v6360_v28, %v448_v57  ;;  %v487_v2 = vmul.f32 %v6276_v51, %v375_v23  ;;  %v488_v43 = vmul.f32 %v6276_v51, %v6852_v37  ;;  %v555_v41 = vmul.f32 %v6279_v52, %v411_v7  ;;  %v1274_v26 = vld [vmem:[#allocation3 + $0x69] sm:$0xff] }
 0x10b   :  { %v1057_v63 = vadd.f32 %v1025_v35, %v989_v36  ;;  %v6887_v24 = vmul.f32 %v6286_v60, %v447_v30  ;;  %v653_v40 = vadd.f32 %v6819_v3, %v585_v18  ;;  %5496 = vmatprep.subr.bf16.mxu0 %v5882_v9  ;;  %v1058_v17 = vadd.f32 %v6810_v31, %v990_v11  ;;  %v5885_v31 = vld [vmem:[%s10261_s2 + $0x30] sm:$0xff]   ;;  %v1196_v36 = vld [vmem:[#allocation3 + $0x7] sm:$0xff] }
 0x10c   :  { %1549 = vrot.lane.b32.xlu1 %v1306_v0, %s5950_s0  ;;  %v6891_v34 = vadd.f32 %v556_v50, %v488_v43  ;;  %v654_v27 = vadd.f32 %v6797_v56, %v6816_v58  ;;  %v689_v62 = vmul.f32 %v6339_v13, %v375_v23  ;;  %5497 = vmatpush3.bf16.msra.mxu0 %v5883_v12  ;;  %v5886_v56 = vld [vmem:[%s10261_s2 + $0x78] sm:$0xff]   ;;  %v1272_v55 = vld [vmem:[#allocation3 + $0x49] sm:$0xff] }
 0x10d   :  { %vm1089_vm10 = vcmp.ge.f32.partialorder %v1057_v63, 0.0  ;;  %v1121_v42 = vmul.f32 0.01, %v1057_v63  ;;  %1764 = vrot.lane.b32.xlu0 %v1338_v8, %s5950_s0  ;;  %v6897_v21 = vadd.f32 %v555_v41, %v487_v2  ;;  %v690_v3 = vmul.f32 %v6339_v13, %v6852_v37  ;;  %5498 = vmatprep.subr.bf16.mxu0 %v5884_v38  ;;  %v1273_v0 = vld [vmem:[#allocation3 + $0x51] sm:$0xff]  ;;  %v1276_v43 = vld [vmem:[#allocation3 + $0x89] sm:$0xff] }
 0x10e   :  { %vm1090_vm11 = vcmp.ge.f32.partialorder %v1058_v17, 0.0  ;;  %v1122_v58 = vmul.f32 0.01, %v1058_v17  ;;  %v721_v18 = vadd.f32 %v689_v62, %v653_v40  ;;  %v757_v57 = vmul.f32 %v6345_v15, %v411_v7  ;;  %v414_v44 = vld [vmem:[#allocation2 + $0x1f0] sm:$0xff] }
 0x10f   :  { %v1153_v29 = vsel %vm1089_vm10, %v1057_v63, %v1121_v42  ;;  %v722_v4 = vadd.f32 %v690_v3, %v654_v27  ;;  %v6910_v35 = vmul.f32 %v6353_v25, %v447_v30  ;;  %v855_v1 = vadd.f32 %v6837_v10, %v787_v33  ;;  %v1197_v38 = vld [vmem:[#allocation3 + $0xf] sm:$0xff]  ;;  %v1202_v63 = vld [vmem:[#allocation3 + $0x67] sm:$0xff] }
 0x110   :  { %1372 = vrot.lane.b32.xlu1 %v1338_v8, %s5948_s23  ;;  %v1154_v9 = vsel %vm1090_vm11, %v1058_v17, %v1122_v58  ;;  %1186 = vst.msk [vmem:[#allocation3 + $0x188] sm:$0xff] %vm19_vm0, %v1153_v29  ;;  %v6914_v54 = vadd.f32 %v757_v57, %v721_v18  ;;  %v856_v50 = vadd.f32 %v6804_v22, %v788_v61  ;;  %v450_v8 = vld [vmem:[#allocation2 + $0x1f1] sm:$0xff]  ;;  %v1238_v3 = vld [vmem:[#allocation3 + $0x68] sm:$0xff] }
 0x111   :  { %v891_v12 = vmul.f32 %v6342_v14, %v375_v23  ;;  %5499 = vmatpush3.bf16.msra.mxu0 %v5885_v31  ;;  %1187 = vst.msk [vmem:[#allocation3 + $0x190] sm:$0xff] %vm19_vm0, %v1154_v9  ;;  %v6919_v11 = vadd.f32 %v758_v20, %v722_v4  ;;  %v892_v10 = vmul.f32 %v6342_v14, %v6852_v37  ;;  %v1203_v22 = vld [vmem:[#allocation3 + $0x6f] sm:$0xff]  ;;  %v5887_v37 = vld [vmem:[%s10261_s2 + $0x38] sm:$0xff]  }
 0x112   :  { %v959_v33 = vmul.f32 %v6348_v16, %v411_v7  ;;  %v1027_v2 = vmul.f32 %v6360_v28, %v447_v30  ;;  %5500 = vmatprep.subr.bf16.mxu0 %v5886_v56  ;;  %v1435_v61 = vpack.c.bf16 %v1273_v0, %v1272_v55  ;;  %v6925_v41 = vpack.c.bf16 %v1275_v59, %v1274_v26  ;;  %v1277_v17 = vld [vmem:[#allocation3 + $0x91] sm:$0xff]  ;;  %v1278_v26 = vld [vmem:[#allocation3 + $0xa9] sm:$0xff] }
 0x113   :  { %v923_v23 = vadd.f32 %v891_v12, %v855_v1  ;;  %v558_v40 = vmul.f32 %v6279_v52, %v414_v44  ;;  %v416_v20 = vld [vmem:[#allocation2 + $0x210] sm:$0xff]  ;;  %v924_v27 = vadd.f32 %v892_v10, %v856_v50  ;;  %v6932_v7 = vmul.f32 %v6286_v60, %v450_v8  ;;  %v377_v0 = vld [vmem:[#allocation2 + $0x1e7] sm:$0xff] }
 0x114   :  { %v6935_v30 = vmul.f32 %v6345_v15, %v414_v44  ;;  %v6938_v62 = vmul.f32 %v6353_v25, %v450_v8  ;;  %v452_v42 = vld [vmem:[#allocation2 + $0x211] sm:$0xff]  ;;  %1829 = vst.msk [vmem:[#allocation4 + $0x10] sm:$0xff] %vm19_vm0, %v1435_v61  ;;  %1633 = vrot.lane.b32.xlu0 %v1435_v61, %s5948_s23  ;;  %1830 = vst.msk [vmem:[#allocation4 + $0x28] sm:$0xff] %vm19_vm0, %v6925_v41  ;;  %v6945_v56 = vmul.f32 %v6348_v16, %v414_v44 }
 0x115   :  { %v991_v31 = vadd.f32 %v959_v33, %v923_v23  ;;  %v6948_v58 = vmul.f32 %v6360_v28, %v450_v8  ;;  %v1304_v18 = vpack.c.bf16 %v1197_v38, %v1196_v36  ;;  %v1239_v57 = vld [vmem:[#allocation3 + $0x70] sm:$0xff]  ;;  %v992_v29 = vadd.f32 %v6872_v19, %v924_v27  ;;  %1469 = vrot.lane.b32.xlu1 %v1435_v61, %s5949_s28  ;;  %v413_v8 = vld [vmem:[#allocation2 + $0x1e8] sm:$0xff] }
 0x116   :  { %v1279_v59 = vld [vmem:[#allocation3 + $0xb1] sm:$0xff]  ;;  %v6951_v4 = vpack.c.bf16 %v1277_v17, %v1276_v43  ;;  %v1307_v1 = vpack.c.bf16 %v1203_v22, %v1202_v63  ;;  %v6954_v55 = vmul.f32 %v6345_v15, %v416_v20  ;;  %v6959_v50 = vmul.f32 %v6353_v25, %v452_v42  ;;  %v449_v36 = vld [vmem:[#allocation2 + $0x1e9] sm:$0xff]  ;;  %5501 = vmatpush3.bf16.msra.mxu0 %v5887_v37 }
 0x117   :  { %v378_v44 = vld [vmem:[#allocation2 + $0x1ef] sm:$0xff]  ;;  %v1059_v9 = vadd.f32 %v1027_v2, %v991_v31  ;;  %1320 = vst.msk [vmem:[#allocation4] sm:$0xff] %vm19_vm0, %v1304_v18  ;;  %v6962_v12 = vmul.f32 %v6348_v16, %v416_v20  ;;  %v6965_v19 = vmul.f32 %v6360_v28, %v452_v42  ;;  %v1060_v38 = vadd.f32 %v6879_v49, %v992_v29 }
 0x118   :  { %1417 = vst.msk [vmem:[#allocation4] sm:$0xff] %vm10266_vm9, %v6555_v5  ;;  %v1339_v10 = vpack.c.bf16 %v1239_v57, %v1238_v3  ;;  %v6973_v33 = vpack.c.bf16 %v1279_v59, %v1278_v26  ;;  %1699 = vrot.lane.b32.xlu0 %v1307_v1, %s5949_s28  ;;  %v489_v49 = vmul.f32 %v6276_v51, %v377_v0  ;;  %v1280_v17 = vld [vmem:[#allocation3 + $0xc9] sm:$0xff]  ;;  %v1281_v3 = vld [vmem:[#allocation3 + $0xd1] sm:$0xff] }
 0x119   :  { %1831 = vst.msk [vmem:[#allocation4 + $0x40] sm:$0xff] %vm19_vm0, %v6951_v4  ;;  %1323 = vst.msk [vmem:[#allocation4 + $0x48] sm:$0xff] %vm19_vm0, %v1307_v1  ;;  %vm1091_vm13 = vcmp.ge.f32.partialorder %v1059_v9, 0.0  ;;  %v1123_v2 = vmul.f32 0.01, %v1059_v9  ;;  %v490_v5 = vmul.f32 %v6276_v51, %v378_v44  ;;  %vm1092_vm14 = vcmp.ge.f32.partialorder %v1060_v38, 0.0  ;;  %1551 = vrot.lane.b32.xlu1 %v1307_v1, %s5950_s0 }
 0x11a   :  { %1514 = vst.msk [vmem:[#allocation4] sm:$0xff] %vm10265_vm12, %v6577_v32  ;;  %v1124_v43 = vmul.f32 0.01, %v1060_v38  ;;  %v557_v63 = vmul.f32 %v6279_v52, %v413_v8  ;;  %v625_v22 = vmul.f32 %v6286_v60, %v449_v36  ;;  %v655_v32 = vadd.f32 %v6887_v24, %v6897_v21  ;;  %v379_v57 = vld [vmem:[#allocation2 + $0x207] sm:$0xff]  ;;  %v380_v26 = vld [vmem:[#allocation2 + $0x20f] sm:$0xff] }
 0x11b   :  { %1615 = vst.msk [vmem:[#allocation4 + $0x38] sm:$0xff] %vm19_vm0, %v1339_v10  ;;  %1832 = vst.msk [vmem:[#allocation4 + $0x58] sm:$0xff] %vm19_vm0, %v6973_v33  ;;  %v1155_v23 = vsel %vm1091_vm13, %v1059_v9, %v1123_v2  ;;  %v590_v61 = vadd.f32 %v558_v40, %v490_v5  ;;  %v656_v51 = vadd.f32 %v6859_v39, %v6891_v34  ;;  %v1847_v37 = vld [vmem:[#allocation4 + $0x10] sm:$0xff]  ;;  %v1850_v27 = vld [vmem:[#allocation4 + $0x28] sm:$0xff] }
 0x11c   :  { %v1156_v20 = vsel %vm1092_vm14, %v1060_v38, %v1124_v43  ;;  %1188 = vst.msk [vmem:[#allocation3 + $0x1a8] sm:$0xff] %vm19_vm0, %v1155_v23  ;;  %v589_v42 = vadd.f32 %v557_v63, %v489_v49  ;;  %v691_v52 = vmul.f32 %v6339_v13, %v377_v0  ;;  %v692_v60 = vmul.f32 %v6339_v13, %v378_v44  ;;  %v415_v59 = vld [vmem:[#allocation2 + $0x208] sm:$0xff] }
 0x11d   :  { %1189 = vst.msk [vmem:[#allocation3 + $0x1b0] sm:$0xff] %vm19_vm0, %v1156_v20  ;;  %5774 = vmatprep.mubr.bf16.mxu1 %v1847_v37  ;;  %1766 = vrot.lane.b32.xlu0 %v1339_v10, %s5950_s0  ;;  %v759_v24 = vmul.f32 %v6345_v15, %v413_v8  ;;  %v827_v39 = vmul.f32 %v6353_v25, %v449_v36  ;;  %v382_v43 = vld [vmem:[#allocation2 + $0x22f] sm:$0xff] }
 0x11e   :  { %v857_v34 = vadd.f32 %v6910_v35, %v6914_v54  ;;  %5775 = vmatmul.mubr.bf16.vlgmr.msra.gmra.mrb[0].mxu1 %v1850_v27  ;;  %v723_v21 = vadd.f32 %v691_v52, %v655_v32  ;;  %v724_v40 = vadd.f32 %v692_v60, %v656_v51  ;;  %v858_v31 = vadd.f32 %v6869_v6, %v6919_v11  ;;  %v7007_v35 = vld [vmem:[#allocation2 + $0x209] sm:$0xff] }
 0x11f   :  { %v893_v18 = vmul.f32 %v6342_v14, %v377_v0  ;;  %v894_v1 = vmul.f32 %v6342_v14, %v378_v44  ;;  %v961_v9 = vmul.f32 %v6348_v16, %v413_v8  ;;  %v1029_v38 = vmul.f32 %v6360_v28, %v449_v36  ;;  %1374 = vrot.lane.b32.xlu1 %v1339_v10, %s5948_s23  ;;  %v381_v44 = vld [vmem:[#allocation2 + $0x227] sm:$0xff]  ;;  %v418_v27 = vld [vmem:[#allocation2 + $0x230] sm:$0xff] }
 0x120   :  { %v1853_v29 = vld [vmem:[#allocation4 + $0x40] sm:$0xff]  ;;  %v7005_v2 = vpack.c.bf16 %v1281_v3, %v1280_v17  ;;  %v791_v6 = vadd.f32 %v759_v24, %v723_v21  ;;  %v657_v11 = vadd.f32 %v625_v22, %v589_v42  ;;  %v658_v0 = vadd.f32 %v6932_v7, %v590_v61  ;;  %v417_v37 = vld [vmem:[#allocation2 + $0x228] sm:$0xff]  ;;  %v454_v3 = vld [vmem:[#allocation2 + $0x231] sm:$0xff] }
 0x121   :  { %5778 = vmatprep.mubr.bf16.mxu1 %v1853_v29  ;;  %v925_v54 = vadd.f32 %v893_v18, %v857_v34  ;;  %v926_v49 = vadd.f32 %v894_v1, %v858_v31  ;;  %1635 = vrot.lane.b32.xlu0 %v6925_v41, %s5948_s23  ;;  %v693_v8 = vmul.f32 %v6339_v13, %v379_v57  ;;  %v1240_v31 = vld [vmem:[#allocation3 + $0x88] sm:$0xff]  ;;  %v1241_v1 = vld [vmem:[#allocation3 + $0x90] sm:$0xff] }
 0x122   :  { %1833 = vst.msk [vmem:[#allocation4 + $0x70] sm:$0xff] %vm19_vm0, %v7005_v2  ;;  %v694_v36 = vmul.f32 %v6339_v13, %v380_v26  ;;  %v761_v10 = vmul.f32 %v6345_v15, %v415_v59  ;;  %v792_v63 = vadd.f32 %v6935_v30, %v724_v40  ;;  %v829_v7 = vmul.f32 %v6353_v25, %v7007_v35  ;;  %v1856_v23 = vld [vmem:[#allocation4 + $0x58] sm:$0xff]  ;;  %v1205_v40 = vld [vmem:[#allocation3 + $0x8f] sm:$0xff] }
 0x123   :  { %v993_v5 = vadd.f32 %v961_v9, %v925_v54  ;;  %v859_v22 = vadd.f32 %v827_v39, %v791_v6  ;;  %v994_v61 = vadd.f32 %v6945_v56, %v926_v49  ;;  %v725_v32 = vadd.f32 %v693_v8, %v657_v11  ;;  %1471 = vrot.lane.b32.xlu1 %v6925_v41, %s5949_s28  ;;  %v453_v41 = vld [vmem:[#allocation2 + $0x229] sm:$0xff]  ;;  %v1283_v54 = vld [vmem:[#allocation3 + $0xf1] sm:$0xff] }
 0x124   :  { %v726_v51 = vadd.f32 %v694_v36, %v658_v0  ;;  %v895_v17 = vmul.f32 %v6342_v14, %v379_v57  ;;  %v860_v15 = vadd.f32 %v6938_v62, %v792_v63  ;;  %v896_v20 = vmul.f32 %v6342_v14, %v380_v26  ;;  %v1282_v29 = vld [vmem:[#allocation3 + $0xe9] sm:$0xff]  ;;  %v1285_v0 = vld [vmem:[#allocation3 + $0x111] sm:$0xff] }
 0x125   :  { %v1061_v13 = vadd.f32 %v1029_v38, %v993_v5  ;;  %v897_v30 = vmul.f32 %v6342_v14, %v381_v44  ;;  %v1062_v25 = vadd.f32 %v6948_v58, %v994_v61  ;;  %v793_v42 = vadd.f32 %v761_v10, %v725_v32  ;;  %v1204_v58 = vld [vmem:[#allocation3 + $0x87] sm:$0xff] }
 0x126   :  { %v794_v56 = vadd.f32 %v6954_v55, %v726_v51  ;;  %v898_v52 = vmul.f32 %v6342_v14, %v382_v43  ;;  %5779 = vmatmul.mubr.bf16.gmra.mrb[4].mxu1 %v1856_v23  ;;  %v927_v24 = vadd.f32 %v895_v17, %v859_v22  ;;  %v928_v62 = vadd.f32 %v896_v20, %v860_v15  ;;  %v1284_v11 = vld [vmem:[#allocation3 + $0x109] sm:$0xff] }
 0x127   :  { %vm1093_vm15 = vcmp.ge.f32.partialorder %v1061_v13, 0.0  ;;  %v1125_v60 = vmul.f32 0.01, %v1061_v13  ;;  %vm1094_vm1 = vcmp.ge.f32.partialorder %v1062_v25, 0.0  ;;  %v1126_v39 = vmul.f32 0.01, %v1062_v25 }
 0x128   :  { %v861_v34 = vadd.f32 %v829_v7, %v793_v42  ;;  %v862_v21 = vadd.f32 %v6959_v50, %v794_v56  ;;  %v963_v55 = vmul.f32 %v6348_v16, %v415_v59  ;;  %v965_v14 = vmul.f32 %v6348_v16, %v417_v37  ;;  %v1286_v8 = vld [vmem:[#allocation3 + $0x129] sm:$0xff]  ;;  %v1289_v7 = vld [vmem:[#allocation3 + $0x151] sm:$0xff] }
 0x129   :  { %v1157_v18 = vsel %vm1093_vm15, %v1061_v13, %v1125_v60  ;;  %v1859_v57 = vld [vmem:[#allocation4 + $0x70] sm:$0xff]  ;;  %v966_v26 = vmul.f32 %v6348_v16, %v418_v27  ;;  %v1158_v9 = vsel %vm1094_vm1, %v1062_v25, %v1126_v39  ;;  %v996_v50 = vadd.f32 %v6962_v12, %v928_v62  ;;  %v1206_v22 = vld [vmem:[#allocation3 + $0xa7] sm:$0xff] }
 0x12a   :  { %1190 = vst.msk [vmem:[#allocation3 + $0x1c8] sm:$0xff] %vm19_vm0, %v1157_v18  ;;  %5782 = vmatprep.mubr.bf16.mxu1 %v1859_v57  ;;  %v929_v38 = vadd.f32 %v897_v30, %v861_v34  ;;  %v930_v6 = vadd.f32 %v898_v52, %v862_v21  ;;  %1191 = vst.msk [vmem:[#allocation3 + $0x1d0] sm:$0xff] %vm19_vm0, %v1158_v9  ;;  %v995_v59 = vadd.f32 %v963_v55, %v927_v24  ;;  %v1287_v12 = vld [vmem:[#allocation3 + $0x131] sm:$0xff]  ;;  %v1288_v63 = vld [vmem:[#allocation3 + $0x149] sm:$0xff] }
 0x12b   :  { %v1031_v49 = vmul.f32 %v6360_v28, %v7007_v35  ;;  %v1033_v16 = vmul.f32 %v6360_v28, %v453_v41  ;;  %v1034_v44 = vmul.f32 %v6360_v28, %v454_v3  ;;  %v1064_v5 = vadd.f32 %v6965_v19, %v996_v50  ;;  %v1207_v51 = vld [vmem:[#allocation3 + $0xaf] sm:$0xff]  ;;  %v1208_v37 = vld [vmem:[#allocation3 + $0xc7] sm:$0xff] }
 0x12c   :  { %v997_v36 = vadd.f32 %v965_v14, %v929_v38  ;;  %v998_v10 = vadd.f32 %v966_v26, %v930_v6  ;;  %v1308_v43 = vpack.c.bf16 %v1205_v40, %v1204_v58  ;;  %v7043_v61 = vpack.c.bf16 %v1283_v54, %v1282_v29  ;;  %v1242_v17 = vld [vmem:[#allocation3 + $0xa8] sm:$0xff]  ;;  %v1243_v13 = vld [vmem:[#allocation3 + $0xb0] sm:$0xff] }
 0x12d   :  { %v1063_v23 = vadd.f32 %v1031_v49, %v995_v59  ;;  %v7045_v32 = vpack.c.bf16 %v1285_v0, %v1284_v11  ;;  %v1340_v35 = vpack.c.bf16 %v1241_v1, %v1240_v31  ;;  %vm1096_vm2 = vcmp.ge.f32.partialorder %v1064_v5, 0.0  ;;  %v1290_v19 = vld [vmem:[#allocation3 + $0x169] sm:$0xff]  ;;  %v1291_v30 = vld [vmem:[#allocation3 + $0x171] sm:$0xff] }
 0x12e   :  { %v1065_v28 = vadd.f32 %v1033_v16, %v997_v36  ;;  %v1066_v15 = vadd.f32 %v1034_v44, %v998_v10  ;;  %v1128_v20 = vmul.f32 0.01, %v1064_v5  ;;  %1701 = vrot.lane.b32.xlu0 %v1308_v43, %s5949_s28  ;;  %1324 = vst.msk [vmem:[#allocation4 + $0x60] sm:$0xff] %vm19_vm0, %v1308_v43  ;;  %1553 = vrot.lane.b32.xlu1 %v1308_v43, %s5950_s0  ;;  %v1292_v25 = vld [vmem:[#allocation3 + $0x189] sm:$0xff]  ;;  %1834 = vst.msk [vmem:[#allocation4 + $0x88] sm:$0xff] %vm19_vm0, %v7043_v61  ;;  %v1293_v3 = vld [vmem:[#allocation3 + $0x191] sm:$0xff] }
 0x12f   :  { %v1209_v27 = vld [vmem:[#allocation3 + $0xcf] sm:$0xff]  ;;  %vm1095_vm3 = vcmp.ge.f32.partialorder %v1063_v23, 0.0  ;;  %v1127_v52 = vmul.f32 0.01, %v1063_v23  ;;  %1835 = vst.msk [vmem:[#allocation4 + $0xa0] sm:$0xff] %vm19_vm0, %v7045_v32  ;;  %1616 = vst.msk [vmem:[#allocation4 + $0x50] sm:$0xff] %vm19_vm0, %v1340_v35  ;;  %v7055_v60 = vpack.c.bf16 %v1287_v12, %v1286_v8  ;;  %v7057_v41 = vpack.c.bf16 %v1289_v7, %v1288_v63 }
 0x130   :  { %v1244_v42 = vld [vmem:[#allocation3 + $0xc8] sm:$0xff]  ;;  %v1245_v56 = vld [vmem:[#allocation3 + $0xd0] sm:$0xff]  ;;  %vm1097_vm4 = vcmp.ge.f32.partialorder %v1065_v28, 0.0  ;;  %vm1098_vm5 = vcmp.ge.f32.partialorder %v1066_v15, 0.0  ;;  %v1129_v18 = vmul.f32 0.01, %v1065_v28  ;;  %v1160_v54 = vsel %vm1096_vm2, %v1064_v5, %v1128_v20 }
 0x131   :  { %v1294_v24 = vld [vmem:[#allocation3 + $0x1a9] sm:$0xff]  ;;  %v1295_v62 = vld [vmem:[#allocation3 + $0x1b1] sm:$0xff]  ;;  %v1130_v57 = vmul.f32 0.01, %v1066_v15  ;;  %v1159_v50 = vsel %vm1095_vm3, %v1063_v23, %v1127_v52  ;;  %1836 = vst.msk [vmem:[#allocation4 + $0xb8] sm:$0xff] %vm19_vm0, %v7055_v60  ;;  %1837 = vst.msk [vmem:[#allocation4 + $0xd0] sm:$0xff] %vm19_vm0, %v7057_v41  ;;  %v7065_v11 = vpack.c.bf16 %v1207_v51, %v1206_v22  ;;  %v7067_v0 = vpack.c.bf16 %v1243_v13, %v1242_v17 }
 0x132   :  { %v1210_v39 = vld [vmem:[#allocation3 + $0xe7] sm:$0xff]  ;;  %v1211_v34 = vld [vmem:[#allocation3 + $0xef] sm:$0xff]  ;;  %v1161_v10 = vsel %vm1097_vm4, %v1065_v28, %v1129_v18  ;;  %1192 = vst.msk [vmem:[#allocation3 + $0x1e8] sm:$0xff] %vm19_vm0, %v1159_v50  ;;  %1193 = vst.msk [vmem:[#allocation3 + $0x1f0] sm:$0xff] %vm19_vm0, %v1160_v54  ;;  %1768 = vrot.lane.b32.xlu0 %v1340_v35, %s5950_s0  ;;  %1376 = vrot.lane.b32.xlu1 %v1340_v35, %s5948_s23  ;;  %v7075_v43 = vpack.c.bf16 %v1291_v30, %v1290_v19 }
 0x133   :  { %v1246_v21 = vld [vmem:[#allocation3 + $0xe8] sm:$0xff]  ;;  %v1247_v58 = vld [vmem:[#allocation3 + $0xf0] sm:$0xff]  ;;  %v1162_v5 = vsel %vm1098_vm5, %v1066_v15, %v1130_v57  ;;  %1194 = vst.msk [vmem:[#allocation3 + $0x208] sm:$0xff] %vm19_vm0, %v1161_v10  ;;  %1325 = vst.msk [vmem:[#allocation4 + $0x78] sm:$0xff] %vm19_vm0, %v7065_v11  ;;  %v7083_v51 = vpack.c.bf16 %v1293_v3, %v1292_v25  ;;  %v7085_v35 = vpack.c.bf16 %v1209_v27, %v1208_v37 }
 0x134   :  { %v1212_v40 = vld [vmem:[#allocation3 + $0x107] sm:$0xff]  ;;  %v1213_v31 = vld [vmem:[#allocation3 + $0x10f] sm:$0xff]  ;;  %1195 = vst.msk [vmem:[#allocation3 + $0x210] sm:$0xff] %vm19_vm0, %v1162_v5  ;;  %1617 = vst.msk [vmem:[#allocation4 + $0x68] sm:$0xff] %vm19_vm0, %v7067_v0  ;;  %v7087_v17 = vpack.c.bf16 %v1295_v62, %v1294_v24  ;;  %v7089_v13 = vpack.c.bf16 %v1245_v56, %v1244_v42  ;;  %v7095_v30 = vpack.c.bf16 %v1211_v34, %v1210_v39 }
 0x135   :  { %v1248_v55 = vld [vmem:[#allocation3 + $0x108] sm:$0xff]  ;;  %v1249_v14 = vld [vmem:[#allocation3 + $0x110] sm:$0xff]  ;;  %1838 = vst.msk [vmem:[#allocation4 + $0xe8] sm:$0xff] %vm19_vm0, %v7075_v43  ;;  %v7097_v52 = vpack.c.bf16 %v1247_v58, %v1246_v21  ;;  %v7099_v25 = vpack.c.bf16 %v1213_v31, %v1212_v40  ;;  %1839 = vst.msk [vmem:[#allocation4 + $0x100] sm:$0xff] %vm19_vm0, %v7083_v51 }
 0x136   :  { %v1214_v26 = vld [vmem:[#allocation3 + $0x127] sm:$0xff]  ;;  %v1215_v29 = vld [vmem:[#allocation3 + $0x12f] sm:$0xff]  ;;  %1326 = vst.msk [vmem:[#allocation4 + $0x90] sm:$0xff] %vm19_vm0, %v7085_v35  ;;  %1840 = vst.msk [vmem:[#allocation4 + $0x118] sm:$0xff] %vm19_vm0, %v7087_v17  ;;  %v7109_v42 = vpack.c.bf16 %v1249_v14, %v1248_v55  ;;  %1637 = vrot.lane.b32.xlu0 %v6951_v4, %s5948_s23  ;;  %1473 = vrot.lane.b32.xlu1 %v6951_v4, %s5949_s28 }
 0x137   :  { %v1250_v1 = vld [vmem:[#allocation3 + $0x128] sm:$0xff]  ;;  %v1251_v9 = vld [vmem:[#allocation3 + $0x130] sm:$0xff]  ;;  %1618 = vst.msk [vmem:[#allocation4 + $0x80] sm:$0xff] %vm19_vm0, %v7089_v13  ;;  %v7111_v56 = vpack.c.bf16 %v1215_v29, %v1214_v26  ;;  %v1865_v40 = vld [vmem:[#allocation4 + $0xa0] sm:$0xff] }
 0x138   :  { %v1216_v38 = vld [vmem:[#allocation3 + $0x147] sm:$0xff]  ;;  %v1217_v6 = vld [vmem:[#allocation3 + $0x14f] sm:$0xff]  ;;  %v7113_v24 = vpack.c.bf16 %v1251_v9, %v1250_v1  ;;  %1327 = vst.msk [vmem:[#allocation4 + $0xa8] sm:$0xff] %vm19_vm0, %v7095_v30  ;;  %1619 = vst.msk [vmem:[#allocation4 + $0x98] sm:$0xff] %vm19_vm0, %v7097_v52 }
 0x139   :  { %v1252_v59 = vld [vmem:[#allocation3 + $0x148] sm:$0xff]  ;;  %v1253_v49 = vld [vmem:[#allocation3 + $0x150] sm:$0xff]  ;;  %v7115_v62 = vpack.c.bf16 %v1217_v6, %v1216_v38  ;;  %1328 = vst.msk [vmem:[#allocation4 + $0xc0] sm:$0xff] %vm19_vm0, %v7099_v25  ;;  %1620 = vst.msk [vmem:[#allocation4 + $0xb0] sm:$0xff] %vm19_vm0, %v7109_v42 }
 0x13a   :  { %v1218_v16 = vld [vmem:[#allocation3 + $0x167] sm:$0xff]  ;;  %v1219_v44 = vld [vmem:[#allocation3 + $0x16f] sm:$0xff]  ;;  %v7129_v31 = vpack.c.bf16 %v1253_v49, %v1252_v59  ;;  %1329 = vst.msk [vmem:[#allocation4 + $0xd8] sm:$0xff] %vm19_vm0, %v7111_v56  ;;  %1621 = vst.msk [vmem:[#allocation4 + $0xc8] sm:$0xff] %vm19_vm0, %v7113_v24  ;;  %1703 = vrot.lane.b32.xlu0 %v7065_v11, %s5949_s28  ;;  %1555 = vrot.lane.b32.xlu1 %v7065_v11, %s5950_s0 }
 0x13b   :  { %v1254_v8 = vld [vmem:[#allocation3 + $0x168] sm:$0xff]  ;;  %v1255_v36 = vld [vmem:[#allocation3 + $0x170] sm:$0xff]  ;;  %v7131_v18 = vpack.c.bf16 %v1219_v44, %v1218_v16  ;;  %1330 = vst.msk [vmem:[#allocation4 + $0xf0] sm:$0xff] %vm19_vm0, %v7115_v62  ;;  %v1868_v10 = vld [vmem:[#allocation4 + $0xb8] sm:$0xff] }
 0x13c   :  { %v1296_v12 = vld [vmem:[#allocation3 + $0x1c9] sm:$0xff]  ;;  %v1297_v63 = vld [vmem:[#allocation3 + $0x1d1] sm:$0xff]  ;;  %v7133_v57 = vpack.c.bf16 %v1255_v36, %v1254_v8  ;;  %1622 = vst.msk [vmem:[#allocation4 + $0xe0] sm:$0xff] %vm19_vm0, %v7129_v31 }
 0x13d   :  { %v1220_v7 = vld [vmem:[#allocation3 + $0x187] sm:$0xff]  ;;  %v1221_v22 = vld [vmem:[#allocation3 + $0x18f] sm:$0xff]  ;;  %v7093_v19 = vpack.c.bf16 %v1297_v63, %v1296_v12  ;;  %1331 = vst.msk [vmem:[#allocation4 + $0x108] sm:$0xff] %vm19_vm0, %v7131_v18 }
 0x13e   :  { %v1256_v23 = vld [vmem:[#allocation3 + $0x188] sm:$0xff]  ;;  %v1257_v28 = vld [vmem:[#allocation3 + $0x190] sm:$0xff]  ;;  %v7143_v4 = vpack.c.bf16 %v1221_v22, %v1220_v7  ;;  %1623 = vst.msk [vmem:[#allocation4 + $0xf8] sm:$0xff] %vm19_vm0, %v7133_v57  ;;  %1770 = vrot.lane.b32.xlu0 %v7067_v0, %s5950_s0  ;;  %1378 = vrot.lane.b32.xlu1 %v7067_v0, %s5948_s23  ;;  %v1880_v0 = vld [vmem:[#allocation4 + $0x118] sm:$0xff] }
 0x13f   :  { %v1222_v15 = vld [vmem:[#allocation3 + $0x1a7] sm:$0xff]  ;;  %v1223_v37 = vld [vmem:[#allocation3 + $0x1af] sm:$0xff]  ;;  %1841 = vst.msk [vmem:[#allocation4 + $0x130] sm:$0xff] %vm19_vm0, %v7093_v19  ;;  %v7145_v55 = vpack.c.bf16 %v1257_v28, %v1256_v23 }
 0x140   :  { %v1258_v20 = vld [vmem:[#allocation3 + $0x1a8] sm:$0xff]  ;;  %v1259_v27 = vld [vmem:[#allocation3 + $0x1b0] sm:$0xff]  ;;  %v7147_v14 = vpack.c.bf16 %v1223_v37, %v1222_v15  ;;  %1332 = vst.msk [vmem:[#allocation4 + $0x120] sm:$0xff] %vm19_vm0, %v7143_v4  ;;  %v1877_v23 = vld [vmem:[#allocation4 + $0x100] sm:$0xff] }
 0x141   :  { %v1224_v3 = vld [vmem:[#allocation3 + $0x1c7] sm:$0xff]  ;;  %v1225_v39 = vld [vmem:[#allocation3 + $0x1cf] sm:$0xff]  ;;  %v7149_v26 = vpack.c.bf16 %v1259_v27, %v1258_v20  ;;  %1624 = vst.msk [vmem:[#allocation4 + $0x110] sm:$0xff] %vm19_vm0, %v7145_v55 }
 0x142   :  { %v1260_v34 = vld [vmem:[#allocation3 + $0x1c8] sm:$0xff]  ;;  %v1261_v21 = vld [vmem:[#allocation3 + $0x1d0] sm:$0xff]  ;;  %v7157_v29 = vpack.c.bf16 %v1225_v39, %v1224_v3  ;;  %1333 = vst.msk [vmem:[#allocation4 + $0x138] sm:$0xff] %vm19_vm0, %v7147_v14  ;;  %1639 = vrot.lane.b32.xlu0 %v6973_v33, %s5948_s23  ;;  %1475 = vrot.lane.b32.xlu1 %v6973_v33, %s5949_s28 }
 0x143   :  { %v1862_v58 = vld [vmem:[#allocation4 + $0x88] sm:$0xff]  ;;  %v7159_v1 = vpack.c.bf16 %v1261_v21, %v1260_v34  ;;  %v1299_v38 = vld [vmem:[#allocation3 + $0x1f1] sm:$0xff]  ;;  %1625 = vst.msk [vmem:[#allocation4 + $0x128] sm:$0xff] %vm19_vm0, %v7149_v26 }
 0x144   :  { %5783 = vmatmul.mubr.bf16.gmra.mrb[8].mxu1 %v1862_v58  ;;  %v1298_v9 = vld [vmem:[#allocation3 + $0x1e9] sm:$0xff]  ;;  %v1301_v59 = vld [vmem:[#allocation3 + $0x211] sm:$0xff]  ;;  %1334 = vst.msk [vmem:[#allocation4 + $0x150] sm:$0xff] %vm19_vm0, %v7157_v29 }
 0x145   :  { %5786 = vmatprep.mubr.bf16.mxu1 %v1865_v40  ;;  %v1226_v6 = vld [vmem:[#allocation3 + $0x1e7] sm:$0xff]  ;;  %v7173_v50 = vpack.c.bf16 %v1299_v38, %v1298_v9  ;;  %1626 = vst.msk [vmem:[#allocation4 + $0x140] sm:$0xff] %vm19_vm0, %v7159_v1  ;;  %v1227_v49 = vld [vmem:[#allocation3 + $0x1ef] sm:$0xff] }
 0x146   :  { %v1300_v54 = vld [vmem:[#allocation3 + $0x209] sm:$0xff]  ;;  %v7181_v44 = vpack.c.bf16 %v1227_v49, %v1226_v6  ;;  %1705 = vrot.lane.b32.xlu0 %v7085_v35, %s5949_s28  ;;  %1557 = vrot.lane.b32.xlu1 %v7085_v35, %s5950_s0 }
 0x147   :  { %v7179_v16 = vpack.c.bf16 %v1301_v59, %v1300_v54  ;;  %v1262_v8 = vld [vmem:[#allocation3 + $0x1e8] sm:$0xff]  ;;  %v1263_v36 = vld [vmem:[#allocation3 + $0x1f0] sm:$0xff]  ;;  %1842 = vst.msk [vmem:[#allocation4 + $0x148] sm:$0xff] %vm19_vm0, %v7173_v50 }
 0x148   :  { %v7185_v11 = vpack.c.bf16 %v1263_v36, %v1262_v8  ;;  %v1871_v5 = vld [vmem:[#allocation4 + $0xd0] sm:$0xff]  ;;  %1335 = vst.msk [vmem:[#allocation4 + $0x168] sm:$0xff] %vm19_vm0, %v7181_v44  ;;  %v1264_v12 = vld [vmem:[#allocation3 + $0x208] sm:$0xff] }
 0x149   :  { %1843 = vst.msk [vmem:[#allocation4 + $0x160] sm:$0xff] %vm19_vm0, %v7179_v16  ;;  %v1265_v63 = vld [vmem:[#allocation3 + $0x210] sm:$0xff]  ;;  %v1874_v22 = vld [vmem:[#allocation4 + $0xe8] sm:$0xff] }
 0x14a   :  { %1627 = vst.msk [vmem:[#allocation4 + $0x158] sm:$0xff] %vm19_vm0, %v7185_v11  ;;  %v7197_v7 = vpack.c.bf16 %v1265_v63, %v1264_v12  ;;  %1772 = vrot.lane.b32.xlu0 %v7089_v13, %s5950_s0  ;;  %1380 = vrot.lane.b32.xlu1 %v7089_v13, %s5948_s23  ;;  %v1883_v28 = vld [vmem:[#allocation4 + $0x130] sm:$0xff]  ;;  %v1228_v6 = vld [vmem:[#allocation3 + $0x207] sm:$0xff] }
 0x14b   :  { %v1229_v54 = vld [vmem:[#allocation3 + $0x20f] sm:$0xff]  ;;  %v1230_v63 = vld [vmem:[#allocation3 + $0x227] sm:$0xff] }
 0x14c   :  { %5787 = vmatmul.mubr.bf16.gmra.mrb[12].mxu1 %v1868_v10  ;;  %1628 = vst.msk [vmem:[#allocation4 + $0x170] sm:$0xff] %vm19_vm0, %v7197_v7  ;;  %v1530_v49 = vpack.c.bf16 %v1229_v54, %v1228_v6  ;;  %v1302_v8 = vld [vmem:[#allocation3 + $0x229] sm:$0xff]  ;;  %v1303_v36 = vld [vmem:[#allocation3 + $0x231] sm:$0xff] }
 0x14d   :  { %5790 = vmatprep.mubr.bf16.mxu1 %v1871_v5  ;;  %v1828_v10 = vpack.c.bf16 %v1303_v36, %v1302_v8  ;;  %v2881_v12 = vld [vmem:[#allocation2 + $0x231] sm:$0xff] }
 0x14e   :  { %1641 = vrot.lane.b32.xlu0 %v7005_v2, %s5948_s23  ;;  %1477 = vrot.lane.b32.xlu1 %v7005_v2, %s5949_s28  ;;  %v1886_v33 = vld [vmem:[#allocation4 + $0x148] sm:$0xff] }
 0x14f   :  { %1844 = vst.msk [vmem:[#allocation4 + $0x178] sm:$0xff] %vm19_vm0, %v1828_v10 }
 0x150   :  { %v1889_v35 = vld [vmem:[#allocation4 + $0x160] sm:$0xff] }
 0x152   :  { %1707 = vrot.lane.b32.xlu0 %v7095_v30, %s5949_s28  ;;  %1559 = vrot.lane.b32.xlu1 %v7095_v30, %s5950_s0 }
 0x154   :  { %5791 = vmatmul.mubr.bf16.gmra.mrb[16].mxu1 %v1874_v22  ;;  %v1231_v22 = vld [vmem:[#allocation3 + $0x22f] sm:$0xff] }
 0x155   :  { %5794 = vmatprep.mubr.bf16.mxu1 %v1877_v23 }
 0x156   :  { %1774 = vrot.lane.b32.xlu0 %v7097_v52, %s5950_s0  ;;  %1382 = vrot.lane.b32.xlu1 %v7097_v52, %s5948_s23 }
 0x15a   :  { %1643 = vrot.lane.b32.xlu0 %v7043_v61, %s5948_s23  ;;  %1479 = vrot.lane.b32.xlu1 %v7043_v61, %s5949_s28 }
 0x15c   :  { %5795 = vmatmul.mubr.bf16.gmra.mrb[20].mxu1 %v1880_v0 }
 0x15d   :  { %5798 = vmatprep.mubr.bf16.mxu1 %v1883_v28 }
 0x15e   :  { %1709 = vrot.lane.b32.xlu0 %v7099_v25, %s5949_s28  ;;  %1561 = vrot.lane.b32.xlu1 %v7099_v25, %s5950_s0 }
 0x162   :  { %1776 = vrot.lane.b32.xlu0 %v7109_v42, %s5950_s0  ;;  %1384 = vrot.lane.b32.xlu1 %v7109_v42, %s5948_s23 }
 0x164   :  { %5799 = vmatmul.mubr.bf16.gmra.mrb[24].mxu1 %v1886_v33 }
 0x165   :  { %5802 = vmatprep.mubr.bf16.mxu1 %v1889_v35 }
 0x166   :  { %1645 = vrot.lane.b32.xlu0 %v7045_v32, %s5948_s23  ;;  %1481 = vrot.lane.b32.xlu1 %v7045_v32, %s5949_s28 }
 0x16a   :  { %1711 = vrot.lane.b32.xlu0 %v7111_v56, %s5949_s28  ;;  %1563 = vrot.lane.b32.xlu1 %v7111_v56, %s5950_s0 }
 0x16e   :  { %1778 = vrot.lane.b32.xlu0 %v7113_v24, %s5950_s0  ;;  %1386 = vrot.lane.b32.xlu1 %v7113_v24, %s5948_s23 }
 0x171   :  { %v1632_v2 = vpop.permute.xlu0 %1631 }
 0x172   :  { %1647 = vrot.lane.b32.xlu0 %v7055_v60, %s5948_s23  ;;  %1483 = vrot.lane.b32.xlu1 %v7055_v60, %s5949_s28  ;;  %v1548_v61 = vpop.permute.xlu1 %1547  ;;  %1679 = vst.msk [vmem:[#allocation4 + $0x8] sm:$0xff] %vm10266_vm9, %v1632_v2  ;;  %v1695_v2 = vpack.c.bf16 %v1231_v22, %v1230_v63 }
 0x173   :  { %1596 = vst.msk [vmem:[#allocation4] sm:$0xff] %vm10264_vm6, %v1548_v61  ;;  %v1267_v61 = vld [vmem:[#allocation3 + $0x230] sm:$0xff] }
 0x176   :  { %1713 = vrot.lane.b32.xlu0 %v7115_v62, %s5949_s28  ;;  %1565 = vrot.lane.b32.xlu1 %v7115_v62, %s5950_s0  ;;  %v1371_v32 = vpop.permute.xlu1 %1370 }
 0x177   :  { %1418 = vst.msk [vmem:[#allocation4 + $0x18] sm:$0xff] %vm10266_vm9, %v1371_v32 }
 0x17a   :  { %1780 = vrot.lane.b32.xlu0 %v7129_v31, %s5950_s0  ;;  %1388 = vrot.lane.b32.xlu1 %v7129_v31, %s5948_s23  ;;  %v1468_v60 = vpop.permute.xlu1 %1467  ;;  %v1845_v37 = vld [vmem:[#allocation4] sm:$0xff] }
 0x17b   :  { %1515 = vst.msk [vmem:[#allocation4 + $0x18] sm:$0xff] %vm10265_vm12, %v1468_v60  ;;  %v1698_v13 = vpop.permute.xlu0 %1697 }
 0x17c   :  { %1745 = vst.msk [vmem:[#allocation4 + $0x8] sm:$0xff] %vm10265_vm12, %v1698_v13  ;;  %v1892_v13 = vld [vmem:[#allocation4 + $0x178] sm:$0xff] }
 0x17d   :  { %5803 = vmatmul.mubr.bf16.gmra.mrb[28].mxu1 %v1892_v13 }
 0x17e   :  { %1649 = vrot.lane.b32.xlu0 %v7057_v41, %s5948_s23  ;;  %1485 = vrot.lane.b32.xlu1 %v7057_v41, %s5949_s28  ;;  %v1550_v15 = vpop.permute.xlu1 %1549 }
 0x17f   :  { %1597 = vst.msk [vmem:[#allocation4 + $0x18] sm:$0xff] %vm10264_vm6, %v1550_v15  ;;  %v1765_v20 = vpop.permute.xlu0 %1764 }
 0x180   :  { %1812 = vst.msk [vmem:[#allocation4 + $0x8] sm:$0xff] %vm10264_vm6, %v1765_v20 }
 0x182   :  { %1715 = vrot.lane.b32.xlu0 %v7131_v18, %s5949_s28  ;;  %1567 = vrot.lane.b32.xlu1 %v7131_v18, %s5950_s0  ;;  %v1373_v30 = vpop.permute.xlu1 %1372 }
 0x183   :  { %1419 = vst.msk [vmem:[#allocation4 + $0x30] sm:$0xff] %vm10266_vm9, %v1373_v30 }
 0x186   :  { %1782 = vrot.lane.b32.xlu0 %v7133_v57, %s5950_s0  ;;  %1390 = vrot.lane.b32.xlu1 %v7133_v57, %s5948_s23  ;;  %v1634_v41 = vpop.permute.xlu0 %1633  ;;  %v1848_v39 = vld [vmem:[#allocation4 + $0x18] sm:$0xff] }
 0x187   :  { %1680 = vst.msk [vmem:[#allocation4 + $0x20] sm:$0xff] %vm10266_vm9, %v1634_v41  ;;  %v1846_v52 = vld [vmem:[#allocation4 + $0x8] sm:$0xff]  ;;  %v1470_v25 = vpop.permute.xlu1 %1469 }
 0x188   :  { %1516 = vst.msk [vmem:[#allocation4 + $0x30] sm:$0xff] %vm10265_vm12, %v1470_v25  ;;  %2117 = vmatprep.mubr.bf16.mxu0 %v1846_v52 }
 0x189   :  { %2118 = vmatmul.mubr.bf16.vlgmr.msra.gmra.mrb[0].mxu0 %v1845_v37 }
 0x18a   :  { %1651 = vrot.lane.b32.xlu0 %v7075_v43, %s5948_s23  ;;  %1487 = vrot.lane.b32.xlu1 %v7075_v43, %s5949_s28  ;;  %v1700_v27 = vpop.permute.xlu0 %1699 }
 0x18b   :  { %1746 = vst.msk [vmem:[#allocation4 + $0x20] sm:$0xff] %vm10265_vm12, %v1700_v27  ;;  %v1552_v3 = vpop.permute.xlu1 %1551 }
 0x18c   :  { %1598 = vst.msk [vmem:[#allocation4 + $0x30] sm:$0xff] %vm10264_vm6, %v1552_v3 }
 0x18e   :  { %1717 = vrot.lane.b32.xlu0 %v7143_v4, %s5949_s28  ;;  %1569 = vrot.lane.b32.xlu1 %v7143_v4, %s5950_s0 }
 0x18f   :  { %v1767_v42 = vpop.permute.xlu0 %1766 }
 0x190   :  { %1813 = vst.msk [vmem:[#allocation4 + $0x20] sm:$0xff] %vm10264_vm6, %v1767_v42 }
 0x191   :  { %v1375_v43 = vpop.permute.xlu1 %1374 }
 0x192   :  { %1784 = vrot.lane.b32.xlu0 %v7145_v55, %s5950_s0  ;;  %1392 = vrot.lane.b32.xlu1 %v7145_v55, %s5948_s23  ;;  %1420 = vst.msk [vmem:[#allocation4 + $0x48] sm:$0xff] %vm10266_vm9, %v1375_v43 }
 0x193   :  { %v1636_v56 = vpop.permute.xlu0 %1635  ;;  %v1851_v4 = vld [vmem:[#allocation4 + $0x30] sm:$0xff] }
 0x194   :  { %1681 = vst.msk [vmem:[#allocation4 + $0x38] sm:$0xff] %vm10266_vm9, %v1636_v56 }
 0x195   :  { %v1472_v24 = vpop.permute.xlu1 %1471 }
 0x196   :  { %1653 = vrot.lane.b32.xlu0 %v7083_v51, %s5948_s23  ;;  %1489 = vrot.lane.b32.xlu1 %v7083_v51, %s5949_s28  ;;  %1517 = vst.msk [vmem:[#allocation4 + $0x48] sm:$0xff] %vm10265_vm12, %v1472_v24 }
 0x197   :  { %v1849_v62 = vld [vmem:[#allocation4 + $0x20] sm:$0xff] }
 0x198   :  { %2125 = vmatprep.mubr.bf16.mxu0 %v1849_v62 }
 0x199   :  { %2126 = vmatmul.mubr.bf16.gmra.mrb[4].mxu0 %v1848_v39 }
 0x19a   :  { %1719 = vrot.lane.b32.xlu0 %v7147_v14, %s5949_s28  ;;  %1571 = vrot.lane.b32.xlu1 %v7147_v14, %s5950_s0 }
 0x19e   :  { %1786 = vrot.lane.b32.xlu0 %v7149_v26, %s5950_s0  ;;  %1394 = vrot.lane.b32.xlu1 %v7149_v26, %s5948_s23 }
 0x1a0   :  { %v1702_v51 = vpop.permute.xlu0 %1701  ;;  %v1554_v34 = vpop.permute.xlu1 %1553 }
 0x1a1   :  { %1747 = vst.msk [vmem:[#allocation4 + $0x38] sm:$0xff] %vm10265_vm12, %v1702_v51 }
 0x1a2   :  { %1599 = vst.msk [vmem:[#allocation4 + $0x48] sm:$0xff] %vm10264_vm6, %v1554_v34  ;;  %1655 = vrot.lane.b32.xlu0 %v7087_v17, %s5948_s23  ;;  %1491 = vrot.lane.b32.xlu1 %v7087_v17, %s5949_s28 }
 0x1a4   :  { %v1769_v21 = vpop.permute.xlu0 %1768  ;;  %v1377_v58 = vpop.permute.xlu1 %1376 }
 0x1a5   :  { %1814 = vst.msk [vmem:[#allocation4 + $0x38] sm:$0xff] %vm10264_vm6, %v1769_v21 }
 0x1a6   :  { %1421 = vst.msk [vmem:[#allocation4 + $0x60] sm:$0xff] %vm10266_vm9, %v1377_v58  ;;  %1721 = vrot.lane.b32.xlu0 %v7157_v29, %s5949_s28  ;;  %1573 = vrot.lane.b32.xlu1 %v7157_v29, %s5950_s0 }
 0x1a8   :  { %v1638_v40 = vpop.permute.xlu0 %1637  ;;  %v1474_v31 = vpop.permute.xlu1 %1473 }
 0x1a9   :  { %1682 = vst.msk [vmem:[#allocation4 + $0x50] sm:$0xff] %vm10266_vm9, %v1638_v40  ;;  %v1854_v38 = vld [vmem:[#allocation4 + $0x48] sm:$0xff] }
 0x1aa   :  { %1518 = vst.msk [vmem:[#allocation4 + $0x60] sm:$0xff] %vm10265_vm12, %v1474_v31  ;;  %1788 = vrot.lane.b32.xlu0 %v7159_v1, %s5950_s0  ;;  %1396 = vrot.lane.b32.xlu1 %v7159_v1, %s5948_s23 }
 0x1ac   :  { %v1704_v17 = vpop.permute.xlu0 %1703  ;;  %v1852_v18 = vld [vmem:[#allocation4 + $0x38] sm:$0xff]  ;;  %v1556_v57 = vpop.permute.xlu1 %1555 }
 0x1ad   :  { %1748 = vst.msk [vmem:[#allocation4 + $0x50] sm:$0xff] %vm10265_vm12, %v1704_v17  ;;  %2133 = vmatprep.mubr.bf16.mxu0 %v1852_v18 }
 0x1ae   :  { %1600 = vst.msk [vmem:[#allocation4 + $0x60] sm:$0xff] %vm10264_vm6, %v1556_v57  ;;  %1657 = vrot.lane.b32.xlu0 %v7093_v19, %s5948_s23  ;;  %2134 = vmatmul.mubr.bf16.gmra.mrb[8].mxu0 %v1851_v4 }
 0x1af   :  { %1493 = vrot.lane.b32.xlu1 %v7093_v19, %s5949_s28 }
 0x1b0   :  { %v1771_v55 = vpop.permute.xlu0 %1770  ;;  %v1379_v14 = vpop.permute.xlu1 %1378 }
 0x1b1   :  { %1815 = vst.msk [vmem:[#allocation4 + $0x50] sm:$0xff] %vm10264_vm6, %v1771_v55 }
 0x1b2   :  { %1422 = vst.msk [vmem:[#allocation4 + $0x78] sm:$0xff] %vm10266_vm9, %v1379_v14  ;;  %1723 = vrot.lane.b32.xlu0 %v7181_v44, %s5949_s28 }
 0x1b3   :  { %1575 = vrot.lane.b32.xlu1 %v7181_v44, %s5950_s0 }
 0x1b4   :  { %v1640_v26 = vpop.permute.xlu0 %1639  ;;  %v1476_v29 = vpop.permute.xlu1 %1475 }
 0x1b5   :  { %1683 = vst.msk [vmem:[#allocation4 + $0x68] sm:$0xff] %vm10266_vm9, %v1640_v26  ;;  %v1857_v33 = vld [vmem:[#allocation4 + $0x60] sm:$0xff] }
 0x1b6   :  { %1519 = vst.msk [vmem:[#allocation4 + $0x78] sm:$0xff] %vm10265_vm12, %v1476_v29  ;;  %1790 = vrot.lane.b32.xlu0 %v7185_v11, %s5950_s0 }
 0x1b7   :  { %1398 = vrot.lane.b32.xlu1 %v7185_v11, %s5948_s23 }
 0x1b8   :  { %v1706_v19 = vpop.permute.xlu0 %1705  ;;  %v1855_v1 = vld [vmem:[#allocation4 + $0x50] sm:$0xff]  ;;  %v1558_v9 = vpop.permute.xlu1 %1557 }
 0x1b9   :  { %1749 = vst.msk [vmem:[#allocation4 + $0x68] sm:$0xff] %vm10265_vm12, %v1706_v19  ;;  %2141 = vmatprep.mubr.bf16.mxu0 %v1855_v1 }
 0x1ba   :  { %1601 = vst.msk [vmem:[#allocation4 + $0x78] sm:$0xff] %vm10264_vm6, %v1558_v9  ;;  %1659 = vrot.lane.b32.xlu0 %v7173_v50, %s5948_s23  ;;  %2142 = vmatmul.mubr.bf16.gmra.mrb[12].mxu0 %v1854_v38 }
 0x1bb   :  { %1495 = vrot.lane.b32.xlu1 %v7173_v50, %s5949_s28  ;;  %v2880_v50 = vld [vmem:[#allocation2 + $0x229] sm:$0xff] }
 0x1bc   :  { %v1773_v59 = vpop.permute.xlu0 %1772  ;;  %v1381_v44 = vpop.permute.xlu1 %1380  ;;  %v3403_v35 = vpack.c.bf16 %v2881_v12, %v2880_v50 }
 0x1bd   :  { %1816 = vst.msk [vmem:[#allocation4 + $0x68] sm:$0xff] %vm10264_vm6, %v1773_v59 }
 0x1be   :  { %1423 = vst.msk [vmem:[#allocation4 + $0x90] sm:$0xff] %vm10266_vm9, %v1381_v44  ;;  %1725 = vrot.lane.b32.xlu0 %v1530_v49, %s5949_s28 }
 0x1bf   :  { %1577 = vrot.lane.b32.xlu1 %v1530_v49, %s5950_s0  ;;  %3419 = vst.msk [vmem:[#allocation4 + $0x178] sm:$0xff] %vm19_vm0, %v3403_v35 }
 0x1c0   :  { %v1642_v11 = vpop.permute.xlu0 %1641  ;;  %v1478_v5 = vpop.permute.xlu1 %1477 }
 0x1c1   :  { %1684 = vst.msk [vmem:[#allocation4 + $0x80] sm:$0xff] %vm10266_vm9, %v1642_v11  ;;  %v1860_v25 = vld [vmem:[#allocation4 + $0x78] sm:$0xff] }
 0x1c2   :  { %1520 = vst.msk [vmem:[#allocation4 + $0x90] sm:$0xff] %vm10265_vm12, %v1478_v5  ;;  %1792 = vrot.lane.b32.xlu0 %v7197_v7, %s5950_s0  ;;  %v1266_v7 = vld [vmem:[#allocation3 + $0x228] sm:$0xff] }
 0x1c3   :  { %v1761_v15 = vpack.c.bf16 %v1267_v61, %v1266_v7 }
 0x1c4   :  { %v1708_v23 = vpop.permute.xlu0 %1707  ;;  %v1858_v0 = vld [vmem:[#allocation4 + $0x68] sm:$0xff]  ;;  %v1560_v28 = vpop.permute.xlu1 %1559 }
 0x1c5   :  { %1750 = vst.msk [vmem:[#allocation4 + $0x80] sm:$0xff] %vm10265_vm12, %v1708_v23  ;;  %2149 = vmatprep.mubr.bf16.mxu0 %v1858_v0 }
 0x1c6   :  { %1602 = vst.msk [vmem:[#allocation4 + $0x90] sm:$0xff] %vm10264_vm6, %v1560_v28  ;;  %1661 = vrot.lane.b32.xlu0 %v7179_v16, %s5948_s23  ;;  %2150 = vmatmul.mubr.bf16.gmra.mrb[16].mxu0 %v1857_v33 }
 0x1c8   :  { %v1775_v32 = vpop.permute.xlu0 %1774  ;;  %v1383_v60 = vpop.permute.xlu1 %1382 }
 0x1c9   :  { %1817 = vst.msk [vmem:[#allocation4 + $0x80] sm:$0xff] %vm10264_vm6, %v1775_v32 }
 0x1ca   :  { %1424 = vst.msk [vmem:[#allocation4 + $0xa8] sm:$0xff] %vm10266_vm9, %v1383_v60  ;;  %1727 = vrot.lane.b32.xlu0 %v1695_v2, %s5949_s28 }
 0x1cc   :  { %v1644_v20 = vpop.permute.xlu0 %1643  ;;  %v1480_v30 = vpop.permute.xlu1 %1479 }
 0x1cd   :  { %1685 = vst.msk [vmem:[#allocation4 + $0x98] sm:$0xff] %vm10266_vm9, %v1644_v20  ;;  %v1863_v62 = vld [vmem:[#allocation4 + $0x90] sm:$0xff] }
 0x1ce   :  { %1521 = vst.msk [vmem:[#allocation4 + $0xa8] sm:$0xff] %vm10265_vm12, %v1480_v30  ;;  %1794 = vrot.lane.b32.xlu0 %v1761_v15, %s5950_s0 }
 0x1d0   :  { %v1710_v16 = vpop.permute.xlu0 %1709  ;;  %v1861_v41 = vld [vmem:[#allocation4 + $0x80] sm:$0xff]  ;;  %v1562_v52 = vpop.permute.xlu1 %1561 }
 0x1d1   :  { %1751 = vst.msk [vmem:[#allocation4 + $0x98] sm:$0xff] %vm10265_vm12, %v1710_v16  ;;  %2157 = vmatprep.mubr.bf16.mxu0 %v1861_v41 }
 0x1d2   :  { %1603 = vst.msk [vmem:[#allocation4 + $0xa8] sm:$0xff] %vm10264_vm6, %v1562_v52  ;;  %2158 = vmatmul.mubr.bf16.gmra.mrb[20].mxu0 %v1860_v25 }
 0x1d4   :  { %v1777_v37 = vpop.permute.xlu0 %1776  ;;  %v1385_v27 = vpop.permute.xlu1 %1384 }
 0x1d5   :  { %1818 = vst.msk [vmem:[#allocation4 + $0x98] sm:$0xff] %vm10264_vm6, %v1777_v37 }
 0x1d6   :  { %1425 = vst.msk [vmem:[#allocation4 + $0xc0] sm:$0xff] %vm10266_vm9, %v1385_v27 }
 0x1d8   :  { %v1646_v3 = vpop.permute.xlu0 %1645  ;;  %v1482_v42 = vpop.permute.xlu1 %1481 }
 0x1d9   :  { %1686 = vst.msk [vmem:[#allocation4 + $0xb0] sm:$0xff] %vm10266_vm9, %v1646_v3  ;;  %v1866_v17 = vld [vmem:[#allocation4 + $0xa8] sm:$0xff] }
 0x1da   :  { %1522 = vst.msk [vmem:[#allocation4 + $0xc0] sm:$0xff] %vm10265_vm12, %v1482_v42 }
 0x1dc   :  { %v1712_v43 = vpop.permute.xlu0 %1711  ;;  %v1864_v56 = vld [vmem:[#allocation4 + $0x98] sm:$0xff]  ;;  %v1564_v24 = vpop.permute.xlu1 %1563 }
 0x1dd   :  { %1752 = vst.msk [vmem:[#allocation4 + $0xb0] sm:$0xff] %vm10265_vm12, %v1712_v43  ;;  %2165 = vmatprep.mubr.bf16.mxu0 %v1864_v56 }
 0x1de   :  { %1604 = vst.msk [vmem:[#allocation4 + $0xc0] sm:$0xff] %vm10264_vm6, %v1564_v24  ;;  %2166 = vmatmul.mubr.bf16.gmra.mrb[24].mxu0 %v1863_v62 }
 0x1e0   :  { %v1779_v39 = vpop.permute.xlu0 %1778  ;;  %v1387_v51 = vpop.permute.xlu1 %1386 }
 0x1e1   :  { %1819 = vst.msk [vmem:[#allocation4 + $0xb0] sm:$0xff] %vm10264_vm6, %v1779_v39 }
 0x1e2   :  { %1426 = vst.msk [vmem:[#allocation4 + $0xd8] sm:$0xff] %vm10266_vm9, %v1387_v51 }
 0x1e4   :  { %v1648_v34 = vpop.permute.xlu0 %1647  ;;  %v1484_v21 = vpop.permute.xlu1 %1483 }
 0x1e5   :  { %1687 = vst.msk [vmem:[#allocation4 + $0xc8] sm:$0xff] %vm10266_vm9, %v1648_v34  ;;  %v1869_v38 = vld [vmem:[#allocation4 + $0xc0] sm:$0xff] }
 0x1e6   :  { %1523 = vst.msk [vmem:[#allocation4 + $0xd8] sm:$0xff] %vm10265_vm12, %v1484_v21 }
 0x1e8   :  { %v1714_v58 = vpop.permute.xlu0 %1713  ;;  %v1867_v40 = vld [vmem:[#allocation4 + $0xb0] sm:$0xff]  ;;  %v1566_v31 = vpop.permute.xlu1 %1565 }
 0x1e9   :  { %1753 = vst.msk [vmem:[#allocation4 + $0xc8] sm:$0xff] %vm10265_vm12, %v1714_v58  ;;  %2173 = vmatprep.mubr.bf16.mxu0 %v1867_v40 }
 0x1ea   :  { %1605 = vst.msk [vmem:[#allocation4 + $0xd8] sm:$0xff] %vm10264_vm6, %v1566_v31  ;;  %2174 = vmatmul.mubr.bf16.gmra.mrb[28].mxu0 %v1866_v17 }
 0x1ec   :  { %v1781_v18 = vpop.permute.xlu0 %1780  ;;  %v1389_v57 = vpop.permute.xlu1 %1388 }
 0x1ed   :  { %1820 = vst.msk [vmem:[#allocation4 + $0xc8] sm:$0xff] %vm10264_vm6, %v1781_v18 }
 0x1ee   :  { %1427 = vst.msk [vmem:[#allocation4 + $0xf0] sm:$0xff] %vm10266_vm9, %v1389_v57 }
 0x1f0   :  { %v1650_v4 = vpop.permute.xlu0 %1649  ;;  %v1486_v55 = vpop.permute.xlu1 %1485 }
 0x1f1   :  { %1688 = vst.msk [vmem:[#allocation4 + $0xe0] sm:$0xff] %vm10266_vm9, %v1650_v4  ;;  %v7393_v14 = vpop.f32.mrb[0].mxu1  ;;  %v1872_v12 = vld [vmem:[#allocation4 + $0xd8] sm:$0xff] }
 0x1f2   :  { %1524 = vst.msk [vmem:[#allocation4 + $0xf0] sm:$0xff] %vm10265_vm12, %v1486_v55  ;;  %v7395_v26 = vpop.f32.mrb[1].mxu1 }
 0x1f3   :  { %v7397_v29 = vpop.f32.mrb[2].mxu1 }
 0x1f4   :  { %v1716_v19 = vpop.permute.xlu0 %1715  ;;  %v1870_v1 = vld [vmem:[#allocation4 + $0xc8] sm:$0xff]  ;;  %v7400_v9 = vpop.f32.mrb[3].mxu1 }
 0x1f5   :  { %1754 = vst.msk [vmem:[#allocation4 + $0xe0] sm:$0xff] %vm10265_vm12, %v1716_v19  ;;  %2181 = vmatprep.mubr.bf16.mxu0 %v1870_v1  ;;  %v1568_v6 = vpop.permute.xlu1 %1567 }
 0x1f6   :  { %2182 = vmatmul.mubr.bf16.gmra.mrb[32].mxu0 %v1869_v38  ;;  %1606 = vst.msk [vmem:[#allocation4 + $0xf0] sm:$0xff] %vm10264_vm6, %v1568_v6 }
 0x1f8   :  { %v1783_v54 = vpop.permute.xlu0 %1782 }
 0x1f9   :  { %1821 = vst.msk [vmem:[#allocation4 + $0xe0] sm:$0xff] %vm10264_vm6, %v1783_v54  ;;  %v1391_v59 = vpop.permute.xlu1 %1390  ;;  %v7404_v49 = vpop.f32.mrb[4].mxu1 }
 0x1fa   :  { %1428 = vst.msk [vmem:[#allocation4 + $0x108] sm:$0xff] %vm10266_vm9, %v1391_v59  ;;  %v7407_v44 = vpop.f32.mrb[5].mxu1 }
 0x1fb   :  { %v7409_v8 = vpop.f32.mrb[6].mxu1 }
 0x1fc   :  { %v1652_v36 = vpop.permute.xlu0 %1651  ;;  %v7412_v10 = vpop.f32.mrb[7].mxu1 }
 0x1fd   :  { %1689 = vst.msk [vmem:[#allocation4 + $0xf8] sm:$0xff] %vm10266_vm9, %v1652_v36  ;;  %v1488_v11 = vpop.permute.xlu1 %1487  ;;  %v1875_v60 = vld [vmem:[#allocation4 + $0xf0] sm:$0xff] }
 0x1fe   :  { %1525 = vst.msk [vmem:[#allocation4 + $0x108] sm:$0xff] %vm10265_vm12, %v1488_v11 }
 0x200   :  { %v1718_v5 = vpop.permute.xlu0 %1717  ;;  %v1873_v50 = vld [vmem:[#allocation4 + $0xe0] sm:$0xff] }
 0x201   :  { %1755 = vst.msk [vmem:[#allocation4 + $0xf8] sm:$0xff] %vm10265_vm12, %v1718_v5  ;;  %2189 = vmatprep.mubr.bf16.mxu0 %v1873_v50  ;;  %v1570_v63 = vpop.permute.xlu1 %1569 }
 0x202   :  { %2190 = vmatmul.mubr.bf16.gmra.mrb[36].mxu0 %v1872_v12  ;;  %1607 = vst.msk [vmem:[#allocation4 + $0x108] sm:$0xff] %vm10264_vm6, %v1570_v63 }
 0x204   :  { %v1785_v22 = vpop.permute.xlu0 %1784 }
 0x205   :  { %1822 = vst.msk [vmem:[#allocation4 + $0xf8] sm:$0xff] %vm10264_vm6, %v1785_v22  ;;  %v1393_v23 = vpop.permute.xlu1 %1392 }
 0x206   :  { %1429 = vst.msk [vmem:[#allocation4 + $0x120] sm:$0xff] %vm10266_vm9, %v1393_v23 }
 0x208   :  { %v1654_v0 = vpop.permute.xlu0 %1653 }
 0x209   :  { %1690 = vst.msk [vmem:[#allocation4 + $0x110] sm:$0xff] %vm10266_vm9, %v1654_v0  ;;  %v1490_v28 = vpop.permute.xlu1 %1489  ;;  %v1878_v42 = vld [vmem:[#allocation4 + $0x108] sm:$0xff] }
 0x20a   :  { %1526 = vst.msk [vmem:[#allocation4 + $0x120] sm:$0xff] %vm10265_vm12, %v1490_v28 }
 0x20c   :  { %v1720_v7 = vpop.permute.xlu0 %1719  ;;  %v1876_v61 = vld [vmem:[#allocation4 + $0xf8] sm:$0xff] }
 0x20d   :  { %1756 = vst.msk [vmem:[#allocation4 + $0x110] sm:$0xff] %vm10265_vm12, %v1720_v7  ;;  %2197 = vmatprep.mubr.bf16.mxu0 %v1876_v61  ;;  %v1572_v13 = vpop.permute.xlu1 %1571 }
 0x20e   :  { %2198 = vmatmul.mubr.bf16.gmra.mrb[40].mxu0 %v1875_v60  ;;  %1608 = vst.msk [vmem:[#allocation4 + $0x120] sm:$0xff] %vm10264_vm6, %v1572_v13 }
 0x210   :  { %v1787_v15 = vpop.permute.xlu0 %1786 }
 0x211   :  { %1823 = vst.msk [vmem:[#allocation4 + $0x110] sm:$0xff] %vm10264_vm6, %v1787_v15  ;;  %v1395_v20 = vpop.permute.xlu1 %1394 }
 0x212   :  { %1430 = vst.msk [vmem:[#allocation4 + $0x138] sm:$0xff] %vm10266_vm9, %v1395_v20 }
 0x214   :  { %v1656_v52 = vpop.permute.xlu0 %1655 }
 0x215   :  { %1691 = vst.msk [vmem:[#allocation4 + $0x128] sm:$0xff] %vm10266_vm9, %v1656_v52  ;;  %v1492_v37 = vpop.permute.xlu1 %1491  ;;  %v1881_v55 = vld [vmem:[#allocation4 + $0x120] sm:$0xff] }
 0x216   :  { %1527 = vst.msk [vmem:[#allocation4 + $0x138] sm:$0xff] %vm10265_vm12, %v1492_v37 }
 0x217   :  { %v7420_v33 = vpop.f32.mrb[8].mxu1 }
 0x218   :  { %v7423_v35 = vpop.f32.mrb[9].mxu1  ;;  %v1722_v27 = vpop.permute.xlu0 %1721  ;;  %v1879_v3 = vld [vmem:[#allocation4 + $0x110] sm:$0xff] }
 0x219   :  { %v7425_v2 = vpop.f32.mrb[10].mxu1  ;;  %1757 = vst.msk [vmem:[#allocation4 + $0x128] sm:$0xff] %vm10265_vm12, %v1722_v27  ;;  %2205 = vmatprep.mubr.bf16.mxu0 %v1879_v3  ;;  %v1574_v43 = vpop.permute.xlu1 %1573 }
 0x21a   :  { %v7427_v32 = vpop.f32.mrb[11].mxu1  ;;  %2206 = vmatmul.mubr.bf16.gmra.mrb[44].mxu0 %v1878_v42  ;;  %1609 = vst.msk [vmem:[#allocation4 + $0x138] sm:$0xff] %vm10264_vm6, %v1574_v43 }
 0x21c   :  { %v1789_v39 = vpop.permute.xlu0 %1788 }
 0x21d   :  { %1824 = vst.msk [vmem:[#allocation4 + $0x128] sm:$0xff] %vm10264_vm6, %v1789_v39  ;;  %v1397_v34 = vpop.permute.xlu1 %1396 }
 0x21e   :  { %1431 = vst.msk [vmem:[#allocation4 + $0x150] sm:$0xff] %vm10266_vm9, %v1397_v34 }
 0x21f   :  { %v7432_v30 = vpop.f32.mrb[12].mxu1 }
 0x220   :  { %v7435_v16 = vpop.f32.mrb[13].mxu1  ;;  %v1658_v21 = vpop.permute.xlu0 %1657 }
 0x221   :  { %v7437_v41 = vpop.f32.mrb[14].mxu1  ;;  %1692 = vst.msk [vmem:[#allocation4 + $0x140] sm:$0xff] %vm10266_vm9, %v1658_v21  ;;  %v1494_v58 = vpop.permute.xlu1 %1493  ;;  %v1884_v63 = vld [vmem:[#allocation4 + $0x138] sm:$0xff] }
 0x222   :  { %v7439_v25 = vpop.f32.mrb[15].mxu1  ;;  %1528 = vst.msk [vmem:[#allocation4 + $0x150] sm:$0xff] %vm10265_vm12, %v1494_v58 }
 0x224   :  { %v1724_v18 = vpop.permute.xlu0 %1723  ;;  %v1882_v57 = vld [vmem:[#allocation4 + $0x128] sm:$0xff] }
 0x225   :  { %1758 = vst.msk [vmem:[#allocation4 + $0x140] sm:$0xff] %vm10265_vm12, %v1724_v18  ;;  %2213 = vmatprep.mubr.bf16.mxu0 %v1882_v57  ;;  %v1576_v19 = vpop.permute.xlu1 %1575 }
 0x226   :  { %2214 = vmatmul.mubr.bf16.gmra.mrb[48].mxu0 %v1881_v55  ;;  %1610 = vst.msk [vmem:[#allocation4 + $0x150] sm:$0xff] %vm10264_vm6, %v1576_v19 }
 0x227   :  { %v7444_v56 = vpop.f32.mrb[16].mxu1 }
 0x228   :  { %v7447_v24 = vpop.f32.mrb[17].mxu1  ;;  %v1791_v1 = vpop.permute.xlu0 %1790 }
 0x229   :  { %v7449_v62 = vpop.f32.mrb[18].mxu1  ;;  %1825 = vst.msk [vmem:[#allocation4 + $0x140] sm:$0xff] %vm10264_vm6, %v1791_v1  ;;  %v1399_v38 = vpop.permute.xlu1 %1398 }
 0x22a   :  { %v7451_v51 = vpop.f32.mrb[19].mxu1  ;;  %1432 = vst.msk [vmem:[#allocation4 + $0x168] sm:$0xff] %vm10266_vm9, %v1399_v38 }
 0x22c   :  { %v1660_v36 = vpop.permute.xlu0 %1659 }
 0x22d   :  { %1693 = vst.msk [vmem:[#allocation4 + $0x158] sm:$0xff] %vm10266_vm9, %v1660_v36  ;;  %v1496_v5 = vpop.permute.xlu1 %1495  ;;  %v1887_v61 = vld [vmem:[#allocation4 + $0x150] sm:$0xff] }
 0x22e   :  { %1529 = vst.msk [vmem:[#allocation4 + $0x168] sm:$0xff] %vm10265_vm12, %v1496_v5 }
 0x22f   :  { %v7456_v40 = vpop.f32.mrb[20].mxu1 }
 0x230   :  { %v7459_v31 = vpop.f32.mrb[21].mxu1  ;;  %v1726_v50 = vpop.permute.xlu0 %1725  ;;  %v1885_v12 = vld [vmem:[#allocation4 + $0x140] sm:$0xff] }
 0x231   :  { %v7461_v17 = vpop.f32.mrb[22].mxu1  ;;  %1759 = vst.msk [vmem:[#allocation4 + $0x158] sm:$0xff] %vm10265_vm12, %v1726_v50  ;;  %2221 = vmatprep.mubr.bf16.mxu0 %v1885_v12  ;;  %v1578_v22 = vpop.permute.xlu1 %1577 }
 0x232   :  { %v7463_v4 = vpop.f32.mrb[23].mxu1  ;;  %2222 = vmatmul.mubr.bf16.gmra.mrb[52].mxu0 %v1884_v63  ;;  %1611 = vst.msk [vmem:[#allocation4 + $0x168] sm:$0xff] %vm10264_vm6, %v1578_v22 }
 0x234   :  { %v1793_v23 = vpop.permute.xlu0 %1792 }
 0x235   :  { %1826 = vst.msk [vmem:[#allocation4 + $0x158] sm:$0xff] %vm10264_vm6, %v1793_v23 }
 0x237   :  { %v7468_v6 = vpop.f32.mrb[24].mxu1 }
 0x238   :  { %v7471_v54 = vpop.f32.mrb[25].mxu1  ;;  %v1662_v0 = vpop.permute.xlu0 %1661 }
 0x239   :  { %v7473_v59 = vpop.f32.mrb[26].mxu1  ;;  %1694 = vst.msk [vmem:[#allocation4 + $0x170] sm:$0xff] %vm10266_vm9, %v1662_v0  ;;  %v1890_v15 = vld [vmem:[#allocation4 + $0x168] sm:$0xff] }
 0x23a   :  { %v7475_v11 = vpop.f32.mrb[27].mxu1 }
 0x23c   :  { %v1728_v28 = vpop.permute.xlu0 %1727  ;;  %v1888_v7 = vld [vmem:[#allocation4 + $0x158] sm:$0xff] }
 0x23d   :  { %1760 = vst.msk [vmem:[#allocation4 + $0x170] sm:$0xff] %vm10265_vm12, %v1728_v28  ;;  %2229 = vmatprep.mubr.bf16.mxu0 %v1888_v7 }
 0x23e   :  { %2230 = vmatmul.mubr.bf16.gmra.mrb[56].mxu0 %v1887_v61 }
 0x240   :  { %v1795_v60 = vpop.permute.xlu0 %1794 }
 0x241   :  { %1827 = vst.msk [vmem:[#allocation4 + $0x170] sm:$0xff] %vm10264_vm6, %v1795_v60 }
 0x248   :  { %v1891_v13 = vld [vmem:[#allocation4 + $0x170] sm:$0xff] }
 0x249   :  { %2237 = vmatprep.mubr.bf16.mxu0 %v1891_v13 }
 0x24a   :  { %2238 = vmatmul.mubr.bf16.gmra.mrb[60].mxu0 %v1890_v15 }
 0x25c   :  { %v5502_v20 = vpop.f32.mrb[0].mxu0 }
 0x25d   :  { %v5503_v52 = vpop.f32.mrb[1].mxu0 }
 0x25e   :  { %v5504_v37 = vadd.f32 %v5503_v52, %v5502_v20  ;;  %v5505_v27 = vpop.f32.mrb[2].mxu0  ;;  %v7509_v52 = vpop.f32.mrb[28].mxu1 }
 0x25f   :  { %v5506_v3 = vpop.f32.mrb[3].mxu0 }
 0x260   :  { %v7486_v42 = vadd.f32 %v5504_v37, %v7395_v26  ;;  %v5507_v43 = vadd.f32 %v5506_v3, %v5505_v27  ;;  %v7514_v27 = vpop.f32.mrb[29].mxu1 }
 0x261   :  { %v7516_v3 = vpop.f32.mrb[30].mxu1 }
 0x262   :  { %v7489_v39 = vadd.f32 %v5507_v43, %v7400_v9 }
 0x26c   :  { %v5508_v34 = vpop.f32.mrb[4].mxu0 }
 0x26d   :  { %v5509_v21 = vpop.f32.mrb[5].mxu0 }
 0x26e   :  { %v5510_v58 = vadd.f32 %v5509_v21, %v5508_v34  ;;  %v5511_v18 = vpop.f32.mrb[6].mxu0 }
 0x26f   :  { %v5512_v57 = vpop.f32.mrb[7].mxu0 }
 0x270   :  { %v7492_v55 = vadd.f32 %v7393_v14, %v5510_v58  ;;  %v5513_v19 = vadd.f32 %v5512_v57, %v5511_v18 }
 0x272   :  { %v7495_v1 = vadd.f32 %v7397_v29, %v5513_v19 }
 0x281   :  { %v5514_v38 = vpop.f32.mrb[8].mxu0 }
 0x282   :  { %v5515_v36 = vpop.f32.mrb[9].mxu0 }
 0x283   :  { %v5516_v26 = vadd.f32 %v5515_v36, %v5514_v38  ;;  %v5517_v5 = vpop.f32.mrb[10].mxu0 }
 0x284   :  { %v5518_v50 = vpop.f32.mrb[11].mxu0 }
 0x285   :  { %v7498_v9 = vadd.f32 %v5516_v26, %v7407_v44  ;;  %v5519_v12 = vadd.f32 %v5518_v50, %v5517_v5 }
 0x287   :  { %v7501_v63 = vadd.f32 %v5519_v12, %v7412_v10 }
 0x28d   :  { %v5520_v22 = vpop.f32.mrb[12].mxu0 }
 0x28e   :  { %v5521_v23 = vpop.f32.mrb[13].mxu0 }
 0x28f   :  { %v5522_v14 = vadd.f32 %v5521_v23, %v5520_v22  ;;  %v5523_v0 = vpop.f32.mrb[14].mxu0  ;;  %v2407_v23 = vsel %vm19_vm0, %v7486_v42, 0.0 }
 0x290   :  { %v5524_v28 = vpop.f32.mrb[15].mxu0 }
 0x291   :  { %v7504_v29 = vadd.f32 %v7404_v49, %v5522_v14  ;;  %v5525_v7 = vadd.f32 %v5524_v28, %v5523_v0 }
 0x293   :  { %v7507_v61 = vadd.f32 %v7409_v8, %v5525_v7  ;;  %v7521_v8 = vpop.f32.mrb[31].mxu1 }
 0x299   :  { %v5526_v60 = vpop.f32.mrb[16].mxu0 }
 0x29a   :  { %v5527_v13 = vpop.f32.mrb[17].mxu0 }
 0x29b   :  { %v5528_v44 = vadd.f32 %v5527_v13, %v5526_v60  ;;  %v5529_v15 = vpop.f32.mrb[18].mxu0 }
 0x29c   :  { %v5530_v20 = vpop.f32.mrb[19].mxu0 }
 0x29d   :  { %v7512_v10 = vadd.f32 %v5528_v44, %v7423_v35  ;;  %v5531_v37 = vadd.f32 %v5530_v20, %v5529_v15  ;;  %v2414_v44 = vsel %vm19_vm0, %v7498_v9, 0.0 }
 0x29f   :  { %v7519_v49 = vadd.f32 %v5531_v37, %v7427_v32 }
 0x2a5   :  { %v5532_v43 = vpop.f32.mrb[20].mxu0 }
 0x2a6   :  { %v5533_v34 = vpop.f32.mrb[21].mxu0 }
 0x2a7   :  { %v5534_v21 = vadd.f32 %v5533_v34, %v5532_v43  ;;  %v5535_v58 = vpop.f32.mrb[22].mxu0 }
 0x2a8   :  { %v5536_v18 = vpop.f32.mrb[23].mxu0 }
 0x2a9   :  { %v7524_v57 = vadd.f32 %v7420_v33, %v5534_v21  ;;  %v5537_v35 = vadd.f32 %v5536_v18, %v5535_v58  ;;  %v2408_v33 = vsel %vm19_vm0, %v7489_v39, 0.0  ;;  %v2416_v21 = vsel %vm19_vm0, %v7501_v63, 0.0 }
 0x2aa   :  { %v2409_v14 = vadd.f32 %v2408_v33, %v2407_v23  ;;  %v2418_v58 = vsel %vm19_vm0, %v7504_v29, 0.0 }
 0x2ab   :  { %v7527_v19 = vadd.f32 %v7425_v2, %v5537_v35  ;;  %v2410_v2 = vsel %vm19_vm0, %v7492_v55, 0.0 }
 0x2ac   :  { %v2411_v28 = vadd.f32 %v2410_v2, %v2409_v14 }
 0x2b1   :  { %v5538_v38 = vpop.f32.mrb[24].mxu0 }
 0x2b2   :  { %v5539_v36 = vpop.f32.mrb[25].mxu0 }
 0x2b3   :  { %v5540_v26 = vadd.f32 %v5539_v36, %v5538_v38  ;;  %v5541_v5 = vpop.f32.mrb[26].mxu0 }
 0x2b4   :  { %v5542_v32 = vpop.f32.mrb[27].mxu0 }
 0x2b5   :  { %v7530_v50 = vadd.f32 %v5540_v26, %v7435_v16  ;;  %v5543_v12 = vadd.f32 %v5542_v32, %v5541_v5  ;;  %v2412_v16 = vsel %vm19_vm0, %v7495_v1, 0.0 }
 0x2b6   :  { %v2413_v37 = vadd.f32 %v2412_v16, %v2411_v28  ;;  %v2426_v28 = vsel %vm19_vm0, %v7524_v57, 0.0 }
 0x2b7   :  { %v7533_v22 = vadd.f32 %v5543_v12, %v7439_v25 }
 0x2b8   :  { %v2415_v34 = vadd.f32 %v2414_v44, %v2413_v37 }
 0x2ba   :  { %v2417_v18 = vadd.f32 %v2416_v21, %v2415_v34 }
 0x2bc   :  { %v2419_v38 = vadd.f32 %v2418_v58, %v2417_v18 }
 0x2bd   :  { %v5544_v0 = vpop.f32.mrb[28].mxu0 }
 0x2be   :  { %v5545_v7 = vpop.f32.mrb[29].mxu0 }
 0x2bf   :  { %v5546_v60 = vadd.f32 %v5545_v7, %v5544_v0  ;;  %v5547_v13 = vpop.f32.mrb[30].mxu0  ;;  %v2424_v0 = vsel %vm19_vm0, %v7519_v49, 0.0 }
 0x2c0   :  { %v5548_v25 = vpop.f32.mrb[31].mxu0 }
 0x2c1   :  { %v7546_v15 = vadd.f32 %v7432_v30, %v5546_v60  ;;  %v5549_v20 = vadd.f32 %v5548_v25, %v5547_v13  ;;  %v2420_v30 = vsel %vm19_vm0, %v7507_v61, 0.0 }
 0x2c2   :  { %v2421_v23 = vadd.f32 %v2420_v30, %v2419_v38 }
 0x2c3   :  { %v7549_v43 = vadd.f32 %v7437_v41, %v5549_v20  ;;  %v2422_v41 = vsel %vm19_vm0, %v7512_v10, 0.0  ;;  %v2434_v38 = vsel %vm19_vm0, %v7546_v15, 0.0 }
 0x2c4   :  { %v2423_v14 = vadd.f32 %v2422_v41, %v2421_v23 }
 0x2c6   :  { %v2425_v7 = vadd.f32 %v2424_v0, %v2423_v14 }
 0x2c8   :  { %v2427_v60 = vadd.f32 %v2426_v28, %v2425_v7 }
 0x2c9   :  { %v5550_v35 = vpop.f32.mrb[32].mxu0 }
 0x2ca   :  { %v5551_v36 = vpop.f32.mrb[33].mxu0 }
 0x2cb   :  { %v5552_v26 = vadd.f32 %v5551_v36, %v5550_v35  ;;  %v5553_v5 = vpop.f32.mrb[34].mxu0  ;;  %v2432_v35 = vsel %vm19_vm0, %v7533_v22, 0.0 }
 0x2cc   :  { %v5554_v32 = vpop.f32.mrb[35].mxu0 }
 0x2cd   :  { %v7560_v12 = vadd.f32 %v5552_v26, %v7447_v24  ;;  %v5555_v33 = vadd.f32 %v5554_v32, %v5553_v5  ;;  %v2428_v24 = vsel %vm19_vm0, %v7527_v19, 0.0 }
 0x2ce   :  { %v2429_v21 = vadd.f32 %v2428_v24, %v2427_v60 }
 0x2cf   :  { %v7563_v2 = vadd.f32 %v5555_v33, %v7451_v51  ;;  %v2430_v51 = vsel %vm19_vm0, %v7530_v50, 0.0 }
 0x2d0   :  { %v2431_v18 = vadd.f32 %v2430_v51, %v2429_v21 }
 0x2d2   :  { %v2433_v36 = vadd.f32 %v2432_v35, %v2431_v18 }
 0x2d4   :  { %v2435_v26 = vadd.f32 %v2434_v38, %v2433_v36 }
 0x2d5   :  { %v5556_v16 = vpop.f32.mrb[36].mxu0 }
 0x2d6   :  { %v5557_v13 = vpop.f32.mrb[37].mxu0 }
 0x2d7   :  { %v5558_v25 = vadd.f32 %v5557_v13, %v5556_v16  ;;  %v5559_v44 = vpop.f32.mrb[38].mxu0  ;;  %v2440_v16 = vsel %vm19_vm0, %v7563_v2, 0.0 }
 0x2d8   :  { %v5560_v20 = vpop.f32.mrb[39].mxu0 }
 0x2d9   :  { %v7574_v37 = vadd.f32 %v7444_v56, %v5558_v25  ;;  %v5561_v34 = vadd.f32 %v5560_v20, %v5559_v44  ;;  %v2436_v56 = vsel %vm19_vm0, %v7549_v43, 0.0 }
 0x2da   :  { %v2437_v0 = vadd.f32 %v2436_v56, %v2435_v26 }
 0x2db   :  { %v7577_v58 = vadd.f32 %v7449_v62, %v5561_v34  ;;  %v2438_v62 = vsel %vm19_vm0, %v7560_v12, 0.0  ;;  %v2442_v60 = vsel %vm19_vm0, %v7574_v37, 0.0 }
 0x2dc   :  { %v2439_v7 = vadd.f32 %v2438_v62, %v2437_v0 }
 0x2de   :  { %v2441_v13 = vadd.f32 %v2440_v16, %v2439_v7 }
 0x2e0   :  { %v2443_v25 = vadd.f32 %v2442_v60, %v2441_v13 }
 0x2e1   :  { %v5562_v30 = vpop.f32.mrb[40].mxu0 }
 0x2e2   :  { %v5563_v5 = vpop.f32.mrb[41].mxu0 }
 0x2e3   :  { %v5564_v32 = vadd.f32 %v5563_v5, %v5562_v30  ;;  %v5565_v41 = vpop.f32.mrb[42].mxu0 }
 0x2e4   :  { %v5566_v33 = vpop.f32.mrb[43].mxu0 }
 0x2e5   :  { %v7588_v23 = vadd.f32 %v5564_v32, %v7459_v31  ;;  %v5567_v14 = vadd.f32 %v5566_v33, %v5565_v41  ;;  %v2444_v31 = vsel %vm19_vm0, %v7577_v58, 0.0 }
 0x2e6   :  { %v2445_v35 = vadd.f32 %v2444_v31, %v2443_v25 }
 0x2e7   :  { %v7591_v28 = vadd.f32 %v5567_v14, %v7463_v4  ;;  %v2446_v4 = vsel %vm19_vm0, %v7588_v23, 0.0 }
 0x2e8   :  { %v2447_v36 = vadd.f32 %v2446_v4, %v2445_v35 }
 0x2e9   :  { %v2448_v30 = vsel %vm19_vm0, %v7591_v28, 0.0 }
 0x2ea   :  { %v2449_v5 = vadd.f32 %v2448_v30, %v2447_v36 }
 0x2ed   :  { %v5568_v24 = vpop.f32.mrb[44].mxu0 }
 0x2ee   :  { %v5569_v44 = vpop.f32.mrb[45].mxu0 }
 0x2ef   :  { %v5570_v20 = vadd.f32 %v5569_v44, %v5568_v24  ;;  %v5571_v51 = vpop.f32.mrb[46].mxu0 }
 0x2f0   :  { %v5572_v34 = vpop.f32.mrb[47].mxu0 }
 0x2f1   :  { %v7602_v21 = vadd.f32 %v7456_v40, %v5570_v20  ;;  %v5573_v18 = vadd.f32 %v5572_v34, %v5571_v51 }
 0x2f3   :  { %v7605_v38 = vadd.f32 %v7461_v17, %v5573_v18  ;;  %v2450_v26 = vsel %vm19_vm0, %v7602_v21, 0.0 }
 0x2f4   :  { %v2451_v32 = vadd.f32 %v2450_v26, %v2449_v5 }
 0x2f5   :  { %v2452_v40 = vsel %vm19_vm0, %v7605_v38, 0.0 }
 0x2f6   :  { %v2453_v7 = vadd.f32 %v2452_v40, %v2451_v32 }
 0x2f9   :  { %v5574_v56 = vpop.f32.mrb[48].mxu0 }
 0x2fa   :  { %v5575_v41 = vpop.f32.mrb[49].mxu0 }
 0x2fb   :  { %v5576_v33 = vadd.f32 %v5575_v41, %v5574_v56  ;;  %v5577_v62 = vpop.f32.mrb[50].mxu0 }
 0x2fc   :  { %v5578_v14 = vpop.f32.mrb[51].mxu0 }
 0x2fd   :  { %v2377_v17 = vadd.f32 %v5576_v33, %v7471_v54  ;;  %v5579_v0 = vadd.f32 %v5578_v14, %v5577_v62 }
 0x2ff   :  { %v2454_v16 = vsel %vm19_vm0, %v2377_v17, 0.0  ;;  %v2380_v60 = vadd.f32 %v5579_v0, %v7475_v11 }
 0x300   :  { %v2455_v13 = vadd.f32 %v2454_v16, %v2453_v7 }
 0x301   :  { %v2456_v24 = vsel %vm19_vm0, %v2380_v60, 0.0 }
 0x302   :  { %v2457_v25 = vadd.f32 %v2456_v24, %v2455_v13 }
 0x305   :  { %v5580_v44 = vpop.f32.mrb[52].mxu0 }
 0x306   :  { %v5581_v31 = vpop.f32.mrb[53].mxu0 }
 0x307   :  { %v5582_v20 = vadd.f32 %v5581_v31, %v5580_v44  ;;  %v5583_v51 = vpop.f32.mrb[54].mxu0 }
 0x308   :  { %v5584_v34 = vpop.f32.mrb[55].mxu0 }
 0x309   :  { %v2385_v4 = vadd.f32 %v7468_v6, %v5582_v20  ;;  %v5585_v18 = vadd.f32 %v5584_v34, %v5583_v51 }
 0x30b   :  { %v2458_v54 = vsel %vm19_vm0, %v2385_v4, 0.0  ;;  %v2388_v35 = vadd.f32 %v7473_v59, %v5585_v18 }
 0x30c   :  { %v2459_v36 = vadd.f32 %v2458_v54, %v2457_v25  ;;  %v5888_v25 = vld [vmem:[%s10261_s2 + $0x140] sm:$0xff]  }
 0x30d   :  { %v2460_v30 = vsel %vm19_vm0, %v2388_v35, 0.0  ;;  %5806 = vmatprep.subr.bf16.mxu0 %v5888_v25 }
 0x30e   :  { %v2461_v11 = vadd.f32 %v2460_v30, %v2459_v36  ;;  %5807 = vmatpush3.bf16.msra.mxu0 %v5888_v25 }
 0x311   :  { %v5586_v26 = vpop.f32.mrb[56].mxu0 }
 0x312   :  { %v5587_v5 = vpop.f32.mrb[57].mxu0 }
 0x313   :  { %v5588_v56 = vadd.f32 %v5587_v5, %v5586_v26  ;;  %v5589_v32 = vpop.f32.mrb[58].mxu0 }
 0x314   :  { %v5590_v41 = vpop.f32.mrb[59].mxu0 }
 0x315   :  { %v5591_v40 = vadd.f32 %v5590_v41, %v5589_v32  ;;  %v2393_v33 = vadd.f32 %v5588_v56, %v7514_v27 }
 0x317   :  { %v2462_v62 = vsel %vm19_vm0, %v2393_v33, 0.0  ;;  %v2396_v6 = vadd.f32 %v5591_v40, %v7521_v8 }
 0x318   :  { %v2463_v14 = vadd.f32 %v2462_v62, %v2461_v11 }
 0x319   :  { %v2464_v0 = vsel %vm19_vm0, %v2396_v6, 0.0 }
 0x31a   :  { %v2465_v59 = vadd.f32 %v2464_v0, %v2463_v14 }
 0x31d   :  { %v5592_v7 = vpop.f32.mrb[60].mxu0 }
 0x31e   :  { %v5593_v16 = vpop.f32.mrb[61].mxu0 }
 0x31f   :  { %v5594_v13 = vadd.f32 %v5593_v16, %v5592_v7  ;;  %v5595_v24 = vpop.f32.mrb[62].mxu0 }
 0x320   :  { %v5596_v44 = vpop.f32.mrb[63].mxu0 }
 0x321   :  { %v2401_v31 = vadd.f32 %v7509_v52, %v5594_v13  ;;  %v5597_v27 = vadd.f32 %v5596_v44, %v5595_v24  ;;  %v5889_v52 = vld [vmem:[%s10261_s2 + $0x148] sm:$0xff]  }
 0x322   :  { %5808 = vmatprep.subr.bf16.mxu0 %v5889_v52 }
 0x323   :  { %v2466_v8 = vsel %vm19_vm0, %v2401_v31, 0.0  ;;  %v2404_v20 = vadd.f32 %v7516_v3, %v5597_v27  ;;  %5809 = vmatpush3.bf16.msra.mxu0 %v5889_v52  ;;  %v5890_v3 = vld [vmem:[%s10261_s2 + $0x150] sm:$0xff]  }
 0x324   :  { %v2467_v51 = vadd.f32 %v2466_v8, %v2465_v59  ;;  %5810 = vmatprep.subr.bf16.mxu0 %v5890_v3  ;;  %v2809_v52 = vld [vmem:[#allocation2 + $0x22f] sm:$0xff] }
 0x325   :  { %v2468_v34 = vsel %vm19_vm0, %v2404_v20, 0.0 }
 0x326   :  { %v2469_v18 = vadd.f32 %v2468_v34, %v2467_v51 }
 0x327   :  { %5811 = vmatpush3.bf16.msra.mxu0 %v5890_v3 }
 0x328   :  { %v2470_v54 = vrot.slane %v2469_v18, 4 }
 0x32a   :  { %v2471_v36 = vadd.f32 %v2470_v54, %v2469_v18 }
 0x32c   :  { %v2472_v30 = vrot.slane %v2471_v36, 2 }
 0x32e   :  { %v2473_v11 = vadd.f32 %v2472_v30, %v2471_v36  ;;  %v2810_v36 = vld [vmem:[#allocation2 + $0x8] sm:$0xff] }
 0x330   :  { %v2474_v26 = vrot.slane %v2473_v11, 1 }
 0x332   :  { %v2475_v5 = vadd.f32 %v2474_v26, %v2473_v11  ;;  %v2811_v26 = vld [vmem:[#allocation2 + $0x10] sm:$0xff] }
 0x334   :  { %v7635_v56 = vmul.f32 0.00390625, %v2475_v5  ;;  %v2808_v5 = vld [vmem:[#allocation2 + $0x227] sm:$0xff] }
 0x336   :  { %v7641_v32 = vsub.f32 %v2377_v17, %v7635_v56  ;;  %v7644_v41 = vsub.f32 %v2380_v60, %v7635_v56  ;;  %v7647_v40 = vsub.f32 %v2385_v4, %v7635_v56  ;;  %v7650_v62 = vsub.f32 %v2388_v35, %v7635_v56  ;;  %v5891_v35 = vld [vmem:[%s10261_s2 + $0x158] sm:$0xff]  }
 0x337   :  { %v7653_v14 = vsub.f32 %v2393_v33, %v7635_v56  ;;  %v7656_v0 = vsub.f32 %v2396_v6, %v7635_v56  ;;  %v7659_v59 = vsub.f32 %v2401_v31, %v7635_v56  ;;  %v7662_v17 = vsub.f32 %v2404_v20, %v7635_v56  ;;  %5812 = vmatprep.subr.bf16.mxu0 %v5891_v35  ;;  %v5892_v6 = vld [vmem:[%s10261_s2 + $0x160] sm:$0xff]  }
 0x338   :  { %v7666_v60 = vsub.f32 %v7486_v42, %v7635_v56  ;;  %v7670_v4 = vsub.f32 %v7489_v39, %v7635_v56  ;;  %v7677_v33 = vsub.f32 %v7492_v55, %v7635_v56  ;;  %5813 = vmatpush3.bf16.msra.mxu0 %v5891_v35  ;;  %v7684_v42 = vsub.f32 %v7495_v1, %v7635_v56  ;;  %v5893_v55 = vld [vmem:[%s10261_s2 + $0x168] sm:$0xff]  }
 0x339   :  { %5814 = vmatprep.subr.bf16.mxu0 %v5892_v6  ;;  %v7695_v16 = vsub.f32 %v7498_v9, %v7635_v56  ;;  %v7701_v1 = vsub.f32 %v7501_v63, %v7635_v56  ;;  %v5894_v9 = vld [vmem:[%s10261_s2 + $0x170] sm:$0xff]   ;;  %v7712_v27 = vsub.f32 %v7504_v29, %v7635_v56  ;;  %v7719_v51 = vsub.f32 %v7507_v61, %v7635_v56  ;;  %v5895_v29 = vld [vmem:[%s10261_s2 + $0x178] sm:$0xff]  }
 0x33a   :  { %v2510_v39 = vmul.f32 %v7666_v60, %v7666_v60  ;;  %v2511_v7 = vmul.f32 %v7670_v4, %v7670_v4  ;;  %v2512_v13 = vmul.f32 %v7677_v33, %v7677_v33  ;;  %v2513_v24 = vmul.f32 %v7684_v42, %v7684_v42 }
 0x33b   :  { %v2514_v63 = vmul.f32 %v7695_v16, %v7695_v16  ;;  %v2515_v34 = vmul.f32 %v7701_v1, %v7701_v1  ;;  %v7729_v30 = vsub.f32 %v7512_v10, %v7635_v56  ;;  %v2516_v61 = vmul.f32 %v7712_v27, %v7712_v27 }
 0x33c   :  { %5815 = vmatpush3.bf16.msra.mxu0 %v5892_v6  ;;  %v2542_v25 = vsel %vm19_vm0, %v2510_v39, 0.0  ;;  %v2543_v44 = vsel %vm19_vm0, %v2511_v7, 0.0  ;;  %v2545_v8 = vsel %vm19_vm0, %v2512_v13, 0.0  ;;  %v2547_v18 = vsel %vm19_vm0, %v2513_v24, 0.0  ;;  %v2846_v39 = vld [vmem:[#allocation2 + $0x9] sm:$0xff]  ;;  %v2847_v7 = vld [vmem:[#allocation2 + $0x11] sm:$0xff] }
 0x33d   :  { %5816 = vmatprep.subr.bf16.mxu0 %v5893_v55  ;;  %v2544_v31 = vadd.f32 %v2543_v44, %v2542_v25  ;;  %v2549_v11 = vsel %vm19_vm0, %v2514_v63, 0.0  ;;  %v7736_v35 = vsub.f32 %v7519_v49, %v7635_v56  ;;  %v2517_v6 = vmul.f32 %v7719_v51, %v7719_v51 }
 0x33e   :  { %v2551_v10 = vsel %vm19_vm0, %v2515_v34, 0.0  ;;  %v2914_v13 = vpack.c.bf16 %v2811_v26, %v2810_v36  ;;  %v3270_v24 = vpack.c.bf16 %v2809_v52, %v2808_v5  ;;  %v7743_v25 = vsub.f32 %v7524_v57, %v7635_v56 }
 0x33f   :  { %v2546_v20 = vadd.f32 %v2545_v8, %v2544_v31  ;;  %v2518_v44 = vmul.f32 %v7729_v30, %v7729_v30  ;;  %v2553_v49 = vsel %vm19_vm0, %v2516_v61, 0.0  ;;  %v3010_v31 = vpack.c.bf16 %v2847_v7, %v2846_v39 }
 0x340   :  { %5817 = vmatpush3.bf16.msra.mxu0 %v5893_v55  ;;  %2946 = vrot.lane.b32.xlu1 %v2914_v13, %s5948_s23  ;;  %v7752_v63 = vsub.f32 %v7527_v19, %v7635_v56  ;;  %v2519_v8 = vmul.f32 %v7736_v35, %v7736_v35  ;;  %v2555_v57 = vsel %vm19_vm0, %v2517_v6, 0.0  ;;  %v7759_v34 = vsub.f32 %v7530_v50, %v7635_v56 }
 0x341   :  { %5818 = vmatprep.subr.bf16.mxu0 %v5894_v9  ;;  %v2548_v54 = vadd.f32 %v2547_v18, %v2546_v20  ;;  %3302 = vrot.lane.b32.xlu0 %v3270_v24, %s5949_s28  ;;  %v2520_v18 = vmul.f32 %v7743_v25, %v7743_v25  ;;  %v7767_v19 = vsub.f32 %v7533_v22, %v7635_v56 }
 0x342   :  { %v2559_v61 = vsel %vm19_vm0, %v2519_v8, 0.0  ;;  %v7774_v50 = vsub.f32 %v7546_v15, %v7635_v56  ;;  %v2522_v26 = vmul.f32 %v7759_v34, %v7759_v34  ;;  %v7781_v22 = vsub.f32 %v7549_v43, %v7635_v56 }
 0x343   :  { %v2550_v3 = vadd.f32 %v2549_v11, %v2548_v54  ;;  %v2557_v54 = vsel %vm19_vm0, %v2518_v44, 0.0  ;;  %v2561_v5 = vsel %vm19_vm0, %v2520_v18, 0.0  ;;  %v7788_v15 = vsub.f32 %v7560_v12, %v7635_v56 }
 0x344   :  { %5819 = vmatpush3.bf16.msra.mxu0 %v5894_v9  ;;  %3042 = vrot.lane.b32.xlu1 %v3010_v31, %s5949_s28  ;;  %v2524_v39 = vmul.f32 %v7774_v50, %v7774_v50  ;;  %v2565_v7 = vsel %vm19_vm0, %v2522_v26, 0.0  ;;  %v7795_v43 = vsub.f32 %v7563_v2, %v7635_v56  ;;  %v2525_v13 = vmul.f32 %v7781_v22, %v7781_v22 }
 0x345   :  { %5820 = vmatprep.subr.bf16.mxu0 %v5895_v29  ;;  %v2552_v55 = vadd.f32 %v2551_v10, %v2550_v3  ;;  %v2523_v3 = vmul.f32 %v7767_v19, %v7767_v19  ;;  %v7802_v12 = vsub.f32 %v7574_v37, %v7635_v56  ;;  %v7809_v2 = vsub.f32 %v7577_v58, %v7635_v56 }
 0x346   :  { %v2527_v8 = vmul.f32 %v7795_v43, %v7795_v43  ;;  %v7816_v37 = vsub.f32 %v7588_v23, %v7635_v56  ;;  %v7823_v58 = vsub.f32 %v7591_v28, %v7635_v56  ;;  %v7830_v23 = vsub.f32 %v7602_v21, %v7635_v56 }
 0x347   :  { %v2554_v9 = vadd.f32 %v2553_v49, %v2552_v55  ;;  %v2567_v24 = vsel %vm19_vm0, %v2523_v3, 0.0  ;;  %v2526_v49 = vmul.f32 %v7788_v15, %v7788_v15  ;;  %v2528_v18 = vmul.f32 %v7802_v12, %v7802_v12 }
 0x348   :  { %5821 = vmatpush3.bf16.msra.mxu0 %v5895_v29  ;;  %v2521_v29 = vmul.f32 %v7752_v63, %v7752_v63  ;;  %v2530_v26 = vmul.f32 %v7816_v37, %v7816_v37  ;;  %v7837_v28 = vsub.f32 %v7605_v38, %v7635_v56  ;;  %v2531_v3 = vmul.f32 %v7823_v58, %v7823_v58 }
 0x349   :  { %v2556_v20 = vadd.f32 %v2555_v57, %v2554_v9  ;;  %v2569_v9 = vsel %vm19_vm0, %v2524_v39, 0.0  ;;  %v2571_v57 = vsel %vm19_vm0, %v2525_v13, 0.0  ;;  %v2532_v21 = vmul.f32 %v7830_v23, %v7830_v23 }
 0x34a   :  { %v2563_v6 = vsel %vm19_vm0, %v2521_v29, 0.0  ;;  %v2529_v29 = vmul.f32 %v7809_v2, %v7809_v2  ;;  %v2581_v39 = vsel %vm19_vm0, %v2530_v26, 0.0  ;;  %v2583_v13 = vsel %vm19_vm0, %v2531_v3, 0.0 }
 0x34b   :  { %v2558_v36 = vadd.f32 %v2557_v54, %v2556_v20  ;;  %v2573_v54 = vsel %vm19_vm0, %v2526_v49, 0.0  ;;  %v2534_v38 = vmul.f32 %v7641_v32, %v7641_v32  ;;  %v2585_v56 = vsel %vm19_vm0, %v2532_v21, 0.0 }
 0x34c   :  { %v2535_v49 = vmul.f32 %v7644_v41, %v7644_v41  ;;  %v2539_v26 = vmul.f32 %v7656_v0, %v7656_v0  ;;  %v2540_v3 = vmul.f32 %v7659_v59, %v7659_v59  ;;  %v2541_v21 = vmul.f32 %v7662_v17, %v7662_v17 }
 0x34d   :  { %v2560_v11 = vadd.f32 %v2559_v61, %v2558_v36  ;;  %v2575_v61 = vsel %vm19_vm0, %v2527_v8, 0.0  ;;  %v2536_v8 = vmul.f32 %v7647_v40, %v7647_v40 }
 0x34f   :  { %v2562_v52 = vadd.f32 %v2561_v5, %v2560_v11  ;;  %v2577_v5 = vsel %vm19_vm0, %v2528_v18, 0.0  ;;  %v2537_v18 = vmul.f32 %v7650_v62, %v7650_v62 }
 0x351   :  { %v2564_v10 = vadd.f32 %v2563_v6, %v2562_v52  ;;  %v2579_v6 = vsel %vm19_vm0, %v2529_v29, 0.0  ;;  %v2538_v29 = vmul.f32 %v7653_v14, %v7653_v14 }
 0x353   :  { %v2566_v55 = vadd.f32 %v2565_v7, %v2564_v10 }
 0x355   :  { %v2568_v44 = vadd.f32 %v2567_v24, %v2566_v55  ;;  %v2533_v55 = vmul.f32 %v7837_v28, %v7837_v28 }
 0x357   :  { %v2570_v31 = vadd.f32 %v2569_v9, %v2568_v44  ;;  %v2587_v9 = vsel %vm19_vm0, %v2533_v55, 0.0  ;;  %v2601_v55 = vsel %vm19_vm0, %v2540_v3, 0.0  ;;  %v5897_v3 = vld [vmem:[%s10261_s2 + $0xc0] sm:$0xff]  }
 0x359   :  { %v2572_v20 = vadd.f32 %v2571_v57, %v2570_v31  ;;  %v2589_v57 = vsel %vm19_vm0, %v2534_v38, 0.0 }
 0x35b   :  { %v2574_v36 = vadd.f32 %v2573_v54, %v2572_v20  ;;  %v2591_v54 = vsel %vm19_vm0, %v2535_v49, 0.0 }
 0x35d   :  { %v2576_v11 = vadd.f32 %v2575_v61, %v2574_v36  ;;  %v2593_v61 = vsel %vm19_vm0, %v2536_v8, 0.0 }
 0x35f   :  { %v2578_v52 = vadd.f32 %v2577_v5, %v2576_v11  ;;  %v2595_v5 = vsel %vm19_vm0, %v2537_v18, 0.0 }
 0x361   :  { %v2580_v10 = vadd.f32 %v2579_v6, %v2578_v52  ;;  %v2597_v6 = vsel %vm19_vm0, %v2538_v29, 0.0  ;;  %v5896_v29 = vld [vmem:[%s10261_s2 + $0x100] sm:$0xff]  }
 0x362   :  { %5622 = vmatprep.subr.bf16.mxu1 %v5896_v29 }
 0x363   :  { %v2582_v7 = vadd.f32 %v2581_v39, %v2580_v10  ;;  %v2599_v39 = vsel %vm19_vm0, %v2539_v26, 0.0  ;;  %5623 = vmatpush3.bf16.msra.mxu1 %v5897_v3 }
 0x365   :  { %v2584_v24 = vadd.f32 %v2583_v13, %v2582_v7 }
 0x367   :  { %v2586_v44 = vadd.f32 %v2585_v56, %v2584_v24  ;;  %v2603_v24 = vsel %vm19_vm0, %v2541_v21, 0.0 }
 0x369   :  { %v2588_v31 = vadd.f32 %v2587_v9, %v2586_v44 }
 0x36b   :  { %v2590_v20 = vadd.f32 %v2589_v57, %v2588_v31 }
 0x36d   :  { %v2592_v36 = vadd.f32 %v2591_v54, %v2590_v20 }
 0x36f   :  { %v2594_v11 = vadd.f32 %v2593_v61, %v2592_v36 }
 0x371   :  { %v2596_v52 = vadd.f32 %v2595_v5, %v2594_v11 }
 0x373   :  { %v2598_v10 = vadd.f32 %v2597_v6, %v2596_v52 }
 0x375   :  { %v2600_v7 = vadd.f32 %v2599_v39, %v2598_v10 }
 0x377   :  { %v2602_v13 = vadd.f32 %v2601_v55, %v2600_v7 }
 0x379   :  { %v2604_v38 = vadd.f32 %v2603_v24, %v2602_v13 }
 0x37b   :  { %v2605_v56 = vrot.slane %v2604_v38, 4 }
 0x37d   :  { %v2606_v44 = vadd.f32 %v2605_v56, %v2604_v38 }
 0x37f   :  { %v2607_v49 = vrot.slane %v2606_v44, 2 }
 0x381   :  { %v2608_v9 = vadd.f32 %v2607_v49, %v2606_v44 }
 0x383   :  { %v2609_v31 = vrot.slane %v2608_v9, 1 }
 0x385   :  { %v2610_v8 = vadd.f32 %v2609_v31, %v2608_v9 }
 0x387   :  { %v2611_v57 = vmul.f32 0.00390625, %v2610_v8 }
 0x389   :  { %v2612_v20 = vadd.f32 1e-05, %v2611_v57 }
 0x38b   :  { %5912 = vrsqrt.f32 %v2612_v20 }
 0x395   :  { %v5913_v18 = vpop.eup %5912 }
 0x396   :  { %v2645_v54 = vmul.f32 %v5913_v18, %v7662_v17  ;;  %v7880_v11 = vmul.f32 %v5913_v18, %v7666_v60  ;;  %v7883_v26 = vmul.f32 %v5913_v18, %v7670_v4  ;;  %v7886_v5 = vmul.f32 %v5913_v18, %v7677_v33  ;;  %v5898_v60 = vld [vmem:[%s10261_s2 + $0x108] sm:$0xff]  }
 0x397   :  { %v7889_v17 = vmul.f32 %v5913_v18, %v7684_v42  ;;  %v7892_v52 = vmul.f32 %v5913_v18, %v7695_v16  ;;  %v7901_v4 = vmul.f32 %v5913_v18, %v7701_v1  ;;  %v7904_v33 = vmul.f32 %v5913_v18, %v7712_v27  ;;  %5624 = vmatprep.subr.bf16.mxu1 %v5898_v60 }
 0x398   :  { %vm2677_vm7 = vcmp.ge.f32.partialorder %v2645_v54, 0.0  ;;  %v2709_v36 = vmul.f32 0.01, %v2645_v54  ;;  %v7907_v42 = vmul.f32 %v5913_v18, %v7719_v51  ;;  %v7910_v16 = vmul.f32 %v5913_v18, %v7729_v30 }
 0x399   :  { %v7913_v6 = vmul.f32 %v5913_v18, %v7736_v35  ;;  %v7916_v10 = vmul.f32 %v5913_v18, %v7743_v25  ;;  %v7919_v21 = vmul.f32 %v5913_v18, %v7656_v0  ;;  %v7922_v1 = vmul.f32 %v5913_v18, %v7659_v59 }
 0x39a   :  { %v2741_v61 = vsel %vm2677_vm7, %v2645_v54, %v2709_v36  ;;  %v7925_v27 = vmul.f32 %v5913_v18, %v7752_v63  ;;  %v7928_v51 = vmul.f32 %v5913_v18, %v7759_v34  ;;  %v7931_v30 = vmul.f32 %v5913_v18, %v7767_v19  ;;  %v5899_v34 = vld [vmem:[%s10261_s2 + $0xc8] sm:$0xff]  }
 0x39b   :  { %2773 = vst.msk [vmem:[#allocation2 + $0x210] sm:$0xff] %vm19_vm0, %v2741_v61  ;;  %v7934_v35 = vmul.f32 %v5913_v18, %v7774_v50  ;;  %v7937_v0 = vmul.f32 %v5913_v18, %v7781_v22  ;;  %v7940_v59 = vmul.f32 %v5913_v18, %v7788_v15  ;;  %v7943_v25 = vmul.f32 %v5913_v18, %v7795_v43  ;;  %v5900_v43 = vld [vmem:[%s10261_s2 + $0x110] sm:$0xff]  }
 0x39c   :  { %v7946_v63 = vmul.f32 %v5913_v18, %v7802_v12  ;;  %v7952_v19 = vmul.f32 %v5913_v18, %v7809_v2  ;;  %v7955_v50 = vmul.f32 %v5913_v18, %v7816_v37  ;;  %v7958_v22 = vmul.f32 %v5913_v18, %v7823_v58  ;;  %5625 = vmatpush3.bf16.msra.mxu1 %v5899_v34 }
 0x39d   :  { %v7961_v15 = vmul.f32 %v5913_v18, %v7830_v23  ;;  %v7967_v12 = vmul.f32 %v5913_v18, %v7837_v28  ;;  %v7970_v39 = vmul.f32 %v5913_v18, %v7641_v32  ;;  %v7973_v2 = vmul.f32 %v5913_v18, %v7644_v41  ;;  %v2774_v23 = vld [vmem:[#allocation2 + $0x7] sm:$0xff]  ;;  %5626 = vmatprep.subr.bf16.mxu1 %v5900_v43  ;;  %v2775_v41 = vld [vmem:[#allocation2 + $0xf] sm:$0xff] }
 0x39e   :  { %v7976_v37 = vmul.f32 %v5913_v18, %v7647_v40  ;;  %v7979_v58 = vmul.f32 %v5913_v18, %v7650_v62  ;;  %vm2646_vm8 = vcmp.ge.f32.partialorder %v7880_v11, 0.0  ;;  %vm2647_vm10 = vcmp.ge.f32.partialorder %v7883_v26, 0.0  ;;  %v5901_v40 = vld [vmem:[%s10261_s2 + $0xd0] sm:$0xff]   ;;  %v5902_v62 = vld [vmem:[%s10261_s2 + $0x118] sm:$0xff]  }
 0x39f   :  { %vm2648_vm11 = vcmp.ge.f32.partialorder %v7886_v5, 0.0  ;;  %v7985_v32 = vmul.f32 %v5913_v18, %v7653_v14  ;;  %vm2649_vm13 = vcmp.ge.f32.partialorder %v7889_v17, 0.0  ;;  %vm2650_vm14 = vcmp.ge.f32.partialorder %v7892_v52, 0.0 }
 0x3a0   :  { %vm2651_vm15 = vcmp.ge.f32.partialorder %v7901_v4, 0.0  ;;  %vm2652_vm1 = vcmp.ge.f32.partialorder %v7904_v33, 0.0  ;;  %vm2656_vm5 = vcmp.ge.f32.partialorder %v7916_v10, 0.0  ;;  %vm2657_vm7 = vcmp.ge.f32.partialorder %v7925_v27, 0.0  ;;  %5627 = vmatpush3.bf16.msra.mxu1 %v5901_v40 }
 0x3a1   :  { %v2678_v14 = vmul.f32 0.01, %v7880_v11  ;;  %v2679_v28 = vmul.f32 0.01, %v7883_v26  ;;  %vm2662_vm3 = vcmp.ge.f32.partialorder %v7940_v59, 0.0  ;;  %v2882_v24 = vpack.c.bf16 %v2775_v41, %v2774_v23  ;;  %5628 = vmatprep.subr.bf16.mxu1 %v5902_v62 }
 0x3a2   :  { %v2680_v7 = vmul.f32 0.01, %v7886_v5  ;;  %v2681_v55 = vmul.f32 0.01, %v7889_v17  ;;  %v2682_v13 = vmul.f32 0.01, %v7892_v52 }
 0x3a3   :  { %vm2667_vm2 = vcmp.ge.f32.partialorder %v7958_v22, 0.0  ;;  %v2683_v38 = vmul.f32 0.01, %v7901_v4  ;;  %v2684_v56 = vmul.f32 0.01, %v7904_v33  ;;  %v2710_v49 = vsel %vm2646_vm8, %v7880_v11, %v2678_v14  ;;  %2898 = vst.msk [vmem:[#allocation4] sm:$0xff] %vm19_vm0, %v2882_v24 }
 0x3a4   :  { %v2685_v44 = vmul.f32 0.01, %v7907_v42  ;;  %vm2668_vm4 = vcmp.ge.f32.partialorder %v7961_v15, 0.0  ;;  %v2686_v9 = vmul.f32 0.01, %v7910_v16  ;;  %v2711_v57 = vsel %vm2647_vm10, %v7883_v26, %v2679_v28  ;;  %2742 = vst.msk [vmem:[#allocation2 + $0x28] sm:$0xff] %vm19_vm0, %v2710_v49 }
 0x3a5   :  { %v2687_v31 = vmul.f32 0.01, %v7913_v6  ;;  %v2688_v8 = vmul.f32 0.01, %v7916_v10  ;;  %vm2672_vm8 = vcmp.ge.f32.partialorder %v7976_v37, 0.0  ;;  %vm2673_vm6 = vcmp.ge.f32.partialorder %v7979_v58, 0.0 }
 0x3a6   :  { %vm2674_vm9 = vcmp.ge.f32.partialorder %v7985_v32, 0.0  ;;  %vm2675_vm12 = vcmp.ge.f32.partialorder %v7919_v21, 0.0  ;;  %v2689_v20 = vmul.f32 0.01, %v7925_v27  ;;  %v2690_v18 = vmul.f32 0.01, %v7928_v51 }
 0x3a7   :  { %v2691_v54 = vmul.f32 0.01, %v7931_v30  ;;  %v2712_v36 = vsel %vm2648_vm11, %v7886_v5, %v2680_v7  ;;  %2743 = vst.msk [vmem:[#allocation2 + $0x30] sm:$0xff] %vm19_vm0, %v2711_v57  ;;  %vm2676_vm10 = vcmp.ge.f32.partialorder %v7922_v1, 0.0  ;;  %v2692_v29 = vmul.f32 0.01, %v7934_v35 }
 0x3a8   :  { %v2693_v61 = vmul.f32 0.01, %v7937_v0  ;;  %v2694_v11 = vmul.f32 0.01, %v7940_v59  ;;  %v2713_v26 = vsel %vm2649_vm13, %v7889_v17, %v2681_v55  ;;  %2744 = vst.msk [vmem:[#allocation2 + $0x48] sm:$0xff] %vm19_vm0, %v2712_v36  ;;  %v2714_v34 = vsel %vm2650_vm14, %v7892_v52, %v2682_v13 }
 0x3a9   :  { %v2695_v3 = vmul.f32 0.01, %v7943_v25  ;;  %v2696_v5 = vmul.f32 0.01, %v7946_v63  ;;  %v2697_v60 = vmul.f32 0.01, %v7952_v19  ;;  %v2715_v41 = vsel %vm2651_vm15, %v7901_v4, %v2683_v38 }
 0x3aa   :  { %2745 = vst.msk [vmem:[#allocation2 + $0x50] sm:$0xff] %vm19_vm0, %v2713_v26  ;;  %v2698_v43 = vmul.f32 0.01, %v7955_v50  ;;  %v2699_v23 = vmul.f32 0.01, %v7958_v22  ;;  %2746 = vst.msk [vmem:[#allocation2 + $0x68] sm:$0xff] %vm19_vm0, %v2714_v34  ;;  %v2716_v14 = vsel %vm2652_vm1, %v7904_v33, %v2684_v56  ;;  %v2721_v56 = vsel %vm2657_vm7, %v7925_v27, %v2689_v20 }
 0x3ab   :  { %v2700_v17 = vmul.f32 0.01, %v7961_v15  ;;  %v2701_v40 = vmul.f32 0.01, %v7967_v12  ;;  %v2702_v62 = vmul.f32 0.01, %v7970_v39 }
 0x3ac   :  { %v2703_v52 = vmul.f32 0.01, %v7973_v2  ;;  %2747 = vst.msk [vmem:[#allocation2 + $0x70] sm:$0xff] %vm19_vm0, %v2715_v41  ;;  %v2704_v28 = vmul.f32 0.01, %v7976_v37  ;;  %vm10296_vm11 = vcmp.ge.f32.partialorder %v7907_v42, 0.0 }
 0x3ad   :  { %v2705_v7 = vmul.f32 0.01, %v7979_v58  ;;  %v2706_v4 = vmul.f32 0.01, %v7985_v32  ;;  %v2717_v55 = vsel %vm10296_vm11, %v7907_v42, %v2685_v44  ;;  %2748 = vst.msk [vmem:[#allocation2 + $0x88] sm:$0xff] %vm19_vm0, %v2716_v14  ;;  %vm10297_vm13 = vcmp.ge.f32.partialorder %v7910_v16, 0.0 }
 0x3ae   :  { %v2707_v13 = vmul.f32 0.01, %v7919_v21  ;;  %v2708_v24 = vmul.f32 0.01, %v7922_v1  ;;  %v2718_v33 = vsel %vm10297_vm13, %v7910_v16, %v2686_v9  ;;  %vm10298_vm14 = vcmp.ge.f32.partialorder %v7913_v6, 0.0  ;;  %2749 = vst.msk [vmem:[#allocation2 + $0x90] sm:$0xff] %vm19_vm0, %v2717_v55 }
 0x3af   :  { %v2719_v38 = vsel %vm10298_vm14, %v7913_v6, %v2687_v31  ;;  %v2720_v42 = vsel %vm2656_vm5, %v7916_v10, %v2688_v8  ;;  %vm10299_vm15 = vcmp.ge.f32.partialorder %v7928_v51, 0.0  ;;  %vm10300_vm1 = vcmp.ge.f32.partialorder %v7931_v30, 0.0  ;;  %2750 = vst.msk [vmem:[#allocation2 + $0xa8] sm:$0xff] %vm19_vm0, %v2718_v33  ;;  %v2848_v6 = vld [vmem:[#allocation2 + $0x29] sm:$0xff]  ;;  %v2849_v49 = vld [vmem:[#allocation2 + $0x31] sm:$0xff]  ;;  %2753 = vst.msk [vmem:[#allocation2 + $0xd0] sm:$0xff] %vm19_vm0, %v2721_v56 }
 0x3b0   :  { %v2722_v44 = vsel %vm10299_vm15, %v7928_v51, %v2690_v18  ;;  %v2723_v16 = vsel %vm10300_vm1, %v7931_v30, %v2691_v54  ;;  %2751 = vst.msk [vmem:[#allocation2 + $0xb0] sm:$0xff] %vm19_vm0, %v2719_v38  ;;  %v2776_v9 = vld [vmem:[#allocation2 + $0x27] sm:$0xff]  ;;  %v2777_v10 = vld [vmem:[#allocation2 + $0x2f] sm:$0xff]  ;;  %vm10301_vm5 = vcmp.ge.f32.partialorder %v7934_v35, 0.0  ;;  %vm10302_vm7 = vcmp.ge.f32.partialorder %v7937_v0, 0.0  ;;  %2752 = vst.msk [vmem:[#allocation2 + $0xc8] sm:$0xff] %vm19_vm0, %v2720_v42 }
 0x3b1   :  { %v2724_v27 = vsel %vm10301_vm5, %v7934_v35, %v2692_v29  ;;  %v2725_v51 = vsel %vm10302_vm7, %v7937_v0, %v2693_v61  ;;  %v2726_v30 = vsel %vm2662_vm3, %v7940_v59, %v2694_v11  ;;  %vm10303_vm11 = vcmp.ge.f32.partialorder %v7943_v25, 0.0  ;;  %2754 = vst.msk [vmem:[#allocation2 + $0xe8] sm:$0xff] %vm19_vm0, %v2722_v44  ;;  %2755 = vst.msk [vmem:[#allocation2 + $0xf0] sm:$0xff] %vm19_vm0, %v2723_v16  ;;  %v2778_v35 = vld [vmem:[#allocation2 + $0x47] sm:$0xff]  ;;  %v2813_v57 = vld [vmem:[#allocation2 + $0x30] sm:$0xff] }
 0x3b2   :  { %v2727_v31 = vsel %vm10303_vm11, %v7943_v25, %v2695_v3  ;;  %v2812_v8 = vld [vmem:[#allocation2 + $0x28] sm:$0xff]  ;;  %vm10304_vm13 = vcmp.ge.f32.partialorder %v7946_v63, 0.0  ;;  %vm10305_vm3 = vcmp.ge.f32.partialorder %v7952_v19, 0.0  ;;  %vm10306_vm14 = vcmp.ge.f32.partialorder %v7955_v50, 0.0  ;;  %2756 = vst.msk [vmem:[#allocation2 + $0x108] sm:$0xff] %vm19_vm0, %v2724_v27  ;;  %2757 = vst.msk [vmem:[#allocation2 + $0x110] sm:$0xff] %vm19_vm0, %v2725_v51 }
 0x3b3   :  { %v2814_v0 = vld [vmem:[#allocation2 + $0x48] sm:$0xff]  ;;  %v2728_v59 = vsel %vm10304_vm13, %v7946_v63, %v2696_v5  ;;  %v2729_v25 = vsel %vm10305_vm3, %v7952_v19, %v2697_v60  ;;  %v2730_v20 = vsel %vm10306_vm14, %v7955_v50, %v2698_v43  ;;  %v2731_v18 = vsel %vm2667_vm2, %v7958_v22, %v2699_v23  ;;  %2758 = vst.msk [vmem:[#allocation2 + $0x128] sm:$0xff] %vm19_vm0, %v2726_v30  ;;  %v2851_v36 = vld [vmem:[#allocation2 + $0x51] sm:$0xff] }
 0x3b4   :  { %2759 = vst.msk [vmem:[#allocation2 + $0x130] sm:$0xff] %vm19_vm0, %v2727_v31  ;;  %v2779_v63 = vld [vmem:[#allocation2 + $0x4f] sm:$0xff]  ;;  %v2732_v19 = vsel %vm2668_vm4, %v7961_v15, %v2700_v17  ;;  %vm10307_vm15 = vcmp.ge.f32.partialorder %v7967_v12, 0.0  ;;  %vm10308_vm2 = vcmp.ge.f32.partialorder %v7970_v39, 0.0  ;;  %vm10309_vm1 = vcmp.ge.f32.partialorder %v7973_v2, 0.0  ;;  %2760 = vst.msk [vmem:[#allocation2 + $0x148] sm:$0xff] %vm19_vm0, %v2728_v59 }
 0x3b5   :  { %v2850_v54 = vld [vmem:[#allocation2 + $0x49] sm:$0xff]  ;;  %v2733_v50 = vsel %vm10307_vm15, %v7967_v12, %v2701_v40  ;;  %v2734_v22 = vsel %vm10308_vm2, %v7970_v39, %v2702_v62  ;;  %v2735_v29 = vsel %vm10309_vm1, %v7973_v2, %v2703_v52  ;;  %2761 = vst.msk [vmem:[#allocation2 + $0x150] sm:$0xff] %vm19_vm0, %v2729_v25  ;;  %2762 = vst.msk [vmem:[#allocation2 + $0x168] sm:$0xff] %vm19_vm0, %v2730_v20  ;;  %v2853_v3 = vld [vmem:[#allocation2 + $0x71] sm:$0xff]  ;;  %vm10313_vm4 = vcmask 1048320  }
 0x3b6   :  { %2763 = vst.msk [vmem:[#allocation2 + $0x170] sm:$0xff] %vm19_vm0, %v2731_v18  ;;  %v2815_v15 = vld [vmem:[#allocation2 + $0x50] sm:$0xff]  ;;  %v2780_v61 = vld [vmem:[#allocation2 + $0x67] sm:$0xff]  ;;  %v2736_v12 = vsel %vm2672_vm8, %v7976_v37, %v2704_v28  ;;  %v2737_v39 = vsel %vm2673_vm6, %v7979_v58, %v2705_v7  ;;  %v2738_v2 = vsel %vm2674_vm9, %v7985_v32, %v2706_v4  ;;  %v2739_v26 = vsel %vm2675_vm12, %v7919_v21, %v2707_v13  ;;  %vm10316_vm5 = vmmov %vm10313_vm4 }
 0x3b7   :  { %v2816_v11 = vld [vmem:[#allocation2 + $0x68] sm:$0xff]  ;;  %2764 = vst.msk [vmem:[#allocation2 + $0x188] sm:$0xff] %vm19_vm0, %v2732_v19  ;;  %2765 = vst.msk [vmem:[#allocation2 + $0x190] sm:$0xff] %vm19_vm0, %v2733_v50  ;;  %v2740_v58 = vsel %vm2676_vm10, %v7922_v1, %v2708_v24  ;;  %v8176_v21 = vpack.c.bf16 %v2849_v49, %v2848_v6  ;;  %v2883_v32 = vpack.c.bf16 %v2777_v10, %v2776_v9  ;;  %v2817_v34 = vld [vmem:[#allocation2 + $0x70] sm:$0xff]  ;;  %v2947_v6 = vpop.permute.xlu1 %2946  ;;  %vm10310_vm9 = vcmask 523520  }
 0x3b8   :  { %2766 = vst.msk [vmem:[#allocation2 + $0x1a8] sm:$0xff] %vm19_vm0, %v2734_v22  ;;  %2767 = vst.msk [vmem:[#allocation2 + $0x1b0] sm:$0xff] %vm19_vm0, %v2735_v29  ;;  %v2852_v37 = vld [vmem:[#allocation2 + $0x69] sm:$0xff]  ;;  %v8178_v60 = vpack.c.bf16 %v2779_v63, %v2778_v35  ;;  %v2915_v17 = vpack.c.bf16 %v2813_v57, %v2812_v8  ;;  %v8181_v1 = vpack.c.bf16 %v2851_v36, %v2850_v54  ;;  %v2855_v52 = vld [vmem:[#allocation2 + $0x91] sm:$0xff]  ;;  %vm10311_vm12 = vcmask 785920  }
 0x3b9   :  { %v2781_v5 = vld [vmem:[#allocation2 + $0x6f] sm:$0xff]  ;;  %2768 = vst.msk [vmem:[#allocation2 + $0x1c8] sm:$0xff] %vm19_vm0, %v2736_v12  ;;  %2769 = vst.msk [vmem:[#allocation2 + $0x1d0] sm:$0xff] %vm19_vm0, %v2737_v39  ;;  %v2782_v43 = vld [vmem:[#allocation2 + $0x87] sm:$0xff]  ;;  %v8183_v41 = vpack.c.bf16 %v2815_v15, %v2814_v0  ;;  %v8185_v40 = vpack.c.bf16 %v2853_v3, %v2852_v37  ;;  %3206 = vrot.lane.b32.xlu0 %v8176_v21, %s5948_s23  ;;  %3123 = vrot.lane.b32.xlu1 %v2883_v32, %s5950_s0 }
 0x3ba   :  { %2770 = vst.msk [vmem:[#allocation2 + $0x1e8] sm:$0xff] %vm19_vm0, %v2738_v2  ;;  %2771 = vst.msk [vmem:[#allocation2 + $0x1f0] sm:$0xff] %vm19_vm0, %v2739_v26  ;;  %v2818_v23 = vld [vmem:[#allocation2 + $0x88] sm:$0xff]  ;;  %v8195_v7 = vpack.c.bf16 %v2781_v5, %v2780_v61  ;;  %v2857_v55 = vld [vmem:[#allocation2 + $0xb1] sm:$0xff]  ;;  %v8197_v13 = vpack.c.bf16 %v2817_v34, %v2816_v11 }
 0x3bb   :  { %2772 = vst.msk [vmem:[#allocation2 + $0x208] sm:$0xff] %vm19_vm0, %v2740_v58  ;;  %v2854_v62 = vld [vmem:[#allocation2 + $0x89] sm:$0xff]  ;;  %2899 = vst.msk [vmem:[#allocation4 + $0x18] sm:$0xff] %vm19_vm0, %v2883_v32  ;;  %v2859_v42 = vld [vmem:[#allocation2 + $0xd1] sm:$0xff]  ;;  %v3043_v19 = vpop.permute.xlu1 %3042 }
 0x3bc   :  { %v2783_v14 = vld [vmem:[#allocation2 + $0x8f] sm:$0xff]  ;;  %2900 = vst.msk [vmem:[#allocation4 + $0x30] sm:$0xff] %vm19_vm0, %v8178_v60  ;;  %v8193_v28 = vpack.c.bf16 %v2855_v52, %v2854_v62  ;;  %3188 = vst.msk [vmem:[#allocation4 + $0x8] sm:$0xff] %vm19_vm0, %v2915_v17  ;;  %v2784_v59 = vld [vmem:[#allocation2 + $0xa7] sm:$0xff] }
 0x3bd   :  { %v2856_v4 = vld [vmem:[#allocation2 + $0xa9] sm:$0xff]  ;;  %3404 = vst.msk [vmem:[#allocation4 + $0x10] sm:$0xff] %vm19_vm0, %v8181_v1  ;;  %3189 = vst.msk [vmem:[#allocation4 + $0x20] sm:$0xff] %vm19_vm0, %v8183_v41  ;;  %v8208_v44 = vpack.c.bf16 %v2783_v14, %v2782_v43  ;;  %v2861_v9 = vld [vmem:[#allocation2 + $0xf1] sm:$0xff]  ;;  %3272 = vrot.lane.b32.xlu0 %v8178_v60, %s5949_s28  ;;  %2948 = vrot.lane.b32.xlu1 %v2915_v17, %s5948_s23 }
 0x3be   :  { %v2819_v24 = vld [vmem:[#allocation2 + $0x90] sm:$0xff]  ;;  %3405 = vst.msk [vmem:[#allocation4 + $0x28] sm:$0xff] %vm19_vm0, %v8185_v40  ;;  %v8206_v33 = vpack.c.bf16 %v2857_v55, %v2856_v4  ;;  %3406 = vst.msk [vmem:[#allocation4 + $0x40] sm:$0xff] %vm19_vm0, %v8193_v28  ;;  %v2820_v29 = vld [vmem:[#allocation2 + $0xa8] sm:$0xff] }
 0x3bf   :  { %v2858_v38 = vld [vmem:[#allocation2 + $0xc9] sm:$0xff]  ;;  %v8210_v16 = vpack.c.bf16 %v2819_v24, %v2818_v23  ;;  %2901 = vst.msk [vmem:[#allocation4 + $0x48] sm:$0xff] %vm19_vm0, %v8195_v7  ;;  %3190 = vst.msk [vmem:[#allocation4 + $0x38] sm:$0xff] %vm19_vm0, %v8197_v13  ;;  %v2863_v27 = vld [vmem:[#allocation2 + $0x111] sm:$0xff] }
 0x3c0   :  { %v2860_v56 = vld [vmem:[#allocation2 + $0xe9] sm:$0xff]  ;;  %v8216_v49 = vpack.c.bf16 %v2859_v42, %v2858_v38  ;;  %2994 = vst.msk [vmem:[#allocation4] sm:$0xff] %vm10310_vm9, %v2947_v6  ;;  %v2865_v35 = vld [vmem:[#allocation2 + $0x131] sm:$0xff]  ;;  %vm10312_vm6 = vmmov %vm10310_vm9 }
 0x3c1   :  { %v2862_v10 = vld [vmem:[#allocation2 + $0x109] sm:$0xff]  ;;  %3407 = vst.msk [vmem:[#allocation4 + $0x58] sm:$0xff] %vm19_vm0, %v8206_v33  ;;  %v8223_v51 = vpack.c.bf16 %v2861_v9, %v2860_v56  ;;  %2902 = vst.msk [vmem:[#allocation4 + $0x60] sm:$0xff] %vm19_vm0, %v8208_v44  ;;  %v2867_v0 = vld [vmem:[#allocation2 + $0x151] sm:$0xff]  ;;  %3339 = vrot.lane.b32.xlu0 %v8183_v41, %s5950_s0  ;;  %3044 = vrot.lane.b32.xlu1 %v8176_v21, %s5949_s28 }
 0x3c2   :  { %v8225_v30 = vpack.c.bf16 %v2863_v27, %v2862_v10  ;;  %3191 = vst.msk [vmem:[#allocation4 + $0x50] sm:$0xff] %vm19_vm0, %v8210_v16  ;;  %v2864_v31 = vld [vmem:[#allocation2 + $0x129] sm:$0xff]  ;;  %3408 = vst.msk [vmem:[#allocation4 + $0x70] sm:$0xff] %vm19_vm0, %v8216_v49  ;;  %v2869_v54 = vld [vmem:[#allocation2 + $0x171] sm:$0xff] }
 0x3c3   :  { %v2866_v8 = vld [vmem:[#allocation2 + $0x149] sm:$0xff]  ;;  %v8236_v57 = vpack.c.bf16 %v2865_v35, %v2864_v31  ;;  %3409 = vst.msk [vmem:[#allocation4 + $0x88] sm:$0xff] %vm19_vm0, %v8223_v51  ;;  %v2871_v22 = vld [vmem:[#allocation2 + $0x191] sm:$0xff]  ;;  %vm10314_vm8 = vmmov %vm10311_vm12 }
 0x3c4   :  { %v2785_v25 = vld [vmem:[#allocation2 + $0xaf] sm:$0xff]  ;;  %3410 = vst.msk [vmem:[#allocation4 + $0xa0] sm:$0xff] %vm19_vm0, %v8225_v30  ;;  %v8242_v20 = vpack.c.bf16 %v2867_v0, %v2866_v8  ;;  %v2786_v32 = vld [vmem:[#allocation2 + $0xc7] sm:$0xff]  ;;  %vm10315_vm10 = vmmov %vm10312_vm6 }
 0x3c5   :  { %v8244_v18 = vpack.c.bf16 %v2785_v25, %v2784_v59  ;;  %v2868_v63 = vld [vmem:[#allocation2 + $0x169] sm:$0xff]  ;;  %3411 = vst.msk [vmem:[#allocation4 + $0xb8] sm:$0xff] %vm19_vm0, %v8236_v57  ;;  %v2873_v39 = vld [vmem:[#allocation2 + $0x1b1] sm:$0xff]  ;;  %v3428_v21 = vld [vmem:[#allocation4 + $0x40] sm:$0xff]  ;;  %3208 = vrot.lane.b32.xlu0 %v8181_v1, %s5948_s23  ;;  %3125 = vrot.lane.b32.xlu1 %v8178_v60, %s5950_s0 }
 0x3c6   :  { %v2870_v36 = vld [vmem:[#allocation2 + $0x189] sm:$0xff]  ;;  %v8248_v50 = vpack.c.bf16 %v2869_v54, %v2868_v63  ;;  %3090 = vst.msk [vmem:[#allocation4] sm:$0xff] %vm10311_vm12, %v3043_v19  ;;  %v2875_v5 = vld [vmem:[#allocation2 + $0x1d1] sm:$0xff]  ;;  %vm10317_vm7 = vmmov %vm10314_vm8 }
 0x3c7   :  { %v2821_v15 = vld [vmem:[#allocation2 + $0xb0] sm:$0xff]  ;;  %3412 = vst.msk [vmem:[#allocation4 + $0xd0] sm:$0xff] %vm19_vm0, %v8242_v20  ;;  %2903 = vst.msk [vmem:[#allocation4 + $0x78] sm:$0xff] %vm19_vm0, %v8244_v18  ;;  %v8255_v61 = vpack.c.bf16 %v2871_v22, %v2870_v36  ;;  %v3425_v37 = vld [vmem:[#allocation4 + $0x28] sm:$0xff] }
 0x3c8   :  { %v8257_v11 = vpack.c.bf16 %v2821_v15, %v2820_v29  ;;  %v2872_v12 = vld [vmem:[#allocation2 + $0x1a9] sm:$0xff]  ;;  %3413 = vst.msk [vmem:[#allocation4 + $0xe8] sm:$0xff] %vm19_vm0, %v8248_v50  ;;  %v2879_v43 = vld [vmem:[#allocation2 + $0x211] sm:$0xff]  ;;  %vm10318_vm11 = vmmov %vm10312_vm6 }
 0x3c9   :  { %v2874_v2 = vld [vmem:[#allocation2 + $0x1c9] sm:$0xff]  ;;  %v8265_v3 = vpack.c.bf16 %v2873_v39, %v2872_v12  ;;  %3414 = vst.msk [vmem:[#allocation4 + $0x100] sm:$0xff] %vm19_vm0, %v8255_v61  ;;  %v2877_v4 = vld [vmem:[#allocation2 + $0x1f1] sm:$0xff]  ;;  %3274 = vrot.lane.b32.xlu0 %v8195_v7, %s5949_s28  ;;  %2950 = vrot.lane.b32.xlu1 %v8183_v41, %s5948_s23  ;;  %vm10319_vm13 = vmmov %vm10313_vm4 }
 0x3ca   :  { %v3422_v26 = vld [vmem:[#allocation4 + $0x10] sm:$0xff]  ;;  %3192 = vst.msk [vmem:[#allocation4 + $0x68] sm:$0xff] %vm19_vm0, %v8257_v11  ;;  %v8271_v58 = vpack.c.bf16 %v2875_v5, %v2874_v2  ;;  %v2822_v17 = vld [vmem:[#allocation2 + $0xc8] sm:$0xff]  ;;  %v3431_v59 = vld [vmem:[#allocation4 + $0x58] sm:$0xff] }
 0x3cb   :  { %5822 = vmatprep.mubr.bf16.mxu0 %v3422_v26  ;;  %v2787_v34 = vld [vmem:[#allocation2 + $0xcf] sm:$0xff]  ;;  %3415 = vst.msk [vmem:[#allocation4 + $0x118] sm:$0xff] %vm19_vm0, %v8265_v3  ;;  %v2788_v42 = vld [vmem:[#allocation2 + $0xe7] sm:$0xff]  ;;  %vm10320_vm3 = vmmov %vm10317_vm7 }
 0x3cc   :  { %5823 = vmatmul.mubr.bf16.vlgmr.msra.gmra.mrb[64].mxu0 %v3425_v37  ;;  %v8275_v23 = vpack.c.bf16 %v2787_v34, %v2786_v32  ;;  %v2823_v62 = vld [vmem:[#allocation2 + $0xd0] sm:$0xff]  ;;  %3416 = vst.msk [vmem:[#allocation4 + $0x130] sm:$0xff] %vm19_vm0, %v8271_v58  ;;  %v2824_v9 = vld [vmem:[#allocation2 + $0xe8] sm:$0xff]  ;;  %vm10321_vm14 = vmmov %vm10312_vm6 }
 0x3cd   :  { %5826 = vmatprep.mubr.bf16.mxu0 %v3428_v21  ;;  %v8279_v52 = vpack.c.bf16 %v2823_v62, %v2822_v17  ;;  %v2876_v14 = vld [vmem:[#allocation2 + $0x1e9] sm:$0xff]  ;;  %3341 = vrot.lane.b32.xlu0 %v8197_v13, %s5950_s0  ;;  %vm10322_vm15 = vmmov %vm10313_vm4 }
 0x3ce   :  { %2904 = vst.msk [vmem:[#allocation4 + $0x90] sm:$0xff] %vm19_vm0, %v8275_v23  ;;  %v8287_v55 = vpack.c.bf16 %v2877_v4, %v2876_v14  ;;  %v2878_v24 = vld [vmem:[#allocation2 + $0x209] sm:$0xff]  ;;  %3046 = vrot.lane.b32.xlu1 %v8181_v1, %s5949_s28  ;;  %v5904_v1 = vld [vmem:[%s10261_s2 + $0x120] sm:$0xff]   ;;  %vm10323_vm2 = vmmov %vm10320_vm3 }
 0x3cf   :  { %3193 = vst.msk [vmem:[#allocation4 + $0x80] sm:$0xff] %vm19_vm0, %v8279_v52  ;;  %v8291_v38 = vpack.c.bf16 %v2879_v43, %v2878_v24  ;;  %v2789_v56 = vld [vmem:[#allocation2 + $0xef] sm:$0xff]  ;;  %v2790_v27 = vld [vmem:[#allocation2 + $0x107] sm:$0xff]  ;;  %v5903_v43 = vld [vmem:[%s10261_s2 + $0xd8] sm:$0xff]  }
 0x3d0   :  { %3417 = vst.msk [vmem:[#allocation4 + $0x148] sm:$0xff] %vm19_vm0, %v8287_v55  ;;  %v8295_v6 = vpack.c.bf16 %v2789_v56, %v2788_v42  ;;  %v2825_v60 = vld [vmem:[#allocation2 + $0xf0] sm:$0xff]  ;;  %v2826_v8 = vld [vmem:[#allocation2 + $0x108] sm:$0xff]  ;;  %5629 = vmatpush3.bf16.msra.mxu1 %v5903_v43  ;;  %v5905_v14 = vld [vmem:[%s10261_s2 + $0xe0] sm:$0xff]  }
 0x3d1   :  { %3418 = vst.msk [vmem:[#allocation4 + $0x160] sm:$0xff] %vm19_vm0, %v8291_v38  ;;  %v8299_v10 = vpack.c.bf16 %v2825_v60, %v2824_v9  ;;  %v2791_v31 = vld [vmem:[#allocation2 + $0x10f] sm:$0xff]  ;;  %v2792_v63 = vld [vmem:[#allocation2 + $0x127] sm:$0xff]  ;;  %3210 = vrot.lane.b32.xlu0 %v8185_v40, %s5948_s23  ;;  %5630 = vmatprep.subr.bf16.mxu1 %v5904_v1  ;;  %vm10324_vm1 = vmmov %vm10312_vm6 }
 0x3d2   :  { %2905 = vst.msk [vmem:[#allocation4 + $0xa8] sm:$0xff] %vm19_vm0, %v8295_v6  ;;  %v8307_v35 = vpack.c.bf16 %v2791_v31, %v2790_v27  ;;  %v2827_v0 = vld [vmem:[#allocation2 + $0x110] sm:$0xff]  ;;  %v2828_v19 = vld [vmem:[#allocation2 + $0x128] sm:$0xff]  ;;  %3127 = vrot.lane.b32.xlu1 %v8195_v7, %s5950_s0  ;;  %v3440_v56 = vld [vmem:[#allocation4 + $0xa0] sm:$0xff] }
 0x3d3   :  { %3194 = vst.msk [vmem:[#allocation4 + $0x98] sm:$0xff] %vm19_vm0, %v8299_v10  ;;  %v8311_v25 = vpack.c.bf16 %v2827_v0, %v2826_v8  ;;  %v2793_v54 = vld [vmem:[#allocation2 + $0x12f] sm:$0xff]  ;;  %v2794_v15 = vld [vmem:[#allocation2 + $0x147] sm:$0xff]  ;;  %vm10325_vm9 = vmmov %vm10313_vm4 }
 0x3d4   :  { %5827 = vmatmul.mubr.bf16.gmra.mrb[68].mxu0 %v3431_v59  ;;  %v3434_v36 = vld [vmem:[#allocation4 + $0x70] sm:$0xff]  ;;  %2906 = vst.msk [vmem:[#allocation4 + $0xc0] sm:$0xff] %vm19_vm0, %v8307_v35  ;;  %v8315_v41 = vpack.c.bf16 %v2793_v54, %v2792_v63  ;;  %v2830_v39 = vld [vmem:[#allocation2 + $0x148] sm:$0xff]  ;;  %5631 = vmatpush3.bf16.msra.mxu1 %v5905_v14  ;;  %vm10326_vm12 = vmmov %vm10323_vm2 }
 0x3d5   :  { %v2829_v22 = vld [vmem:[#allocation2 + $0x130] sm:$0xff]  ;;  %5830 = vmatprep.mubr.bf16.mxu0 %v3434_v36  ;;  %3195 = vst.msk [vmem:[#allocation4 + $0xb0] sm:$0xff] %vm19_vm0, %v8311_v25  ;;  %v2796_v37 = vld [vmem:[#allocation2 + $0x167] sm:$0xff]  ;;  %3276 = vrot.lane.b32.xlu0 %v8208_v44, %s5949_s28 }
 0x3d6   :  { %v8319_v29 = vpack.c.bf16 %v2829_v22, %v2828_v19  ;;  %v2795_v12 = vld [vmem:[#allocation2 + $0x14f] sm:$0xff]  ;;  %2907 = vst.msk [vmem:[#allocation4 + $0xd8] sm:$0xff] %vm19_vm0, %v8315_v41  ;;  %v2798_v24 = vld [vmem:[#allocation2 + $0x187] sm:$0xff]  ;;  %2952 = vrot.lane.b32.xlu1 %v8197_v13, %s5948_s23 }
 0x3d7   :  { %v8327_v2 = vpack.c.bf16 %v2795_v12, %v2794_v15  ;;  %v2831_v26 = vld [vmem:[#allocation2 + $0x150] sm:$0xff]  ;;  %v2832_v21 = vld [vmem:[#allocation2 + $0x168] sm:$0xff] }
 0x3d8   :  { %v2797_v5 = vld [vmem:[#allocation2 + $0x16f] sm:$0xff]  ;;  %3196 = vst.msk [vmem:[#allocation4 + $0xc8] sm:$0xff] %vm19_vm0, %v8319_v29  ;;  %v8331_v32 = vpack.c.bf16 %v2831_v26, %v2830_v39  ;;  %v2800_v8 = vld [vmem:[#allocation2 + $0x1a7] sm:$0xff] }
 0x3d9   :  { %v8333_v34 = vpack.c.bf16 %v2797_v5, %v2796_v37  ;;  %2908 = vst.msk [vmem:[#allocation4 + $0xf0] sm:$0xff] %vm19_vm0, %v8327_v2  ;;  %v2833_v17 = vld [vmem:[#allocation2 + $0x170] sm:$0xff]  ;;  %v3437_v4 = vld [vmem:[#allocation4 + $0x88] sm:$0xff]  ;;  %3343 = vrot.lane.b32.xlu0 %v8210_v16, %s5950_s0 }
 0x3da   :  { %3197 = vst.msk [vmem:[#allocation4 + $0xe0] sm:$0xff] %vm19_vm0, %v8331_v32  ;;  %v8347_v62 = vpack.c.bf16 %v2833_v17, %v2832_v21  ;;  %v2799_v42 = vld [vmem:[#allocation2 + $0x18f] sm:$0xff]  ;;  %v2802_v12 = vld [vmem:[#allocation2 + $0x1c7] sm:$0xff]  ;;  %3048 = vrot.lane.b32.xlu1 %v8185_v40, %s5949_s28  ;;  %v5911_v40 = vld [vmem:[%s10261_s2 + $0xf8] sm:$0xff]  }
 0x3db   :  { %2909 = vst.msk [vmem:[#allocation4 + $0x108] sm:$0xff] %vm19_vm0, %v8333_v34  ;;  %v5906_v9 = vld [vmem:[%s10261_s2 + $0x128] sm:$0xff]   ;;  %v8361_v60 = vpack.c.bf16 %v2799_v42, %v2798_v24  ;;  %v2835_v31 = vld [vmem:[#allocation2 + $0x190] sm:$0xff] }
 0x3dc   :  { %3198 = vst.msk [vmem:[#allocation4 + $0xf8] sm:$0xff] %vm19_vm0, %v8347_v62  ;;  %v2834_v27 = vld [vmem:[#allocation2 + $0x188] sm:$0xff]  ;;  %5831 = vmatmul.mubr.bf16.gmra.mrb[72].mxu0 %v3437_v4  ;;  %v5908_v0 = vld [vmem:[%s10261_s2 + $0x130] sm:$0xff]   ;;  %5632 = vmatprep.subr.bf16.mxu1 %v5906_v9  ;;  %v3443_v9 = vld [vmem:[#allocation4 + $0xb8] sm:$0xff] }
 0x3dd   :  { %v5907_v7 = vld [vmem:[%s10261_s2 + $0xe8] sm:$0xff]   ;;  %5834 = vmatprep.mubr.bf16.mxu0 %v3440_v56  ;;  %2910 = vst.msk [vmem:[#allocation4 + $0x120] sm:$0xff] %vm19_vm0, %v8361_v60  ;;  %v8371_v59 = vpack.c.bf16 %v2835_v31, %v2834_v27  ;;  %v2837_v36 = vld [vmem:[#allocation2 + $0x1b0] sm:$0xff]  ;;  %v5910_v27 = vld [vmem:[%s10261_s2 + $0x138] sm:$0xff]   ;;  %3212 = vrot.lane.b32.xlu0 %v8193_v28, %s5948_s23 }
 0x3de   :  { %v2801_v63 = vld [vmem:[#allocation2 + $0x1af] sm:$0xff]  ;;  %v2804_v43 = vld [vmem:[#allocation2 + $0x1e7] sm:$0xff]  ;;  %5633 = vmatpush3.bf16.msra.mxu1 %v5907_v7  ;;  %3129 = vrot.lane.b32.xlu1 %v8208_v44, %s5950_s0  ;;  %v3455_v44 = vld [vmem:[#allocation4 + $0x118] sm:$0xff] }
 0x3df   :  { %v2836_v54 = vld [vmem:[#allocation2 + $0x1a8] sm:$0xff]  ;;  %v2843_v19 = vld [vmem:[#allocation2 + $0x210] sm:$0xff]  ;;  %v8377_v22 = vpack.c.bf16 %v2801_v63, %v2800_v8  ;;  %3199 = vst.msk [vmem:[#allocation4 + $0x110] sm:$0xff] %vm19_vm0, %v8371_v59  ;;  %5634 = vmatprep.subr.bf16.mxu1 %v5908_v0  ;;  %v3452_v8 = vld [vmem:[#allocation4 + $0x100] sm:$0xff] }
 0x3e0   :  { %v8379_v15 = vpack.c.bf16 %v2837_v36, %v2836_v54  ;;  %v2803_v39 = vld [vmem:[#allocation2 + $0x1cf] sm:$0xff] }
 0x3e1   :  { %v2838_v26 = vld [vmem:[#allocation2 + $0x1c8] sm:$0xff]  ;;  %v8383_v37 = vpack.c.bf16 %v2803_v39, %v2802_v12  ;;  %v2839_v5 = vld [vmem:[#allocation2 + $0x1d0] sm:$0xff]  ;;  %2911 = vst.msk [vmem:[#allocation4 + $0x138] sm:$0xff] %vm19_vm0, %v8377_v22  ;;  %3278 = vrot.lane.b32.xlu0 %v8244_v18, %s5949_s28 }
 0x3e2   :  { %v2805_v1 = vld [vmem:[#allocation2 + $0x1ef] sm:$0xff]  ;;  %3200 = vst.msk [vmem:[#allocation4 + $0x128] sm:$0xff] %vm19_vm0, %v8379_v15  ;;  %v8389_v13 = vpack.c.bf16 %v2839_v5, %v2838_v26  ;;  %2954 = vrot.lane.b32.xlu1 %v8210_v16, %s5948_s23  ;;  %v3464_v16 = vld [vmem:[#allocation4 + $0x160] sm:$0xff] }
 0x3e3   :  { %v8391_v21 = vpack.c.bf16 %v2805_v1, %v2804_v43  ;;  %v2840_v17 = vld [vmem:[#allocation2 + $0x1e8] sm:$0xff]  ;;  %v2841_v14 = vld [vmem:[#allocation2 + $0x1f0] sm:$0xff]  ;;  %2912 = vst.msk [vmem:[#allocation4 + $0x150] sm:$0xff] %vm19_vm0, %v8383_v37 }
 0x3e4   :  { %v5909_v4 = vld [vmem:[%s10261_s2 + $0xf0] sm:$0xff]   ;;  %v8398_v24 = vpack.c.bf16 %v2841_v14, %v2840_v17  ;;  %v2842_v42 = vld [vmem:[#allocation2 + $0x208] sm:$0xff]  ;;  %3201 = vst.msk [vmem:[#allocation4 + $0x140] sm:$0xff] %vm19_vm0, %v8389_v13  ;;  %5835 = vmatmul.mubr.bf16.gmra.mrb[76].mxu0 %v3443_v9 }
 0x3e5   :  { %2913 = vst.msk [vmem:[#allocation4 + $0x168] sm:$0xff] %vm19_vm0, %v8391_v21  ;;  %v8408_v56 = vpack.c.bf16 %v2843_v19, %v2842_v42  ;;  %v3446_v7 = vld [vmem:[#allocation4 + $0xd0] sm:$0xff]  ;;  %5635 = vmatpush3.bf16.msra.mxu1 %v5909_v4  ;;  %v3449_v31 = vld [vmem:[#allocation4 + $0xe8] sm:$0xff]  ;;  %3345 = vrot.lane.b32.xlu0 %v8257_v11, %s5950_s0  ;;  %v3467_v4 = vld [vmem:[#allocation4 + $0x178] sm:$0xff] }
 0x3e6   :  { %3202 = vst.msk [vmem:[#allocation4 + $0x158] sm:$0xff] %vm19_vm0, %v8398_v24  ;;  %5838 = vmatprep.mubr.bf16.mxu0 %v3446_v7  ;;  %5636 = vmatprep.subr.bf16.mxu1 %v5910_v27  ;;  %v3458_v0 = vld [vmem:[#allocation4 + $0x130] sm:$0xff]  ;;  %v2806_v43 = vld [vmem:[#allocation2 + $0x207] sm:$0xff] }
 0x3e7   :  { %3203 = vst.msk [vmem:[#allocation4 + $0x170] sm:$0xff] %vm19_vm0, %v8408_v56  ;;  %3050 = vrot.lane.b32.xlu1 %v8193_v28, %s5949_s28  ;;  %v3461_v28 = vld [vmem:[#allocation4 + $0x148] sm:$0xff]  ;;  %v2845_v27 = vld [vmem:[#allocation2 + $0x230] sm:$0xff] }
 0x3e8   :  { %v2807_v1 = vld [vmem:[#allocation2 + $0x20f] sm:$0xff] }
 0x3e9   :  { %5637 = vmatpush3.bf16.msra.mxu1 %v5911_v40  ;;  %3214 = vrot.lane.b32.xlu0 %v8206_v33, %s5948_s23  ;;  %v3106_v14 = vpack.c.bf16 %v2807_v1, %v2806_v43 }
 0x3eb   :  { %3131 = vrot.lane.b32.xlu1 %v8244_v18, %s5950_s0 }
 0x3ec   :  { %5839 = vmatmul.mubr.bf16.gmra.mrb[80].mxu0 %v3449_v31 }
 0x3ed   :  { %5842 = vmatprep.mubr.bf16.mxu0 %v3452_v8  ;;  %3280 = vrot.lane.b32.xlu0 %v8275_v23, %s5949_s28 }
 0x3ef   :  { %2956 = vrot.lane.b32.xlu1 %v8257_v11, %s5948_s23 }
 0x3f1   :  { %3347 = vrot.lane.b32.xlu0 %v8279_v52, %s5950_s0 }
 0x3f3   :  { %3052 = vrot.lane.b32.xlu1 %v8206_v33, %s5949_s28  ;;  %v8496_v33 = vpop.permute.xlu0 %3302 }
 0x3f4   :  { %5843 = vmatmul.mubr.bf16.gmra.mrb[84].mxu0 %v3455_v44 }
 0x3f5   :  { %5846 = vmatprep.mubr.bf16.mxu0 %v3458_v0  ;;  %3216 = vrot.lane.b32.xlu0 %v8216_v49, %s5948_s23 }
 0x3f7   :  { %3133 = vrot.lane.b32.xlu1 %v8275_v23, %s5950_s0 }
 0x3f9   :  { %3282 = vrot.lane.b32.xlu0 %v8295_v6, %s5949_s28 }
 0x3fb   :  { %2958 = vrot.lane.b32.xlu1 %v8279_v52, %s5948_s23 }
 0x3fc   :  { %5847 = vmatmul.mubr.bf16.gmra.mrb[88].mxu0 %v3461_v28 }
 0x3fd   :  { %5850 = vmatprep.mubr.bf16.mxu0 %v3464_v16  ;;  %3349 = vrot.lane.b32.xlu0 %v8299_v10, %s5950_s0 }
 0x3ff   :  { %3054 = vrot.lane.b32.xlu1 %v8216_v49, %s5949_s28 }
 0x401   :  { %3218 = vrot.lane.b32.xlu0 %v8223_v51, %s5948_s23 }
 0x403   :  { %3135 = vrot.lane.b32.xlu1 %v8295_v6, %s5950_s0 }
 0x404   :  { %5851 = vmatmul.mubr.bf16.gmra.mrb[92].mxu0 %v3467_v4 }
 0x405   :  { %3284 = vrot.lane.b32.xlu0 %v8307_v35, %s5949_s28 }
 0x407   :  { %2960 = vrot.lane.b32.xlu1 %v8299_v10, %s5948_s23 }
 0x409   :  { %3351 = vrot.lane.b32.xlu0 %v8311_v25, %s5950_s0 }
 0x40b   :  { %3056 = vrot.lane.b32.xlu1 %v8223_v51, %s5949_s28 }
 0x40d   :  { %3220 = vrot.lane.b32.xlu0 %v8225_v30, %s5948_s23 }
 0x40f   :  { %3137 = vrot.lane.b32.xlu1 %v8307_v35, %s5950_s0 }
 0x411   :  { %3286 = vrot.lane.b32.xlu0 %v8315_v41, %s5949_s28 }
 0x413   :  { %2962 = vrot.lane.b32.xlu1 %v8311_v25, %s5948_s23 }
 0x415   :  { %3353 = vrot.lane.b32.xlu0 %v8319_v29, %s5950_s0 }
 0x417   :  { %3058 = vrot.lane.b32.xlu1 %v8225_v30, %s5949_s28 }
 0x419   :  { %3222 = vrot.lane.b32.xlu0 %v8236_v57, %s5948_s23 }
 0x41b   :  { %3139 = vrot.lane.b32.xlu1 %v8315_v41, %s5950_s0 }
 0x41d   :  { %3288 = vrot.lane.b32.xlu0 %v8327_v2, %s5949_s28 }
 0x41f   :  { %2964 = vrot.lane.b32.xlu1 %v8319_v29, %s5948_s23 }
 0x421   :  { %3355 = vrot.lane.b32.xlu0 %v8331_v32, %s5950_s0 }
 0x423   :  { %3060 = vrot.lane.b32.xlu1 %v8236_v57, %s5949_s28 }
 0x425   :  { %3224 = vrot.lane.b32.xlu0 %v8242_v20, %s5948_s23 }
 0x427   :  { %3141 = vrot.lane.b32.xlu1 %v8327_v2, %s5950_s0 }
 0x429   :  { %3290 = vrot.lane.b32.xlu0 %v8333_v34, %s5949_s28 }
 0x42b   :  { %2966 = vrot.lane.b32.xlu1 %v8331_v32, %s5948_s23  ;;  %v3207_v49 = vpop.permute.xlu0 %3206  ;;  %v3124_v51 = vpop.permute.xlu1 %3123 }
 0x42c   :  { %3254 = vst.msk [vmem:[#allocation4 + $0x8] sm:$0xff] %vm10312_vm6, %v3207_v49  ;;  %vm10327_vm6 = vmmov %vm10324_vm1 }
 0x42d   :  { %3171 = vst.msk [vmem:[#allocation4] sm:$0xff] %vm10313_vm4, %v3124_v51  ;;  %3357 = vrot.lane.b32.xlu0 %v8347_v62, %s5950_s0 }
 0x42f   :  { %3062 = vrot.lane.b32.xlu1 %v8242_v20, %s5949_s28  ;;  %v3273_v30 = vpop.permute.xlu0 %3272  ;;  %v2949_v57 = vpop.permute.xlu1 %2948 }
 0x430   :  { %3320 = vst.msk [vmem:[#allocation4 + $0x8] sm:$0xff] %vm10314_vm8, %v3273_v30  ;;  %vm10328_vm8 = vmmov %vm10323_vm2 }
 0x431   :  { %2995 = vst.msk [vmem:[#allocation4 + $0x18] sm:$0xff] %vm10315_vm10, %v2949_v57  ;;  %3226 = vrot.lane.b32.xlu0 %v8248_v50, %s5948_s23  ;;  %vm10329_vm10 = vmmov %vm10324_vm1 }
 0x433   :  { %3143 = vrot.lane.b32.xlu1 %v8333_v34, %s5950_s0  ;;  %v3340_v18 = vpop.permute.xlu0 %3339  ;;  %v3045_v11 = vpop.permute.xlu1 %3044 }
 0x434   :  { %3387 = vst.msk [vmem:[#allocation4 + $0x8] sm:$0xff] %vm10316_vm5, %v3340_v18  ;;  %v3420_v35 = vld [vmem:[#allocation4] sm:$0xff]  ;;  %vm10330_vm5 = vmmov %vm10313_vm4 }
 0x435   :  { %3091 = vst.msk [vmem:[#allocation4 + $0x18] sm:$0xff] %vm10317_vm7, %v3045_v11  ;;  %3292 = vrot.lane.b32.xlu0 %v8361_v60, %s5949_s28  ;;  %vm10331_vm7 = vmmov %vm10323_vm2 }
 0x437   :  { %2968 = vrot.lane.b32.xlu1 %v8347_v62, %s5948_s23  ;;  %v3209_v20 = vpop.permute.xlu0 %3208  ;;  %v3126_v23 = vpop.permute.xlu1 %3125 }
 0x438   :  { %3255 = vst.msk [vmem:[#allocation4 + $0x20] sm:$0xff] %vm10318_vm11, %v3209_v20  ;;  %vm10332_vm11 = vmmov %vm10324_vm1 }
 0x439   :  { %3172 = vst.msk [vmem:[#allocation4 + $0x18] sm:$0xff] %vm10319_vm13, %v3126_v23  ;;  %3359 = vrot.lane.b32.xlu0 %v8371_v59, %s5950_s0  ;;  %vm10333_vm13 = vmmov %vm10313_vm4 }
 0x43b   :  { %3064 = vrot.lane.b32.xlu1 %v8248_v50, %s5949_s28  ;;  %v3275_v52 = vpop.permute.xlu0 %3274  ;;  %v2951_v6 = vpop.permute.xlu1 %2950  ;;  %v3421_v10 = vld [vmem:[#allocation4 + $0x8] sm:$0xff] }
 0x43c   :  { %3321 = vst.msk [vmem:[#allocation4 + $0x20] sm:$0xff] %vm10320_vm3, %v3275_v52  ;;  %3693 = vmatprep.mubr.bf16.mxu1 %v3421_v10  ;;  %vm10334_vm3 = vmmov %vm10323_vm2 }
 0x43d   :  { %2996 = vst.msk [vmem:[#allocation4 + $0x30] sm:$0xff] %vm10321_vm14, %v2951_v6  ;;  %3228 = vrot.lane.b32.xlu0 %v8255_v61, %s5948_s23  ;;  %3694 = vmatmul.mubr.bf16.vlgmr.msra.gmra.mrb[32].mxu1 %v3420_v35  ;;  %vm10335_vm14 = vmmov %vm10324_vm1 }
 0x43f   :  { %3145 = vrot.lane.b32.xlu1 %v8361_v60, %s5950_s0  ;;  %v3342_v25 = vpop.permute.xlu0 %3341 }
 0x440   :  { %v3047_v41 = vpop.permute.xlu1 %3046  ;;  %3388 = vst.msk [vmem:[#allocation4 + $0x20] sm:$0xff] %vm10322_vm15, %v3342_v25  ;;  %v3423_v62 = vld [vmem:[#allocation4 + $0x18] sm:$0xff]  ;;  %vm10336_vm15 = vmmov %vm10313_vm4 }
 0x441   :  { %3092 = vst.msk [vmem:[#allocation4 + $0x30] sm:$0xff] %vm10323_vm2, %v3047_v41  ;;  %3294 = vrot.lane.b32.xlu0 %v8377_v22, %s5949_s28 }
 0x443   :  { %2970 = vrot.lane.b32.xlu1 %v8371_v59, %s5948_s23  ;;  %v3211_v50 = vpop.permute.xlu0 %3210 }
 0x444   :  { %v3128_v29 = vpop.permute.xlu1 %3127  ;;  %3256 = vst.msk [vmem:[#allocation4 + $0x38] sm:$0xff] %vm10324_vm1, %v3211_v50 }
 0x445   :  { %3173 = vst.msk [vmem:[#allocation4 + $0x30] sm:$0xff] %vm10325_vm9, %v3128_v29  ;;  %3361 = vrot.lane.b32.xlu0 %v8379_v15, %s5950_s0  ;;  %vm10337_vm9 = vmmov %vm10313_vm4 }
 0x447   :  { %3066 = vrot.lane.b32.xlu1 %v8255_v61, %s5949_s28  ;;  %v3277_v2 = vpop.permute.xlu0 %3276  ;;  %v3424_v34 = vld [vmem:[#allocation4 + $0x20] sm:$0xff] }
 0x448   :  { %v2953_v32 = vpop.permute.xlu1 %2952  ;;  %3322 = vst.msk [vmem:[#allocation4 + $0x38] sm:$0xff] %vm10326_vm12, %v3277_v2  ;;  %3701 = vmatprep.mubr.bf16.mxu1 %v3424_v34  ;;  %vm10338_vm12 = vmmov %vm10323_vm2 }
 0x449   :  { %2997 = vst.msk [vmem:[#allocation4 + $0x48] sm:$0xff] %vm10327_vm6, %v2953_v32  ;;  %3230 = vrot.lane.b32.xlu0 %v8265_v3, %s5948_s23  ;;  %3702 = vmatmul.mubr.bf16.gmra.mrb[36].mxu1 %v3423_v62  ;;  %vm10339_vm6 = vmmov %vm10324_vm1 }
 0x44b   :  { %3147 = vrot.lane.b32.xlu1 %v8377_v22, %s5950_s0  ;;  %v3344_v60 = vpop.permute.xlu0 %3343 }
 0x44c   :  { %v3049_v59 = vpop.permute.xlu1 %3048  ;;  %3389 = vst.msk [vmem:[#allocation4 + $0x38] sm:$0xff] %vm10313_vm4, %v3344_v60  ;;  %v3426_v22 = vld [vmem:[#allocation4 + $0x30] sm:$0xff] }
 0x44d   :  { %3093 = vst.msk [vmem:[#allocation4 + $0x48] sm:$0xff] %vm10328_vm8, %v3049_v59  ;;  %3296 = vrot.lane.b32.xlu0 %v8383_v37, %s5949_s28  ;;  %vm10340_vm8 = vmmov %vm10323_vm2 }
 0x44f   :  { %2972 = vrot.lane.b32.xlu1 %v8379_v15, %s5948_s23  ;;  %v3213_v61 = vpop.permute.xlu0 %3212 }
 0x450   :  { %v3130_v63 = vpop.permute.xlu1 %3129  ;;  %3257 = vst.msk [vmem:[#allocation4 + $0x50] sm:$0xff] %vm10329_vm10, %v3213_v61  ;;  %vm10341_vm10 = vmmov %vm10324_vm1 }
 0x451   :  { %3174 = vst.msk [vmem:[#allocation4 + $0x48] sm:$0xff] %vm10330_vm5, %v3130_v63  ;;  %3363 = vrot.lane.b32.xlu0 %v8389_v13, %s5950_s0  ;;  %vm10342_vm5 = vmmov %vm10313_vm4 }
 0x453   :  { %3068 = vrot.lane.b32.xlu1 %v8265_v3, %s5949_s28  ;;  %v3279_v54 = vpop.permute.xlu0 %3278  ;;  %v3427_v19 = vld [vmem:[#allocation4 + $0x38] sm:$0xff] }
 0x454   :  { %v2955_v36 = vpop.permute.xlu1 %2954  ;;  %3323 = vst.msk [vmem:[#allocation4 + $0x50] sm:$0xff] %vm10331_vm7, %v3279_v54  ;;  %3709 = vmatprep.mubr.bf16.mxu1 %v3427_v19  ;;  %vm10343_vm7 = vmmov %vm10323_vm2 }
 0x455   :  { %2998 = vst.msk [vmem:[#allocation4 + $0x60] sm:$0xff] %vm10332_vm11, %v2955_v36  ;;  %3232 = vrot.lane.b32.xlu0 %v8271_v58, %s5948_s23  ;;  %3710 = vmatmul.mubr.bf16.gmra.mrb[40].mxu1 %v3426_v22  ;;  %vm10344_vm11 = vmmov %vm10324_vm1 }
 0x457   :  { %3149 = vrot.lane.b32.xlu1 %v8383_v37, %s5950_s0  ;;  %v3346_v15 = vpop.permute.xlu0 %3345 }
 0x458   :  { %3390 = vst.msk [vmem:[#allocation4 + $0x50] sm:$0xff] %vm10333_vm13, %v3346_v15  ;;  %vm10345_vm13 = vmmov %vm10313_vm4 }
 0x459   :  { %v3051_v12 = vpop.permute.xlu1 %3050  ;;  %3298 = vrot.lane.b32.xlu0 %v8391_v21, %s5949_s28 }
 0x45a   :  { %3094 = vst.msk [vmem:[#allocation4 + $0x60] sm:$0xff] %vm10334_vm3, %v3051_v12  ;;  %vm10346_vm3 = vmmov %vm10323_vm2 }
 0x45b   :  { %2974 = vrot.lane.b32.xlu1 %v8389_v13, %s5948_s23  ;;  %v3215_v3 = vpop.permute.xlu0 %3214  ;;  %v3429_v13 = vld [vmem:[#allocation4 + $0x48] sm:$0xff] }
 0x45c   :  { %3258 = vst.msk [vmem:[#allocation4 + $0x68] sm:$0xff] %vm10335_vm14, %v3215_v3  ;;  %vm10347_vm14 = vmmov %vm10324_vm1 }
 0x45d   :  { %v3132_v39 = vpop.permute.xlu1 %3131  ;;  %3365 = vrot.lane.b32.xlu0 %v8398_v24, %s5950_s0 }
 0x45e   :  { %3175 = vst.msk [vmem:[#allocation4 + $0x60] sm:$0xff] %vm10336_vm15, %v3132_v39  ;;  %vm10348_vm15 = vmmov %vm10313_vm4 }
 0x45f   :  { %3070 = vrot.lane.b32.xlu1 %v8271_v58, %s5949_s28  ;;  %v3281_v26 = vpop.permute.xlu0 %3280  ;;  %v3430_v5 = vld [vmem:[#allocation4 + $0x50] sm:$0xff] }
 0x460   :  { %3324 = vst.msk [vmem:[#allocation4 + $0x68] sm:$0xff] %vm10323_vm2, %v3281_v26  ;;  %3717 = vmatprep.mubr.bf16.mxu1 %v3430_v5 }
 0x461   :  { %v2957_v37 = vpop.permute.xlu1 %2956  ;;  %3234 = vrot.lane.b32.xlu0 %v8287_v55, %s5948_s23  ;;  %3718 = vmatmul.mubr.bf16.gmra.mrb[44].mxu1 %v3429_v13 }
 0x462   :  { %2999 = vst.msk [vmem:[#allocation4 + $0x78] sm:$0xff] %vm10324_vm1, %v2957_v37 }
 0x463   :  { %3151 = vrot.lane.b32.xlu1 %v8391_v21, %s5950_s0  ;;  %v3348_v17 = vpop.permute.xlu0 %3347  ;;  %v2844_v21 = vld [vmem:[#allocation2 + $0x228] sm:$0xff] }
 0x464   :  { %3391 = vst.msk [vmem:[#allocation4 + $0x68] sm:$0xff] %vm10337_vm9, %v3348_v17  ;;  %vm10349_vm9 = vmmov %vm10313_vm4 }
 0x465   :  { %v3053_v58 = vpop.permute.xlu1 %3052  ;;  %3300 = vrot.lane.b32.xlu0 %v3106_v14, %s5949_s28 }
 0x466   :  { %3095 = vst.msk [vmem:[#allocation4 + $0x78] sm:$0xff] %vm10338_vm12, %v3053_v58  ;;  %vm10350_vm12 = vmmov %vm10323_vm2 }
 0x467   :  { %2976 = vrot.lane.b32.xlu1 %v8398_v24, %s5948_s23  ;;  %v3217_v42 = vpop.permute.xlu0 %3216  ;;  %v3432_v24 = vld [vmem:[#allocation4 + $0x60] sm:$0xff] }
 0x468   :  { %3259 = vst.msk [vmem:[#allocation4 + $0x80] sm:$0xff] %vm10339_vm6, %v3217_v42  ;;  %vm10351_vm6 = vmmov %vm10324_vm1 }
 0x469   :  { %v3134_v9 = vpop.permute.xlu1 %3133  ;;  %3367 = vrot.lane.b32.xlu0 %v8408_v56, %s5950_s0  ;;  %v3336_v56 = vpack.c.bf16 %v2845_v27, %v2844_v21 }
 0x46a   :  { %3176 = vst.msk [vmem:[#allocation4 + $0x78] sm:$0xff] %vm10313_vm4, %v3134_v9 }
 0x46b   :  { %3072 = vrot.lane.b32.xlu1 %v8287_v55, %s5949_s28  ;;  %v3283_v7 = vpop.permute.xlu0 %3282  ;;  %v3433_v31 = vld [vmem:[#allocation4 + $0x68] sm:$0xff] }
 0x46c   :  { %3325 = vst.msk [vmem:[#allocation4 + $0x80] sm:$0xff] %vm10340_vm8, %v3283_v7  ;;  %3725 = vmatprep.mubr.bf16.mxu1 %v3433_v31  ;;  %vm10352_vm8 = vmmov %vm10323_vm2 }
 0x46d   :  { %v2959_v40 = vpop.permute.xlu1 %2958  ;;  %3236 = vrot.lane.b32.xlu0 %v8291_v38, %s5948_s23  ;;  %3726 = vmatmul.mubr.bf16.gmra.mrb[48].mxu1 %v3432_v24 }
 0x46e   :  { %3000 = vst.msk [vmem:[#allocation4 + $0x90] sm:$0xff] %vm10341_vm10, %v2959_v40  ;;  %vm10353_vm10 = vmmov %vm10324_vm1 }
 0x46f   :  { %3153 = vrot.lane.b32.xlu1 %v3106_v14, %s5950_s0  ;;  %v3350_v8 = vpop.permute.xlu0 %3349 }
 0x470   :  { %3392 = vst.msk [vmem:[#allocation4 + $0x80] sm:$0xff] %vm10342_vm5, %v3350_v8  ;;  %vm10354_vm5 = vmmov %vm10313_vm4 }
 0x471   :  { %v3055_v55 = vpop.permute.xlu1 %3054  ;;  %3369 = vrot.lane.b32.xlu0 %v3336_v56, %s5950_s0  ;;  %v3435_v49 = vld [vmem:[#allocation4 + $0x78] sm:$0xff] }
 0x472   :  { %3096 = vst.msk [vmem:[#allocation4 + $0x90] sm:$0xff] %vm10343_vm7, %v3055_v55  ;;  %vm10355_vm7 = vmmov %vm10323_vm2 }
 0x473   :  { %v3219_v44 = vpop.permute.xlu0 %3218 }
 0x474   :  { %3260 = vst.msk [vmem:[#allocation4 + $0x98] sm:$0xff] %vm10344_vm11, %v3219_v44  ;;  %vm10356_vm11 = vmmov %vm10324_vm1 }
 0x475   :  { %v3136_v0 = vpop.permute.xlu1 %3135 }
 0x476   :  { %3177 = vst.msk [vmem:[#allocation4 + $0x90] sm:$0xff] %vm10345_vm13, %v3136_v0  ;;  %vm10357_vm13 = vmmov %vm10313_vm4 }
 0x477   :  { %v3285_v38 = vpop.permute.xlu0 %3284  ;;  %v3436_v16 = vld [vmem:[#allocation4 + $0x80] sm:$0xff] }
 0x478   :  { %3326 = vst.msk [vmem:[#allocation4 + $0x98] sm:$0xff] %vm10346_vm3, %v3285_v38  ;;  %3733 = vmatprep.mubr.bf16.mxu1 %v3436_v16  ;;  %vm10358_vm3 = vmmov %vm10323_vm2 }
 0x479   :  { %v2961_v28 = vpop.permute.xlu1 %2960  ;;  %3734 = vmatmul.mubr.bf16.gmra.mrb[52].mxu1 %v3435_v49 }
 0x47a   :  { %3001 = vst.msk [vmem:[#allocation4 + $0xa8] sm:$0xff] %vm10347_vm14, %v2961_v28  ;;  %vm10359_vm14 = vmmov %vm10324_vm1 }
 0x47b   :  { %v3352_v51 = vpop.permute.xlu0 %3351 }
 0x47c   :  { %3393 = vst.msk [vmem:[#allocation4 + $0x98] sm:$0xff] %vm10348_vm15, %v3352_v51  ;;  %vm10360_vm15 = vmmov %vm10313_vm4 }
 0x47d   :  { %v3057_v30 = vpop.permute.xlu1 %3056  ;;  %v3438_v52 = vld [vmem:[#allocation4 + $0x90] sm:$0xff] }
 0x47e   :  { %3097 = vst.msk [vmem:[#allocation4 + $0xa8] sm:$0xff] %vm10323_vm2, %v3057_v30 }
 0x47f   :  { %v3221_v57 = vpop.permute.xlu0 %3220 }
 0x480   :  { %3261 = vst.msk [vmem:[#allocation4 + $0xb0] sm:$0xff] %vm10324_vm1, %v3221_v57 }
 0x481   :  { %v3138_v18 = vpop.permute.xlu1 %3137 }
 0x482   :  { %3178 = vst.msk [vmem:[#allocation4 + $0xa8] sm:$0xff] %vm10349_vm9, %v3138_v18  ;;  %vm10361_vm9 = vmmov %vm10313_vm4 }
 0x483   :  { %v3287_v11 = vpop.permute.xlu0 %3286  ;;  %v3439_v23 = vld [vmem:[#allocation4 + $0x98] sm:$0xff] }
 0x484   :  { %3327 = vst.msk [vmem:[#allocation4 + $0xb0] sm:$0xff] %vm10350_vm12, %v3287_v11  ;;  %3741 = vmatprep.mubr.bf16.mxu1 %v3439_v23  ;;  %vm10362_vm12 = vmmov %vm10323_vm2 }
 0x485   :  { %v2963_v20 = vpop.permute.xlu1 %2962  ;;  %3742 = vmatmul.mubr.bf16.gmra.mrb[56].mxu1 %v3438_v52 }
 0x486   :  { %3002 = vst.msk [vmem:[#allocation4 + $0xc0] sm:$0xff] %vm10351_vm6, %v2963_v20  ;;  %vm10363_vm6 = vmmov %vm10324_vm1 }
 0x487   :  { %v3354_v6 = vpop.permute.xlu0 %3353 }
 0x488   :  { %3394 = vst.msk [vmem:[#allocation4 + $0xb0] sm:$0xff] %vm10313_vm4, %v3354_v6 }
 0x489   :  { %v3059_v10 = vpop.permute.xlu1 %3058  ;;  %v3441_v2 = vld [vmem:[#allocation4 + $0xa8] sm:$0xff] }
 0x48a   :  { %3098 = vst.msk [vmem:[#allocation4 + $0xc0] sm:$0xff] %vm10352_vm8, %v3059_v10  ;;  %vm10364_vm8 = vmmov %vm10323_vm2 }
 0x48b   :  { %v3223_v35 = vpop.permute.xlu0 %3222 }
 0x48c   :  { %3262 = vst.msk [vmem:[#allocation4 + $0xc8] sm:$0xff] %vm10353_vm10, %v3223_v35  ;;  %vm10365_vm10 = vmmov %vm10324_vm1 }
 0x48d   :  { %v3140_v25 = vpop.permute.xlu1 %3139 }
 0x48e   :  { %3179 = vst.msk [vmem:[#allocation4 + $0xc0] sm:$0xff] %vm10354_vm5, %v3140_v25  ;;  %vm10366_vm5 = vmmov %vm10313_vm4 }
 0x48f   :  { %v3289_v41 = vpop.permute.xlu0 %3288  ;;  %v3442_v29 = vld [vmem:[#allocation4 + $0xb0] sm:$0xff] }
 0x490   :  { %3328 = vst.msk [vmem:[#allocation4 + $0xc8] sm:$0xff] %vm10355_vm7, %v3289_v41  ;;  %3749 = vmatprep.mubr.bf16.mxu1 %v3442_v29  ;;  %vm10367_vm7 = vmmov %vm10323_vm2 }
 0x491   :  { %v2965_v50 = vpop.permute.xlu1 %2964  ;;  %3750 = vmatmul.mubr.bf16.gmra.mrb[60].mxu1 %v3441_v2 }
 0x492   :  { %3003 = vst.msk [vmem:[#allocation4 + $0xd8] sm:$0xff] %vm10356_vm11, %v2965_v50  ;;  %vm10368_vm11 = vmmov %vm10324_vm1 }
 0x493   :  { %v3356_v32 = vpop.permute.xlu0 %3355 }
 0x494   :  { %3395 = vst.msk [vmem:[#allocation4 + $0xc8] sm:$0xff] %vm10357_vm13, %v3356_v32  ;;  %vm10369_vm13 = vmmov %vm10313_vm4 }
 0x495   :  { %v3061_v34 = vpop.permute.xlu1 %3060  ;;  %v3444_v15 = vld [vmem:[#allocation4 + $0xc0] sm:$0xff] }
 0x496   :  { %3099 = vst.msk [vmem:[#allocation4 + $0xd8] sm:$0xff] %vm10358_vm3, %v3061_v34  ;;  %vm10370_vm3 = vmmov %vm10323_vm2 }
 0x497   :  { %v3225_v59 = vpop.permute.xlu0 %3224 }
 0x498   :  { %3263 = vst.msk [vmem:[#allocation4 + $0xe0] sm:$0xff] %vm10359_vm14, %v3225_v59  ;;  %vm10371_vm14 = vmmov %vm10324_vm1 }
 0x499   :  { %v3142_v63 = vpop.permute.xlu1 %3141 }
 0x49a   :  { %3180 = vst.msk [vmem:[#allocation4 + $0xd8] sm:$0xff] %vm10360_vm15, %v3142_v63  ;;  %vm10372_vm15 = vmmov %vm10313_vm4 }
 0x49b   :  { %v3291_v36 = vpop.permute.xlu0 %3290  ;;  %v3445_v19 = vld [vmem:[#allocation4 + $0xc8] sm:$0xff] }
 0x49c   :  { %3329 = vst.msk [vmem:[#allocation4 + $0xe0] sm:$0xff] %vm10323_vm2, %v3291_v36  ;;  %3757 = vmatprep.mubr.bf16.mxu1 %v3445_v19 }
 0x49d   :  { %v2967_v22 = vpop.permute.xlu1 %2966  ;;  %3758 = vmatmul.mubr.bf16.gmra.mrb[64].mxu1 %v3444_v15 }
 0x49e   :  { %3004 = vst.msk [vmem:[#allocation4 + $0xf0] sm:$0xff] %vm10324_vm1, %v2967_v22 }
 0x49f   :  { %v8623_v62 = vpop.f32.mrb[64].mxu0  ;;  %v3358_v39 = vpop.permute.xlu0 %3357 }
 0x4a0   :  { %v8625_v60 = vpop.f32.mrb[65].mxu0  ;;  %3396 = vst.msk [vmem:[#allocation4 + $0xe0] sm:$0xff] %vm10361_vm9, %v3358_v39  ;;  %vm10373_vm9 = vmmov %vm10313_vm4 }
 0x4a1   :  { %v8627_v61 = vpop.f32.mrb[66].mxu0  ;;  %v3063_v37 = vpop.permute.xlu1 %3062  ;;  %v3447_v9 = vld [vmem:[#allocation4 + $0xd8] sm:$0xff] }
 0x4a2   :  { %v8631_v54 = vpop.f32.mrb[67].mxu0  ;;  %3100 = vst.msk [vmem:[#allocation4 + $0xf0] sm:$0xff] %vm10362_vm12, %v3063_v37  ;;  %vm10374_vm12 = vmmov %vm10323_vm2 }
 0x4a3   :  { %v3227_v43 = vpop.permute.xlu0 %3226 }
 0x4a4   :  { %3264 = vst.msk [vmem:[#allocation4 + $0xf8] sm:$0xff] %vm10363_vm6, %v3227_v43  ;;  %vm10375_vm6 = vmmov %vm10324_vm1 }
 0x4a5   :  { %v3144_v1 = vpop.permute.xlu1 %3143 }
 0x4a6   :  { %3181 = vst.msk [vmem:[#allocation4 + $0xf0] sm:$0xff] %vm10313_vm4, %v3144_v1 }
 0x4a7   :  { %v8635_v12 = vpop.f32.mrb[68].mxu0  ;;  %v3293_v58 = vpop.permute.xlu0 %3292  ;;  %v3448_v14 = vld [vmem:[#allocation4 + $0xe0] sm:$0xff] }
 0x4a8   :  { %v8637_v3 = vpop.f32.mrb[69].mxu0  ;;  %3330 = vst.msk [vmem:[#allocation4 + $0xf8] sm:$0xff] %vm10364_vm8, %v3293_v58  ;;  %3765 = vmatprep.mubr.bf16.mxu1 %v3448_v14  ;;  %vm10376_vm8 = vmmov %vm10323_vm2 }
 0x4a9   :  { %v8639_v26 = vpop.f32.mrb[70].mxu0  ;;  %v2969_v42 = vpop.permute.xlu1 %2968  ;;  %3766 = vmatmul.mubr.bf16.gmra.mrb[68].mxu1 %v3447_v9 }
 0x4aa   :  { %v8643_v5 = vpop.f32.mrb[71].mxu0  ;;  %3005 = vst.msk [vmem:[#allocation4 + $0x108] sm:$0xff] %vm10365_vm10, %v2969_v42  ;;  %vm10377_vm10 = vmmov %vm10324_vm1 }
 0x4ab   :  { %v3360_v27 = vpop.permute.xlu0 %3359 }
 0x4ac   :  { %3397 = vst.msk [vmem:[#allocation4 + $0xf8] sm:$0xff] %vm10366_vm5, %v3360_v27  ;;  %vm10378_vm5 = vmmov %vm10313_vm4 }
 0x4ad   :  { %v3065_v7 = vpop.permute.xlu1 %3064  ;;  %v3450_v28 = vld [vmem:[#allocation4 + $0xf0] sm:$0xff] }
 0x4ae   :  { %3101 = vst.msk [vmem:[#allocation4 + $0x108] sm:$0xff] %vm10367_vm7, %v3065_v7  ;;  %vm10379_vm7 = vmmov %vm10323_vm2 }
 0x4af   :  { %v8647_v13 = vpop.f32.mrb[72].mxu0  ;;  %v3229_v24 = vpop.permute.xlu0 %3228 }
 0x4b0   :  { %v8649_v17 = vpop.f32.mrb[73].mxu0  ;;  %3265 = vst.msk [vmem:[#allocation4 + $0x110] sm:$0xff] %vm10368_vm11, %v3229_v24  ;;  %vm10380_vm11 = vmmov %vm10324_vm1 }
 0x4b1   :  { %v8651_v4 = vpop.f32.mrb[74].mxu0  ;;  %v3146_v8 = vpop.permute.xlu1 %3145 }
 0x4b2   :  { %v8655_v21 = vpop.f32.mrb[75].mxu0  ;;  %3182 = vst.msk [vmem:[#allocation4 + $0x108] sm:$0xff] %vm10369_vm13, %v3146_v8  ;;  %vm10381_vm13 = vmmov %vm10313_vm4 }
 0x4b3   :  { %v3295_v44 = vpop.permute.xlu0 %3294  ;;  %v3451_v0 = vld [vmem:[#allocation4 + $0xf8] sm:$0xff] }
 0x4b4   :  { %3331 = vst.msk [vmem:[#allocation4 + $0x110] sm:$0xff] %vm10370_vm3, %v3295_v44  ;;  %3773 = vmatprep.mubr.bf16.mxu1 %v3451_v0  ;;  %vm10382_vm3 = vmmov %vm10323_vm2 }
 0x4b5   :  { %v2971_v38 = vpop.permute.xlu1 %2970  ;;  %3774 = vmatmul.mubr.bf16.gmra.mrb[72].mxu1 %v3450_v28 }
 0x4b6   :  { %3006 = vst.msk [vmem:[#allocation4 + $0x120] sm:$0xff] %vm10371_vm14, %v2971_v38  ;;  %vm10383_vm14 = vmmov %vm10324_vm1 }
 0x4b7   :  { %v8659_v40 = vpop.f32.mrb[76].mxu0  ;;  %v3362_v51 = vpop.permute.xlu0 %3361 }
 0x4b8   :  { %v8661_v31 = vpop.f32.mrb[77].mxu0  ;;  %3398 = vst.msk [vmem:[#allocation4 + $0x110] sm:$0xff] %vm10372_vm15, %v3362_v51  ;;  %vm10384_vm15 = vmmov %vm10313_vm4 }
 0x4b9   :  { %v8663_v56 = vpop.f32.mrb[78].mxu0  ;;  %v3067_v57 = vpop.permute.xlu1 %3066  ;;  %v3453_v41 = vld [vmem:[#allocation4 + $0x108] sm:$0xff] }
 0x4ba   :  { %v8667_v55 = vpop.f32.mrb[79].mxu0  ;;  %3102 = vst.msk [vmem:[#allocation4 + $0x120] sm:$0xff] %vm10323_vm2, %v3067_v57 }
 0x4bb   :  { %v3231_v11 = vpop.permute.xlu0 %3230 }
 0x4bc   :  { %3266 = vst.msk [vmem:[#allocation4 + $0x128] sm:$0xff] %vm10324_vm1, %v3231_v11 }
 0x4bd   :  { %v3148_v20 = vpop.permute.xlu1 %3147 }
 0x4be   :  { %3183 = vst.msk [vmem:[#allocation4 + $0x120] sm:$0xff] %vm10373_vm9, %v3148_v20  ;;  %vm10385_vm9 = vmmov %vm10313_vm4 }
 0x4bf   :  { %v8671_v16 = vpop.f32.mrb[80].mxu0  ;;  %v3297_v6 = vpop.permute.xlu0 %3296  ;;  %v3454_v10 = vld [vmem:[#allocation4 + $0x110] sm:$0xff] }
 0x4c0   :  { %v8673_v49 = vpop.f32.mrb[81].mxu0  ;;  %3332 = vst.msk [vmem:[#allocation4 + $0x128] sm:$0xff] %vm10374_vm12, %v3297_v6  ;;  %3781 = vmatprep.mubr.bf16.mxu1 %v3454_v10  ;;  %vm10386_vm12 = vmmov %vm10323_vm2 }
 0x4c1   :  { %v8675_v30 = vpop.f32.mrb[82].mxu0  ;;  %v2973_v25 = vpop.permute.xlu1 %2972  ;;  %3782 = vmatmul.mubr.bf16.gmra.mrb[76].mxu1 %v3453_v41 }
 0x4c2   :  { %v8679_v18 = vpop.f32.mrb[83].mxu0  ;;  %3007 = vst.msk [vmem:[#allocation4 + $0x138] sm:$0xff] %vm10375_vm6, %v2973_v25  ;;  %vm10387_vm6 = vmmov %vm10324_vm1 }
 0x4c3   :  { %v3364_v29 = vpop.permute.xlu0 %3363 }
 0x4c4   :  { %3399 = vst.msk [vmem:[#allocation4 + $0x128] sm:$0xff] %vm10313_vm4, %v3364_v29  ;;  %vm10388_vm4 = vmmov %vm10323_vm2 }
 0x4c5   :  { %v3069_v2 = vpop.permute.xlu1 %3068  ;;  %v3456_v37 = vld [vmem:[#allocation4 + $0x120] sm:$0xff] }
 0x4c6   :  { %3103 = vst.msk [vmem:[#allocation4 + $0x138] sm:$0xff] %vm10376_vm8, %v3069_v2  ;;  %vm10389_vm8 = vmmov %vm10378_vm5 }
 0x4c7   :  { %v8683_v23 = vpop.f32.mrb[84].mxu0  ;;  %v3233_v59 = vpop.permute.xlu0 %3232 }
 0x4c8   :  { %v8685_v52 = vpop.f32.mrb[85].mxu0  ;;  %3267 = vst.msk [vmem:[#allocation4 + $0x140] sm:$0xff] %vm10377_vm10, %v3233_v59  ;;  %vm10390_vm10 = vmmov %vm10378_vm5 }
 0x4c9   :  { %v8687_v35 = vpop.f32.mrb[86].mxu0  ;;  %v3150_v36 = vpop.permute.xlu1 %3149 }
 0x4ca   :  { %v8691_v50 = vpop.f32.mrb[87].mxu0  ;;  %3184 = vst.msk [vmem:[#allocation4 + $0x138] sm:$0xff] %vm10378_vm5, %v3150_v36 }
 0x4cb   :  { %v3299_v22 = vpop.permute.xlu0 %3298  ;;  %v3457_v15 = vld [vmem:[#allocation4 + $0x128] sm:$0xff] }
 0x4cc   :  { %3333 = vst.msk [vmem:[#allocation4 + $0x140] sm:$0xff] %vm10379_vm7, %v3299_v22  ;;  %3789 = vmatprep.mubr.bf16.mxu1 %v3457_v15 }
 0x4cd   :  { %v2975_v39 = vpop.permute.xlu1 %2974  ;;  %3790 = vmatmul.mubr.bf16.gmra.mrb[80].mxu1 %v3456_v37 }
 0x4ce   :  { %3008 = vst.msk [vmem:[#allocation4 + $0x150] sm:$0xff] %vm10380_vm11, %v2975_v39 }
 0x4cf   :  { %v8695_v32 = vpop.f32.mrb[88].mxu0  ;;  %v3366_v43 = vpop.permute.xlu0 %3365 }
 0x4d0   :  { %v8697_v34 = vpop.f32.mrb[89].mxu0  ;;  %3400 = vst.msk [vmem:[#allocation4 + $0x140] sm:$0xff] %vm10381_vm13, %v3366_v43 }
 0x4d1   :  { %v8699_v63 = vpop.f32.mrb[90].mxu0  ;;  %v3071_v1 = vpop.permute.xlu1 %3070  ;;  %v3459_v7 = vld [vmem:[#allocation4 + $0x138] sm:$0xff] }
 0x4d2   :  { %v8703_v19 = vpop.f32.mrb[91].mxu0  ;;  %3104 = vst.msk [vmem:[#allocation4 + $0x150] sm:$0xff] %vm10382_vm3, %v3071_v1 }
 0x4d3   :  { %v3235_v58 = vpop.permute.xlu0 %3234 }
 0x4d4   :  { %3268 = vst.msk [vmem:[#allocation4 + $0x158] sm:$0xff] %vm10383_vm14, %v3235_v58 }
 0x4d5   :  { %v3152_v14 = vpop.permute.xlu1 %3151 }
 0x4d6   :  { %3185 = vst.msk [vmem:[#allocation4 + $0x150] sm:$0xff] %vm10384_vm15, %v3152_v14 }
 0x4d7   :  { %v3301_v42 = vpop.permute.xlu0 %3300  ;;  %v3460_v9 = vld [vmem:[#allocation4 + $0x140] sm:$0xff] }
 0x4d8   :  { %3334 = vst.msk [vmem:[#allocation4 + $0x158] sm:$0xff] %vm10323_vm2, %v3301_v42  ;;  %3797 = vmatprep.mubr.bf16.mxu1 %v3460_v9 }
 0x4d9   :  { %v2977_v27 = vpop.permute.xlu1 %2976  ;;  %3798 = vmatmul.mubr.bf16.gmra.mrb[84].mxu1 %v3459_v7 }
 0x4da   :  { %3009 = vst.msk [vmem:[#allocation4 + $0x168] sm:$0xff] %vm10324_vm1, %v2977_v27 }
 0x4db   :  { %v3368_v24 = vpop.permute.xlu0 %3367 }
 0x4dc   :  { %3401 = vst.msk [vmem:[#allocation4 + $0x158] sm:$0xff] %vm10385_vm9, %v3368_v24 }
 0x4dd   :  { %v3073_v8 = vpop.permute.xlu1 %3072  ;;  %v3462_v51 = vld [vmem:[#allocation4 + $0x150] sm:$0xff] }
 0x4de   :  { %3105 = vst.msk [vmem:[#allocation4 + $0x168] sm:$0xff] %vm10386_vm12, %v3073_v8 }
 0x4df   :  { %v3237_v44 = vpop.permute.xlu0 %3236 }
 0x4e0   :  { %3269 = vst.msk [vmem:[#allocation4 + $0x170] sm:$0xff] %vm10387_vm6, %v3237_v44 }
 0x4e1   :  { %v3154_v0 = vpop.permute.xlu1 %3153  ;;  %3335 = vst.msk [vmem:[#allocation4 + $0x170] sm:$0xff] %vm10388_vm4, %v8496_v33 }
 0x4e2   :  { %3186 = vst.msk [vmem:[#allocation4 + $0x168] sm:$0xff] %vm10389_vm8, %v3154_v0 }
 0x4e3   :  { %v3370_v38 = vpop.permute.xlu0 %3369  ;;  %v3463_v28 = vld [vmem:[#allocation4 + $0x158] sm:$0xff] }
 0x4e4   :  { %3402 = vst.msk [vmem:[#allocation4 + $0x170] sm:$0xff] %vm10390_vm10, %v3370_v38  ;;  %3805 = vmatprep.mubr.bf16.mxu1 %v3463_v28  ;;  %v8741_v28 = vpop.f32.mrb[92].mxu0 }
 0x4e5   :  { %3806 = vmatmul.mubr.bf16.gmra.mrb[88].mxu1 %v3462_v51 }
 0x4e9   :  { %v3465_v11 = vld [vmem:[#allocation4 + $0x168] sm:$0xff] }
 0x4eb   :  { %v3466_v57 = vld [vmem:[#allocation4 + $0x170] sm:$0xff] }
 0x4ec   :  { %3813 = vmatprep.mubr.bf16.mxu1 %v3466_v57 }
 0x4ed   :  { %3814 = vmatmul.mubr.bf16.gmra.mrb[92].mxu1 %v3465_v11 }
 0x510   :  { %v5638_v20 = vpop.f32.mrb[32].mxu1 }
 0x511   :  { %v5639_v6 = vpop.f32.mrb[33].mxu1 }
 0x512   :  { %v5640_v10 = vadd.f32 %v5639_v6, %v5638_v20  ;;  %v5641_v25 = vpop.f32.mrb[34].mxu1 }
 0x513   :  { %v5642_v41 = vpop.f32.mrb[35].mxu1 }
 0x514   :  { %v8721_v33 = vadd.f32 %v5640_v10, %v8625_v60  ;;  %v5643_v29 = vadd.f32 %v5642_v41, %v5641_v25 }
 0x516   :  { %v8724_v2 = vadd.f32 %v5643_v29, %v8631_v54 }
 0x51c   :  { %v5644_v59 = vpop.f32.mrb[36].mxu1 }
 0x51d   :  { %v5645_v36 = vpop.f32.mrb[37].mxu1 }
 0x51e   :  { %v5646_v22 = vadd.f32 %v5645_v36, %v5644_v59  ;;  %v5647_v15 = vpop.f32.mrb[38].mxu1 }
 0x51f   :  { %v5648_v39 = vpop.f32.mrb[39].mxu1 }
 0x520   :  { %v8727_v37 = vadd.f32 %v8623_v62, %v5646_v22  ;;  %v5649_v43 = vadd.f32 %v5648_v39, %v5647_v15 }
 0x522   :  { %v8730_v1 = vadd.f32 %v8627_v61, %v5649_v43 }
 0x528   :  { %v5650_v58 = vpop.f32.mrb[40].mxu1 }
 0x529   :  { %v5651_v14 = vpop.f32.mrb[41].mxu1 }
 0x52a   :  { %v5652_v60 = vadd.f32 %v5651_v14, %v5650_v58  ;;  %v5653_v42 = vpop.f32.mrb[42].mxu1 }
 0x52b   :  { %v5654_v9 = vpop.f32.mrb[43].mxu1 }
 0x52c   :  { %v8733_v54 = vadd.f32 %v5652_v60, %v8637_v3  ;;  %v5655_v27 = vadd.f32 %v5654_v9, %v5653_v42  ;;  %v8746_v3 = vpop.f32.mrb[93].mxu0 }
 0x52d   :  { %v8748_v57 = vpop.f32.mrb[94].mxu0 }
 0x52e   :  { %v8736_v7 = vadd.f32 %v5655_v27, %v8643_v5  ;;  %v8750_v5 = vpop.f32.mrb[95].mxu0 }
 0x534   :  { %v5656_v24 = vpop.f32.mrb[44].mxu1 }
 0x535   :  { %v5657_v8 = vpop.f32.mrb[45].mxu1 }
 0x536   :  { %v5658_v62 = vadd.f32 %v5657_v8, %v5656_v24  ;;  %v5659_v44 = vpop.f32.mrb[46].mxu1  ;;  %v3983_v8 = vsel %vm19_vm0, %v8721_v33, 0.0 }
 0x537   :  { %v5660_v0 = vpop.f32.mrb[47].mxu1 }
 0x538   :  { %v8739_v61 = vadd.f32 %v8635_v12, %v5658_v62  ;;  %v5661_v38 = vadd.f32 %v5660_v0, %v5659_v44 }
 0x53a   :  { %v8744_v51 = vadd.f32 %v8639_v26, %v5661_v38 }
 0x540   :  { %v5662_v11 = vpop.f32.mrb[48].mxu1 }
 0x541   :  { %v5663_v20 = vpop.f32.mrb[49].mxu1 }
 0x542   :  { %v5664_v6 = vadd.f32 %v5663_v20, %v5662_v11  ;;  %v5665_v10 = vpop.f32.mrb[50].mxu1 }
 0x543   :  { %v5666_v25 = vpop.f32.mrb[51].mxu1 }
 0x544   :  { %v8753_v12 = vadd.f32 %v5664_v6, %v8649_v17  ;;  %v5667_v41 = vadd.f32 %v5666_v25, %v5665_v10  ;;  %v3990_v6 = vsel %vm19_vm0, %v8733_v54, 0.0 }
 0x546   :  { %v8756_v29 = vadd.f32 %v5667_v41, %v8655_v21 }
 0x54c   :  { %v5668_v26 = vpop.f32.mrb[52].mxu1 }
 0x54d   :  { %v5669_v59 = vpop.f32.mrb[53].mxu1 }
 0x54e   :  { %v5670_v36 = vadd.f32 %v5669_v59, %v5668_v26  ;;  %v5671_v22 = vpop.f32.mrb[54].mxu1 }
 0x54f   :  { %v5672_v15 = vpop.f32.mrb[55].mxu1 }
 0x550   :  { %v8759_v39 = vadd.f32 %v8647_v13, %v5670_v36  ;;  %v5673_v43 = vadd.f32 %v5672_v15, %v5671_v22  ;;  %v3984_v13 = vsel %vm19_vm0, %v8724_v2, 0.0  ;;  %v3992_v36 = vsel %vm19_vm0, %v8736_v7, 0.0 }
 0x551   :  { %v3985_v62 = vadd.f32 %v3984_v13, %v3983_v8  ;;  %v3994_v22 = vsel %vm19_vm0, %v8739_v61, 0.0 }
 0x552   :  { %v8762_v58 = vadd.f32 %v8651_v4, %v5673_v43  ;;  %v3986_v4 = vsel %vm19_vm0, %v8727_v37, 0.0 }
 0x553   :  { %v3987_v0 = vadd.f32 %v3986_v4, %v3985_v62 }
 0x558   :  { %v5674_v14 = vpop.f32.mrb[56].mxu1 }
 0x559   :  { %v5675_v60 = vpop.f32.mrb[57].mxu1 }
 0x55a   :  { %v5676_v17 = vadd.f32 %v5675_v60, %v5674_v14  ;;  %v5677_v42 = vpop.f32.mrb[58].mxu1 }
 0x55b   :  { %v5678_v9 = vpop.f32.mrb[59].mxu1 }
 0x55c   :  { %v8765_v21 = vadd.f32 %v5676_v17, %v8661_v31  ;;  %v5679_v27 = vadd.f32 %v5678_v9, %v5677_v42  ;;  %v3988_v31 = vsel %vm19_vm0, %v8730_v1, 0.0 }
 0x55d   :  { %v3989_v41 = vadd.f32 %v3988_v31, %v3987_v0  ;;  %v4002_v0 = vsel %vm19_vm0, %v8759_v39, 0.0 }
 0x55e   :  { %v8768_v24 = vadd.f32 %v5679_v27, %v8667_v55 }
 0x55f   :  { %v3991_v59 = vadd.f32 %v3990_v6, %v3989_v41 }
 0x561   :  { %v3993_v15 = vadd.f32 %v3992_v36, %v3991_v59 }
 0x563   :  { %v3995_v14 = vadd.f32 %v3994_v22, %v3993_v15 }
 0x564   :  { %v5680_v44 = vpop.f32.mrb[60].mxu1 }
 0x565   :  { %v5681_v38 = vpop.f32.mrb[61].mxu1 }
 0x566   :  { %v5682_v11 = vadd.f32 %v5681_v38, %v5680_v44  ;;  %v5683_v20 = vpop.f32.mrb[62].mxu1  ;;  %v4000_v44 = vsel %vm19_vm0, %v8756_v29, 0.0 }
 0x567   :  { %v5684_v55 = vpop.f32.mrb[63].mxu1 }
 0x568   :  { %v8781_v10 = vadd.f32 %v8659_v40, %v5682_v11  ;;  %v5685_v25 = vadd.f32 %v5684_v55, %v5683_v20  ;;  %v3996_v40 = vsel %vm19_vm0, %v8744_v51, 0.0 }
 0x569   :  { %v3997_v8 = vadd.f32 %v3996_v40, %v3995_v14 }
 0x56a   :  { %v8784_v26 = vadd.f32 %v8663_v56, %v5685_v25  ;;  %v3998_v56 = vsel %vm19_vm0, %v8753_v12, 0.0  ;;  %v4010_v14 = vsel %vm19_vm0, %v8781_v10, 0.0 }
 0x56b   :  { %v3999_v62 = vadd.f32 %v3998_v56, %v3997_v8 }
 0x56d   :  { %v4001_v38 = vadd.f32 %v4000_v44, %v3999_v62 }
 0x56f   :  { %v4003_v11 = vadd.f32 %v4002_v0, %v4001_v38 }
 0x570   :  { %v5686_v43 = vpop.f32.mrb[64].mxu1 }
 0x571   :  { %v5687_v60 = vpop.f32.mrb[65].mxu1 }
 0x572   :  { %v5688_v17 = vadd.f32 %v5687_v60, %v5686_v43  ;;  %v5689_v42 = vpop.f32.mrb[66].mxu1  ;;  %v4008_v43 = vsel %vm19_vm0, %v8768_v24, 0.0 }
 0x573   :  { %v5690_v9 = vpop.f32.mrb[67].mxu1 }
 0x574   :  { %v8795_v27 = vadd.f32 %v5688_v17, %v8673_v49  ;;  %v5691_v13 = vadd.f32 %v5690_v9, %v5689_v42  ;;  %v4004_v49 = vsel %vm19_vm0, %v8762_v58, 0.0 }
 0x575   :  { %v4005_v36 = vadd.f32 %v4004_v49, %v4003_v11 }
 0x576   :  { %v8798_v4 = vadd.f32 %v5691_v13, %v8679_v18  ;;  %v4006_v18 = vsel %vm19_vm0, %v8765_v21, 0.0 }
 0x577   :  { %v4007_v15 = vadd.f32 %v4006_v18, %v4005_v36 }
 0x579   :  { %v4009_v60 = vadd.f32 %v4008_v43, %v4007_v15 }
 0x57b   :  { %v4011_v17 = vadd.f32 %v4010_v14, %v4009_v60 }
 0x57c   :  { %v5692_v31 = vpop.f32.mrb[68].mxu1 }
 0x57d   :  { %v5693_v20 = vpop.f32.mrb[69].mxu1 }
 0x57e   :  { %v5694_v55 = vadd.f32 %v5693_v20, %v5692_v31  ;;  %v5695_v6 = vpop.f32.mrb[70].mxu1  ;;  %v4016_v31 = vsel %vm19_vm0, %v8798_v4, 0.0 }
 0x57f   :  { %v5696_v25 = vpop.f32.mrb[71].mxu1 }
 0x580   :  { %v8809_v41 = vadd.f32 %v8671_v16, %v5694_v55  ;;  %v5697_v59 = vadd.f32 %v5696_v25, %v5695_v6  ;;  %v4012_v16 = vsel %vm19_vm0, %v8784_v26, 0.0 }
 0x581   :  { %v4013_v44 = vadd.f32 %v4012_v16, %v4011_v17 }
 0x582   :  { %v8812_v22 = vadd.f32 %v8675_v30, %v5697_v59  ;;  %v4014_v30 = vsel %vm19_vm0, %v8795_v27, 0.0  ;;  %v4018_v11 = vsel %vm19_vm0, %v8809_v41, 0.0 }
 0x583   :  { %v4015_v38 = vadd.f32 %v4014_v30, %v4013_v44 }
 0x585   :  { %v4017_v20 = vadd.f32 %v4016_v31, %v4015_v38 }
 0x587   :  { %v4019_v55 = vadd.f32 %v4018_v11, %v4017_v20 }
 0x588   :  { %v5698_v40 = vpop.f32.mrb[72].mxu1 }
 0x589   :  { %v5699_v42 = vpop.f32.mrb[73].mxu1 }
 0x58a   :  { %v5700_v9 = vadd.f32 %v5699_v42, %v5698_v40  ;;  %v5701_v56 = vpop.f32.mrb[74].mxu1 }
 0x58b   :  { %v5702_v13 = vpop.f32.mrb[75].mxu1 }
 0x58c   :  { %v8823_v8 = vadd.f32 %v5700_v9, %v8685_v52  ;;  %v5703_v62 = vadd.f32 %v5702_v13, %v5701_v56  ;;  %v4020_v52 = vsel %vm19_vm0, %v8812_v22, 0.0 }
 0x58d   :  { %v4021_v43 = vadd.f32 %v4020_v52, %v4019_v55 }
 0x58e   :  { %v8826_v0 = vadd.f32 %v5703_v62, %v8691_v50  ;;  %v4022_v50 = vsel %vm19_vm0, %v8823_v8, 0.0 }
 0x58f   :  { %v4023_v60 = vadd.f32 %v4022_v50, %v4021_v43 }
 0x590   :  { %v4024_v40 = vsel %vm19_vm0, %v8826_v0, 0.0 }
 0x591   :  { %v4025_v42 = vadd.f32 %v4024_v40, %v4023_v60 }
 0x594   :  { %v5704_v49 = vpop.f32.mrb[76].mxu1 }
 0x595   :  { %v5705_v6 = vpop.f32.mrb[77].mxu1 }
 0x596   :  { %v5706_v25 = vadd.f32 %v5705_v6, %v5704_v49  ;;  %v5707_v18 = vpop.f32.mrb[78].mxu1 }
 0x597   :  { %v5708_v59 = vpop.f32.mrb[79].mxu1 }
 0x598   :  { %v8837_v36 = vadd.f32 %v8683_v23, %v5706_v25  ;;  %v5709_v15 = vadd.f32 %v5708_v59, %v5707_v18 }
 0x59a   :  { %v8840_v14 = vadd.f32 %v8687_v35, %v5709_v15  ;;  %v4026_v17 = vsel %vm19_vm0, %v8837_v36, 0.0 }
 0x59b   :  { %v4027_v9 = vadd.f32 %v4026_v17, %v4025_v42 }
 0x59c   :  { %v4028_v23 = vsel %vm19_vm0, %v8840_v14, 0.0 }
 0x59d   :  { %v4029_v38 = vadd.f32 %v4028_v23, %v4027_v9 }
 0x5a0   :  { %v5710_v16 = vpop.f32.mrb[80].mxu1 }
 0x5a1   :  { %v5711_v56 = vpop.f32.mrb[81].mxu1 }
 0x5a2   :  { %v5712_v13 = vadd.f32 %v5711_v56, %v5710_v16  ;;  %v5713_v30 = vpop.f32.mrb[82].mxu1 }
 0x5a3   :  { %v5714_v62 = vpop.f32.mrb[83].mxu1 }
 0x5a4   :  { %v3953_v35 = vadd.f32 %v5712_v13, %v8697_v34  ;;  %v5715_v44 = vadd.f32 %v5714_v62, %v5713_v30 }
 0x5a6   :  { %v4030_v31 = vsel %vm19_vm0, %v3953_v35, 0.0  ;;  %v3956_v11 = vadd.f32 %v5715_v44, %v8703_v19 }
 0x5a7   :  { %v4031_v20 = vadd.f32 %v4030_v31, %v4029_v38 }
 0x5a8   :  { %v4032_v49 = vsel %vm19_vm0, %v3956_v11, 0.0 }
 0x5a9   :  { %v4033_v55 = vadd.f32 %v4032_v49, %v4031_v20 }
 0x5ac   :  { %v5716_v6 = vpop.f32.mrb[84].mxu1 }
 0x5ad   :  { %v5717_v52 = vpop.f32.mrb[85].mxu1 }
 0x5ae   :  { %v5718_v25 = vadd.f32 %v5717_v52, %v5716_v6  ;;  %v5719_v18 = vpop.f32.mrb[86].mxu1 }
 0x5af   :  { %v5720_v59 = vpop.f32.mrb[87].mxu1 }
 0x5b0   :  { %v3961_v50 = vadd.f32 %v8695_v32, %v5718_v25  ;;  %v5721_v15 = vadd.f32 %v5720_v59, %v5719_v18 }
 0x5b2   :  { %v4034_v34 = vsel %vm19_vm0, %v3961_v50, 0.0  ;;  %v3964_v43 = vadd.f32 %v8699_v63, %v5721_v15 }
 0x5b3   :  { %v4035_v60 = vadd.f32 %v4034_v34, %v4033_v55 }
 0x5b4   :  { %v4036_v40 = vsel %vm19_vm0, %v3964_v43, 0.0 }
 0x5b5   :  { %v4037_v19 = vadd.f32 %v4036_v40, %v4035_v60 }
 0x5b8   :  { %v5722_v17 = vpop.f32.mrb[88].mxu1 }
 0x5b9   :  { %v5723_v42 = vpop.f32.mrb[89].mxu1 }
 0x5ba   :  { %v5724_v16 = vadd.f32 %v5723_v42, %v5722_v17  ;;  %v5725_v9 = vpop.f32.mrb[90].mxu1 }
 0x5bb   :  { %v5726_v56 = vpop.f32.mrb[91].mxu1 }
 0x5bc   :  { %v5727_v23 = vadd.f32 %v5726_v56, %v5725_v9  ;;  %v3969_v13 = vadd.f32 %v5724_v16, %v8746_v3 }
 0x5be   :  { %v4038_v30 = vsel %vm19_vm0, %v3969_v13, 0.0  ;;  %v3972_v32 = vadd.f32 %v5727_v23, %v8750_v5 }
 0x5bf   :  { %v4039_v62 = vadd.f32 %v4038_v30, %v4037_v19 }
 0x5c0   :  { %v4040_v44 = vsel %vm19_vm0, %v3972_v32, 0.0  ;;  %v5728_v63 = vpop.f32.mrb[92].mxu1 }
 0x5c1   :  { %v4041_v38 = vadd.f32 %v4040_v44, %v4039_v62  ;;  %v5729_v31 = vpop.f32.mrb[93].mxu1 }
 0x5c2   :  { %v5730_v20 = vadd.f32 %v5729_v31, %v5728_v63  ;;  %v5731_v49 = vpop.f32.mrb[94].mxu1 }
 0x5c3   :  { %v5732_v55 = vpop.f32.mrb[95].mxu1 }
 0x5c4   :  { %v3977_v6 = vadd.f32 %v8741_v28, %v5730_v20  ;;  %v5733_v52 = vadd.f32 %v5732_v55, %v5731_v49 }
 0x5c6   :  { %v4042_v25 = vsel %vm19_vm0, %v3977_v6, 0.0  ;;  %v3980_v3 = vadd.f32 %v8748_v57, %v5733_v52 }
 0x5c7   :  { %v4043_v18 = vadd.f32 %v4042_v25, %v4041_v38 }
 0x5c8   :  { %v4044_v59 = vsel %vm19_vm0, %v3980_v3, 0.0 }
 0x5c9   :  { %v4045_v5 = vadd.f32 %v4044_v59, %v4043_v18 }
 0x5cb   :  { %v4046_v15 = vrot.slane %v4045_v5, 4 }
 0x5cd   :  { %v4047_v34 = vadd.f32 %v4046_v15, %v4045_v5 }
 0x5cf   :  { %v4048_v60 = vrot.slane %v4047_v34, 2 }
 0x5d1   :  { %v4049_v40 = vadd.f32 %v4048_v60, %v4047_v34 }
 0x5d3   :  { %v4050_v19 = vrot.slane %v4049_v40, 1 }
 0x5d5   :  { %v4051_v17 = vadd.f32 %v4050_v19, %v4049_v40 }
 0x5d7   :  { %v8864_v42 = vmul.f32 0.00390625, %v4051_v17 }
 0x5d9   :  { %v8867_v16 = vsub.f32 %v3953_v35, %v8864_v42  ;;  %v8870_v28 = vsub.f32 %v3956_v11, %v8864_v42  ;;  %v8873_v57 = vsub.f32 %v3961_v50, %v8864_v42  ;;  %v8876_v9 = vsub.f32 %v3964_v43, %v8864_v42 }
 0x5da   :  { %v8879_v56 = vsub.f32 %v3969_v13, %v8864_v42  ;;  %v8882_v23 = vsub.f32 %v3972_v32, %v8864_v42  ;;  %v8885_v30 = vsub.f32 %v3977_v6, %v8864_v42  ;;  %v8888_v35 = vsub.f32 %v3980_v3, %v8864_v42 }
 0x5db   :  { %v8892_v11 = vsub.f32 %v8721_v33, %v8864_v42  ;;  %v8896_v50 = vsub.f32 %v8724_v2, %v8864_v42  ;;  %v8900_v43 = vsub.f32 %v8727_v37, %v8864_v42  ;;  %v8904_v13 = vsub.f32 %v8730_v1, %v8864_v42 }
 0x5dc   :  { %v8912_v33 = vsub.f32 %v8733_v54, %v8864_v42  ;;  %v8918_v37 = vsub.f32 %v8736_v7, %v8864_v42  ;;  %v8926_v31 = vsub.f32 %v8739_v61, %v8864_v42  ;;  %v8933_v7 = vsub.f32 %v8744_v51, %v8864_v42 }
 0x5dd   :  { %v4085_v32 = vmul.f32 %v8892_v11, %v8892_v11  ;;  %v4086_v62 = vmul.f32 %v8896_v50, %v8896_v50  ;;  %v4087_v2 = vmul.f32 %v8900_v43, %v8900_v43  ;;  %v4088_v1 = vmul.f32 %v8904_v13, %v8904_v13 }
 0x5de   :  { %v4089_v54 = vmul.f32 %v8912_v33, %v8912_v33  ;;  %v4090_v55 = vmul.f32 %v8918_v37, %v8918_v37  ;;  %v8940_v61 = vsub.f32 %v8753_v12, %v8864_v42  ;;  %v4091_v25 = vmul.f32 %v8926_v31, %v8926_v31 }
 0x5df   :  { %v4117_v44 = vsel %vm19_vm0, %v4085_v32, 0.0  ;;  %v4118_v63 = vsel %vm19_vm0, %v4086_v62, 0.0  ;;  %v4120_v20 = vsel %vm19_vm0, %v4087_v2, 0.0  ;;  %v4122_v6 = vsel %vm19_vm0, %v4088_v1, 0.0 }
 0x5e0   :  { %v4119_v38 = vadd.f32 %v4118_v63, %v4117_v44  ;;  %v4124_v3 = vsel %vm19_vm0, %v4089_v54, 0.0  ;;  %v8947_v51 = vsub.f32 %v8756_v29, %v8864_v42  ;;  %v4092_v59 = vmul.f32 %v8933_v7, %v8933_v7 }
 0x5e1   :  { %v4126_v5 = vsel %vm19_vm0, %v4090_v55, 0.0  ;;  %v8954_v12 = vsub.f32 %v8759_v39, %v8864_v42  ;;  %v4093_v34 = vmul.f32 %v8940_v61, %v8940_v61  ;;  %v4128_v60 = vsel %vm19_vm0, %v4091_v25, 0.0 }
 0x5e2   :  { %v4121_v49 = vadd.f32 %v4120_v20, %v4119_v38  ;;  %v8961_v29 = vsub.f32 %v8762_v58, %v8864_v42  ;;  %v4094_v19 = vmul.f32 %v8947_v51, %v8947_v51  ;;  %v4130_v17 = vsel %vm19_vm0, %v4092_v59, 0.0 }
 0x5e3   :  { %v8968_v39 = vsub.f32 %v8765_v21, %v8864_v42  ;;  %v4095_v62 = vmul.f32 %v8954_v12, %v8954_v12  ;;  %v4132_v2 = vsel %vm19_vm0, %v4093_v34, 0.0  ;;  %v8975_v58 = vsub.f32 %v8768_v24, %v8864_v42 }
 0x5e4   :  { %v4123_v52 = vadd.f32 %v4122_v6, %v4121_v49  ;;  %v4096_v44 = vmul.f32 %v8961_v29, %v8961_v29  ;;  %v4134_v63 = vsel %vm19_vm0, %v4094_v19, 0.0  ;;  %v8982_v21 = vsub.f32 %v8781_v10, %v8864_v42 }
 0x5e5   :  { %v4097_v54 = vmul.f32 %v8968_v39, %v8968_v39  ;;  %v4136_v20 = vsel %vm19_vm0, %v4095_v62, 0.0  ;;  %v8989_v24 = vsub.f32 %v8784_v26, %v8864_v42  ;;  %v4098_v55 = vmul.f32 %v8975_v58, %v8975_v58 }
 0x5e6   :  { %v4125_v18 = vadd.f32 %v4124_v3, %v4123_v52  ;;  %v4138_v6 = vsel %vm19_vm0, %v4096_v44, 0.0  ;;  %v8996_v10 = vsub.f32 %v8795_v27, %v8864_v42  ;;  %v4099_v25 = vmul.f32 %v8982_v21, %v8982_v21 }
 0x5e7   :  { %v4140_v3 = vsel %vm19_vm0, %v4097_v54, 0.0  ;;  %v9003_v26 = vsub.f32 %v8798_v4, %v8864_v42  ;;  %v4100_v59 = vmul.f32 %v8989_v24, %v8989_v24  ;;  %v9010_v27 = vsub.f32 %v8809_v41, %v8864_v42 }
 0x5e8   :  { %v4127_v15 = vadd.f32 %v4126_v5, %v4125_v18  ;;  %v4142_v5 = vsel %vm19_vm0, %v4098_v55, 0.0  ;;  %v4101_v34 = vmul.f32 %v8996_v10, %v8996_v10  ;;  %v9017_v4 = vsub.f32 %v8812_v22, %v8864_v42 }
 0x5e9   :  { %v4102_v19 = vmul.f32 %v9003_v26, %v9003_v26  ;;  %v9024_v41 = vsub.f32 %v8823_v8, %v8864_v42  ;;  %v4103_v62 = vmul.f32 %v9010_v27, %v9010_v27  ;;  %v9031_v22 = vsub.f32 %v8826_v0, %v8864_v42 }
 0x5ea   :  { %v4129_v40 = vadd.f32 %v4128_v60, %v4127_v15  ;;  %v4144_v60 = vsel %vm19_vm0, %v4099_v25, 0.0  ;;  %v4104_v44 = vmul.f32 %v9017_v4, %v9017_v4  ;;  %v9038_v8 = vsub.f32 %v8837_v36, %v8864_v42 }
 0x5eb   :  { %v4105_v54 = vmul.f32 %v9024_v41, %v9024_v41  ;;  %v9045_v0 = vsub.f32 %v8840_v14, %v8864_v42  ;;  %v4106_v55 = vmul.f32 %v9031_v22, %v9031_v22  ;;  %v4109_v14 = vmul.f32 %v8867_v16, %v8867_v16 }
 0x5ec   :  { %v4131_v32 = vadd.f32 %v4130_v17, %v4129_v40  ;;  %v4146_v17 = vsel %vm19_vm0, %v4100_v59, 0.0  ;;  %v4107_v36 = vmul.f32 %v9038_v8, %v9038_v8 }
 0x5ed   :  { %v4156_v25 = vsel %vm19_vm0, %v4105_v54, 0.0  ;;  %v4158_v59 = vsel %vm19_vm0, %v4106_v55, 0.0  ;;  %v4114_v54 = vmul.f32 %v8882_v23, %v8882_v23  ;;  %v4115_v55 = vmul.f32 %v8885_v30, %v8885_v30 }
 0x5ee   :  { %v4133_v1 = vadd.f32 %v4132_v2, %v4131_v32  ;;  %v4148_v2 = vsel %vm19_vm0, %v4101_v34, 0.0  ;;  %v4160_v42 = vsel %vm19_vm0, %v4107_v36, 0.0  ;;  %v4110_v34 = vmul.f32 %v8870_v28, %v8870_v28 }
 0x5ef   :  { %v4116_v36 = vmul.f32 %v8888_v35, %v8888_v35 }
 0x5f0   :  { %v4135_v38 = vadd.f32 %v4134_v63, %v4133_v1  ;;  %v4150_v63 = vsel %vm19_vm0, %v4102_v19, 0.0  ;;  %v4111_v19 = vmul.f32 %v8873_v57, %v8873_v57 }
 0x5f2   :  { %v4137_v49 = vadd.f32 %v4136_v20, %v4135_v38  ;;  %v4152_v20 = vsel %vm19_vm0, %v4103_v62, 0.0  ;;  %v4112_v62 = vmul.f32 %v8876_v9, %v8876_v9 }
 0x5f4   :  { %v4139_v52 = vadd.f32 %v4138_v6, %v4137_v49  ;;  %v4154_v6 = vsel %vm19_vm0, %v4104_v44, 0.0  ;;  %v4113_v44 = vmul.f32 %v8879_v56, %v8879_v56 }
 0x5f6   :  { %v4141_v18 = vadd.f32 %v4140_v3, %v4139_v52 }
 0x5f8   :  { %v4143_v15 = vadd.f32 %v4142_v5, %v4141_v18  ;;  %v4108_v18 = vmul.f32 %v9045_v0, %v9045_v0 }
 0x5fa   :  { %v4145_v40 = vadd.f32 %v4144_v60, %v4143_v15  ;;  %v4162_v60 = vsel %vm19_vm0, %v4108_v18, 0.0  ;;  %v4176_v18 = vsel %vm19_vm0, %v4115_v55, 0.0 }
 0x5fc   :  { %v4147_v32 = vadd.f32 %v4146_v17, %v4145_v40  ;;  %v4164_v17 = vsel %vm19_vm0, %v4109_v14, 0.0 }
 0x5fe   :  { %v4149_v1 = vadd.f32 %v4148_v2, %v4147_v32  ;;  %v4166_v2 = vsel %vm19_vm0, %v4110_v34, 0.0 }
 0x600   :  { %v4151_v38 = vadd.f32 %v4150_v63, %v4149_v1  ;;  %v4168_v63 = vsel %vm19_vm0, %v4111_v19, 0.0 }
 0x602   :  { %v4153_v49 = vadd.f32 %v4152_v20, %v4151_v38  ;;  %v4170_v20 = vsel %vm19_vm0, %v4112_v62, 0.0  ;;  %v4349_v62 = vld [vmem:[%s10262_s3] sm:$0x7] }
 0x604   :  { %v4155_v52 = vadd.f32 %v4154_v6, %v4153_v49  ;;  %v4172_v6 = vsel %vm19_vm0, %v4113_v44, 0.0  ;;  %v9091_v44 = vrot.slane %v4349_v62, %v6267_v48 }
 0x606   :  { %v4157_v3 = vadd.f32 %v4156_v25, %v4155_v52  ;;  %v4174_v25 = vsel %vm19_vm0, %v4114_v54, 0.0  ;;  %10391 = vst [vmem:[#allocation9_spill] sm:$0xff] %v9091_v44  ;;  %v4389_v54 = vld [vmem:[#allocation3 + $0x10] sm:$0xff] }
 0x608   :  { %v4159_v5 = vadd.f32 %v4158_v59, %v4157_v3 }
 0x60a   :  { %v4161_v15 = vadd.f32 %v4160_v42, %v4159_v5  ;;  %v4178_v5 = vsel %vm19_vm0, %v4116_v36, 0.0  ;;  %v9098_v36 = vrot.slane %v4349_v62, %v6282_v53 }
 0x60c   :  { %v4163_v40 = vadd.f32 %v4162_v60, %v4161_v15  ;;  %10392 = vst [vmem:[#allocation10_spill] sm:$0xff] %v9098_v36 }
 0x60e   :  { %v4165_v32 = vadd.f32 %v4164_v17, %v4163_v40 }
 0x610   :  { %v4167_v1 = vadd.f32 %v4166_v2, %v4165_v32 }
 0x612   :  { %v4169_v38 = vadd.f32 %v4168_v63, %v4167_v1  ;;  %v9088_v1 = vrot.slane %v4349_v62, %v6264_v47 }
 0x614   :  { %v4171_v49 = vadd.f32 %v4170_v20, %v4169_v38  ;;  %v4353_v38 = vld [vmem:[#allocation3 + $0xf] sm:$0xff]  ;;  %v4352_v20 = vld [vmem:[#allocation3 + $0x7] sm:$0xff] }
 0x616   :  { %v4173_v52 = vadd.f32 %v4172_v6, %v4171_v49  ;;  %v4388_v49 = vld [vmem:[#allocation3 + $0x8] sm:$0xff]  ;;  %v4465_v6 = vmul.f32 %v9088_v1, %v4353_v38 }
 0x618   :  { %v4175_v3 = vadd.f32 %v4174_v25, %v4173_v52  ;;  %v4533_v52 = vmul.f32 %v9091_v44, %v4389_v54 }
 0x61a   :  { %v4177_v59 = vadd.f32 %v4176_v18, %v4175_v3  ;;  %v4464_v18 = vmul.f32 %v9088_v1, %v4352_v20 }
 0x61c   :  { %v4179_v14 = vadd.f32 %v4178_v5, %v4177_v59  ;;  %v4532_v59 = vmul.f32 %v9091_v44, %v4388_v49 }
 0x61e   :  { %v4180_v42 = vrot.slane %v4179_v14, 4 }
 0x620   :  { %v4181_v15 = vadd.f32 %v4180_v42, %v4179_v14 }
 0x622   :  { %v4182_v34 = vrot.slane %v4181_v15, 2 }
 0x624   :  { %v4183_v60 = vadd.f32 %v4182_v34, %v4181_v15  ;;  %v4424_v15 = vld [vmem:[#allocation3 + $0x9] sm:$0xff]  ;;  %v4565_v34 = vadd.f32 %v4533_v52, %v4465_v6 }
 0x626   :  { %v4184_v40 = vrot.slane %v4183_v60, 1 }
 0x628   :  { %v4185_v19 = vadd.f32 %v4184_v40, %v4183_v60 }
 0x62a   :  { %v4186_v17 = vmul.f32 0.00390625, %v4185_v19 }
 0x62c   :  { %v4187_v32 = vadd.f32 1e-05, %v4186_v17  ;;  %v4600_v17 = vmul.f32 %v9098_v36, %v4424_v15 }
 0x62e   :  { %5914 = vrsqrt.f32 %v4187_v32 }
 0x638   :  { %v9085_v2 = vpop.eup %5914 }
 0x639   :  { %v4220_v63 = vmul.f32 %v9085_v2, %v8888_v35  ;;  %v4189_v3 = vmul.f32 %v9085_v2, %v8892_v11  ;;  %v4350_v35 = vld [vmem:[%s10262_s3 + $0x4] sm:$0x7]  ;;  %v4190_v5 = vmul.f32 %v9085_v2, %v8896_v50  ;;  %v4191_v14 = vmul.f32 %v9085_v2, %v8900_v43  ;;  %v4425_v11 = vld [vmem:[#allocation3 + $0x11] sm:$0xff]  ;;  %v4351_v50 = vld [vmem:[%s10262_s3 + $0x8] sm:$0x7]  ;;  %s5951_s3 = smov [#allocation5]  }
 0x63a   :  { %v4192_v42 = vmul.f32 %v9085_v2, %v8904_v13  ;;  %v9115_v60 = vrot.slane %v4350_v35, %v6264_v47  ;;  %v9118_v40 = vrot.slane %v4350_v35, %v6267_v48  ;;  %v4601_v19 = vmul.f32 %v9098_v36, %v4425_v11  ;;  %s5379_s6 = sshll.u32 %s5951_s3, 4  ;;  %s5380_s6 = int_to_ptr.vmem [resolvable:$true] %s5379_s6 }
 0x63b   :  { %vm4252_vm5 = vcmp.ge.f32.partialorder %v4220_v63, 0.0  ;;  %v4284_v55 = vmul.f32 0.01, %v4220_v63  ;;  %vm4221_vm7 = vcmp.ge.f32.partialorder %v4189_v3, 0.0  ;;  %v4564_v43 = vadd.f32 %v4532_v59, %v4464_v18  ;;  %s5922_s7 = scalar_lea.vmem %s5380_s6, 256  ;;  %p5927_p1 = scmp.lt.s32.totalorder %s5380_s6, %s5380_s6 }
 0x63c   :  { %vm4222_vm11 = vcmp.ge.f32.partialorder %v4190_v5, 0.0  ;;  %vm4223_vm13 = vcmp.ge.f32.partialorder %v4191_v14, 0.0  ;;  %vm4224_vm3 = vcmp.ge.f32.partialorder %v4192_v42, 0.0  ;;  %v4253_v13 = vmul.f32 0.01, %v4189_v3  ;;  %p5923_p0 = scmp.ne.s32.totalorder %s5380_s6, %s5922_s7  ;;  %p5928_p2 = scmp.lt.s32.totalorder %s5922_s7, %s5922_s7 }
 0x63d   :  { %v4316_v25 = vsel %vm4252_vm5, %v4220_v63, %v4284_v55  ;;  %v4254_v32 = vmul.f32 0.01, %v4190_v5  ;;  %v4255_v62 = vmul.f32 0.01, %v4191_v14  ;;  %v4256_v63 = vmul.f32 0.01, %v4192_v42 }
 0x63e   :  { %4348 = vst.msk [vmem:[#allocation3 + $0x210] sm:$0xff] %vm19_vm0, %v4316_v25  ;;  %v9126_v38 = vrot.slane %v4350_v35, %v6282_v53  ;;  %v4285_v54 = vsel %vm4221_vm7, %v4189_v3, %v4253_v13  ;;  %v9129_v20 = vrot.slane %v4351_v50, %v6264_v47  ;;  %v9132_v49 = vrot.slane %v4351_v50, %v6267_v48  ;;  %p5929_p3 = por %p5928_p2, %p5927_p1 }
 0x63f   :  { %v9135_v55 = vrot.slane %v4351_v50, %v6282_v53  ;;  %v4286_v6 = vsel %vm4222_vm11, %v4190_v5, %v4254_v32  ;;  %v4287_v52 = vsel %vm4223_vm13, %v4191_v14, %v4255_v62  ;;  %v4288_v25 = vsel %vm4224_vm3, %v4192_v42, %v4256_v63  ;;  %4317 = vst.msk [vmem:[#allocation3 + $0x28] sm:$0xff] %vm19_vm0, %v4285_v54 }
 0x640   :  { %v4633_v18 = vadd.f32 %v4601_v19, %v4565_v34  ;;  %v4193_v35 = vmul.f32 %v9085_v2, %v8912_v33  ;;  %v9142_v3 = vmul.f32 %v9085_v2, %v8918_v37  ;;  %v9146_v47 = vmul.f32 %v9085_v2, %v8926_v31  ;;  %4318 = vst.msk [vmem:[#allocation3 + $0x30] sm:$0xff] %vm19_vm0, %v4286_v6  ;;  %p5930_p4 = pnand %p5929_p3, %p5923_p0 }
 0x641   :  { %4319 = vst.msk [vmem:[#allocation3 + $0x48] sm:$0xff] %vm19_vm0, %v4287_v52  ;;  %4320 = vst.msk [vmem:[#allocation3 + $0x50] sm:$0xff] %vm19_vm0, %v4288_v25  ;;  %v9151_v48 = vadd.f32 %v4600_v17, %v4564_v43  ;;  %v9155_v53 = vmul.f32 %v9085_v2, %v8933_v7  ;;  %v9159_v33 = vmul.f32 %v9085_v2, %v8940_v61 }
 0x642   :  { %v9163_v37 = vmul.f32 %v9085_v2, %v8947_v51  ;;  %v9167_v31 = vmul.f32 %v9085_v2, %v8954_v12  ;;  %v9171_v59 = vmul.f32 %v9085_v2, %v8961_v29  ;;  %v9175_v7 = vmul.f32 %v9085_v2, %v8968_v39 }
 0x643   :  { %v9179_v61 = vmul.f32 %v9085_v2, %v8975_v58  ;;  %v9183_v51 = vmul.f32 %v9085_v2, %v8982_v21  ;;  %v9187_v12 = vmul.f32 %v9085_v2, %v8989_v24  ;;  %v9191_v29 = vmul.f32 %v9085_v2, %v8996_v10 }
 0x644   :  { %v9195_v39 = vmul.f32 %v9085_v2, %v9003_v26  ;;  %v9199_v58 = vmul.f32 %v9085_v2, %v9010_v27  ;;  %v9203_v21 = vmul.f32 %v9085_v2, %v9017_v4  ;;  %v9207_v24 = vmul.f32 %v9085_v2, %v9024_v41 }
 0x645   :  { %v9211_v10 = vmul.f32 %v9085_v2, %v9031_v22  ;;  %vm4225_vm14 = vcmp.ge.f32.partialorder %v4193_v35, 0.0  ;;  %v9215_v26 = vmul.f32 %v9085_v2, %v9038_v8  ;;  %v9219_v27 = vmul.f32 %v9085_v2, %v9045_v0 }
 0x646   :  { %10393 = vst [vmem:[#allocation11_spill] sm:$0xff] %v9207_v24  ;;  %v9223_v4 = vmul.f32 %v9085_v2, %v8867_v16  ;;  %v4257_v5 = vmul.f32 0.01, %v4193_v35  ;;  %v9227_v41 = vmul.f32 %v9085_v2, %v8870_v28  ;;  %v9231_v22 = vmul.f32 %v9085_v2, %v8873_v57 }
 0x647   :  { %10394 = vst [vmem:[#allocation12_spill] sm:$0xff] %v9211_v10  ;;  %v9235_v8 = vmul.f32 %v9085_v2, %v8876_v9  ;;  %v9238_v0 = vmul.f32 0.01, %v9142_v3  ;;  %v9242_v16 = vmul.f32 %v9085_v2, %v8879_v56  ;;  %v9246_v14 = vmul.f32 %v9085_v2, %v8882_v23  ;;  %v4355_v28 = vld [vmem:[#allocation3 + $0x2f] sm:$0xff] }
 0x648   :  { %10395 = vst [vmem:[#allocation13_spill] sm:$0xff] %v9223_v4  ;;  %10396 = vst [vmem:[#allocation14_spill] sm:$0xff] %v9227_v41  ;;  %v4357_v42 = vld [vmem:[#allocation3 + $0x4f] sm:$0xff]  ;;  %v9249_v57 = vmul.f32 0.01, %v9146_v47  ;;  %v4289_v15 = vsel %vm4225_vm14, %v4193_v35, %v4257_v5  ;;  %v9253_v9 = vmul.f32 %v9085_v2, %v8885_v30  ;;  %v4669_v43 = vmul.f32 %v9115_v60, %v4355_v28 }
 0x649   :  { %10397 = vst [vmem:[#allocation15_spill] sm:$0xff] %v9231_v22  ;;  %10398 = vst [vmem:[#allocation16_spill] sm:$0xff] %v9235_v8  ;;  %v4391_v11 = vld [vmem:[#allocation3 + $0x30] sm:$0xff]  ;;  %v4469_v56 = vmul.f32 %v9088_v1, %v4357_v42  ;;  %v9258_v23 = vmul.f32 0.01, %v9155_v53  ;;  %v9266_v30 = vmul.f32 %v9115_v60, %v4357_v42  ;;  %vm4226_vm15 = vcmp.ge.f32.partialorder %v9142_v3, 0.0 }
 0x64a   :  { %10399 = vst [vmem:[#allocation17_spill] sm:$0xff] %v9242_v16  ;;  %10400 = vst [vmem:[#allocation18_spill] sm:$0xff] %v9253_v9  ;;  %v4393_v34 = vld [vmem:[#allocation3 + $0x50] sm:$0xff]  ;;  %v9262_v17 = vmul.f32 %v9091_v44, %v4391_v11  ;;  %v9269_v2 = vmul.f32 0.01, %v9159_v33  ;;  %v4701_v63 = vadd.f32 %v4669_v43, %v4633_v18  ;;  %v4737_v54 = vmul.f32 %v9118_v40, %v4391_v11 }
 0x64b   :  { %v4427_v50 = vld [vmem:[#allocation3 + $0x31] sm:$0xff]  ;;  %4321 = vst.msk [vmem:[#allocation3 + $0x68] sm:$0xff] %vm19_vm0, %v4289_v15  ;;  %v4537_v13 = vmul.f32 %v9091_v44, %v4393_v34  ;;  %10402 = vst [vmem:[#allocation20_spill] sm:$0xff] %v9266_v30  ;;  %v9277_v52 = vmul.f32 %v9118_v40, %v4393_v34  ;;  %v4873_v15 = vmul.f32 %v9129_v20, %v4357_v42  ;;  %v9286_v30 = vld [vmem:[#allocation3 + $0x47] sm:$0xff]  ;;  %vm4227_vm2 = vcmp.ge.f32.partialorder %v9146_v47, 0.0 }
 0x64c   :  { %v4429_v19 = vld [vmem:[#allocation3 + $0x51] sm:$0xff]  ;;  %10401 = vst [vmem:[#allocation19_spill] sm:$0xff] %v9262_v17  ;;  %v9272_v32 = vmul.f32 %v9098_v36, %v4427_v50  ;;  %v4805_v25 = vmul.f32 %v9126_v38, %v4427_v50  ;;  %v4769_v5 = vadd.f32 %v4737_v54, %v4701_v63  ;;  %v4941_v45 = vmul.f32 %v9132_v49, %v4393_v34  ;;  %v4390_v50 = vld [vmem:[#allocation3 + $0x28] sm:$0xff] }
 0x64d   :  { %v4605_v62 = vmul.f32 %v9098_v36, %v4429_v19  ;;  %v4569_v6 = vadd.f32 %v4537_v13, %v4469_v56  ;;  %10404 = vst [vmem:[#allocation22_spill] sm:$0xff] %v9277_v52  ;;  %v9281_v35 = vmul.f32 %v9126_v38, %v4429_v19  ;;  %v5009_v46 = vmul.f32 %v9135_v55, %v4429_v19  ;;  %v9316_v13 = vld [vmem:[#allocation3 + $0x48] sm:$0xff] }
 0x64e   :  { %10403 = vst [vmem:[#allocation21_spill] sm:$0xff] %v9272_v32  ;;  %v9289_v18 = vmul.f32 %v9088_v1, %v4355_v28  ;;  %vm4228_vm1 = vcmp.ge.f32.partialorder %v9155_v53, 0.0  ;;  %v9295_v11 = vmul.f32 0.01, %v9163_v37  ;;  %v9298_v42 = vmul.f32 0.01, %v9167_v31 }
 0x64f   :  { %10405 = vst [vmem:[#allocation23_spill] sm:$0xff] %v9281_v35  ;;  %v9301_v34 = vmul.f32 0.01, %v9171_v59  ;;  %v4837_v19 = vadd.f32 %v4805_v25, %v4769_v5  ;;  %vm4229_vm9 = vcmp.ge.f32.partialorder %v9159_v33, 0.0  ;;  %vm4230_vm12 = vcmp.ge.f32.partialorder %v9163_v37, 0.0  ;;  %v4354_v35 = vld [vmem:[#allocation3 + $0x27] sm:$0xff] }
 0x650   :  { %10406 = vst [vmem:[#allocation24_spill] sm:$0xff] %v9289_v18  ;;  %vm4231_vm6 = vcmp.ge.f32.partialorder %v9167_v31, 0.0  ;;  %vm4232_vm4 = vcmp.ge.f32.partialorder %v9171_v59, 0.0  ;;  %v9308_v28 = vmul.f32 0.01, %v9175_v7  ;;  %v9318_v63 = vadd.f32 %v4605_v62, %v4569_v6 }
 0x651   :  { %v9311_v56 = vmul.f32 0.01, %v9179_v61  ;;  %v9314_v43 = vmul.f32 0.01, %v9183_v51  ;;  %vm4233_vm8 = vcmp.ge.f32.partialorder %v9175_v7, 0.0  ;;  %vm4234_vm10 = vcmp.ge.f32.partialorder %v9179_v61, 0.0 }
 0x652   :  { %10407 = vst [vmem:[#allocation25_spill] sm:$0xff] %v9318_v63  ;;  %v9324_v54 = vmul.f32 0.01, %v9187_v12  ;;  %v9327_v25 = vmul.f32 0.01, %v9191_v29  ;;  %v4905_v52 = vadd.f32 %v4873_v15, %v4837_v19  ;;  %vm4237_vm11 = vcmp.ge.f32.partialorder %v9191_v29, 0.0 }
 0x653   :  { %v9330_v5 = vmul.f32 0.01, %v9195_v39  ;;  %vm4238_vm13 = vcmp.ge.f32.partialorder %v9195_v39, 0.0  ;;  %v9337_v62 = vmul.f32 0.01, %v9199_v58  ;;  %v4468_v17 = vmul.f32 %v9088_v1, %v9286_v30 }
 0x654   :  { %v9340_v6 = vmul.f32 0.01, %v9203_v21  ;;  %v9343_v63 = vmul.f32 0.01, %v9207_v24  ;;  %v9349_v15 = vmul.f32 0.01, %v9211_v10  ;;  %v4973_v18 = vadd.f32 %v4941_v45, %v4905_v52 }
 0x655   :  { %v9352_v19 = vmul.f32 0.01, %v9215_v26  ;;  %v9355_v32 = vmul.f32 0.01, %v9219_v27  ;;  %v9364_v10 = vmul.f32 0.01, %v9223_v4  ;;  %v9372_v24 = vmul.f32 %v9091_v44, %v4390_v50 }
 0x656   :  { %10408 = vst [vmem:[#allocation26_spill] sm:$0xff] %v9349_v15  ;;  %v4426_v15 = vld [vmem:[#allocation3 + $0x29] sm:$0xff]  ;;  %vm4248_vm14 = vcmp.ge.f32.partialorder %v9235_v8, 0.0  ;;  %vm4249_vm5 = vcmp.ge.f32.partialorder %v9242_v16, 0.0  ;;  %v9378_v45 = vmul.f32 0.01, %v9231_v22  ;;  %v5041_v4 = vadd.f32 %v5009_v46, %v4973_v18 }
 0x657   :  { %10409 = vst [vmem:[#allocation27_spill] sm:$0xff] %v9352_v19  ;;  %10410 = vst [vmem:[#allocation28_spill] sm:$0xff] %v9355_v32  ;;  %v9367_v19 = vmul.f32 0.01, %v9227_v41  ;;  %v9369_v32 = vld [vmem:[#allocation3 + $0x49] sm:$0xff]  ;;  %vm4250_vm7 = vcmp.ge.f32.partialorder %v9246_v14, 0.0  ;;  %v9408_v18 = vmul.f32 %v9115_v60, %v9286_v30 }
 0x658   :  { %10412 = vst [vmem:[#allocation30_spill] sm:$0xff] %v9372_v24  ;;  %v9381_v52 = vmul.f32 0.01, %v9235_v8  ;;  %v9384_v41 = vmul.f32 0.01, %v9242_v16  ;;  %vm4251_vm3 = vcmp.ge.f32.partialorder %v9253_v9, 0.0  ;;  %v4668_v8 = vmul.f32 %v9115_v60, %v4354_v35 }
 0x659   :  { %10411 = vst [vmem:[#allocation29_spill] sm:$0xff] %v9367_v19  ;;  %v4536_v19 = vmul.f32 %v9091_v44, %v9316_v13  ;;  %v9391_v24 = vmul.f32 0.01, %v9246_v14  ;;  %v9394_v22 = vmul.f32 0.01, %v9253_v9  ;;  %v9400_v16 = vmul.f32 %v9098_v36, %v4426_v15  ;;  %10416 = vst [vmem:[#allocation34_spill] sm:$0xff] %v9408_v18 }
 0x65a   :  { %10413 = vst [vmem:[#allocation31_spill] sm:$0xff] %v9381_v52  ;;  %v9404_v46 = vmul.f32 %v9098_v36, %v9369_v32  ;;  %v5075_v44 = vsel %vm19_vm0, %v5041_v4, 0.0  ;;  %v4700_v9 = vadd.f32 %v4668_v8, %v9151_v48  ;;  %v5008_v36 = vmul.f32 %v9135_v55, %v9369_v32 }
 0x65b   :  { %10414 = vst [vmem:[#allocation32_spill] sm:$0xff] %v9394_v22  ;;  %v9397_v52 = vadd.f32 %v4536_v19, %v4468_v17  ;;  %10415 = vst [vmem:[#allocation33_spill] sm:$0xff] %v9400_v16  ;;  %v4736_v22 = vmul.f32 %v9118_v40, %v4390_v50  ;;  %v4804_v17 = vmul.f32 %v9126_v38, %v4426_v15  ;;  %5076 = vadd.xlane.f32.xlu1 %v5075_v44  ;;  %v10441_v15 = vld [vmem:[#allocation18_spill] sm:$0xff] }
 0x65c   :  { %v4872_v19 = vmul.f32 %v9129_v20, %v9286_v30  ;;  %v4940_v16 = vmul.f32 %v9132_v49, %v9316_v13  ;;  %v9421_v18 = vmul.f32 %v9088_v1, %v4354_v35  ;;  %v4290_v48 = vsel %vm4226_vm15, %v9142_v3, %v9238_v0  ;;  %v4358_v30 = vld [vmem:[#allocation3 + $0x67] sm:$0xff] }
 0x65d   :  { %v4768_v4 = vadd.f32 %v4736_v22, %v4700_v9  ;;  %v4291_v44 = vsel %vm4227_vm2, %v9146_v47, %v9249_v57  ;;  %v4292_v8 = vsel %vm4228_vm1, %v9155_v53, %v9258_v23  ;;  %v4293_v22 = vsel %vm4229_vm9, %v9159_v33, %v9269_v2  ;;  %4322 = vst.msk [vmem:[#allocation3 + $0x70] sm:$0xff] %vm19_vm0, %v4290_v48  ;;  %v10421_v57 = vld [vmem:[#allocation11_spill] sm:$0xff]  ;;  %v10423_v9 = vld [vmem:[#allocation26_spill] sm:$0xff]  ;;  %v10424_v23 = vld [vmem:[#allocation12_spill] sm:$0xff] }
 0x65e   :  { %v4294_v3 = vsel %vm4230_vm12, %v9163_v37, %v9295_v11  ;;  %v4295_v47 = vsel %vm4231_vm6, %v9167_v31, %v9298_v42  ;;  %v4296_v53 = vsel %vm4232_vm4, %v9171_v59, %v9301_v34  ;;  %4323 = vst.msk [vmem:[#allocation3 + $0x88] sm:$0xff] %vm19_vm0, %v4291_v44  ;;  %4324 = vst.msk [vmem:[#allocation3 + $0x90] sm:$0xff] %vm19_vm0, %v4292_v8  ;;  %vm10417_vm15 = vcmp.ge.f32.partialorder %v9183_v51, 0.0  ;;  %v10426_v2 = vld [vmem:[#allocation27_spill] sm:$0xff]  ;;  %v10428_v11 = vld [vmem:[#allocation28_spill] sm:$0xff] }
 0x65f   :  { %v4836_v33 = vadd.f32 %v4804_v17, %v4768_v4  ;;  %v4297_v37 = vsel %vm4233_vm8, %v9175_v7, %v9308_v28  ;;  %v4298_v31 = vsel %vm4234_vm10, %v9179_v61, %v9311_v56  ;;  %v4299_v59 = vsel %vm10417_vm15, %v9183_v51, %v9314_v43  ;;  %4325 = vst.msk [vmem:[#allocation3 + $0xa8] sm:$0xff] %vm19_vm0, %v4293_v22  ;;  %v10430_v34 = vld [vmem:[#allocation13_spill] sm:$0xff]  ;;  %v10433_v56 = vld [vmem:[#allocation14_spill] sm:$0xff] }
 0x660   :  { %4326 = vst.msk [vmem:[#allocation3 + $0xb0] sm:$0xff] %vm19_vm0, %v4294_v3  ;;  %4327 = vst.msk [vmem:[#allocation3 + $0xc8] sm:$0xff] %vm19_vm0, %v4295_v47  ;;  %vm10418_vm2 = vcmp.ge.f32.partialorder %v9187_v12, 0.0  ;;  %v4301_v61 = vsel %vm4237_vm11, %v9191_v29, %v9327_v25  ;;  %v4302_v51 = vsel %vm4238_vm13, %v9195_v39, %v9330_v5  ;;  %vm10419_vm1 = vcmp.ge.f32.partialorder %v9199_v58, 0.0  ;;  %v10432_v28 = vld [vmem:[#allocation29_spill] sm:$0xff]  ;;  %v10438_v25 = vld [vmem:[#allocation16_spill] sm:$0xff] }
 0x661   :  { %4328 = vst.msk [vmem:[#allocation3 + $0xd0] sm:$0xff] %vm19_vm0, %v4296_v53  ;;  %v4300_v7 = vsel %vm10418_vm2, %v9187_v12, %v9324_v54  ;;  %v4303_v0 = vsel %vm10419_vm1, %v9199_v58, %v9337_v62  ;;  %4331 = vst.msk [vmem:[#allocation3 + $0x108] sm:$0xff] %vm19_vm0, %v4299_v59  ;;  %v4904_v12 = vadd.f32 %v4872_v19, %v4836_v33  ;;  %vm10420_vm9 = vcmp.ge.f32.partialorder %v9203_v21, 0.0  ;;  %v10437_v54 = vld [vmem:[#allocation31_spill] sm:$0xff]  ;;  %v10439_v5 = vld [vmem:[#allocation17_spill] sm:$0xff] }
 0x662   :  { %4329 = vst.msk [vmem:[#allocation3 + $0xe8] sm:$0xff] %vm19_vm0, %v4297_v37  ;;  %4330 = vst.msk [vmem:[#allocation3 + $0xf0] sm:$0xff] %vm19_vm0, %v4298_v31  ;;  %v4304_v29 = vsel %vm10420_vm9, %v9203_v21, %v9340_v6  ;;  %vm10422_vm12 = vcmp.ge.f32.partialorder %v10421_v57, 0.0  ;;  %vm10425_vm6 = vcmp.ge.f32.partialorder %v10424_v23, 0.0  ;;  %v4394_v21 = vld [vmem:[#allocation3 + $0x68] sm:$0xff]  ;;  %vm10427_vm4 = vcmp.ge.f32.partialorder %v9215_v26, 0.0 }
 0x663   :  { %v4305_v39 = vsel %vm10422_vm12, %v10421_v57, %v9343_v63  ;;  %v4306_v58 = vsel %vm10425_vm6, %v10424_v23, %v10423_v9  ;;  %4332 = vst.msk [vmem:[#allocation3 + $0x110] sm:$0xff] %vm19_vm0, %v4300_v7  ;;  %4333 = vst.msk [vmem:[#allocation3 + $0x128] sm:$0xff] %vm19_vm0, %v4301_v61  ;;  %v4307_v35 = vsel %vm10427_vm4, %v9215_v26, %v10426_v2  ;;  %vm10429_vm8 = vcmp.ge.f32.partialorder %v9219_v27, 0.0  ;;  %v10435_v63 = vld [vmem:[#allocation15_spill] sm:$0xff]  ;;  %v10440_v6 = vld [vmem:[#allocation32_spill] sm:$0xff] }
 0x664   :  { %4334 = vst.msk [vmem:[#allocation3 + $0x130] sm:$0xff] %vm19_vm0, %v4302_v51  ;;  %4335 = vst.msk [vmem:[#allocation3 + $0x148] sm:$0xff] %vm19_vm0, %v4303_v0  ;;  %v4308_v42 = vsel %vm10429_vm8, %v9219_v27, %v10428_v11  ;;  %vm10431_vm10 = vcmp.ge.f32.partialorder %v10430_v34, 0.0  ;;  %vm10434_vm11 = vcmp.ge.f32.partialorder %v10433_v56, 0.0  ;;  %v4972_v26 = vadd.f32 %v4940_v16, %v4904_v12  ;;  %v10442_v17 = vld [vmem:[#allocation9_spill] sm:$0xff]  ;;  %v4430_v48 = vld [vmem:[#allocation3 + $0x69] sm:$0xff] }
 0x665   :  { %v4309_v50 = vsel %vm10431_vm10, %v10430_v34, %v9364_v10  ;;  %v4310_v43 = vsel %vm10434_vm11, %v10433_v56, %v10432_v28  ;;  %4336 = vst.msk [vmem:[#allocation3 + $0x150] sm:$0xff] %vm19_vm0, %v4304_v29  ;;  %4337 = vst.msk [vmem:[#allocation3 + $0x168] sm:$0xff] %vm19_vm0, %v4305_v39  ;;  %vm10436_vm13 = vcmp.ge.f32.partialorder %v10435_v63, 0.0  ;;  %v4312_v10 = vsel %vm4248_vm14, %v10438_v25, %v10437_v54  ;;  %v10443_v44 = vld [vmem:[#allocation30_spill] sm:$0xff]  ;;  %v10445_v0 = vld [vmem:[#allocation33_spill] sm:$0xff] }
 0x666   :  { %4338 = vst.msk [vmem:[#allocation3 + $0x170] sm:$0xff] %vm19_vm0, %v4306_v58  ;;  %v4311_v27 = vsel %vm10436_vm13, %v10435_v63, %v9378_v45  ;;  %v4313_v62 = vsel %vm4249_vm5, %v10439_v5, %v9384_v41  ;;  %4339 = vst.msk [vmem:[#allocation3 + $0x188] sm:$0xff] %vm19_vm0, %v4307_v35  ;;  %v4314_v16 = vsel %vm4250_vm7, %v9246_v14, %v9391_v24  ;;  %vm5348_vm5 = vcmask 1041409  }
 0x667   :  { %4340 = vst.msk [vmem:[#allocation3 + $0x190] sm:$0xff] %vm19_vm0, %v4308_v42  ;;  %4341 = vst.msk [vmem:[#allocation3 + $0x1a8] sm:$0xff] %vm19_vm0, %v4309_v50  ;;  %v4315_v45 = vsel %vm4251_vm3, %v10441_v15, %v10440_v6  ;;  %v4470_v41 = vmul.f32 %v9088_v1, %v4358_v30  ;;  %v4538_v19 = vmul.f32 %v10442_v17, %v4394_v21  ;;  %vm5350_vm7 = vcmask 1042434  }
 0x668   :  { %4342 = vst.msk [vmem:[#allocation3 + $0x1b0] sm:$0xff] %vm19_vm0, %v4310_v43  ;;  %4343 = vst.msk [vmem:[#allocation3 + $0x1c8] sm:$0xff] %vm19_vm0, %v4311_v27  ;;  %v4738_v4 = vmul.f32 %v9118_v40, %v9316_v13  ;;  %v9557_v24 = vmul.f32 %v9126_v38, %v9369_v32  ;;  %v5040_v14 = vadd.f32 %v5008_v36, %v4972_v26  ;;  %v9573_v36 = vld [vmem:[#allocation3 + $0x6f] sm:$0xff]  ;;  %v9576_v53 = vld [vmem:[#allocation3 + $0x107] sm:$0xff]  ;;  %vm5352_vm3 = vcmask 1043459  }
 0x669   :  { %4344 = vst.msk [vmem:[#allocation3 + $0x1d0] sm:$0xff] %vm19_vm0, %v4312_v10  ;;  %4345 = vst.msk [vmem:[#allocation3 + $0x1e8] sm:$0xff] %vm19_vm0, %v4313_v62  ;;  %v4566_v8 = vadd.f32 %v10443_v44, %v9421_v18  ;;  %v9565_v22 = vadd.f32 %v9404_v46, %v9397_v52  ;;  %v4570_v3 = vadd.f32 %v4538_v19, %v4470_v41  ;;  %v9578_v33 = vld [vmem:[#allocation3 + $0x108] sm:$0xff]  ;;  %v10444_v18 = vld [vmem:[#allocation10_spill] sm:$0xff]  ;;  %vm5354_vm14 = vcmask 1044484  }
 0x66a   :  { %4346 = vst.msk [vmem:[#allocation3 + $0x1f0] sm:$0xff] %vm19_vm0, %v4314_v16  ;;  %4347 = vst.msk [vmem:[#allocation3 + $0x208] sm:$0xff] %vm19_vm0, %v4315_v45  ;;  %v9568_v13 = vmul.f32 %v9115_v60, %v4358_v30  ;;  %v9571_v32 = vmul.f32 %v9118_v40, %v4394_v21  ;;  %v5072_v47 = vsel %vm19_vm0, %v5040_v14, 0.0  ;;  %v4606_v37 = vmul.f32 %v10444_v18, %v4430_v48  ;;  %v4370_v31 = vld [vmem:[#allocation3 + $0x127] sm:$0xff] }
 0x66b   :  { %v9582_v52 = vmul.f32 %v9126_v38, %v4430_v48  ;;  %v4874_v46 = vmul.f32 %v9129_v20, %v4358_v30  ;;  %5073 = vadd.xlane.f32.xlu0 %v5072_v47  ;;  %v4372_v59 = vld [vmem:[#allocation3 + $0x147] sm:$0xff]  ;;  %v4480_v61 = vmul.f32 %v9088_v1, %v9576_v53  ;;  %v4548_v51 = vmul.f32 %v10442_v17, %v9578_v33 }
 0x66c   :  { %v4406_v7 = vld [vmem:[#allocation3 + $0x128] sm:$0xff]  ;;  %v4634_v12 = vadd.f32 %v10445_v0, %v4566_v8  ;;  %v4942_v29 = vmul.f32 %v9132_v49, %v4394_v21  ;;  %v4484_v23 = vmul.f32 %v9088_v1, %v4372_v59  ;;  %v9594_v58 = vadd.f32 %v4606_v37, %v4570_v3  ;;  %v10446_v16 = vld [vmem:[#allocation34_spill] sm:$0xff]  ;;  %v4395_v37 = vld [vmem:[#allocation3 + $0x70] sm:$0xff] }
 0x66d   :  { %v4408_v57 = vld [vmem:[#allocation3 + $0x148] sm:$0xff]  ;;  %v5010_v30 = vmul.f32 %v9135_v55, %v4430_v48  ;;  %v4471_v2 = vmul.f32 %v9088_v1, %v9573_v36  ;;  %v4550_v11 = vmul.f32 %v10442_v17, %v4406_v7  ;;  %v4580_v34 = vadd.f32 %v4548_v51, %v4480_v61 }
 0x66e   :  { %v9591_v39 = vld [vmem:[#allocation3 + $0x109] sm:$0xff]  ;;  %v4552_v42 = vmul.f32 %v10442_v17, %v4408_v57  ;;  %v4684_v56 = vmul.f32 %v9115_v60, %v4370_v31  ;;  %v4686_v43 = vmul.f32 %v9115_v60, %v4372_v59  ;;  %v4752_v25 = vmul.f32 %v9118_v40, %v4406_v7 }
 0x66f   :  { %v4442_v9 = vld [vmem:[#allocation3 + $0x129] sm:$0xff]  ;;  %v4616_v21 = vmul.f32 %v10444_v18, %v9591_v39  ;;  %v4754_v10 = vmul.f32 %v9118_v40, %v4408_v57  ;;  %v4702_v6 = vadd.f32 %v10446_v16, %v4634_v12  ;;  %v4482_v45 = vmul.f32 %v9088_v1, %v4370_v31 }
 0x670   :  { %v4444_v35 = vld [vmem:[#allocation3 + $0x149] sm:$0xff]  ;;  %v4618_v50 = vmul.f32 %v10444_v18, %v4442_v9  ;;  %v4584_v27 = vadd.f32 %v4552_v42, %v4484_v23  ;;  %v4820_v5 = vmul.f32 %v9126_v38, %v4442_v9  ;;  %v4888_v19 = vmul.f32 %v9129_v20, %v4372_v59 }
 0x671   :  { %v4620_v28 = vmul.f32 %v10444_v18, %v4444_v35  ;;  %v4374_v26 = vld [vmem:[#allocation3 + $0x167] sm:$0xff]  ;;  %v4648_v54 = vadd.f32 %v4616_v21, %v4580_v34  ;;  %v4822_v62 = vmul.f32 %v9126_v38, %v4444_v35  ;;  %v4956_v44 = vmul.f32 %v9132_v49, %v4408_v57  ;;  %v10447_v21 = vld [vmem:[#allocation24_spill] sm:$0xff] }
 0x672   :  { %v4410_v63 = vld [vmem:[#allocation3 + $0x168] sm:$0xff]  ;;  %v4486_v14 = vmul.f32 %v9088_v1, %v4374_v26  ;;  %v5024_v8 = vmul.f32 %v9135_v55, %v4444_v35  ;;  %v4770_v3 = vadd.f32 %v4738_v4, %v4702_v6  ;;  %v4582_v47 = vadd.f32 %v4550_v11, %v4482_v45  ;;  %v4431_v35 = vld [vmem:[#allocation3 + $0x71] sm:$0xff] }
 0x673   :  { %v4446_v15 = vld [vmem:[#allocation3 + $0x169] sm:$0xff]  ;;  %v4716_v41 = vadd.f32 %v4684_v56, %v4648_v54  ;;  %v4554_v48 = vmul.f32 %v10442_v17, %v4410_v63  ;;  %v9618_v7 = vadd.f32 %v4620_v28, %v4584_v27  ;;  %v9623_v12 = vmul.f32 %v9115_v60, %v4374_v26  ;;  %v10449_v6 = vld [vmem:[#allocation21_spill] sm:$0xff] }
 0x674   :  { %v4622_v31 = vmul.f32 %v10444_v18, %v4446_v15  ;;  %v4838_v0 = vadd.f32 %v9557_v24, %v4770_v3  ;;  %v4650_v59 = vadd.f32 %v4618_v50, %v4582_v47  ;;  %v9626_v9 = vmul.f32 %v9118_v40, %v4410_v63  ;;  %v10448_v50 = vld [vmem:[#allocation19_spill] sm:$0xff] }
 0x675   :  { %v4784_v61 = vadd.f32 %v4752_v25, %v4716_v41  ;;  %v4586_v51 = vadd.f32 %v4554_v48, %v4486_v14  ;;  %v9629_v4 = vmul.f32 %v9126_v38, %v4446_v15  ;;  %v4890_v23 = vmul.f32 %v9129_v20, %v4374_v26  ;;  %v4360_v41 = vld [vmem:[#allocation3 + $0x87] sm:$0xff] }
 0x676   :  { %v4539_v11 = vmul.f32 %v10442_v17, %v4395_v37  ;;  %v4906_v42 = vadd.f32 %v4874_v46, %v4838_v0  ;;  %v4718_v34 = vadd.f32 %v4686_v43, %v4650_v59  ;;  %v4958_v24 = vmul.f32 %v9132_v49, %v4410_v63  ;;  %v4396_v46 = vld [vmem:[#allocation3 + $0x88] sm:$0xff]  ;;  %v10451_v59 = vld [vmem:[#allocation22_spill] sm:$0xff] }
 0x677   :  { %v4852_v57 = vadd.f32 %v4820_v5, %v4784_v61  ;;  %v4567_v28 = vadd.f32 %v10448_v50, %v10447_v21  ;;  %v9636_v27 = vadd.f32 %v4622_v31, %v4586_v51  ;;  %v5026_v54 = vmul.f32 %v9135_v55, %v4446_v15  ;;  %v10450_v15 = vld [vmem:[#allocation20_spill] sm:$0xff]  ;;  %v10452_v50 = vld [vmem:[#allocation23_spill] sm:$0xff] }
 0x678   :  { %v4571_v25 = vadd.f32 %v4539_v11, %v4471_v2  ;;  %v4974_v5 = vadd.f32 %v4942_v29, %v4906_v42  ;;  %v4786_v16 = vadd.f32 %v4754_v10, %v4718_v34  ;;  %v4607_v26 = vmul.f32 %v10444_v18, %v4431_v35  ;;  %v4432_v47 = vld [vmem:[#allocation3 + $0x89] sm:$0xff] }
 0x679   :  { %v4920_v56 = vadd.f32 %v4888_v19, %v4852_v57  ;;  %v4635_v45 = vadd.f32 %v10449_v6, %v4567_v28  ;;  %v9643_v63 = vmul.f32 %v9115_v60, %v9573_v36  ;;  %v9646_v19 = vmul.f32 %v9118_v40, %v4395_v37  ;;  %v9665_v42 = vld [vmem:[#allocation3 + $0x10f] sm:$0xff] }
 0x67a   :  { %v9649_v14 = vmul.f32 %v9126_v38, %v4431_v35  ;;  %v5042_v2 = vadd.f32 %v5010_v30, %v4974_v5  ;;  %v4854_v29 = vadd.f32 %v4822_v62, %v4786_v16  ;;  %v9651_v10 = vadd.f32 %v4607_v26, %v4571_v25  ;;  %v4373_v34 = vld [vmem:[#allocation3 + $0x14f] sm:$0xff] }
 0x67b   :  { %v4988_v43 = vadd.f32 %v4956_v44, %v4920_v56  ;;  %v4703_v48 = vadd.f32 %v10450_v15, %v4635_v45  ;;  %v4875_v44 = vmul.f32 %v9129_v20, %v9573_v36  ;;  %v4472_v61 = vmul.f32 %v9088_v1, %v4360_v41  ;;  %v9672_v56 = vld [vmem:[#allocation3 + $0x110] sm:$0xff] }
 0x67c   :  { %v4540_v51 = vmul.f32 %v10442_v17, %v4396_v46  ;;  %v5078_v31 = vsel %vm19_vm0, %v5042_v2, 0.0  ;;  %v4922_v0 = vadd.f32 %v4890_v23, %v4854_v29  ;;  %v4943_v30 = vmul.f32 %v9132_v49, %v4395_v37  ;;  %v4409_v25 = vld [vmem:[#allocation3 + $0x150] sm:$0xff] }
 0x67d   :  { %v5056_v3 = vadd.f32 %v5024_v8, %v4988_v43  ;;  %v4771_v57 = vadd.f32 %v10451_v59, %v4703_v48  ;;  %5079 = vadd.xlane.f32.xlu0 %v5078_v31  ;;  %v5011_v8 = vmul.f32 %v9135_v55, %v4431_v35  ;;  %v4704_v36 = vadd.f32 %v9568_v13, %v9565_v22  ;;  %v9682_v26 = vld [vmem:[#allocation3 + $0x111] sm:$0xff] }
 0x67e   :  { %v4572_v11 = vadd.f32 %v4540_v51, %v4472_v61  ;;  %v4990_v21 = vadd.f32 %v4958_v24, %v4922_v0  ;;  %v4608_v28 = vmul.f32 %v10444_v18, %v4432_v47  ;;  %v9670_v37 = vmul.f32 %v9115_v60, %v4360_v41  ;;  %10453 = vst [vmem:[#allocation11_spill] sm:$0xff] %v9682_v26  ;;  %v9690_v29 = vld [vmem:[#allocation3 + $0x130] sm:$0xff] }
 0x67f   :  { %v5120_v62 = vsel %vm19_vm0, %v5056_v3, 0.0  ;;  %v4839_v23 = vadd.f32 %v10452_v50, %v4771_v57  ;;  %v9675_v35 = vmul.f32 %v9118_v40, %v4396_v46  ;;  %v4772_v22 = vadd.f32 %v9571_v32, %v4704_v36  ;;  %10454 = vst [vmem:[#allocation26_spill] sm:$0xff] %v9690_v29  ;;  %v9692_v32 = vld [vmem:[#allocation3 + $0x131] sm:$0xff]  ;;  %v4376_v50 = vld [vmem:[#allocation3 + $0x187] sm:$0xff] }
 0x680   :  { %5121 = vadd.xlane.f32.xlu1 %v5120_v62  ;;  %v9679_v13 = vmul.f32 %v9126_v38, %v4432_v47  ;;  %v4876_v24 = vmul.f32 %v9129_v20, %v4360_v41  ;;  %v5058_v5 = vadd.f32 %v5026_v54, %v4990_v21  ;;  %v4481_v6 = vmul.f32 %v9088_v1, %v9665_v42  ;;  %v4445_v15 = vld [vmem:[#allocation3 + $0x151] sm:$0xff] }
 0x681   :  { %v4907_v16 = vadd.f32 %v4875_v44, %v4839_v23  ;;  %v4485_v45 = vmul.f32 %v9088_v1, %v4373_v34  ;;  %v9687_v43 = vadd.f32 %v4608_v28, %v4572_v11  ;;  %v4840_v2 = vadd.f32 %v9582_v52, %v4772_v22  ;;  %10455 = vst [vmem:[#allocation12_spill] sm:$0xff] %v9692_v32  ;;  %v9700_v51 = vld [vmem:[#allocation3 + $0x12f] sm:$0xff] }
 0x682   :  { %v4549_v54 = vmul.f32 %v10442_v17, %v9672_v56  ;;  %v4553_v41 = vmul.f32 %v10442_v17, %v4409_v25  ;;  %v5126_v48 = vsel %vm19_vm0, %v5058_v5, 0.0  ;;  %v4944_v44 = vmul.f32 %v9132_v49, %v4396_v46  ;;  %10456 = vst [vmem:[#allocation27_spill] sm:$0xff] %v9700_v51  ;;  %v4412_v23 = vld [vmem:[#allocation3 + $0x188] sm:$0xff] }
 0x683   :  { %v4975_v3 = vadd.f32 %v4943_v30, %v4907_v16  ;;  %v5012_v61 = vmul.f32 %v9135_v55, %v4432_v47  ;;  %v4908_v52 = vadd.f32 %v4876_v24, %v4840_v2  ;;  %v4617_v59 = vmul.f32 %v10444_v18, %v9682_v26  ;;  %v4448_v2 = vld [vmem:[#allocation3 + $0x189] sm:$0xff] }
 0x684   :  { %5127 = vadd.xlane.f32.xlu1 %v5126_v48  ;;  %v4581_v31 = vadd.f32 %v4549_v54, %v4481_v6  ;;  %v4585_v0 = vadd.f32 %v4553_v41, %v4485_v45  ;;  %v4551_v62 = vmul.f32 %v10442_v17, %v9690_v29  ;;  %v4619_v30 = vmul.f32 %v10444_v18, %v9692_v32 }
 0x685   :  { %v5043_v57 = vadd.f32 %v5011_v8, %v4975_v3  ;;  %v4621_v46 = vmul.f32 %v10444_v18, %v4445_v15  ;;  %v4976_v11 = vadd.f32 %v4944_v44, %v4908_v52  ;;  %v4685_v36 = vmul.f32 %v9115_v60, %v9700_v51 }
 0x686   :  { %v4649_v47 = vadd.f32 %v4617_v59, %v4581_v31  ;;  %v4687_v21 = vmul.f32 %v9115_v60, %v4373_v34  ;;  %v4753_v22 = vmul.f32 %v9118_v40, %v9690_v29  ;;  %v4755_v24 = vmul.f32 %v9118_v40, %v4409_v25  ;;  %v4411_v59 = vld [vmem:[#allocation3 + $0x170] sm:$0xff] }
 0x687   :  { %v5081_v28 = vsel %vm19_vm0, %v5043_v57, 0.0  ;;  %v9713_v8 = vadd.f32 %v4621_v46, %v4585_v0  ;;  %v5044_v5 = vadd.f32 %v5012_v61, %v4976_v11  ;;  %v4821_v6 = vmul.f32 %v9126_v38, %v9692_v32  ;;  %v4375_v0 = vld [vmem:[#allocation3 + $0x16f] sm:$0xff] }
 0x688   :  { %5082 = vadd.xlane.f32.xlu0 %v5081_v28  ;;  %v4717_v16 = vadd.f32 %v4685_v36, %v4649_v47  ;;  %v9721_v45 = vmul.f32 %v9126_v38, %v4445_v15  ;;  %v4889_v54 = vmul.f32 %v9129_v20, %v4373_v34  ;;  %v4957_v41 = vmul.f32 %v9132_v49, %v4409_v25  ;;  %v4447_v36 = vld [vmem:[#allocation3 + $0x171] sm:$0xff] }
 0x689   :  { %v4488_v48 = vmul.f32 %v9088_v1, %v4376_v50  ;;  %v4556_v3 = vmul.f32 %v10442_v17, %v4412_v23  ;;  %v5084_v44 = vsel %vm19_vm0, %v5044_v5, 0.0  ;;  %v5025_v61 = vmul.f32 %v9135_v55, %v4445_v15 }
 0x68a   :  { %v4785_v52 = vadd.f32 %v4753_v22, %v4717_v16  ;;  %v4720_v31 = vadd.f32 %v9623_v12, %v9618_v7  ;;  %5085 = vadd.xlane.f32.xlu1 %v5084_v44  ;;  %v4624_v34 = vmul.f32 %v10444_v18, %v4448_v2  ;;  %v9733_v25 = vmul.f32 %v9115_v60, %v4376_v50  ;;  %v4398_v44 = vld [vmem:[#allocation3 + $0xa8] sm:$0xff] }
 0x68b   :  { %v4588_v57 = vadd.f32 %v4556_v3, %v4488_v48  ;;  %v9736_v46 = vmul.f32 %v9118_v40, %v4412_v23  ;;  %v9740_v15 = vmul.f32 %v9126_v38, %v4448_v2  ;;  %v4483_v7 = vmul.f32 %v9088_v1, %v9700_v51  ;;  %v4362_v3 = vld [vmem:[#allocation3 + $0xa7] sm:$0xff] }
 0x68c   :  { %v4853_v11 = vadd.f32 %v4821_v6, %v4785_v52  ;;  %v4788_v47 = vadd.f32 %v9626_v9, %v4720_v31  ;;  %v4892_v12 = vmul.f32 %v9129_v20, %v4376_v50  ;;  %v4960_v28 = vmul.f32 %v9132_v49, %v4412_v23 }
 0x68d   :  { %v4487_v22 = vmul.f32 %v9088_v1, %v4375_v0  ;;  %v4555_v5 = vmul.f32 %v10442_v17, %v4411_v59  ;;  %v5028_v9 = vmul.f32 %v9135_v55, %v4448_v2  ;;  %v4583_v48 = vadd.f32 %v4551_v62, %v4483_v7  ;;  %v4434_v2 = vld [vmem:[#allocation3 + $0xa9] sm:$0xff] }
 0x68e   :  { %v4921_v16 = vadd.f32 %v4889_v54, %v4853_v11  ;;  %v4856_v6 = vadd.f32 %v9629_v4, %v4788_v47  ;;  %v9750_v52 = vadd.f32 %v4624_v34, %v4588_v57  ;;  %v4623_v32 = vmul.f32 %v10444_v18, %v4447_v36 }
 0x68f   :  { %v4587_v31 = vadd.f32 %v4555_v5, %v4487_v22  ;;  %v9754_v50 = vmul.f32 %v9115_v60, %v4375_v0  ;;  %v4651_v51 = vadd.f32 %v4619_v30, %v4583_v48  ;;  %v9757_v54 = vmul.f32 %v9118_v40, %v4411_v59 }
 0x690   :  { %v4989_v23 = vadd.f32 %v4957_v41, %v4921_v16  ;;  %v4924_v29 = vadd.f32 %v4892_v12, %v4856_v6  ;;  %v9760_v4 = vmul.f32 %v9126_v38, %v4447_v36  ;;  %v4891_v62 = vmul.f32 %v9129_v20, %v4375_v0  ;;  %v4361_v16 = vld [vmem:[#allocation3 + $0x8f] sm:$0xff] }
 0x691   :  { %v4474_v57 = vmul.f32 %v9088_v1, %v4362_v3  ;;  %v4542_v34 = vmul.f32 %v10442_v17, %v4398_v44  ;;  %v4719_v7 = vadd.f32 %v4687_v21, %v4651_v51  ;;  %v4959_v41 = vmul.f32 %v9132_v49, %v4411_v59 }
 0x692   :  { %v5057_v11 = vadd.f32 %v5025_v61, %v4989_v23  ;;  %v4992_v47 = vadd.f32 %v4960_v28, %v4924_v29  ;;  %v9766_v12 = vadd.f32 %v4623_v32, %v4587_v31  ;;  %v5027_v30 = vmul.f32 %v9135_v55, %v4447_v36  ;;  %v4397_v61 = vld [vmem:[#allocation3 + $0x90] sm:$0xff]  ;;  %v4378_v23 = vld [vmem:[#allocation3 + $0x1a7] sm:$0xff] }
 0x693   :  { %v4574_v22 = vadd.f32 %v4542_v34, %v4474_v57  ;;  %v4706_v5 = vadd.f32 %v9670_v37, %v9594_v58  ;;  %v4787_v48 = vadd.f32 %v4755_v24, %v4719_v7  ;;  %v4610_v26 = vmul.f32 %v10444_v18, %v4434_v2  ;;  %v4433_v58 = vld [vmem:[#allocation3 + $0x91] sm:$0xff] }
 0x694   :  { %v5123_v0 = vsel %vm19_vm0, %v5057_v11, 0.0  ;;  %v5060_v6 = vadd.f32 %v5028_v9, %v4992_v47  ;;  %v9774_v29 = vmul.f32 %v9115_v60, %v4362_v3  ;;  %v9777_v32 = vmul.f32 %v9118_v40, %v4398_v44  ;;  %v4414_v47 = vld [vmem:[#allocation3 + $0x1a8] sm:$0xff] }
 0x695   :  { %5124 = vadd.xlane.f32.xlu0 %v5123_v0  ;;  %v4774_v51 = vadd.f32 %v9675_v35, %v4706_v5  ;;  %v9781_v21 = vmul.f32 %v9126_v38, %v4434_v2  ;;  %v4855_v24 = vadd.f32 %v9721_v45, %v4787_v48  ;;  %v9785_v59 = vadd.f32 %v4610_v26, %v4574_v22  ;;  %v10457_v45 = vld [vmem:[#allocation25_spill] sm:$0xff] }
 0x696   :  { %v5132_v37 = vsel %vm19_vm0, %v5060_v6, 0.0  ;;  %v4473_v36 = vmul.f32 %v9088_v1, %v4361_v16  ;;  %v4878_v9 = vmul.f32 %v9129_v20, %v4362_v3  ;;  %v4946_v31 = vmul.f32 %v9132_v49, %v4398_v44 }
 0x697   :  { %5133 = vadd.xlane.f32.xlu1 %v5132_v37  ;;  %v4842_v28 = vadd.f32 %v9679_v13, %v4774_v51  ;;  %v4541_v35 = vmul.f32 %v10442_v17, %v4397_v61  ;;  %v4923_v57 = vadd.f32 %v4891_v62, %v4855_v24  ;;  %v5014_v34 = vmul.f32 %v9135_v55, %v4434_v2  ;;  %v4450_v2 = vld [vmem:[#allocation3 + $0x1a9] sm:$0xff] }
 0x698   :  { %v4609_v11 = vmul.f32 %v10444_v18, %v4433_v58  ;;  %v4705_v26 = vadd.f32 %v9643_v63, %v10457_v45  ;;  %v9797_v13 = vmul.f32 %v9115_v60, %v4361_v16  ;;  %v9800_v3 = vmul.f32 %v9118_v40, %v4397_v61 }
 0x699   :  { %v4910_v7 = vadd.f32 %v4878_v9, %v4842_v28  ;;  %v4573_v22 = vadd.f32 %v4541_v35, %v4473_v36  ;;  %v4991_v44 = vadd.f32 %v4959_v41, %v4923_v57  ;;  %v9804_v62 = vmul.f32 %v9126_v38, %v4433_v58  ;;  %v4377_v35 = vld [vmem:[#allocation3 + $0x18f] sm:$0xff] }
 0x69a   :  { %v4773_v5 = vadd.f32 %v9646_v19, %v4705_v26  ;;  %v4490_v0 = vmul.f32 %v9088_v1, %v4378_v23  ;;  %v4877_v63 = vmul.f32 %v9129_v20, %v4361_v16  ;;  %v4945_v48 = vmul.f32 %v9132_v49, %v4397_v61  ;;  %v4413_v16 = vld [vmem:[#allocation3 + $0x190] sm:$0xff] }
 0x69b   :  { %v4978_v6 = vadd.f32 %v4946_v31, %v4910_v7  ;;  %v4558_v51 = vmul.f32 %v10442_v17, %v4414_v47  ;;  %v5059_v37 = vadd.f32 %v5027_v30, %v4991_v44  ;;  %v5013_v41 = vmul.f32 %v9135_v55, %v4433_v58 }
 0x69c   :  { %v4841_v24 = vadd.f32 %v9649_v14, %v4773_v5  ;;  %v4722_v19 = vadd.f32 %v9733_v25, %v9636_v27  ;;  %v9814_v28 = vadd.f32 %v4609_v11, %v4573_v22  ;;  %v4626_v31 = vmul.f32 %v10444_v18, %v4450_v2  ;;  %v4449_v11 = vld [vmem:[#allocation3 + $0x191] sm:$0xff] }
 0x69d   :  { %v5046_v36 = vadd.f32 %v5014_v34, %v4978_v6  ;;  %v4590_v9 = vadd.f32 %v4558_v51, %v4490_v0  ;;  %v5129_v61 = vsel %vm19_vm0, %v5059_v37, 0.0  ;;  %v9819_v30 = vmul.f32 %v9115_v60, %v4378_v23  ;;  %v4364_v6 = vld [vmem:[#allocation3 + $0xc7] sm:$0xff] }
 0x69e   :  { %v4909_v57 = vadd.f32 %v4877_v63, %v4841_v24  ;;  %v4790_v14 = vadd.f32 %v9736_v46, %v4722_v19  ;;  %5130 = vadd.xlane.f32.xlu0 %v5129_v61  ;;  %v9824_v27 = vmul.f32 %v9118_v40, %v4414_v47  ;;  %v9827_v25 = vmul.f32 %v9126_v38, %v4450_v2  ;;  %v4436_v19 = vld [vmem:[#allocation3 + $0xc9] sm:$0xff] }
 0x69f   :  { %v5090_v58 = vsel %vm19_vm0, %v5046_v36, 0.0  ;;  %v4894_v34 = vmul.f32 %v9129_v20, %v4378_v23  ;;  %v4489_v7 = vmul.f32 %v9088_v1, %v4377_v35  ;;  %v4557_v46 = vmul.f32 %v10442_v17, %v4413_v16 }
 0x6a0   :  { %5091 = vadd.xlane.f32.xlu1 %v5090_v58  ;;  %v4977_v45 = vadd.f32 %v4945_v48, %v4909_v57  ;;  %v4858_v26 = vadd.f32 %v9740_v15, %v4790_v14  ;;  %v9833_v22 = vadd.f32 %v4626_v31, %v4590_v9  ;;  %v4962_v44 = vmul.f32 %v9132_v49, %v4414_v47  ;;  %v4400_v15 = vld [vmem:[#allocation3 + $0xc8] sm:$0xff] }
 0x6a1   :  { %v5030_v5 = vmul.f32 %v9135_v55, %v4450_v2  ;;  %v4721_v0 = vadd.f32 %v9754_v50, %v9713_v8  ;;  %v4589_v51 = vadd.f32 %v4557_v46, %v4489_v7  ;;  %v4625_v48 = vmul.f32 %v10444_v18, %v4449_v11  ;;  %v4363_v57 = vld [vmem:[#allocation3 + $0xaf] sm:$0xff] }
 0x6a2   :  { %v5045_v23 = vadd.f32 %v5013_v41, %v4977_v45  ;;  %v4926_v63 = vadd.f32 %v4894_v34, %v4858_v26  ;;  %v9841_v37 = vmul.f32 %v9115_v60, %v4377_v35  ;;  %v9844_v24 = vmul.f32 %v9118_v40, %v4413_v16  ;;  %v4399_v45 = vld [vmem:[#allocation3 + $0xb0] sm:$0xff] }
 0x6a3   :  { %v4789_v47 = vadd.f32 %v9757_v54, %v4721_v0  ;;  %v9848_v2 = vmul.f32 %v9126_v38, %v4449_v11  ;;  %v4893_v41 = vmul.f32 %v9129_v20, %v4377_v35  ;;  %v4476_v36 = vmul.f32 %v9088_v1, %v4364_v6 }
 0x6a4   :  { %v5087_v8 = vsel %vm19_vm0, %v5045_v23, 0.0  ;;  %v4994_v50 = vadd.f32 %v4962_v44, %v4926_v63  ;;  %v4961_v31 = vmul.f32 %v9132_v49, %v4413_v16  ;;  %v5029_v61 = vmul.f32 %v9135_v55, %v4449_v11 }
 0x6a5   :  { %5088 = vadd.xlane.f32.xlu0 %v5087_v8  ;;  %v4857_v9 = vadd.f32 %v9760_v4, %v4789_v47  ;;  %v4544_v54 = vmul.f32 %v10442_v17, %v4400_v15  ;;  %v9857_v58 = vadd.f32 %v4625_v48, %v4589_v51  ;;  %v4612_v34 = vmul.f32 %v10444_v18, %v4436_v19  ;;  %v4380_v8 = vld [vmem:[#allocation3 + $0x1c7] sm:$0xff] }
 0x6a6   :  { %v5062_v14 = vadd.f32 %v5030_v5, %v4994_v50  ;;  %v4708_v35 = vadd.f32 %v9774_v29, %v9687_v43  ;;  %v9863_v4 = vmul.f32 %v9115_v60, %v4364_v6  ;;  %v9866_v16 = vmul.f32 %v9118_v40, %v4400_v15  ;;  %v4435_v5 = vld [vmem:[#allocation3 + $0xb1] sm:$0xff]  ;;  %v4416_v50 = vld [vmem:[#allocation3 + $0x1c8] sm:$0xff] }
 0x6a7   :  { %v4925_v26 = vadd.f32 %v4893_v41, %v4857_v9  ;;  %v4576_v7 = vadd.f32 %v4544_v54, %v4476_v36  ;;  %v9871_v44 = vmul.f32 %v9126_v38, %v4436_v19  ;;  %v4475_v0 = vmul.f32 %v9088_v1, %v4363_v57  ;;  %v4452_v54 = vld [vmem:[#allocation3 + $0x1c9] sm:$0xff] }
 0x6a8   :  { %v5138_v11 = vsel %vm19_vm0, %v5062_v14, 0.0  ;;  %v4776_v46 = vadd.f32 %v9777_v32, %v4708_v35  ;;  %v4880_v29 = vmul.f32 %v9129_v20, %v4364_v6  ;;  %v4948_v23 = vmul.f32 %v9132_v49, %v4400_v15 }
 0x6a9   :  { %5139 = vadd.xlane.f32.xlu1 %v5138_v11  ;;  %v4993_v43 = vadd.f32 %v4961_v31, %v4925_v26  ;;  %v4543_v63 = vmul.f32 %v10442_v17, %v4399_v45  ;;  %v9877_v51 = vadd.f32 %v4612_v34, %v4576_v7  ;;  %v5016_v32 = vmul.f32 %v9135_v55, %v4436_v19  ;;  %v4379_v7 = vld [vmem:[#allocation3 + $0x1af] sm:$0xff] }
 0x6aa   :  { %v4844_v48 = vadd.f32 %v9781_v21, %v4776_v46  ;;  %v4707_v47 = vadd.f32 %v9797_v13, %v9651_v10  ;;  %v4611_v9 = vmul.f32 %v10444_v18, %v4435_v5  ;;  %v9885_v6 = vmul.f32 %v9115_v60, %v4363_v57 }
 0x6ab   :  { %v5061_v41 = vadd.f32 %v5029_v61, %v4993_v43  ;;  %v4575_v36 = vadd.f32 %v4543_v63, %v4475_v0  ;;  %v9888_v31 = vmul.f32 %v9118_v40, %v4399_v45  ;;  %v9892_v19 = vmul.f32 %v9126_v38, %v4435_v5  ;;  %v4415_v43 = vld [vmem:[#allocation3 + $0x1b0] sm:$0xff] }
 0x6ac   :  { %v4912_v15 = vadd.f32 %v4880_v29, %v4844_v48  ;;  %v4775_v21 = vadd.f32 %v9800_v3, %v4707_v47  ;;  %v4879_v13 = vmul.f32 %v9129_v20, %v4363_v57  ;;  %v4492_v61 = vmul.f32 %v9088_v1, %v4380_v8  ;;  %v4451_v47 = vld [vmem:[#allocation3 + $0x1b1] sm:$0xff] }
 0x6ad   :  { %v5135_v10 = vsel %vm19_vm0, %v5061_v41, 0.0  ;;  %v4560_v14 = vmul.f32 %v10442_v17, %v4416_v50  ;;  %v4947_v26 = vmul.f32 %v9132_v49, %v4399_v45  ;;  %v5015_v3 = vmul.f32 %v9135_v55, %v4435_v5 }
 0x6ae   :  { %5136 = vadd.xlane.f32.xlu0 %v5135_v10  ;;  %v4980_v34 = vadd.f32 %v4948_v23, %v4912_v15  ;;  %v4843_v35 = vadd.f32 %v9804_v62, %v4775_v21  ;;  %v9901_v11 = vadd.f32 %v4611_v9, %v4575_v36  ;;  %v4628_v0 = vmul.f32 %v10444_v18, %v4452_v54  ;;  %v4366_v21 = vld [vmem:[#allocation3 + $0xe7] sm:$0xff] }
 0x6af   :  { %v4592_v46 = vadd.f32 %v4560_v14, %v4492_v61  ;;  %v4724_v57 = vadd.f32 %v9819_v30, %v9750_v52  ;;  %v9907_v23 = vmul.f32 %v9115_v60, %v4380_v8  ;;  %v9910_v62 = vmul.f32 %v9118_v40, %v4416_v50  ;;  %v4402_v10 = vld [vmem:[#allocation3 + $0xe8] sm:$0xff] }
 0x6b0   :  { %v5048_v29 = vadd.f32 %v5016_v32, %v4980_v34  ;;  %v4911_v63 = vadd.f32 %v4879_v13, %v4843_v35  ;;  %v9914_v5 = vmul.f32 %v9126_v38, %v4452_v54  ;;  %v4896_v48 = vmul.f32 %v9129_v20, %v4380_v8 }
 0x6b1   :  { %v4792_v45 = vadd.f32 %v9824_v27, %v4724_v57  ;;  %v4491_v41 = vmul.f32 %v9088_v1, %v4379_v7  ;;  %v4964_v32 = vmul.f32 %v9132_v49, %v4416_v50  ;;  %v4559_v36 = vmul.f32 %v10442_v17, %v4415_v43 }
 0x6b2   :  { %v5096_v52 = vsel %vm19_vm0, %v5048_v29, 0.0  ;;  %v4979_v30 = vadd.f32 %v4947_v26, %v4911_v63  ;;  %v9921_v9 = vadd.f32 %v4628_v0, %v4592_v46  ;;  %v5032_v15 = vmul.f32 %v9135_v55, %v4452_v54  ;;  %v4438_v26 = vld [vmem:[#allocation3 + $0xe9] sm:$0xff] }
 0x6b3   :  { %5097 = vadd.xlane.f32.xlu1 %v5096_v52  ;;  %v4860_v27 = vadd.f32 %v9827_v25, %v4792_v45  ;;  %v4723_v8 = vadd.f32 %v9841_v37, %v9766_v12  ;;  %v4591_v61 = vadd.f32 %v4559_v36, %v4491_v41  ;;  %v4627_v14 = vmul.f32 %v10444_v18, %v4451_v47  ;;  %v4365_v63 = vld [vmem:[#allocation3 + $0xcf] sm:$0xff] }
 0x6b4   :  { %v5047_v13 = vadd.f32 %v5015_v3, %v4979_v30  ;;  %v9929_v50 = vmul.f32 %v9115_v60, %v4379_v7  ;;  %v9932_v35 = vmul.f32 %v9118_v40, %v4415_v43  ;;  %v9936_v54 = vmul.f32 %v9126_v38, %v4451_v47  ;;  %v4401_v52 = vld [vmem:[#allocation3 + $0xd0] sm:$0xff] }
 0x6b5   :  { %v4928_v34 = vadd.f32 %v4896_v48, %v4860_v27  ;;  %v4791_v25 = vadd.f32 %v9844_v24, %v4723_v8  ;;  %v4895_v37 = vmul.f32 %v9129_v20, %v4379_v7  ;;  %v4478_v3 = vmul.f32 %v9088_v1, %v4366_v21  ;;  %v4437_v8 = vld [vmem:[#allocation3 + $0xd1] sm:$0xff] }
 0x6b6   :  { %v5093_v12 = vsel %vm19_vm0, %v5047_v13, 0.0  ;;  %v4546_v46 = vmul.f32 %v10442_v17, %v4402_v10  ;;  %v4963_v29 = vmul.f32 %v9132_v49, %v4415_v43  ;;  %v5031_v24 = vmul.f32 %v9135_v55, %v4451_v47 }
 0x6b7   :  { %5094 = vadd.xlane.f32.xlu0 %v5093_v12  ;;  %v4996_v0 = vadd.f32 %v4964_v32, %v4928_v34  ;;  %v4859_v57 = vadd.f32 %v9848_v2, %v4791_v25  ;;  %v9945_v45 = vadd.f32 %v4627_v14, %v4591_v61  ;;  %v4614_v41 = vmul.f32 %v10444_v18, %v4438_v26  ;;  %v4382_v25 = vld [vmem:[#allocation3 + $0x1e7] sm:$0xff] }
 0x6b8   :  { %v4578_v48 = vadd.f32 %v4546_v46, %v4478_v3  ;;  %v4710_v7 = vadd.f32 %v9863_v4, %v9785_v59  ;;  %v9951_v32 = vmul.f32 %v9115_v60, %v4366_v21  ;;  %v9954_v2 = vmul.f32 %v9118_v40, %v4402_v10  ;;  %v4418_v12 = vld [vmem:[#allocation3 + $0x1e8] sm:$0xff] }
 0x6b9   :  { %v5064_v30 = vadd.f32 %v5032_v15, %v4996_v0  ;;  %v4927_v36 = vadd.f32 %v4895_v37, %v4859_v57  ;;  %v9958_v47 = vmul.f32 %v9126_v38, %v4438_v26  ;;  %v4882_v27 = vmul.f32 %v9129_v20, %v4366_v21 }
 0x6ba   :  { %v4778_v43 = vadd.f32 %v9866_v16, %v4710_v7  ;;  %v4477_v13 = vmul.f32 %v9088_v1, %v4365_v63  ;;  %v4950_v15 = vmul.f32 %v9132_v49, %v4402_v10  ;;  %v4545_v61 = vmul.f32 %v10442_v17, %v4401_v52 }
 0x6bb   :  { %v5144_v59 = vsel %vm19_vm0, %v5064_v30, 0.0  ;;  %v4995_v4 = vadd.f32 %v4963_v29, %v4927_v36  ;;  %v9965_v14 = vadd.f32 %v4614_v41, %v4578_v48  ;;  %v5018_v34 = vmul.f32 %v9135_v55, %v4438_v26  ;;  %v4454_v29 = vld [vmem:[#allocation3 + $0x1e9] sm:$0xff] }
 0x6bc   :  { %5145 = vadd.xlane.f32.xlu1 %v5144_v59  ;;  %v4846_v16 = vadd.f32 %v9871_v44, %v4778_v43  ;;  %v4709_v21 = vadd.f32 %v9885_v6, %v9814_v28  ;;  %v4577_v3 = vadd.f32 %v4545_v61, %v4477_v13  ;;  %v4613_v46 = vmul.f32 %v10444_v18, %v4437_v8  ;;  %v4381_v36 = vld [vmem:[#allocation3 + $0x1cf] sm:$0xff] }
 0x6bd   :  { %v5063_v37 = vadd.f32 %v5031_v24, %v4995_v4  ;;  %v9973_v10 = vmul.f32 %v9115_v60, %v4365_v63  ;;  %v9976_v57 = vmul.f32 %v9118_v40, %v4401_v52  ;;  %v9980_v26 = vmul.f32 %v9126_v38, %v4437_v8  ;;  %v4417_v59 = vld [vmem:[#allocation3 + $0x1d0] sm:$0xff] }
 0x6be   :  { %v4914_v0 = vadd.f32 %v4882_v27, %v4846_v16  ;;  %v4777_v44 = vadd.f32 %v9888_v31, %v4709_v21  ;;  %v4881_v6 = vmul.f32 %v9129_v20, %v4365_v63  ;;  %v4494_v24 = vmul.f32 %v9088_v1, %v4382_v25  ;;  %v4453_v21 = vld [vmem:[#allocation3 + $0x1d1] sm:$0xff] }
 0x6bf   :  { %v5141_v28 = vsel %vm19_vm0, %v5063_v37, 0.0  ;;  %v4562_v48 = vmul.f32 %v10442_v17, %v4418_v12  ;;  %v4949_v30 = vmul.f32 %v9132_v49, %v4401_v52  ;;  %v5017_v31 = vmul.f32 %v9135_v55, %v4437_v8 }
 0x6c0   :  { %5142 = vadd.xlane.f32.xlu0 %v5141_v28  ;;  %v4982_v41 = vadd.f32 %v4950_v15, %v4914_v0  ;;  %v4845_v7 = vadd.f32 %v9892_v19, %v4777_v44  ;;  %v9989_v43 = vadd.f32 %v4613_v46, %v4577_v3  ;;  %v4630_v13 = vmul.f32 %v10444_v18, %v4454_v29 }
 0x6c1   :  { %v4594_v27 = vadd.f32 %v4562_v48, %v4494_v24  ;;  %v4726_v63 = vadd.f32 %v9907_v23, %v9833_v22  ;;  %v9995_v15 = vmul.f32 %v9115_v60, %v4382_v25  ;;  %v9998_v19 = vmul.f32 %v9118_v40, %v4418_v12 }
 0x6c2   :  { %v5050_v4 = vadd.f32 %v5018_v34, %v4982_v41  ;;  %v4913_v61 = vadd.f32 %v4881_v6, %v4845_v7  ;;  %v10002_v8 = vmul.f32 %v9126_v38, %v4454_v29  ;;  %v4898_v16 = vmul.f32 %v9129_v20, %v4382_v25  ;;  %v4403_v7 = vld [vmem:[#allocation3 + $0xf0] sm:$0xff] }
 0x6c3   :  { %v4794_v52 = vadd.f32 %v9910_v62, %v4726_v63  ;;  %v4493_v37 = vmul.f32 %v9088_v1, %v4381_v36  ;;  %v4966_v34 = vmul.f32 %v9132_v49, %v4418_v12  ;;  %v4561_v3 = vmul.f32 %v10442_v17, %v4417_v59 }
 0x6c4   :  { %v5102_v22 = vsel %vm19_vm0, %v5050_v4, 0.0  ;;  %v4981_v23 = vadd.f32 %v4949_v30, %v4913_v61  ;;  %v10009_v46 = vadd.f32 %v4630_v13, %v4594_v27  ;;  %v5034_v0 = vmul.f32 %v9135_v55, %v4454_v29  ;;  %v4367_v29 = vld [vmem:[#allocation3 + $0xef] sm:$0xff] }
 0x6c5   :  { %5103 = vadd.xlane.f32.xlu1 %v5102_v22  ;;  %v4862_v62 = vadd.f32 %v9914_v5, %v4794_v52  ;;  %v4725_v25 = vadd.f32 %v9929_v50, %v9857_v58  ;;  %v4593_v28 = vadd.f32 %v4561_v3, %v4493_v37  ;;  %v4629_v6 = vmul.f32 %v10444_v18, %v4453_v21  ;;  %v4439_v4 = vld [vmem:[#allocation3 + $0xf1] sm:$0xff] }
 0x6c6   :  { %v5049_v44 = vadd.f32 %v5017_v31, %v4981_v23  ;;  %v10017_v24 = vmul.f32 %v9115_v60, %v4381_v36  ;;  %v10020_v48 = vmul.f32 %v9118_v40, %v4417_v59  ;;  %v10024_v5 = vmul.f32 %v9126_v38, %v4453_v21 }
 0x6c7   :  { %v4930_v12 = vadd.f32 %v4898_v16, %v4862_v62  ;;  %v4793_v41 = vadd.f32 %v9932_v35, %v4725_v25  ;;  %v4897_v50 = vmul.f32 %v9129_v20, %v4381_v36  ;;  %v4965_v30 = vmul.f32 %v9132_v49, %v4417_v59  ;;  %v4384_v62 = vld [vmem:[#allocation3 + $0x207] sm:$0xff] }
 0x6c8   :  { %v5099_v58 = vsel %vm19_vm0, %v5049_v44, 0.0  ;;  %v4712_v31 = vadd.f32 %v9951_v32, %v9877_v51  ;;  %v10031_v13 = vadd.f32 %v4629_v6, %v4593_v28  ;;  %v5033_v63 = vmul.f32 %v9135_v55, %v4453_v21  ;;  %v4456_v28 = vld [vmem:[#allocation3 + $0x209] sm:$0xff] }
 0x6c9   :  { %5100 = vadd.xlane.f32.xlu0 %v5099_v58  ;;  %v4998_v27 = vadd.f32 %v4966_v34, %v4930_v12  ;;  %v4861_v35 = vadd.f32 %v9936_v54, %v4793_v41  ;;  %v4884_v52 = vmul.f32 %v9129_v20, %v9576_v53  ;;  %v4479_v36 = vmul.f32 %v9088_v1, %v4367_v29  ;;  %v4383_v6 = vld [vmem:[#allocation3 + $0x1ef] sm:$0xff] }
 0x6ca   :  { %v4780_v61 = vadd.f32 %v9954_v2, %v4712_v31  ;;  %v4547_v59 = vmul.f32 %v10442_v17, %v4403_v7  ;;  %v4952_v32 = vmul.f32 %v9132_v49, %v9578_v33  ;;  %v4711_v54 = vadd.f32 %v9973_v10, %v9901_v11  ;;  %v4420_v10 = vld [vmem:[#allocation3 + $0x208] sm:$0xff]  ;;  %v4419_v12 = vld [vmem:[#allocation3 + $0x1f0] sm:$0xff] }
 0x6cb   :  { %v5066_v16 = vadd.f32 %v5034_v0, %v4998_v27  ;;  %v4929_v51 = vadd.f32 %v4897_v50, %v4861_v35  ;;  %v5020_v2 = vmul.f32 %v9135_v55, %v9591_v39  ;;  %v4615_v53 = vmul.f32 %v10444_v18, %v4439_v4 }
 0x6cc   :  { %v4848_v21 = vadd.f32 %v9958_v47, %v4780_v61  ;;  %v4579_v37 = vadd.f32 %v4547_v59, %v4479_v36  ;;  %v4681_v34 = vmul.f32 %v9115_v60, %v4367_v29  ;;  %v4779_v3 = vadd.f32 %v9976_v57, %v4711_v54 }
 0x6cd   :  { %v5150_v22 = vsel %vm19_vm0, %v5066_v16, 0.0  ;;  %v4997_v23 = vadd.f32 %v4965_v30, %v4929_v51  ;;  %v10052_v11 = vmul.f32 %v9118_v40, %v4403_v7  ;;  %v10055_v47 = vmul.f32 %v9126_v38, %v4439_v4 }
 0x6ce   :  { %5151 = vadd.xlane.f32.xlu1 %v5150_v22  ;;  %v4916_v33 = vadd.f32 %v4884_v52, %v4848_v21  ;;  %v4883_v39 = vmul.f32 %v9129_v20, %v4367_v29  ;;  %v10058_v25 = vadd.f32 %v4615_v53, %v4579_v37  ;;  %v4847_v44 = vadd.f32 %v9980_v26, %v4779_v3 }
 0x6cf   :  { %v5065_v0 = vadd.f32 %v5033_v63, %v4997_v23  ;;  %v4728_v57 = vadd.f32 %v9995_v15, %v9921_v9  ;;  %v4951_v58 = vmul.f32 %v9132_v49, %v4403_v7  ;;  %v5019_v50 = vmul.f32 %v9135_v55, %v4439_v4  ;;  %v4455_v15 = vld [vmem:[#allocation3 + $0x1f1] sm:$0xff] }
 0x6d0   :  { %v4984_v41 = vadd.f32 %v4952_v32, %v4916_v33  ;;  %v4698_v30 = vmul.f32 %v9115_v60, %v4384_v62  ;;  %v4915_v31 = vadd.f32 %v4883_v39, %v4847_v44  ;;  %v10068_v27 = vmul.f32 %v9118_v40, %v4420_v10 }
 0x6d1   :  { %v5147_v29 = vsel %vm19_vm0, %v5065_v0, 0.0  ;;  %v4796_v26 = vadd.f32 %v9998_v19, %v4728_v57  ;;  %v10072_v9 = vmul.f32 %v9126_v38, %v4456_v28  ;;  %v4495_v7 = vmul.f32 %v9088_v1, %v4383_v6  ;;  %v5918_v0 = vld [vmem:[#allocation3 + $0x109] sm:$0xff] }
 0x6d2   :  { %5148 = vadd.xlane.f32.xlu0 %v5147_v29  ;;  %v5052_v35 = vadd.f32 %v5020_v2, %v4984_v41  ;;  %v4563_v63 = vmul.f32 %v10442_v17, %v4419_v12  ;;  %v4983_v4 = vadd.f32 %v4951_v58, %v4915_v31  ;;  %v4900_v52 = vmul.f32 %v9129_v20, %v4384_v62  ;;  %v5921_v58 = vld [vmem:[#allocation3 + $0x129] sm:$0xff] }
 0x6d3   :  { %v4864_v61 = vadd.f32 %v10002_v8, %v4796_v26  ;;  %v4968_v36 = vmul.f32 %v9132_v49, %v4420_v10  ;;  %v5036_v19 = vmul.f32 %v9135_v55, %v4456_v28  ;;  %v4727_v51 = vadd.f32 %v10017_v24, %v9945_v45  ;;  %v5916_v45 = vld [vmem:[#allocation3 + $0x107] sm:$0xff] }
 0x6d4   :  { %v5108_v59 = vsel %vm19_vm0, %v5052_v35, 0.0  ;;  %v4595_v16 = vadd.f32 %v4563_v63, %v4495_v7  ;;  %v5051_v32 = vadd.f32 %v5019_v50, %v4983_v4  ;;  %v4631_v17 = vmul.f32 %v10444_v18, %v4455_v15  ;;  %v4386_v29 = vld [vmem:[#allocation3 + $0x227] sm:$0xff] }
 0x6d5   :  { %5109 = vadd.xlane.f32.xlu1 %v5108_v59  ;;  %v4932_v1 = vadd.f32 %v4900_v52, %v4864_v61  ;;  %v4697_v54 = vmul.f32 %v9115_v60, %v4383_v6  ;;  %v4765_v8 = vmul.f32 %v9118_v40, %v4419_v12  ;;  %v4795_v21 = vadd.f32 %v10020_v48, %v4727_v51  ;;  %v5917_v48 = vld [vmem:[#allocation3 + $0x108] sm:$0xff] }
 0x6d6   :  { %v4833_v2 = vmul.f32 %v9126_v38, %v4455_v15  ;;  %v4899_v37 = vmul.f32 %v9129_v20, %v4383_v6  ;;  %v5105_v53 = vsel %vm19_vm0, %v5051_v32, 0.0  ;;  %v10090_v23 = vadd.f32 %v4631_v17, %v4595_v16  ;;  %v5919_v6 = vld [vmem:[#allocation3 + $0x127] sm:$0xff]  ;;  %v4385_v52 = vld [vmem:[#allocation3 + $0x20f] sm:$0xff] }
 0x6d7   :  { %v5000_v22 = vadd.f32 %v4968_v36, %v4932_v1  ;;  %v4682_v24 = vmul.f32 %v5916_v45, %v9115_v60  ;;  %5106 = vadd.xlane.f32.xlu0 %v5105_v53  ;;  %v4863_v18 = vadd.f32 %v10024_v5, %v4795_v21  ;;  %v4967_v3 = vmul.f32 %v9132_v49, %v4419_v12  ;;  %v5920_v5 = vld [vmem:[#allocation3 + $0x128] sm:$0xff] }
 0x6d8   :  { %v5035_v62 = vmul.f32 %v9135_v55, %v4455_v15  ;;  %v4750_v33 = vmul.f32 %v5917_v48, %v9118_v40  ;;  %v4818_v44 = vmul.f32 %v5918_v0, %v9126_v38  ;;  %v4713_v28 = vadd.f32 %v4681_v34, %v9989_v43  ;;  %v4422_v35 = vld [vmem:[#allocation3 + $0x228] sm:$0xff] }
 0x6d9   :  { %v5068_v39 = vadd.f32 %v5036_v19, %v5000_v22  ;;  %v4714_v10 = vadd.f32 %v4682_v24, %v9965_v14  ;;  %v4931_v57 = vadd.f32 %v4899_v37, %v4863_v18  ;;  %v4886_v41 = vmul.f32 %v5919_v6, %v9129_v20  ;;  %v4458_v15 = vld [vmem:[#allocation3 + $0x229] sm:$0xff] }
 0x6da   :  { %v4954_v12 = vmul.f32 %v5920_v5, %v9132_v49  ;;  %v5022_v50 = vmul.f32 %v5921_v58, %v9135_v55  ;;  %v4781_v14 = vadd.f32 %v10052_v11, %v4713_v28  ;;  %v4730_v43 = vadd.f32 %v4698_v30, %v10009_v46  ;;  %v10458_v4 = vld [vmem:[#allocation11_spill] sm:$0xff]  ;;  %v4421_v46 = vld [vmem:[#allocation3 + $0x210] sm:$0xff] }
 0x6db   :  { %v5156_v31 = vsel %vm19_vm0, %v5068_v39, 0.0  ;;  %v4782_v26 = vadd.f32 %v4750_v33, %v4714_v10  ;;  %v4999_v34 = vadd.f32 %v4967_v3, %v4931_v57  ;;  %v4885_v7 = vmul.f32 %v9129_v20, %v9665_v42  ;;  %v4457_v30 = vld [vmem:[#allocation3 + $0x211] sm:$0xff]  ;;  %v10459_v58 = vld [vmem:[#allocation27_spill] sm:$0xff] }
 0x6dc   :  { %5157 = vadd.xlane.f32.xlu1 %v5156_v31  ;;  %v4953_v63 = vmul.f32 %v9132_v49, %v9672_v56  ;;  %v5021_v61 = vmul.f32 %v9135_v55, %v10458_v4  ;;  %v4849_v59 = vadd.f32 %v10055_v47, %v4781_v14  ;;  %v4798_v11 = vadd.f32 %v10068_v27, %v4730_v43  ;;  %v4387_v0 = vld [vmem:[#allocation3 + $0x22f] sm:$0xff] }
 0x6dd   :  { %v4850_v36 = vadd.f32 %v4818_v44, %v4782_v26  ;;  %v4902_v19 = vmul.f32 %v9129_v20, %v4386_v29  ;;  %v5067_v16 = vadd.f32 %v5035_v62, %v4999_v34  ;;  %v4970_v51 = vmul.f32 %v9132_v49, %v4422_v35  ;;  %v4459_v29 = vld [vmem:[#allocation3 + $0x231] sm:$0xff]  ;;  %v10460_v35 = vld [vmem:[#allocation26_spill] sm:$0xff] }
 0x6de   :  { %v5038_v32 = vmul.f32 %v9135_v55, %v4458_v15  ;;  %v4729_v1 = vadd.f32 %v4697_v54, %v10031_v13  ;;  %v4917_v21 = vadd.f32 %v4885_v7, %v4849_v59  ;;  %v4866_v37 = vadd.f32 %v10072_v9, %v4798_v11 }
 0x6df   :  { %v4918_v17 = vadd.f32 %v4886_v41, %v4850_v36  ;;  %v4699_v53 = vmul.f32 %v9115_v60, %v4385_v52  ;;  %v5153_v47 = vsel %vm19_vm0, %v5067_v16, 0.0  ;;  %v4767_v27 = vmul.f32 %v9118_v40, %v4421_v46 }
 0x6e0   :  { %v4797_v22 = vadd.f32 %v4765_v8, %v4729_v1  ;;  %v4835_v45 = vmul.f32 %v9126_v38, %v4457_v30  ;;  %5154 = vadd.xlane.f32.xlu0 %v5153_v47  ;;  %v4985_v18 = vadd.f32 %v4953_v63, %v4917_v21  ;;  %v4934_v3 = vadd.f32 %v4902_v19, %v4866_v37  ;;  %v10461_v63 = vld [vmem:[#allocation12_spill] sm:$0xff] }
 0x6e1   :  { %v4986_v24 = vadd.f32 %v4954_v12, %v4918_v17  ;;  %v4683_v13 = vmul.f32 %v9115_v60, %v9665_v42  ;;  %v4901_v62 = vmul.f32 %v9129_v20, %v4385_v52  ;;  %v4969_v9 = vmul.f32 %v9132_v49, %v4421_v46 }
 0x6e2   :  { %v4865_v54 = vadd.f32 %v4833_v2, %v4797_v22  ;;  %v4751_v48 = vmul.f32 %v9118_v40, %v9672_v56  ;;  %v5053_v39 = vadd.f32 %v5021_v61, %v4985_v18  ;;  %v5002_v8 = vadd.f32 %v4970_v51, %v4934_v3  ;;  %v4423_v56 = vld [vmem:[#allocation3 + $0x230] sm:$0xff] }
 0x6e3   :  { %v5054_v33 = vadd.f32 %v5022_v50, %v4986_v24  ;;  %v4715_v10 = vadd.f32 %v4683_v13, %v10058_v25  ;;  %v5037_v28 = vmul.f32 %v9135_v55, %v4457_v30  ;;  %v4819_v60 = vmul.f32 %v9126_v38, %v10458_v4 }
 0x6e4   :  { %v4933_v44 = vadd.f32 %v4901_v62, %v4865_v54  ;;  %v4731_v42 = vadd.f32 %v4699_v53, %v10090_v23  ;;  %v5111_v57 = vsel %vm19_vm0, %v5053_v39, 0.0  ;;  %v5070_v6 = vadd.f32 %v5038_v32, %v5002_v8  ;;  %v10463_v8 = vld [vmem:[#allocation8_spill] sm:$0xff] }
 0x6e5   :  { %v5114_v2 = vsel %vm19_vm0, %v5054_v33, 0.0  ;;  %v4783_v40 = vadd.f32 %v4751_v48, %v4715_v10  ;;  %5112 = vadd.xlane.f32.xlu0 %v5111_v57  ;;  %v4903_v5 = vmul.f32 %v9129_v20, %v4387_v0  ;;  %v4887_v50 = vmul.f32 %v9129_v20, %v10459_v58 }
 0x6e6   :  { %5115 = vadd.xlane.f32.xlu1 %v5114_v2  ;;  %v5001_v41 = vadd.f32 %v4969_v9, %v4933_v44  ;;  %v4799_v25 = vadd.f32 %v4767_v27, %v4731_v42  ;;  %v4971_v31 = vmul.f32 %v9132_v49, %v4423_v56  ;;  %v5162_v26 = vsel %vm19_vm0, %v5070_v6, 0.0 }
 0x6e7   :  { %v4851_v12 = vadd.f32 %v4819_v60, %v4783_v40  ;;  %v4955_v15 = vmul.f32 %v9132_v49, %v10460_v35  ;;  %v5023_v20 = vmul.f32 %v9135_v55, %v10461_v63  ;;  %v5039_v4 = vmul.f32 %v9135_v55, %v4459_v29 }
 0x6e8   :  { %v5069_v38 = vadd.f32 %v5037_v28, %v5001_v41  ;;  %v4867_v23 = vadd.f32 %v4835_v45, %v4799_v25  ;;  %v5077_v19 = vpop.xlane.xlu1 %5076  ;;  %v10462_v54 = vlaneseq  ;;  %vm5356_vm15 = vcmask 1045509  }
 0x6e9   :  { %v4919_v14 = vadd.f32 %v4887_v50, %v4851_v12  ;;  %vm5358_vm2 = vcmask 1046534   ;;  %vm5360_vm1 = vcmask 1047559   ;;  %vm5371_vm9 = vcmask 130048  }
 0x6ea   :  { %5163 = vadd.xlane.f32.xlu1 %v5162_v26  ;;  %v5159_v43 = vsel %vm19_vm0, %v5069_v38, 0.0  ;;  %v4935_v34 = vadd.f32 %v4903_v5, %v4867_v23  ;;  %v5201_v62 = vand.u32 127, %v10462_v54 }
 0x6eb   :  { %5160 = vadd.xlane.f32.xlu0 %v5159_v43  ;;  %v4987_v7 = vadd.f32 %v4955_v15, %v4919_v14 }
 0x6ec   :  { %v5003_v61 = vadd.f32 %v4971_v31, %v4935_v34  ;;  %v5206_v33 = vadd.s32 4294967288, %v5201_v62  ;;  %v10170_v0 = vsub.s32 %v5201_v62, %v10463_v8 }
 0x6ed   :  { %v5055_v52 = vadd.f32 %v5023_v20, %v4987_v7 }
 0x6ee   :  { %v5071_v59 = vadd.f32 %v5039_v4, %v5003_v61  ;;  %v10167_v10 = vsub.s32 %v5206_v33, %v10463_v8 }
 0x6ef   :  { %v5117_v36 = vsel %vm19_vm0, %v5055_v52, 0.0 }
 0x6f0   :  { %5118 = vadd.xlane.f32.xlu0 %v5117_v36  ;;  %v5165_v11 = vsel %vm19_vm0, %v5071_v59, 0.0  ;;  %v5210_v60 = vrot.slane %v5077_v19, %v10167_v10  ;;  %vm5211_vm0 = vcmask 130112  }
 0x6f4   :  { %5166 = vadd.xlane.f32.xlu0 %v5165_v11 }
 0x6f8   :  { %v5074_v49 = vpop.xlane.xlu0 %5073 }
 0x6f9   :  { %v5205_v42 = vrot.slane %v5074_v49, %v10170_v0 }
 0x6fb   :  { %v5212_v12 = vsel %vm5211_vm0, %v5210_v60, %v5205_v42 }
 0x70a   :  { %v5080_v46 = vpop.xlane.xlu0 %5079 }
 0x70b   :  { %v5216_v2 = vrot.slane %v5080_v46, %v10170_v0 }
 0x70d   :  { %v5122_v30 = vpop.xlane.xlu1 %5121 }
 0x70e   :  { %v5279_v58 = vrot.slane %v5122_v30, %v10170_v0 }
 0x711   :  { %v10149_v51 = vpop.xlane.xlu1 %5127 }
 0x712   :  { %v5288_v38 = vrot.slane %v10149_v51, %v10170_v0 }
 0x715   :  { %v5083_v16 = vpop.xlane.xlu0 %5082 }
 0x716   :  { %v5220_v28 = vrot.slane %v5083_v16, %v10167_v10 }
 0x717   :  { %v5086_v1 = vpop.xlane.xlu1 %5085 }
 0x718   :  { %v5221_v41 = vsel %vm5211_vm0, %v5220_v28, %v5216_v2  ;;  %v5225_v25 = vrot.slane %v5086_v1, %v10170_v0 }
 0x719   :  { %v5349_v26 = vsel %vm5348_vm5, %v5221_v41, %v5212_v12 }
 0x722   :  { %v5125_v32 = vpop.xlane.xlu0 %5124 }
 0x723   :  { %v5283_v56 = vrot.slane %v5125_v32, %v10167_v10 }
 0x724   :  { %v10151_v55 = vpop.xlane.xlu1 %5133 }
 0x725   :  { %v5284_v14 = vsel %vm5211_vm0, %v5283_v56, %v5279_v58  ;;  %v5297_v61 = vrot.slane %v10151_v55, %v10170_v0 }
 0x72b   :  { %v5131_v17 = vpop.xlane.xlu0 %5130 }
 0x72c   :  { %v5292_v50 = vrot.slane %v5131_v17, %v10167_v10 }
 0x72d   :  { %v5092_v37 = vpop.xlane.xlu1 %5091 }
 0x72e   :  { %v5234_v29 = vrot.slane %v5092_v37, %v10170_v0  ;;  %v5293_v52 = vsel %vm5211_vm0, %v5292_v50, %v5288_v38 }
 0x732   :  { %v5089_v21 = vpop.xlane.xlu0 %5088 }
 0x733   :  { %v5229_v57 = vrot.slane %v5089_v21, %v10167_v10 }
 0x735   :  { %v5230_v23 = vsel %vm5211_vm0, %v5229_v57, %v5225_v25 }
 0x736   :  { %v10155_v47 = vpop.xlane.xlu1 %5139  ;;  %v5351_v36 = vsel %vm5350_vm7, %v5230_v23, %v5349_v26 }
 0x737   :  { %v5306_v11 = vrot.slane %v10155_v47, %v10170_v0 }
 0x73b   :  { %v10153_v53 = vpop.xlane.xlu0 %5136 }
 0x73c   :  { %v5301_v35 = vrot.slane %v10153_v53, %v10167_v10 }
 0x73e   :  { %v5302_v30 = vsel %vm5211_vm0, %v5301_v35, %v5297_v61 }
 0x740   :  { %v5098_v22 = vpop.xlane.xlu1 %5097 }
 0x741   :  { %v5243_v34 = vrot.slane %v5098_v22, %v10170_v0 }
 0x744   :  { %v5095_v27 = vpop.xlane.xlu0 %5094 }
 0x745   :  { %v5238_v5 = vrot.slane %v5095_v27, %v10167_v10 }
 0x747   :  { %v5239_v7 = vsel %vm5211_vm0, %v5238_v5, %v5234_v29 }
 0x748   :  { %v5353_v16 = vsel %vm5352_vm3, %v5239_v7, %v5351_v36 }
 0x749   :  { %v10159_v24 = vpop.xlane.xlu1 %5145 }
 0x74a   :  { %v5315_v1 = vrot.slane %v10159_v24, %v10170_v0 }
 0x74d   :  { %v10157_v45 = vpop.xlane.xlu0 %5142 }
 0x74e   :  { %v5310_v63 = vrot.slane %v10157_v45, %v10167_v10  ;;  %v5362_v45 = vsel %vm5348_vm5, %v5293_v52, %v5284_v14 }
 0x74f   :  { %v5363_v54 = vsel %vm5350_vm7, %v5302_v30, %v5362_v45 }
 0x750   :  { %v5311_v17 = vsel %vm5211_vm0, %v5310_v63, %v5306_v11 }
 0x751   :  { %v5364_v33 = vsel %vm5352_vm3, %v5311_v17, %v5363_v54 }
 0x752   :  { %v5104_v3 = vpop.xlane.xlu1 %5103 }
 0x753   :  { %v5252_v59 = vrot.slane %v5104_v3, %v10170_v0 }
 0x756   :  { %v5101_v18 = vpop.xlane.xlu0 %5100 }
 0x757   :  { %v5247_v31 = vrot.slane %v5101_v18, %v10167_v10 }
 0x759   :  { %v5248_v49 = vsel %vm5211_vm0, %v5247_v31, %v5243_v34 }
 0x75a   :  { %v5355_v53 = vsel %vm5354_vm14, %v5248_v49, %v5353_v16 }
 0x75b   :  { %v10164_v9 = vpop.xlane.xlu1 %5151 }
 0x75c   :  { %v5324_v47 = vrot.slane %v10164_v9, %v10170_v0 }
 0x75f   :  { %v10161_v13 = vpop.xlane.xlu0 %5148 }
 0x760   :  { %v5319_v19 = vrot.slane %v10161_v13, %v10167_v10 }
 0x762   :  { %v5110_v39 = vpop.xlane.xlu1 %5109  ;;  %v5320_v24 = vsel %vm5211_vm0, %v5319_v19, %v5315_v1 }
 0x763   :  { %v5261_v46 = vrot.slane %v5110_v39, %v10170_v0  ;;  %v5365_v28 = vsel %vm5354_vm14, %v5320_v24, %v5364_v33 }
 0x764   :  { %v5107_v48 = vpop.xlane.xlu0 %5106 }
 0x765   :  { %v5256_v15 = vrot.slane %v5107_v48, %v10167_v10 }
 0x767   :  { %v5257_v51 = vsel %vm5211_vm0, %v5256_v15, %v5252_v59 }
 0x768   :  { %v5357_v18 = vsel %vm5356_vm15, %v5257_v51, %v5355_v53 }
 0x769   :  { %v5158_v6 = vpop.xlane.xlu1 %5157 }
 0x76a   :  { %v5333_v3 = vrot.slane %v5158_v6, %v10170_v0 }
 0x76d   :  { %v10172_v44 = vpop.xlane.xlu0 %5154 }
 0x76e   :  { %v5328_v32 = vrot.slane %v10172_v44, %v10167_v10 }
 0x770   :  { %v5329_v62 = vsel %vm5211_vm0, %v5328_v32, %v5324_v47 }
 0x771   :  { %v5366_v2 = vsel %vm5356_vm15, %v5329_v62, %v5365_v28 }
 0x772   :  { %v5113_v40 = vpop.xlane.xlu0 %5112 }
 0x773   :  { %v5116_v20 = vpop.xlane.xlu1 %5115  ;;  %v5265_v4 = vrot.slane %v5113_v40, %v10167_v10 }
 0x774   :  { %v5270_v27 = vrot.slane %v5116_v20, %v10170_v0 }
 0x775   :  { %v5266_v55 = vsel %vm5211_vm0, %v5265_v4, %v5261_v46 }
 0x776   :  { %v5359_v48 = vsel %vm5358_vm2, %v5266_v55, %v5357_v18 }
 0x777   :  { %v5164_v13 = vpop.xlane.xlu1 %5163 }
 0x778   :  { %v5161_v43 = vpop.xlane.xlu0 %5160  ;;  %v5342_v60 = vrot.slane %v5164_v13, %v10170_v0 }
 0x779   :  { %v5337_v21 = vrot.slane %v5161_v43, %v10167_v10 }
 0x77b   :  { %v5338_v39 = vsel %vm5211_vm0, %v5337_v21, %v5333_v3 }
 0x77c   :  { %v5367_v57 = vsel %vm5358_vm2, %v5338_v39, %v5366_v2 }
 0x77d   :  { %v5119_v37 = vpop.xlane.xlu0 %5118 }
 0x77e   :  { %v5274_v22 = vrot.slane %v5119_v37, %v10167_v10 }
 0x780   :  { %v5275_v9 = vsel %vm5211_vm0, %v5274_v22, %v5270_v27 }
 0x781   :  { %v5361_v8 = vsel %vm5360_vm1, %v5275_v9, %v5359_v48  ;;  %v5167_v44 = vpop.xlane.xlu0 %5166 }
 0x782   :  { %5372 = vst.msk [vmem:[#allocation5] sm:$0xff] %vm5371_vm9, %v5361_v8  ;;  %v5346_v42 = vrot.slane %v5167_v44, %v10167_v10 }
 0x784   :  { %v5347_v6 = vsel %vm5211_vm0, %v5346_v42, %v5342_v60 }
 0x785   :  { %v5368_v40 = vsel %vm5360_vm1, %v5347_v6, %v5367_v57 }
 0x786   :  { %5373 = vst.msk [vmem:[#allocation5 + $0x8] sm:$0xff] %vm5371_vm9, %v5368_v40 }
 0x787   :  { %5933 = shalt.err (!%p5930_p4)
}
 0x788   :  { %s5934_s10 = scalar_lea.hbm %s10263_s4, 256 }
 0x789   :  { %p5935_p5 = scmp.ne.s32.totalorder %s10263_s4, %s5934_s10  ;;  %p5938_p6 = scmp.lt.u32.totalorder %s5934_s10, %s10263_s4 }
 0x78b   :  { %p5940_p7 = pnand %p5938_p6, %p5935_p5 }
 0x78d   :  { %5943 = shalt.err (!%p5940_p7)
}
 0x78e   :  { %s5952_s15 = smov 128   ;;  %s5953_s16 = smov 8  }
 0x78f   :  { %5385 = dma.vmem_to_hbm [thread:$0]  %s5380_s6, 256, %s10263_s4, [#allocation6], %s5952_s15, %s5952_s15, %s5953_s16  }
 0x790   :  { %5944 = dma.done.wait [#allocation6], 256  }
 0x791   :  { %5945 = vsyncadd [#allocation6], 4294967040 }
 0x792   :  { %5389 = vsyncpa [#allocation6], 1 }

</bundles_post_ra>
